<compile_context>
chip_gen: v5e
topology: v5e:2x2
jax: 0.10.0
libtpu: 0.0.40
codegen_flags: <defaults>
</compile_context>

<pallas_src>
import functools

import jax
import jax.numpy as jnp
from jax import lax
from jax.experimental import pallas as pl
from jax.experimental.pallas import tpu as pltpu


def _round_up(n, m):
    return (n + m - 1) // m * m


# ----------------------------------------------------------------------------
# The fused kernel
# ----------------------------------------------------------------------------
def _multinet_kernel(x_ref, w1_ref, b1_ref, w2_ref, b2_ref,
                     wf1_hbm, bf1_ref, wf2_hbm, bf2_ref,
                     wf3_hbm, bf3_ref, wf4_hbm, bf4_ref,
                     out_ref,
                     c1_ref, pm_ref, p1c_ref, c2_ref, pm2_ref,
                     wf1_v, wf2_v, wf3_v, wf4_v, dsem,
                     *, batch, l1, l2, l2a, m2, p1_rows, tm2):
    f32, bf16 = jnp.float32, jnp.bfloat16

    # -- kick off classifier-weight DMAs; they overlap the conv stages -------
    cps = []
    for idx, (src, dst) in enumerate(((wf1_hbm, wf1_v), (wf2_hbm, wf2_v),
                                      (wf3_hbm, wf3_v), (wf4_hbm, wf4_v))):
        cp = pltpu.make_async_copy(src, dst, dsem.at[idx])
        cp.start()
        cps.append(cp)

    # ---------------- conv1: ONE K=128 matmul over im2col rows --------------
    # row = b*576 + 24*y + x ; lane = (5*i + j)*3 + c  (built in the wrapper)
    c1_ref[...] = jnp.dot(x_ref[...], w1_ref[...], preferred_element_type=f32)

    # ------------- pool-1 dense 2x2/2 max (window offsets 0,1,24,25) --------
    m4 = jnp.maximum(jnp.maximum(c1_ref[0:l1, :], c1_ref[1:l1 + 1, :]),
                     jnp.maximum(c1_ref[24:l1 + 24, :], c1_ref[25:l1 + 25, :]))
    pm_ref[...] = m4

    # ------ compact pooled anchors to a dense 12x12 domain (+bias +ReLU) ----
    # src anchors: b*576 + 48*y1 + 2*x1  ->  dst rows: b*144 + 12*y1 + x1
    b1 = b1_ref[...]
    for b in range(batch):
        for y1 in range(12):
            src = pm_ref[pl.ds(b * 576 + 48 * y1, 12, stride=2), :]
            d0 = b * 144 + 12 * y1
            p1c_ref[d0:d0 + 12, :] = (
                jnp.maximum(src[:, :16] + b1, 0.0).astype(bf16))
    if p1_rows > batch * 144:          # keep unread tail rows deterministic
        p1c_ref[batch * 144:p1_rows, :] = jnp.zeros(
            (p1_rows - batch * 144, 16), bf16)

    # -------- conv2: 9 taps, K=16, per-64-row-tile value accumulation -------
    for t in range(m2 // tm2):
        r0 = t * tm2
        acc = None
        for k in range(9):
            i, j = divmod(k, 3)
            ofs = 12 * i + j
            d = jnp.dot(p1c_ref[r0 + ofs:r0 + ofs + tm2, :], w2_ref[k],
                        preferred_element_type=f32)
            acc = d if acc is None else acc + d
        c2_ref[r0:r0 + tm2, :] = acc

    # -------- pool-2 dense max (offsets 0,1,12,13) + bias + ReLU ------------
    if l2 < l2a:                       # zeros feed the padded batch rows
        pm2_ref[l2:l2a, :] = jnp.zeros((l2a - l2, 128), f32)
    m4 = jnp.maximum(jnp.maximum(c2_ref[0:l2, :], c2_ref[1:l2 + 1, :]),
                     jnp.maximum(c2_ref[12:l2 + 12, :], c2_ref[13:l2 + 13, :]))
    pm2_ref[0:l2, :] = jnp.maximum(m4 + b2_ref[...], 0.0)

    # -------- fc1: 25 position-sliced matmuls against the compact weight ----
    # anchor rows: b*144 + 24*py + 2*px -> one (8,128) strided gather per p.
    cps[0].wait()
    acc = None
    for p in range(25):
        py, px = divmod(p, 5)
        rows = pm2_ref[pl.ds(24 * py + 2 * px, 8, stride=144), :]   # (8,128)
        lhs = rows[:, :20].astype(bf16)                             # (8, 20)
        d = jnp.dot(lhs, wf1_v[20 * p:20 * p + 20, :],
                    preferred_element_type=f32)                     # (8,384)
        acc = d if acc is None else acc + d
    h = jnp.maximum(acc + bf1_ref[...], 0.0).astype(bf16)

    cps[1].wait()
    h = jnp.dot(h, wf2_v[...], preferred_element_type=f32)
    h = jnp.maximum(h + bf2_ref[...], 0.0).astype(bf16)
    cps[2].wait()
    h = jnp.dot(h, wf3_v[...], preferred_element_type=f32)
    h = jnp.maximum(h + bf3_ref[...], 0.0).astype(bf16)
    cps[3].wait()
    h = jnp.dot(h, wf4_v[...], preferred_element_type=f32)
    out_ref[...] = h + bf4_ref[...]


# ----------------------------------------------------------------------------
# One-time weight preparation (pre-transpose / zero-pad / bf16 cast)
# ----------------------------------------------------------------------------
def prepare_params(params, num_classes):
    f32, bf16 = jnp.float32, jnp.bfloat16

    # conv1 im2col weight: row = (5i+j)*3 + c, 75 -> 128 rows, 10 -> 128 cols.
    w1 = jnp.transpose(params["conv1_w"], (2, 3, 1, 0)).reshape(75, 10)
    w1p = jnp.zeros((128, 128), f32).at[:75, :10].set(w1).astype(bf16)
    b1p = jnp.zeros((1, 16), f32).at[0, :10].set(params["conv1_b"])

    # conv2: 9 taps of (16, 128), tap k = 3i + j (compact K=16 slices).
    w2 = jnp.transpose(params["conv2_w"], (2, 3, 1, 0)).reshape(9, 10, 20)
    w2p = jnp.zeros((9, 16, 128), f32).at[:, :10, :20].set(w2).astype(bf16)
    b2p = jnp.zeros((1, 128), f32).at[0, :20].set(params["conv2_b"])

    # fc1: compact, position-major rows 20*p + c (p = 5*py + px); the torch
    # NCHW flatten index c*25 + p is folded into this permutation.
    wf1 = (params["fc1_w"].T.reshape(20, 25, 300)
           .transpose(1, 0, 2).reshape(500, 300))
    wf1p = jnp.zeros((512, 384), f32).at[:500, :300].set(wf1).astype(bf16)
    bf1p = jnp.zeros((1, 384), f32).at[0, :300].set(params["fc1_b"])

    wf2p = (jnp.zeros((384, 256), f32)
            .at[:300, :200].set(params["fc2_w"].T).astype(bf16))
    bf2p = jnp.zeros((1, 256), f32).at[0, :200].set(params["fc2_b"])

    wf3p = (jnp.zeros((256, 128), f32)
            .at[:200, :100].set(params["fc3_w"].T).astype(bf16))
    bf3p = jnp.zeros((1, 128), f32).at[0, :100].set(params["fc3_b"])

    wf4p = (jnp.zeros((128, 128), f32)
            .at[:100, :num_classes].set(params["fc4_w"].T).astype(bf16))
    bf4p = jnp.zeros((1, 128), f32).at[0, :num_classes].set(params["fc4_b"])

    return dict(w1=w1p, b1=b1p, w2=w2p, b2=b2p,
                wf1=wf1p, bf1=bf1p, wf2=wf2p, bf2=bf2p,
                wf3=wf3p, bf3=bf3p, wf4=wf4p, bf4=bf4p)


# ----------------------------------------------------------------------------
# Forward pass
# ----------------------------------------------------------------------------
def multinet_forward(prep, x_nchw, *, num_classes):
    B, C, H, W = x_nchw.shape
    assert (C, H, W) == (3, 28, 28), "MultiNet classifier requires 28x28x3 input"
    assert 1 <= B <= 8
    assert num_classes <= 128
    f32, bf16 = jnp.float32, jnp.bfloat16
    BP = 8                                   # FC batch rows padded to 8
    TM2 = 64                                 # conv2 row-tile

    # Row extents (all static).
    l1 = _round_up((B - 1) * 576 + 48 * 11 + 2 * 11 + 1, 8)   # pool1 max rows
    m1 = _round_up(l1 + 25, 8)                                # conv1 out rows
    l2 = _round_up((B - 1) * 144 + 24 * 4 + 2 * 4 + 1, 8)     # pool2 valid rows
    l2a = _round_up((BP - 1) * 144 + 24 * 4 + 2 * 4 + 1, 8)   # pool2 alloc rows
    m2 = _round_up(l2 + 13, TM2)                              # conv2 out rows
    p1_rows = _round_up(m2 + 26, 8)                           # compact pool1 rows
    assert l2 <= l2a

    # conv1 im2col (tiny; one fused XLA op): row = b*576 + 24*y + x,
    # lane = (5*i + j)*3 + c, padded to 128 lanes / m1 rows, cast to bf16.
    x_nhwc = jnp.transpose(x_nchw, (0, 2, 3, 1))
    cols = jnp.stack([x_nhwc[:, i:i + 24, j:j + 24, :]
                      for i in range(5) for j in range(5)], axis=3)
    x_cols = cols.reshape(B * 576, 75)
    x_cols = jnp.pad(x_cols, ((0, m1 - B * 576), (0, 128 - 75))).astype(bf16)

    args = (x_cols, prep["w1"], prep["b1"], prep["w2"], prep["b2"],
            prep["wf1"], prep["bf1"], prep["wf2"], prep["bf2"],
            prep["wf3"], prep["bf3"], prep["wf4"], prep["bf4"])

    vmem = pl.BlockSpec(memory_space=pltpu.MemorySpace.VMEM)
    hbm = pl.BlockSpec(memory_space=pl.ANY)       # classifier weights: manual DMA
    in_specs = [vmem, vmem, vmem, vmem, vmem,
                hbm, vmem, hbm, vmem, hbm, vmem, hbm, vmem]

    flops = 2 * (m1 * 128 * 128 + 9 * m2 * 16 * 128
                 + BP * (25 * 20 * 384 + 384 * 256 + 256 * 128 + 128 * 128))
    bytes_accessed = (sum(int(a.size) * a.dtype.itemsize for a in args)
                      + BP * 128 * 4)

    out = pl.pallas_call(
        functools.partial(_multinet_kernel, batch=B, l1=l1, l2=l2, l2a=l2a,
                          m2=m2, p1_rows=p1_rows, tm2=TM2),
        out_shape=jax.ShapeDtypeStruct((BP, 128), f32),
        in_specs=in_specs,
        out_specs=vmem,
        scratch_shapes=[
            pltpu.VMEM((m1, 128), f32),        # conv1 output
            pltpu.VMEM((l1, 128), f32),        # pool-1 dense max
            pltpu.VMEM((p1_rows, 16), bf16),   # compact pool-1 activations
            pltpu.VMEM((m2, 128), f32),        # conv2 output
            pltpu.VMEM((l2a, 128), f32),       # pool-2 relu output (padded batch)
            pltpu.VMEM((512, 384), bf16),      # fc1 weight (DMA target)
            pltpu.VMEM((384, 256), bf16),      # fc2 weight (DMA target)
            pltpu.VMEM((256, 128), bf16),      # fc3 weight (DMA target)
            pltpu.VMEM((128, 128), bf16),      # fc4 weight (DMA target)
            pltpu.SemaphoreType.DMA((4,)),
        ],
        compiler_params=pltpu.CompilerParams(
            vmem_limit_bytes=32 * 1024 * 1024),
        cost_estimate=pl.CostEstimate(flops=flops, transcendentals=0,
                                      bytes_accessed=bytes_accessed),
    )(*args)

    # Single slice back to the real batch / class count (drops zero padding).
    return out[:B, :num_classes]


# ----------------------------------------------------------------------------
# Parameters (deterministic, PyTorch default-init style) + pure-JAX reference
# ----------------------------------------------------------------------------
def init_params(key, num_classes):
    def uniform(k, shape, fan_in):
        bound = 1.0 / float(fan_in) ** 0.5
        return jax.random.uniform(k, shape, jnp.float32, -bound, bound)

    ks = jax.random.split(key, 12)
    return {
        "conv1_w": uniform(ks[0], (10, 3, 5, 5), 3 * 5 * 5),
        "conv1_b": uniform(ks[1], (10,), 3 * 5 * 5),
        "conv2_w": uniform(ks[2], (20, 10, 3, 3), 10 * 3 * 3),
        "conv2_b": uniform(ks[3], (20,), 10 * 3 * 3),
        "fc1_w": uniform(ks[4], (300, 500), 500),
        "fc1_b": uniform(ks[5], (300,), 500),
        "fc2_w": uniform(ks[6], (200, 300), 300),
        "fc2_b": uniform(ks[7], (200,), 300),
        "fc3_w": uniform(ks[8], (100, 200), 200),
        "fc3_b": uniform(ks[9], (100,), 200),
        "fc4_w": uniform(ks[10], (num_classes, 100), 100),
        "fc4_b": uniform(ks[11], (num_classes,), 100),
    }


def multinet_reference(params, x):
    def conv(x, w, b):
        y = lax.conv_general_dilated(
            x, w, (1, 1), "VALID",
            dimension_numbers=("NCHW", "OIHW", "NCHW"))
        return y + b[None, :, None, None]

    def pool(x):
        B, C, H, W = x.shape
        return x.reshape(B, C, H // 2, 2, W // 2, 2).max(axis=(3, 5))

    y = pool(jax.nn.relu(conv(x, params["conv1_w"], params["conv1_b"])))
    y = pool(jax.nn.relu(conv(y, params["conv2_w"], params["conv2_b"])))
    y = y.reshape(y.shape[0], -1)
    y = jax.nn.relu(y @ params["fc1_w"].T + params["fc1_b"])
    y = jax.nn.relu(y @ params["fc2_w"].T + params["fc2_b"])
    y = jax.nn.relu(y @ params["fc3_w"].T + params["fc3_b"])
    return y @ params["fc4_w"].T + params["fc4_b"]


if __name__ == "__main__":
    num_classes = 10
    batch = 2
    key = jax.random.PRNGKey(0)
    k_params, k_x = jax.random.split(key)

    params = init_params(k_params, num_classes)
    # Input must be 28x28 so the flattened feature dim is 20*5*5 = 500.
    x = jax.random.normal(k_x, (batch, 3, 28, 28), dtype=jnp.float32)

    prep = prepare_params(params, num_classes)     # one-time weight transform
    fwd = jax.jit(functools.partial(multinet_forward, num_classes=num_classes))
    out = fwd(prep, x)
    jax.block_until_ready(out)
    assert out.shape == (batch, num_classes), out.shape

    # Correctness check against a pure-JAX f32 reference (bf16 MXU operands ->
    # generous tolerance).
    ref = jax.jit(multinet_reference)(params, x)
    err = float(jnp.max(jnp.abs(out - ref)))
    assert err < 0.05, f"max |pallas - reference| = {err}"

    print("KERNEL_OK")
</pallas_src>

<mosaic_0001>
module attributes {stable_mosaic.version = 11 : i64} {
  func.func @_multinet_kernel(%arg0: memref<1160x128xbf16, #tpu.memory_space<vmem>>, %arg1: memref<128x128xbf16, #tpu.memory_space<vmem>>, %arg2: memref<1x16xf32, #tpu.memory_space<vmem>>, %arg3: memref<9x16x128xbf16, #tpu.memory_space<vmem>>, %arg4: memref<1x128xf32, #tpu.memory_space<vmem>>, %arg5: memref<512x384xbf16, #tpu.memory_space<any>>, %arg6: memref<1x384xf32, #tpu.memory_space<vmem>>, %arg7: memref<384x256xbf16, #tpu.memory_space<any>>, %arg8: memref<1x256xf32, #tpu.memory_space<vmem>>, %arg9: memref<256x128xbf16, #tpu.memory_space<any>>, %arg10: memref<1x128xf32, #tpu.memory_space<vmem>>, %arg11: memref<128x128xbf16, #tpu.memory_space<any>>, %arg12: memref<1x128xf32, #tpu.memory_space<vmem>>, %arg13: memref<8x128xf32, #tpu.memory_space<vmem>>, %arg14: memref<1160x128xf32, #tpu.memory_space<vmem>>, %arg15: memref<1128x128xf32, #tpu.memory_space<vmem>>, %arg16: memref<352x16xbf16, #tpu.memory_space<vmem>>, %arg17: memref<320x128xf32, #tpu.memory_space<vmem>>, %arg18: memref<1120x128xf32, #tpu.memory_space<vmem>>, %arg19: memref<512x384xbf16, #tpu.memory_space<vmem>>, %arg20: memref<384x256xbf16, #tpu.memory_space<vmem>>, %arg21: memref<256x128xbf16, #tpu.memory_space<vmem>>, %arg22: memref<128x128xbf16, #tpu.memory_space<vmem>>, %arg23: memref<4x!tpu.dma_semaphore, #tpu.memory_space<semaphore_mem>>) attributes {dimension_semantics = [], scalar_prefetch = 0 : i64, scratch_operands = 10 : i64, tpu.core_type = #tpu.core_type<tc>} {
    %c0_i32 = arith.constant 0 : i32
    %0 = tpu.memref_slice %arg23[%c0_i32] : memref<4x!tpu.dma_semaphore, #tpu.memory_space<semaphore_mem>> -> memref<1x!tpu.dma_semaphore, #tpu.memory_space<semaphore_mem>>
    %1 = tpu.memref_squeeze %0 : memref<1x!tpu.dma_semaphore, #tpu.memory_space<semaphore_mem>> -> memref<!tpu.dma_semaphore, #tpu.memory_space<semaphore_mem>>
    tpu.enqueue_dma source(%arg5 : memref<512x384xbf16, #tpu.memory_space<any>>) target(%arg19 : memref<512x384xbf16, #tpu.memory_space<vmem>>) target_semaphore(%1 : memref<!tpu.dma_semaphore, #tpu.memory_space<semaphore_mem>>)
    %c1_i32 = arith.constant 1 : i32
    %2 = tpu.memref_slice %arg23[%c1_i32] : memref<4x!tpu.dma_semaphore, #tpu.memory_space<semaphore_mem>> -> memref<1x!tpu.dma_semaphore, #tpu.memory_space<semaphore_mem>>
    %3 = tpu.memref_squeeze %2 : memref<1x!tpu.dma_semaphore, #tpu.memory_space<semaphore_mem>> -> memref<!tpu.dma_semaphore, #tpu.memory_space<semaphore_mem>>
    tpu.enqueue_dma source(%arg7 : memref<384x256xbf16, #tpu.memory_space<any>>) target(%arg20 : memref<384x256xbf16, #tpu.memory_space<vmem>>) target_semaphore(%3 : memref<!tpu.dma_semaphore, #tpu.memory_space<semaphore_mem>>)
    %c2_i32 = arith.constant 2 : i32
    %4 = tpu.memref_slice %arg23[%c2_i32] : memref<4x!tpu.dma_semaphore, #tpu.memory_space<semaphore_mem>> -> memref<1x!tpu.dma_semaphore, #tpu.memory_space<semaphore_mem>>
    %5 = tpu.memref_squeeze %4 : memref<1x!tpu.dma_semaphore, #tpu.memory_space<semaphore_mem>> -> memref<!tpu.dma_semaphore, #tpu.memory_space<semaphore_mem>>
    tpu.enqueue_dma source(%arg9 : memref<256x128xbf16, #tpu.memory_space<any>>) target(%arg21 : memref<256x128xbf16, #tpu.memory_space<vmem>>) target_semaphore(%5 : memref<!tpu.dma_semaphore, #tpu.memory_space<semaphore_mem>>)
    %c3_i32 = arith.constant 3 : i32
    %6 = tpu.memref_slice %arg23[%c3_i32] : memref<4x!tpu.dma_semaphore, #tpu.memory_space<semaphore_mem>> -> memref<1x!tpu.dma_semaphore, #tpu.memory_space<semaphore_mem>>
    %7 = tpu.memref_squeeze %6 : memref<1x!tpu.dma_semaphore, #tpu.memory_space<semaphore_mem>> -> memref<!tpu.dma_semaphore, #tpu.memory_space<semaphore_mem>>
    tpu.enqueue_dma source(%arg11 : memref<128x128xbf16, #tpu.memory_space<any>>) target(%arg22 : memref<128x128xbf16, #tpu.memory_space<vmem>>) target_semaphore(%7 : memref<!tpu.dma_semaphore, #tpu.memory_space<semaphore_mem>>)
    %c0 = arith.constant 0 : index
    %c0_0 = arith.constant 0 : index
    %8 = vector.load %arg0[%c0, %c0_0] : memref<1160x128xbf16, #tpu.memory_space<vmem>>, vector<1160x128xbf16>
    %c0_1 = arith.constant 0 : index
    %c0_2 = arith.constant 0 : index
    %9 = vector.load %arg1[%c0_1, %c0_2] : memref<128x128xbf16, #tpu.memory_space<vmem>>, vector<128x128xbf16>
    %cst = arith.constant dense<0.000000e+00> : vector<1160x128xf32>
    %10 = tpu.matmul %8, %9, %cst {dimension_numbers = #tpu.dot_dimension_numbers<[1], [0], [0], [1], [0, 0, 1, 1], [], []>} : vector<1160x128xbf16>, vector<128x128xbf16>, vector<1160x128xf32> -> vector<1160x128xf32>
    %c0_3 = arith.constant 0 : index
    %c0_4 = arith.constant 0 : index
    %11 = vector.load %arg14[%c0_3, %c0_4] : memref<1160x128xf32, #tpu.memory_space<vmem>>, vector<1160x128xf32>
    tpu.vector_store %arg14[%c0_3, %c0_4], %10 {strides = array<i32>} : memref<1160x128xf32, #tpu.memory_space<vmem>>, vector<1160x128xf32>,
    %c0_5 = arith.constant 0 : index
    %c0_6 = arith.constant 0 : index
    %12 = vector.load %arg14[%c0_5, %c0_6] : memref<1160x128xf32, #tpu.memory_space<vmem>>, vector<1128x128xf32>
    %c1 = arith.constant 1 : index
    %c0_7 = arith.constant 0 : index
    %13 = vector.load %arg14[%c1, %c0_7] : memref<1160x128xf32, #tpu.memory_space<vmem>>, vector<1128x128xf32>
    %14 = arith.maximumf %12, %13 : vector<1128x128xf32>
    %c24 = arith.constant 24 : index
    %c0_8 = arith.constant 0 : index
    %15 = vector.load %arg14[%c24, %c0_8] : memref<1160x128xf32, #tpu.memory_space<vmem>>, vector<1128x128xf32>
    %c25 = arith.constant 25 : index
    %c0_9 = arith.constant 0 : index
    %16 = vector.load %arg14[%c25, %c0_9] : memref<1160x128xf32, #tpu.memory_space<vmem>>, vector<1128x128xf32>
    %17 = arith.maximumf %15, %16 : vector<1128x128xf32>
    %18 = arith.maximumf %14, %17 : vector<1128x128xf32>
    %c0_10 = arith.constant 0 : index
    %c0_11 = arith.constant 0 : index
    %19 = vector.load %arg15[%c0_10, %c0_11] : memref<1128x128xf32, #tpu.memory_space<vmem>>, vector<1128x128xf32>
    tpu.vector_store %arg15[%c0_10, %c0_11], %18 {strides = array<i32>} : memref<1128x128xf32, #tpu.memory_space<vmem>>, vector<1128x128xf32>,
    %c0_12 = arith.constant 0 : index
    %c0_13 = arith.constant 0 : index
    %20 = vector.load %arg2[%c0_12, %c0_13] : memref<1x16xf32, #tpu.memory_space<vmem>>, vector<1x16xf32>
    %c0_14 = arith.constant 0 : index
    %c0_15 = arith.constant 0 : index
    %21 = tpu.strided_load %arg15[%c0_14, %c0_15] {strides = array<i32: 2, 1>} : memref<1128x128xf32, #tpu.memory_space<vmem>>, vector<12x128xf32>
    %22 = vector.extract_strided_slice %21 {offsets = [0, 0], sizes = [12, 16], strides = [1, 1]} : vector<12x128xf32> to vector<12x16xf32>
    %23 = vector.broadcast %20 : vector<1x16xf32> to vector<12x16xf32>
    %24 = arith.addf %22, %23 : vector<12x16xf32>
    %cst_16 = arith.constant 0.000000e+00 : f32
    %25 = vector.broadcast %cst_16 : f32 to vector<12x16xf32>
    %26 = arith.maximumf %24, %25 : vector<12x16xf32>
    %27 = arith.truncf %26 : vector<12x16xf32> to vector<12x16xbf16>
    %c0_17 = arith.constant 0 : index
    %c0_18 = arith.constant 0 : index
    %28 = vector.load %arg16[%c0_17, %c0_18] : memref<352x16xbf16, #tpu.memory_space<vmem>>, vector<12x16xbf16>
    tpu.vector_store %arg16[%c0_17, %c0_18], %27 {strides = array<i32>} : memref<352x16xbf16, #tpu.memory_space<vmem>>, vector<12x16xbf16>,
    %c48 = arith.constant 48 : index
    %c0_19 = arith.constant 0 : index
    %29 = tpu.strided_load %arg15[%c48, %c0_19] {strides = array<i32: 2, 1>} : memref<1128x128xf32, #tpu.memory_space<vmem>>, vector<12x128xf32>
    %30 = vector.extract_strided_slice %29 {offsets = [0, 0], sizes = [12, 16], strides = [1, 1]} : vector<12x128xf32> to vector<12x16xf32>
    %31 = vector.broadcast %20 : vector<1x16xf32> to vector<12x16xf32>
    %32 = arith.addf %30, %31 : vector<12x16xf32>
    %cst_20 = arith.constant 0.000000e+00 : f32
    %33 = vector.broadcast %cst_20 : f32 to vector<12x16xf32>
    %34 = arith.maximumf %32, %33 : vector<12x16xf32>
    %35 = arith.truncf %34 : vector<12x16xf32> to vector<12x16xbf16>
    %c12 = arith.constant 12 : index
    %c0_21 = arith.constant 0 : index
    %36 = vector.load %arg16[%c12, %c0_21] : memref<352x16xbf16, #tpu.memory_space<vmem>>, vector<12x16xbf16>
    tpu.vector_store %arg16[%c12, %c0_21], %35 {strides = array<i32>} : memref<352x16xbf16, #tpu.memory_space<vmem>>, vector<12x16xbf16>,
    %c96 = arith.constant 96 : index
    %c0_22 = arith.constant 0 : index
    %37 = tpu.strided_load %arg15[%c96, %c0_22] {strides = array<i32: 2, 1>} : memref<1128x128xf32, #tpu.memory_space<vmem>>, vector<12x128xf32>
    %38 = vector.extract_strided_slice %37 {offsets = [0, 0], sizes = [12, 16], strides = [1, 1]} : vector<12x128xf32> to vector<12x16xf32>
    %39 = vector.broadcast %20 : vector<1x16xf32> to vector<12x16xf32>
    %40 = arith.addf %38, %39 : vector<12x16xf32>
    %cst_23 = arith.constant 0.000000e+00 : f32
    %41 = vector.broadcast %cst_23 : f32 to vector<12x16xf32>
    %42 = arith.maximumf %40, %41 : vector<12x16xf32>
    %43 = arith.truncf %42 : vector<12x16xf32> to vector<12x16xbf16>
    %c24_24 = arith.constant 24 : index
    %c0_25 = arith.constant 0 : index
    %44 = vector.load %arg16[%c24_24, %c0_25] : memref<352x16xbf16, #tpu.memory_space<vmem>>, vector<12x16xbf16>
    tpu.vector_store %arg16[%c24_24, %c0_25], %43 {strides = array<i32>} : memref<352x16xbf16, #tpu.memory_space<vmem>>, vector<12x16xbf16>,
    %c144 = arith.constant 144 : index
    %c0_26 = arith.constant 0 : index
    %45 = tpu.strided_load %arg15[%c144, %c0_26] {strides = array<i32: 2, 1>} : memref<1128x128xf32, #tpu.memory_space<vmem>>, vector<12x128xf32>
    %46 = vector.extract_strided_slice %45 {offsets = [0, 0], sizes = [12, 16], strides = [1, 1]} : vector<12x128xf32> to vector<12x16xf32>
    %47 = vector.broadcast %20 : vector<1x16xf32> to vector<12x16xf32>
    %48 = arith.addf %46, %47 : vector<12x16xf32>
    %cst_27 = arith.constant 0.000000e+00 : f32
    %49 = vector.broadcast %cst_27 : f32 to vector<12x16xf32>
    %50 = arith.maximumf %48, %49 : vector<12x16xf32>
    %51 = arith.truncf %50 : vector<12x16xf32> to vector<12x16xbf16>
    %c36 = arith.constant 36 : index
    %c0_28 = arith.constant 0 : index
    %52 = vector.load %arg16[%c36, %c0_28] : memref<352x16xbf16, #tpu.memory_space<vmem>>, vector<12x16xbf16>
    tpu.vector_store %arg16[%c36, %c0_28], %51 {strides = array<i32>} : memref<352x16xbf16, #tpu.memory_space<vmem>>, vector<12x16xbf16>,
    %c192 = arith.constant 192 : index
    %c0_29 = arith.constant 0 : index
    %53 = tpu.strided_load %arg15[%c192, %c0_29] {strides = array<i32: 2, 1>} : memref<1128x128xf32, #tpu.memory_space<vmem>>, vector<12x128xf32>
    %54 = vector.extract_strided_slice %53 {offsets = [0, 0], sizes = [12, 16], strides = [1, 1]} : vector<12x128xf32> to vector<12x16xf32>
    %55 = vector.broadcast %20 : vector<1x16xf32> to vector<12x16xf32>
    %56 = arith.addf %54, %55 : vector<12x16xf32>
    %cst_30 = arith.constant 0.000000e+00 : f32
    %57 = vector.broadcast %cst_30 : f32 to vector<12x16xf32>
    %58 = arith.maximumf %56, %57 : vector<12x16xf32>
    %59 = arith.truncf %58 : vector<12x16xf32> to vector<12x16xbf16>
    %c48_31 = arith.constant 48 : index
    %c0_32 = arith.constant 0 : index
    %60 = vector.load %arg16[%c48_31, %c0_32] : memref<352x16xbf16, #tpu.memory_space<vmem>>, vector<12x16xbf16>
    tpu.vector_store %arg16[%c48_31, %c0_32], %59 {strides = array<i32>} : memref<352x16xbf16, #tpu.memory_space<vmem>>, vector<12x16xbf16>,
    %c240 = arith.constant 240 : index
    %c0_33 = arith.constant 0 : index
    %61 = tpu.strided_load %arg15[%c240, %c0_33] {strides = array<i32: 2, 1>} : memref<1128x128xf32, #tpu.memory_space<vmem>>, vector<12x128xf32>
    %62 = vector.extract_strided_slice %61 {offsets = [0, 0], sizes = [12, 16], strides = [1, 1]} : vector<12x128xf32> to vector<12x16xf32>
    %63 = vector.broadcast %20 : vector<1x16xf32> to vector<12x16xf32>
    %64 = arith.addf %62, %63 : vector<12x16xf32>
    %cst_34 = arith.constant 0.000000e+00 : f32
    %65 = vector.broadcast %cst_34 : f32 to vector<12x16xf32>
    %66 = arith.maximumf %64, %65 : vector<12x16xf32>
    %67 = arith.truncf %66 : vector<12x16xf32> to vector<12x16xbf16>
    %c60 = arith.constant 60 : index
    %c0_35 = arith.constant 0 : index
    %68 = vector.load %arg16[%c60, %c0_35] : memref<352x16xbf16, #tpu.memory_space<vmem>>, vector<12x16xbf16>
    tpu.vector_store %arg16[%c60, %c0_35], %67 {strides = array<i32>} : memref<352x16xbf16, #tpu.memory_space<vmem>>, vector<12x16xbf16>,
    %c288 = arith.constant 288 : index
    %c0_36 = arith.constant 0 : index
    %69 = tpu.strided_load %arg15[%c288, %c0_36] {strides = array<i32: 2, 1>} : memref<1128x128xf32, #tpu.memory_space<vmem>>, vector<12x128xf32>
    %70 = vector.extract_strided_slice %69 {offsets = [0, 0], sizes = [12, 16], strides = [1, 1]} : vector<12x128xf32> to vector<12x16xf32>
    %71 = vector.broadcast %20 : vector<1x16xf32> to vector<12x16xf32>
    %72 = arith.addf %70, %71 : vector<12x16xf32>
    %cst_37 = arith.constant 0.000000e+00 : f32
    %73 = vector.broadcast %cst_37 : f32 to vector<12x16xf32>
    %74 = arith.maximumf %72, %73 : vector<12x16xf32>
    %75 = arith.truncf %74 : vector<12x16xf32> to vector<12x16xbf16>
    %c72 = arith.constant 72 : index
    %c0_38 = arith.constant 0 : index
    %76 = vector.load %arg16[%c72, %c0_38] : memref<352x16xbf16, #tpu.memory_space<vmem>>, vector<12x16xbf16>
    tpu.vector_store %arg16[%c72, %c0_38], %75 {strides = array<i32>} : memref<352x16xbf16, #tpu.memory_space<vmem>>, vector<12x16xbf16>,
    %c336 = arith.constant 336 : index
    %c0_39 = arith.constant 0 : index
    %77 = tpu.strided_load %arg15[%c336, %c0_39] {strides = array<i32: 2, 1>} : memref<1128x128xf32, #tpu.memory_space<vmem>>, vector<12x128xf32>
    %78 = vector.extract_strided_slice %77 {offsets = [0, 0], sizes = [12, 16], strides = [1, 1]} : vector<12x128xf32> to vector<12x16xf32>
    %79 = vector.broadcast %20 : vector<1x16xf32> to vector<12x16xf32>
    %80 = arith.addf %78, %79 : vector<12x16xf32>
    %cst_40 = arith.constant 0.000000e+00 : f32
    %81 = vector.broadcast %cst_40 : f32 to vector<12x16xf32>
    %82 = arith.maximumf %80, %81 : vector<12x16xf32>
    %83 = arith.truncf %82 : vector<12x16xf32> to vector<12x16xbf16>
    %c84 = arith.constant 84 : index
    %c0_41 = arith.constant 0 : index
    %84 = vector.load %arg16[%c84, %c0_41] : memref<352x16xbf16, #tpu.memory_space<vmem>>, vector<12x16xbf16>
    tpu.vector_store %arg16[%c84, %c0_41], %83 {strides = array<i32>} : memref<352x16xbf16, #tpu.memory_space<vmem>>, vector<12x16xbf16>,
    %c384 = arith.constant 384 : index
    %c0_42 = arith.constant 0 : index
    %85 = tpu.strided_load %arg15[%c384, %c0_42] {strides = array<i32: 2, 1>} : memref<1128x128xf32, #tpu.memory_space<vmem>>, vector<12x128xf32>
    %86 = vector.extract_strided_slice %85 {offsets = [0, 0], sizes = [12, 16], strides = [1, 1]} : vector<12x128xf32> to vector<12x16xf32>
    %87 = vector.broadcast %20 : vector<1x16xf32> to vector<12x16xf32>
    %88 = arith.addf %86, %87 : vector<12x16xf32>
    %cst_43 = arith.constant 0.000000e+00 : f32
    %89 = vector.broadcast %cst_43 : f32 to vector<12x16xf32>
    %90 = arith.maximumf %88, %89 : vector<12x16xf32>
    %91 = arith.truncf %90 : vector<12x16xf32> to vector<12x16xbf16>
    %c96_44 = arith.constant 96 : index
    %c0_45 = arith.constant 0 : index
    %92 = vector.load %arg16[%c96_44, %c0_45] : memref<352x16xbf16, #tpu.memory_space<vmem>>, vector<12x16xbf16>
    tpu.vector_store %arg16[%c96_44, %c0_45], %91 {strides = array<i32>} : memref<352x16xbf16, #tpu.memory_space<vmem>>, vector<12x16xbf16>,
    %c432 = arith.constant 432 : index
    %c0_46 = arith.constant 0 : index
    %93 = tpu.strided_load %arg15[%c432, %c0_46] {strides = array<i32: 2, 1>} : memref<1128x128xf32, #tpu.memory_space<vmem>>, vector<12x128xf32>
    %94 = vector.extract_strided_slice %93 {offsets = [0, 0], sizes = [12, 16], strides = [1, 1]} : vector<12x128xf32> to vector<12x16xf32>
    %95 = vector.broadcast %20 : vector<1x16xf32> to vector<12x16xf32>
    %96 = arith.addf %94, %95 : vector<12x16xf32>
    %cst_47 = arith.constant 0.000000e+00 : f32
    %97 = vector.broadcast %cst_47 : f32 to vector<12x16xf32>
    %98 = arith.maximumf %96, %97 : vector<12x16xf32>
    %99 = arith.truncf %98 : vector<12x16xf32> to vector<12x16xbf16>
    %c108 = arith.constant 108 : index
    %c0_48 = arith.constant 0 : index
    %100 = vector.load %arg16[%c108, %c0_48] : memref<352x16xbf16, #tpu.memory_space<vmem>>, vector<12x16xbf16>
    tpu.vector_store %arg16[%c108, %c0_48], %99 {strides = array<i32>} : memref<352x16xbf16, #tpu.memory_space<vmem>>, vector<12x16xbf16>,
    %c480 = arith.constant 480 : index
    %c0_49 = arith.constant 0 : index
    %101 = tpu.strided_load %arg15[%c480, %c0_49] {strides = array<i32: 2, 1>} : memref<1128x128xf32, #tpu.memory_space<vmem>>, vector<12x128xf32>
    %102 = vector.extract_strided_slice %101 {offsets = [0, 0], sizes = [12, 16], strides = [1, 1]} : vector<12x128xf32> to vector<12x16xf32>
    %103 = vector.broadcast %20 : vector<1x16xf32> to vector<12x16xf32>
    %104 = arith.addf %102, %103 : vector<12x16xf32>
    %cst_50 = arith.constant 0.000000e+00 : f32
    %105 = vector.broadcast %cst_50 : f32 to vector<12x16xf32>
    %106 = arith.maximumf %104, %105 : vector<12x16xf32>
    %107 = arith.truncf %106 : vector<12x16xf32> to vector<12x16xbf16>
    %c120 = arith.constant 120 : index
    %c0_51 = arith.constant 0 : index
    %108 = vector.load %arg16[%c120, %c0_51] : memref<352x16xbf16, #tpu.memory_space<vmem>>, vector<12x16xbf16>
    tpu.vector_store %arg16[%c120, %c0_51], %107 {strides = array<i32>} : memref<352x16xbf16, #tpu.memory_space<vmem>>, vector<12x16xbf16>,
    %c528 = arith.constant 528 : index
    %c0_52 = arith.constant 0 : index
    %109 = tpu.strided_load %arg15[%c528, %c0_52] {strides = array<i32: 2, 1>} : memref<1128x128xf32, #tpu.memory_space<vmem>>, vector<12x128xf32>
    %110 = vector.extract_strided_slice %109 {offsets = [0, 0], sizes = [12, 16], strides = [1, 1]} : vector<12x128xf32> to vector<12x16xf32>
    %111 = vector.broadcast %20 : vector<1x16xf32> to vector<12x16xf32>
    %112 = arith.addf %110, %111 : vector<12x16xf32>
    %cst_53 = arith.constant 0.000000e+00 : f32
    %113 = vector.broadcast %cst_53 : f32 to vector<12x16xf32>
    %114 = arith.maximumf %112, %113 : vector<12x16xf32>
    %115 = arith.truncf %114 : vector<12x16xf32> to vector<12x16xbf16>
    %c132 = arith.constant 132 : index
    %c0_54 = arith.constant 0 : index
    %116 = vector.load %arg16[%c132, %c0_54] : memref<352x16xbf16, #tpu.memory_space<vmem>>, vector<12x16xbf16>
    tpu.vector_store %arg16[%c132, %c0_54], %115 {strides = array<i32>} : memref<352x16xbf16, #tpu.memory_space<vmem>>, vector<12x16xbf16>,
    %c576 = arith.constant 576 : index
    %c0_55 = arith.constant 0 : index
    %117 = tpu.strided_load %arg15[%c576, %c0_55] {strides = array<i32: 2, 1>} : memref<1128x128xf32, #tpu.memory_space<vmem>>, vector<12x128xf32>
    %118 = vector.extract_strided_slice %117 {offsets = [0, 0], sizes = [12, 16], strides = [1, 1]} : vector<12x128xf32> to vector<12x16xf32>
    %119 = vector.broadcast %20 : vector<1x16xf32> to vector<12x16xf32>
    %120 = arith.addf %118, %119 : vector<12x16xf32>
    %cst_56 = arith.constant 0.000000e+00 : f32
    %121 = vector.broadcast %cst_56 : f32 to vector<12x16xf32>
    %122 = arith.maximumf %120, %121 : vector<12x16xf32>
    %123 = arith.truncf %122 : vector<12x16xf32> to vector<12x16xbf16>
    %c144_57 = arith.constant 144 : index
    %c0_58 = arith.constant 0 : index
    %124 = vector.load %arg16[%c144_57, %c0_58] : memref<352x16xbf16, #tpu.memory_space<vmem>>, vector<12x16xbf16>
    tpu.vector_store %arg16[%c144_57, %c0_58], %123 {strides = array<i32>} : memref<352x16xbf16, #tpu.memory_space<vmem>>, vector<12x16xbf16>,
    %c624 = arith.constant 624 : index
    %c0_59 = arith.constant 0 : index
    %125 = tpu.strided_load %arg15[%c624, %c0_59] {strides = array<i32: 2, 1>} : memref<1128x128xf32, #tpu.memory_space<vmem>>, vector<12x128xf32>
    %126 = vector.extract_strided_slice %125 {offsets = [0, 0], sizes = [12, 16], strides = [1, 1]} : vector<12x128xf32> to vector<12x16xf32>
    %127 = vector.broadcast %20 : vector<1x16xf32> to vector<12x16xf32>
    %128 = arith.addf %126, %127 : vector<12x16xf32>
    %cst_60 = arith.constant 0.000000e+00 : f32
    %129 = vector.broadcast %cst_60 : f32 to vector<12x16xf32>
    %130 = arith.maximumf %128, %129 : vector<12x16xf32>
    %131 = arith.truncf %130 : vector<12x16xf32> to vector<12x16xbf16>
    %c156 = arith.constant 156 : index
    %c0_61 = arith.constant 0 : index
    %132 = vector.load %arg16[%c156, %c0_61] : memref<352x16xbf16, #tpu.memory_space<vmem>>, vector<12x16xbf16>
    tpu.vector_store %arg16[%c156, %c0_61], %131 {strides = array<i32>} : memref<352x16xbf16, #tpu.memory_space<vmem>>, vector<12x16xbf16>,
    %c672 = arith.constant 672 : index
    %c0_62 = arith.constant 0 : index
    %133 = tpu.strided_load %arg15[%c672, %c0_62] {strides = array<i32: 2, 1>} : memref<1128x128xf32, #tpu.memory_space<vmem>>, vector<12x128xf32>
    %134 = vector.extract_strided_slice %133 {offsets = [0, 0], sizes = [12, 16], strides = [1, 1]} : vector<12x128xf32> to vector<12x16xf32>
    %135 = vector.broadcast %20 : vector<1x16xf32> to vector<12x16xf32>
    %136 = arith.addf %134, %135 : vector<12x16xf32>
    %cst_63 = arith.constant 0.000000e+00 : f32
    %137 = vector.broadcast %cst_63 : f32 to vector<12x16xf32>
    %138 = arith.maximumf %136, %137 : vector<12x16xf32>
    %139 = arith.truncf %138 : vector<12x16xf32> to vector<12x16xbf16>
    %c168 = arith.constant 168 : index
    %c0_64 = arith.constant 0 : index
    %140 = vector.load %arg16[%c168, %c0_64] : memref<352x16xbf16, #tpu.memory_space<vmem>>, vector<12x16xbf16>
    tpu.vector_store %arg16[%c168, %c0_64], %139 {strides = array<i32>} : memref<352x16xbf16, #tpu.memory_space<vmem>>, vector<12x16xbf16>,
    %c720 = arith.constant 720 : index
    %c0_65 = arith.constant 0 : index
    %141 = tpu.strided_load %arg15[%c720, %c0_65] {strides = array<i32: 2, 1>} : memref<1128x128xf32, #tpu.memory_space<vmem>>, vector<12x128xf32>
    %142 = vector.extract_strided_slice %141 {offsets = [0, 0], sizes = [12, 16], strides = [1, 1]} : vector<12x128xf32> to vector<12x16xf32>
    %143 = vector.broadcast %20 : vector<1x16xf32> to vector<12x16xf32>
    %144 = arith.addf %142, %143 : vector<12x16xf32>
    %cst_66 = arith.constant 0.000000e+00 : f32
    %145 = vector.broadcast %cst_66 : f32 to vector<12x16xf32>
    %146 = arith.maximumf %144, %145 : vector<12x16xf32>
    %147 = arith.truncf %146 : vector<12x16xf32> to vector<12x16xbf16>
    %c180 = arith.constant 180 : index
    %c0_67 = arith.constant 0 : index
    %148 = vector.load %arg16[%c180, %c0_67] : memref<352x16xbf16, #tpu.memory_space<vmem>>, vector<12x16xbf16>
    tpu.vector_store %arg16[%c180, %c0_67], %147 {strides = array<i32>} : memref<352x16xbf16, #tpu.memory_space<vmem>>, vector<12x16xbf16>,
    %c768 = arith.constant 768 : index
    %c0_68 = arith.constant 0 : index
    %149 = tpu.strided_load %arg15[%c768, %c0_68] {strides = array<i32: 2, 1>} : memref<1128x128xf32, #tpu.memory_space<vmem>>, vector<12x128xf32>
    %150 = vector.extract_strided_slice %149 {offsets = [0, 0], sizes = [12, 16], strides = [1, 1]} : vector<12x128xf32> to vector<12x16xf32>
    %151 = vector.broadcast %20 : vector<1x16xf32> to vector<12x16xf32>
    %152 = arith.addf %150, %151 : vector<12x16xf32>
    %cst_69 = arith.constant 0.000000e+00 : f32
    %153 = vector.broadcast %cst_69 : f32 to vector<12x16xf32>
    %154 = arith.maximumf %152, %153 : vector<12x16xf32>
    %155 = arith.truncf %154 : vector<12x16xf32> to vector<12x16xbf16>
    %c192_70 = arith.constant 192 : index
    %c0_71 = arith.constant 0 : index
    %156 = vector.load %arg16[%c192_70, %c0_71] : memref<352x16xbf16, #tpu.memory_space<vmem>>, vector<12x16xbf16>
    tpu.vector_store %arg16[%c192_70, %c0_71], %155 {strides = array<i32>} : memref<352x16xbf16, #tpu.memory_space<vmem>>, vector<12x16xbf16>,
    %c816 = arith.constant 816 : index
    %c0_72 = arith.constant 0 : index
    %157 = tpu.strided_load %arg15[%c816, %c0_72] {strides = array<i32: 2, 1>} : memref<1128x128xf32, #tpu.memory_space<vmem>>, vector<12x128xf32>
    %158 = vector.extract_strided_slice %157 {offsets = [0, 0], sizes = [12, 16], strides = [1, 1]} : vector<12x128xf32> to vector<12x16xf32>
    %159 = vector.broadcast %20 : vector<1x16xf32> to vector<12x16xf32>
    %160 = arith.addf %158, %159 : vector<12x16xf32>
    %cst_73 = arith.constant 0.000000e+00 : f32
    %161 = vector.broadcast %cst_73 : f32 to vector<12x16xf32>
    %162 = arith.maximumf %160, %161 : vector<12x16xf32>
    %163 = arith.truncf %162 : vector<12x16xf32> to vector<12x16xbf16>
    %c204 = arith.constant 204 : index
    %c0_74 = arith.constant 0 : index
    %164 = vector.load %arg16[%c204, %c0_74] : memref<352x16xbf16, #tpu.memory_space<vmem>>, vector<12x16xbf16>
    tpu.vector_store %arg16[%c204, %c0_74], %163 {strides = array<i32>} : memref<352x16xbf16, #tpu.memory_space<vmem>>, vector<12x16xbf16>,
    %c864 = arith.constant 864 : index
    %c0_75 = arith.constant 0 : index
    %165 = tpu.strided_load %arg15[%c864, %c0_75] {strides = array<i32: 2, 1>} : memref<1128x128xf32, #tpu.memory_space<vmem>>, vector<12x128xf32>
    %166 = vector.extract_strided_slice %165 {offsets = [0, 0], sizes = [12, 16], strides = [1, 1]} : vector<12x128xf32> to vector<12x16xf32>
    %167 = vector.broadcast %20 : vector<1x16xf32> to vector<12x16xf32>
    %168 = arith.addf %166, %167 : vector<12x16xf32>
    %cst_76 = arith.constant 0.000000e+00 : f32
    %169 = vector.broadcast %cst_76 : f32 to vector<12x16xf32>
    %170 = arith.maximumf %168, %169 : vector<12x16xf32>
    %171 = arith.truncf %170 : vector<12x16xf32> to vector<12x16xbf16>
    %c216 = arith.constant 216 : index
    %c0_77 = arith.constant 0 : index
    %172 = vector.load %arg16[%c216, %c0_77] : memref<352x16xbf16, #tpu.memory_space<vmem>>, vector<12x16xbf16>
    tpu.vector_store %arg16[%c216, %c0_77], %171 {strides = array<i32>} : memref<352x16xbf16, #tpu.memory_space<vmem>>, vector<12x16xbf16>,
    %c912 = arith.constant 912 : index
    %c0_78 = arith.constant 0 : index
    %173 = tpu.strided_load %arg15[%c912, %c0_78] {strides = array<i32: 2, 1>} : memref<1128x128xf32, #tpu.memory_space<vmem>>, vector<12x128xf32>
    %174 = vector.extract_strided_slice %173 {offsets = [0, 0], sizes = [12, 16], strides = [1, 1]} : vector<12x128xf32> to vector<12x16xf32>
    %175 = vector.broadcast %20 : vector<1x16xf32> to vector<12x16xf32>
    %176 = arith.addf %174, %175 : vector<12x16xf32>
    %cst_79 = arith.constant 0.000000e+00 : f32
    %177 = vector.broadcast %cst_79 : f32 to vector<12x16xf32>
    %178 = arith.maximumf %176, %177 : vector<12x16xf32>
    %179 = arith.truncf %178 : vector<12x16xf32> to vector<12x16xbf16>
    %c228 = arith.constant 228 : index
    %c0_80 = arith.constant 0 : index
    %180 = vector.load %arg16[%c228, %c0_80] : memref<352x16xbf16, #tpu.memory_space<vmem>>, vector<12x16xbf16>
    tpu.vector_store %arg16[%c228, %c0_80], %179 {strides = array<i32>} : memref<352x16xbf16, #tpu.memory_space<vmem>>, vector<12x16xbf16>,
    %c960 = arith.constant 960 : index
    %c0_81 = arith.constant 0 : index
    %181 = tpu.strided_load %arg15[%c960, %c0_81] {strides = array<i32: 2, 1>} : memref<1128x128xf32, #tpu.memory_space<vmem>>, vector<12x128xf32>
    %182 = vector.extract_strided_slice %181 {offsets = [0, 0], sizes = [12, 16], strides = [1, 1]} : vector<12x128xf32> to vector<12x16xf32>
    %183 = vector.broadcast %20 : vector<1x16xf32> to vector<12x16xf32>
    %184 = arith.addf %182, %183 : vector<12x16xf32>
    %cst_82 = arith.constant 0.000000e+00 : f32
    %185 = vector.broadcast %cst_82 : f32 to vector<12x16xf32>
    %186 = arith.maximumf %184, %185 : vector<12x16xf32>
    %187 = arith.truncf %186 : vector<12x16xf32> to vector<12x16xbf16>
    %c240_83 = arith.constant 240 : index
    %c0_84 = arith.constant 0 : index
    %188 = vector.load %arg16[%c240_83, %c0_84] : memref<352x16xbf16, #tpu.memory_space<vmem>>, vector<12x16xbf16>
    tpu.vector_store %arg16[%c240_83, %c0_84], %187 {strides = array<i32>} : memref<352x16xbf16, #tpu.memory_space<vmem>>, vector<12x16xbf16>,
    %c1008 = arith.constant 1008 : index
    %c0_85 = arith.constant 0 : index
    %189 = tpu.strided_load %arg15[%c1008, %c0_85] {strides = array<i32: 2, 1>} : memref<1128x128xf32, #tpu.memory_space<vmem>>, vector<12x128xf32>
    %190 = vector.extract_strided_slice %189 {offsets = [0, 0], sizes = [12, 16], strides = [1, 1]} : vector<12x128xf32> to vector<12x16xf32>
    %191 = vector.broadcast %20 : vector<1x16xf32> to vector<12x16xf32>
    %192 = arith.addf %190, %191 : vector<12x16xf32>
    %cst_86 = arith.constant 0.000000e+00 : f32
    %193 = vector.broadcast %cst_86 : f32 to vector<12x16xf32>
    %194 = arith.maximumf %192, %193 : vector<12x16xf32>
    %195 = arith.truncf %194 : vector<12x16xf32> to vector<12x16xbf16>
    %c252 = arith.constant 252 : index
    %c0_87 = arith.constant 0 : index
    %196 = vector.load %arg16[%c252, %c0_87] : memref<352x16xbf16, #tpu.memory_space<vmem>>, vector<12x16xbf16>
    tpu.vector_store %arg16[%c252, %c0_87], %195 {strides = array<i32>} : memref<352x16xbf16, #tpu.memory_space<vmem>>, vector<12x16xbf16>,
    %c1056 = arith.constant 1056 : index
    %c0_88 = arith.constant 0 : index
    %197 = tpu.strided_load %arg15[%c1056, %c0_88] {strides = array<i32: 2, 1>} : memref<1128x128xf32, #tpu.memory_space<vmem>>, vector<12x128xf32>
    %198 = vector.extract_strided_slice %197 {offsets = [0, 0], sizes = [12, 16], strides = [1, 1]} : vector<12x128xf32> to vector<12x16xf32>
    %199 = vector.broadcast %20 : vector<1x16xf32> to vector<12x16xf32>
    %200 = arith.addf %198, %199 : vector<12x16xf32>
    %cst_89 = arith.constant 0.000000e+00 : f32
    %201 = vector.broadcast %cst_89 : f32 to vector<12x16xf32>
    %202 = arith.maximumf %200, %201 : vector<12x16xf32>
    %203 = arith.truncf %202 : vector<12x16xf32> to vector<12x16xbf16>
    %c264 = arith.constant 264 : index
    %c0_90 = arith.constant 0 : index
    %204 = vector.load %arg16[%c264, %c0_90] : memref<352x16xbf16, #tpu.memory_space<vmem>>, vector<12x16xbf16>
    tpu.vector_store %arg16[%c264, %c0_90], %203 {strides = array<i32>} : memref<352x16xbf16, #tpu.memory_space<vmem>>, vector<12x16xbf16>,
    %c1104 = arith.constant 1104 : index
    %c0_91 = arith.constant 0 : index
    %205 = tpu.strided_load %arg15[%c1104, %c0_91] {strides = array<i32: 2, 1>} : memref<1128x128xf32, #tpu.memory_space<vmem>>, vector<12x128xf32>
    %206 = vector.extract_strided_slice %205 {offsets = [0, 0], sizes = [12, 16], strides = [1, 1]} : vector<12x128xf32> to vector<12x16xf32>
    %207 = vector.broadcast %20 : vector<1x16xf32> to vector<12x16xf32>
    %208 = arith.addf %206, %207 : vector<12x16xf32>
    %cst_92 = arith.constant 0.000000e+00 : f32
    %209 = vector.broadcast %cst_92 : f32 to vector<12x16xf32>
    %210 = arith.maximumf %208, %209 : vector<12x16xf32>
    %211 = arith.truncf %210 : vector<12x16xf32> to vector<12x16xbf16>
    %c276 = arith.constant 276 : index
    %c0_93 = arith.constant 0 : index
    %212 = vector.load %arg16[%c276, %c0_93] : memref<352x16xbf16, #tpu.memory_space<vmem>>, vector<12x16xbf16>
    tpu.vector_store %arg16[%c276, %c0_93], %211 {strides = array<i32>} : memref<352x16xbf16, #tpu.memory_space<vmem>>, vector<12x16xbf16>,
    %cst_94 = arith.constant 0.000000e+00 : bf16
    %213 = vector.broadcast %cst_94 : bf16 to vector<64x16xbf16>
    %c288_95 = arith.constant 288 : index
    %c0_96 = arith.constant 0 : index
    %214 = vector.load %arg16[%c288_95, %c0_96] : memref<352x16xbf16, #tpu.memory_space<vmem>>, vector<64x16xbf16>
    tpu.vector_store %arg16[%c288_95, %c0_96], %213 {strides = array<i32>} : memref<352x16xbf16, #tpu.memory_space<vmem>>, vector<64x16xbf16>,
    %c0_97 = arith.constant 0 : index
    %c0_98 = arith.constant 0 : index
    %215 = vector.load %arg16[%c0_97, %c0_98] : memref<352x16xbf16, #tpu.memory_space<vmem>>, vector<64x16xbf16>
    %c0_99 = arith.constant 0 : index
    %c0_100 = arith.constant 0 : index
    %c0_101 = arith.constant 0 : index
    %216 = vector.load %arg3[%c0_99, %c0_100, %c0_101] : memref<9x16x128xbf16, #tpu.memory_space<vmem>>, vector<1x16x128xbf16>
    %217 = vector.shape_cast %216 : vector<1x16x128xbf16> to vector<16x128xbf16>
    %cst_102 = arith.constant dense<0.000000e+00> : vector<64x128xf32>
    %218 = tpu.matmul %215, %217, %cst_102 {dimension_numbers = #tpu.dot_dimension_numbers<[1], [0], [0], [1], [0, 0, 1, 1], [], []>} : vector<64x16xbf16>, vector<16x128xbf16>, vector<64x128xf32> -> vector<64x128xf32>
    %c1_103 = arith.constant 1 : index
    %c0_104 = arith.constant 0 : index
    %219 = vector.load %arg16[%c1_103, %c0_104] : memref<352x16xbf16, #tpu.memory_space<vmem>>, vector<64x16xbf16>
    %c1_105 = arith.constant 1 : index
    %c0_106 = arith.constant 0 : index
    %c0_107 = arith.constant 0 : index
    %220 = vector.load %arg3[%c1_105, %c0_106, %c0_107] : memref<9x16x128xbf16, #tpu.memory_space<vmem>>, vector<1x16x128xbf16>
    %221 = vector.shape_cast %220 : vector<1x16x128xbf16> to vector<16x128xbf16>
    %cst_108 = arith.constant dense<0.000000e+00> : vector<64x128xf32>
    %222 = tpu.matmul %219, %221, %cst_108 {dimension_numbers = #tpu.dot_dimension_numbers<[1], [0], [0], [1], [0, 0, 1, 1], [], []>} : vector<64x16xbf16>, vector<16x128xbf16>, vector<64x128xf32> -> vector<64x128xf32>
    %223 = arith.addf %218, %222 : vector<64x128xf32>
    %c2 = arith.constant 2 : index
    %c0_109 = arith.constant 0 : index
    %224 = vector.load %arg16[%c2, %c0_109] : memref<352x16xbf16, #tpu.memory_space<vmem>>, vector<64x16xbf16>
    %c2_110 = arith.constant 2 : index
    %c0_111 = arith.constant 0 : index
    %c0_112 = arith.constant 0 : index
    %225 = vector.load %arg3[%c2_110, %c0_111, %c0_112] : memref<9x16x128xbf16, #tpu.memory_space<vmem>>, vector<1x16x128xbf16>
    %226 = vector.shape_cast %225 : vector<1x16x128xbf16> to vector<16x128xbf16>
    %cst_113 = arith.constant dense<0.000000e+00> : vector<64x128xf32>
    %227 = tpu.matmul %224, %226, %cst_113 {dimension_numbers = #tpu.dot_dimension_numbers<[1], [0], [0], [1], [0, 0, 1, 1], [], []>} : vector<64x16xbf16>, vector<16x128xbf16>, vector<64x128xf32> -> vector<64x128xf32>
    %228 = arith.addf %223, %227 : vector<64x128xf32>
    %c12_114 = arith.constant 12 : index
    %c0_115 = arith.constant 0 : index
    %229 = vector.load %arg16[%c12_114, %c0_115] : memref<352x16xbf16, #tpu.memory_space<vmem>>, vector<64x16xbf16>
    %c3 = arith.constant 3 : index
    %c0_116 = arith.constant 0 : index
    %c0_117 = arith.constant 0 : index
    %230 = vector.load %arg3[%c3, %c0_116, %c0_117] : memref<9x16x128xbf16, #tpu.memory_space<vmem>>, vector<1x16x128xbf16>
    %231 = vector.shape_cast %230 : vector<1x16x128xbf16> to vector<16x128xbf16>
    %cst_118 = arith.constant dense<0.000000e+00> : vector<64x128xf32>
    %232 = tpu.matmul %229, %231, %cst_118 {dimension_numbers = #tpu.dot_dimension_numbers<[1], [0], [0], [1], [0, 0, 1, 1], [], []>} : vector<64x16xbf16>, vector<16x128xbf16>, vector<64x128xf32> -> vector<64x128xf32>
    %233 = arith.addf %228, %232 : vector<64x128xf32>
    %c13 = arith.constant 13 : index
    %c0_119 = arith.constant 0 : index
    %234 = vector.load %arg16[%c13, %c0_119] : memref<352x16xbf16, #tpu.memory_space<vmem>>, vector<64x16xbf16>
    %c4 = arith.constant 4 : index
    %c0_120 = arith.constant 0 : index
    %c0_121 = arith.constant 0 : index
    %235 = vector.load %arg3[%c4, %c0_120, %c0_121] : memref<9x16x128xbf16, #tpu.memory_space<vmem>>, vector<1x16x128xbf16>
    %236 = vector.shape_cast %235 : vector<1x16x128xbf16> to vector<16x128xbf16>
    %cst_122 = arith.constant dense<0.000000e+00> : vector<64x128xf32>
    %237 = tpu.matmul %234, %236, %cst_122 {dimension_numbers = #tpu.dot_dimension_numbers<[1], [0], [0], [1], [0, 0, 1, 1], [], []>} : vector<64x16xbf16>, vector<16x128xbf16>, vector<64x128xf32> -> vector<64x128xf32>
    %238 = arith.addf %233, %237 : vector<64x128xf32>
    %c14 = arith.constant 14 : index
    %c0_123 = arith.constant 0 : index
    %239 = vector.load %arg16[%c14, %c0_123] : memref<352x16xbf16, #tpu.memory_space<vmem>>, vector<64x16xbf16>
    %c5 = arith.constant 5 : index
    %c0_124 = arith.constant 0 : index
    %c0_125 = arith.constant 0 : index
    %240 = vector.load %arg3[%c5, %c0_124, %c0_125] : memref<9x16x128xbf16, #tpu.memory_space<vmem>>, vector<1x16x128xbf16>
    %241 = vector.shape_cast %240 : vector<1x16x128xbf16> to vector<16x128xbf16>
    %cst_126 = arith.constant dense<0.000000e+00> : vector<64x128xf32>
    %242 = tpu.matmul %239, %241, %cst_126 {dimension_numbers = #tpu.dot_dimension_numbers<[1], [0], [0], [1], [0, 0, 1, 1], [], []>} : vector<64x16xbf16>, vector<16x128xbf16>, vector<64x128xf32> -> vector<64x128xf32>
    %243 = arith.addf %238, %242 : vector<64x128xf32>
    %c24_127 = arith.constant 24 : index
    %c0_128 = arith.constant 0 : index
    %244 = vector.load %arg16[%c24_127, %c0_128] : memref<352x16xbf16, #tpu.memory_space<vmem>>, vector<64x16xbf16>
    %c6 = arith.constant 6 : index
    %c0_129 = arith.constant 0 : index
    %c0_130 = arith.constant 0 : index
    %245 = vector.load %arg3[%c6, %c0_129, %c0_130] : memref<9x16x128xbf16, #tpu.memory_space<vmem>>, vector<1x16x128xbf16>
    %246 = vector.shape_cast %245 : vector<1x16x128xbf16> to vector<16x128xbf16>
    %cst_131 = arith.constant dense<0.000000e+00> : vector<64x128xf32>
    %247 = tpu.matmul %244, %246, %cst_131 {dimension_numbers = #tpu.dot_dimension_numbers<[1], [0], [0], [1], [0, 0, 1, 1], [], []>} : vector<64x16xbf16>, vector<16x128xbf16>, vector<64x128xf32> -> vector<64x128xf32>
    %248 = arith.addf %243, %247 : vector<64x128xf32>
    %c25_132 = arith.constant 25 : index
    %c0_133 = arith.constant 0 : index
    %249 = vector.load %arg16[%c25_132, %c0_133] : memref<352x16xbf16, #tpu.memory_space<vmem>>, vector<64x16xbf16>
    %c7 = arith.constant 7 : index
    %c0_134 = arith.constant 0 : index
    %c0_135 = arith.constant 0 : index
    %250 = vector.load %arg3[%c7, %c0_134, %c0_135] : memref<9x16x128xbf16, #tpu.memory_space<vmem>>, vector<1x16x128xbf16>
    %251 = vector.shape_cast %250 : vector<1x16x128xbf16> to vector<16x128xbf16>
    %cst_136 = arith.constant dense<0.000000e+00> : vector<64x128xf32>
    %252 = tpu.matmul %249, %251, %cst_136 {dimension_numbers = #tpu.dot_dimension_numbers<[1], [0], [0], [1], [0, 0, 1, 1], [], []>} : vector<64x16xbf16>, vector<16x128xbf16>, vector<64x128xf32> -> vector<64x128xf32>
    %253 = arith.addf %248, %252 : vector<64x128xf32>
    %c26 = arith.constant 26 : index
    %c0_137 = arith.constant 0 : index
    %254 = vector.load %arg16[%c26, %c0_137] : memref<352x16xbf16, #tpu.memory_space<vmem>>, vector<64x16xbf16>
    %c8 = arith.constant 8 : index
    %c0_138 = arith.constant 0 : index
    %c0_139 = arith.constant 0 : index
    %255 = vector.load %arg3[%c8, %c0_138, %c0_139] : memref<9x16x128xbf16, #tpu.memory_space<vmem>>, vector<1x16x128xbf16>
    %256 = vector.shape_cast %255 : vector<1x16x128xbf16> to vector<16x128xbf16>
    %cst_140 = arith.constant dense<0.000000e+00> : vector<64x128xf32>
    %257 = tpu.matmul %254, %256, %cst_140 {dimension_numbers = #tpu.dot_dimension_numbers<[1], [0], [0], [1], [0, 0, 1, 1], [], []>} : vector<64x16xbf16>, vector<16x128xbf16>, vector<64x128xf32> -> vector<64x128xf32>
    %258 = arith.addf %253, %257 : vector<64x128xf32>
    %c0_141 = arith.constant 0 : index
    %c0_142 = arith.constant 0 : index
    %259 = vector.load %arg17[%c0_141, %c0_142] : memref<320x128xf32, #tpu.memory_space<vmem>>, vector<64x128xf32>
    tpu.vector_store %arg17[%c0_141, %c0_142], %258 {strides = array<i32>} : memref<320x128xf32, #tpu.memory_space<vmem>>, vector<64x128xf32>,
    %c64 = arith.constant 64 : index
    %c0_143 = arith.constant 0 : index
    %260 = vector.load %arg16[%c64, %c0_143] : memref<352x16xbf16, #tpu.memory_space<vmem>>, vector<64x16xbf16>
    %c0_144 = arith.constant 0 : index
    %c0_145 = arith.constant 0 : index
    %c0_146 = arith.constant 0 : index
    %261 = vector.load %arg3[%c0_144, %c0_145, %c0_146] : memref<9x16x128xbf16, #tpu.memory_space<vmem>>, vector<1x16x128xbf16>
    %262 = vector.shape_cast %261 : vector<1x16x128xbf16> to vector<16x128xbf16>
    %cst_147 = arith.constant dense<0.000000e+00> : vector<64x128xf32>
    %263 = tpu.matmul %260, %262, %cst_147 {dimension_numbers = #tpu.dot_dimension_numbers<[1], [0], [0], [1], [0, 0, 1, 1], [], []>} : vector<64x16xbf16>, vector<16x128xbf16>, vector<64x128xf32> -> vector<64x128xf32>
    %c65 = arith.constant 65 : index
    %c0_148 = arith.constant 0 : index
    %264 = vector.load %arg16[%c65, %c0_148] : memref<352x16xbf16, #tpu.memory_space<vmem>>, vector<64x16xbf16>
    %c1_149 = arith.constant 1 : index
    %c0_150 = arith.constant 0 : index
    %c0_151 = arith.constant 0 : index
    %265 = vector.load %arg3[%c1_149, %c0_150, %c0_151] : memref<9x16x128xbf16, #tpu.memory_space<vmem>>, vector<1x16x128xbf16>
    %266 = vector.shape_cast %265 : vector<1x16x128xbf16> to vector<16x128xbf16>
    %cst_152 = arith.constant dense<0.000000e+00> : vector<64x128xf32>
    %267 = tpu.matmul %264, %266, %cst_152 {dimension_numbers = #tpu.dot_dimension_numbers<[1], [0], [0], [1], [0, 0, 1, 1], [], []>} : vector<64x16xbf16>, vector<16x128xbf16>, vector<64x128xf32> -> vector<64x128xf32>
    %268 = arith.addf %263, %267 : vector<64x128xf32>
    %c66 = arith.constant 66 : index
    %c0_153 = arith.constant 0 : index
    %269 = vector.load %arg16[%c66, %c0_153] : memref<352x16xbf16, #tpu.memory_space<vmem>>, vector<64x16xbf16>
    %c2_154 = arith.constant 2 : index
    %c0_155 = arith.constant 0 : index
    %c0_156 = arith.constant 0 : index
    %270 = vector.load %arg3[%c2_154, %c0_155, %c0_156] : memref<9x16x128xbf16, #tpu.memory_space<vmem>>, vector<1x16x128xbf16>
    %271 = vector.shape_cast %270 : vector<1x16x128xbf16> to vector<16x128xbf16>
    %cst_157 = arith.constant dense<0.000000e+00> : vector<64x128xf32>
    %272 = tpu.matmul %269, %271, %cst_157 {dimension_numbers = #tpu.dot_dimension_numbers<[1], [0], [0], [1], [0, 0, 1, 1], [], []>} : vector<64x16xbf16>, vector<16x128xbf16>, vector<64x128xf32> -> vector<64x128xf32>
    %273 = arith.addf %268, %272 : vector<64x128xf32>
    %c76 = arith.constant 76 : index
    %c0_158 = arith.constant 0 : index
    %274 = vector.load %arg16[%c76, %c0_158] : memref<352x16xbf16, #tpu.memory_space<vmem>>, vector<64x16xbf16>
    %c3_159 = arith.constant 3 : index
    %c0_160 = arith.constant 0 : index
    %c0_161 = arith.constant 0 : index
    %275 = vector.load %arg3[%c3_159, %c0_160, %c0_161] : memref<9x16x128xbf16, #tpu.memory_space<vmem>>, vector<1x16x128xbf16>
    %276 = vector.shape_cast %275 : vector<1x16x128xbf16> to vector<16x128xbf16>
    %cst_162 = arith.constant dense<0.000000e+00> : vector<64x128xf32>
    %277 = tpu.matmul %274, %276, %cst_162 {dimension_numbers = #tpu.dot_dimension_numbers<[1], [0], [0], [1], [0, 0, 1, 1], [], []>} : vector<64x16xbf16>, vector<16x128xbf16>, vector<64x128xf32> -> vector<64x128xf32>
    %278 = arith.addf %273, %277 : vector<64x128xf32>
    %c77 = arith.constant 77 : index
    %c0_163 = arith.constant 0 : index
    %279 = vector.load %arg16[%c77, %c0_163] : memref<352x16xbf16, #tpu.memory_space<vmem>>, vector<64x16xbf16>
    %c4_164 = arith.constant 4 : index
    %c0_165 = arith.constant 0 : index
    %c0_166 = arith.constant 0 : index
    %280 = vector.load %arg3[%c4_164, %c0_165, %c0_166] : memref<9x16x128xbf16, #tpu.memory_space<vmem>>, vector<1x16x128xbf16>
    %281 = vector.shape_cast %280 : vector<1x16x128xbf16> to vector<16x128xbf16>
    %cst_167 = arith.constant dense<0.000000e+00> : vector<64x128xf32>
    %282 = tpu.matmul %279, %281, %cst_167 {dimension_numbers = #tpu.dot_dimension_numbers<[1], [0], [0], [1], [0, 0, 1, 1], [], []>} : vector<64x16xbf16>, vector<16x128xbf16>, vector<64x128xf32> -> vector<64x128xf32>
    %283 = arith.addf %278, %282 : vector<64x128xf32>
    %c78 = arith.constant 78 : index
    %c0_168 = arith.constant 0 : index
    %284 = vector.load %arg16[%c78, %c0_168] : memref<352x16xbf16, #tpu.memory_space<vmem>>, vector<64x16xbf16>
    %c5_169 = arith.constant 5 : index
    %c0_170 = arith.constant 0 : index
    %c0_171 = arith.constant 0 : index
    %285 = vector.load %arg3[%c5_169, %c0_170, %c0_171] : memref<9x16x128xbf16, #tpu.memory_space<vmem>>, vector<1x16x128xbf16>
    %286 = vector.shape_cast %285 : vector<1x16x128xbf16> to vector<16x128xbf16>
    %cst_172 = arith.constant dense<0.000000e+00> : vector<64x128xf32>
    %287 = tpu.matmul %284, %286, %cst_172 {dimension_numbers = #tpu.dot_dimension_numbers<[1], [0], [0], [1], [0, 0, 1, 1], [], []>} : vector<64x16xbf16>, vector<16x128xbf16>, vector<64x128xf32> -> vector<64x128xf32>
    %288 = arith.addf %283, %287 : vector<64x128xf32>
    %c88 = arith.constant 88 : index
    %c0_173 = arith.constant 0 : index
    %289 = vector.load %arg16[%c88, %c0_173] : memref<352x16xbf16, #tpu.memory_space<vmem>>, vector<64x16xbf16>
    %c6_174 = arith.constant 6 : index
    %c0_175 = arith.constant 0 : index
    %c0_176 = arith.constant 0 : index
    %290 = vector.load %arg3[%c6_174, %c0_175, %c0_176] : memref<9x16x128xbf16, #tpu.memory_space<vmem>>, vector<1x16x128xbf16>
    %291 = vector.shape_cast %290 : vector<1x16x128xbf16> to vector<16x128xbf16>
    %cst_177 = arith.constant dense<0.000000e+00> : vector<64x128xf32>
    %292 = tpu.matmul %289, %291, %cst_177 {dimension_numbers = #tpu.dot_dimension_numbers<[1], [0], [0], [1], [0, 0, 1, 1], [], []>} : vector<64x16xbf16>, vector<16x128xbf16>, vector<64x128xf32> -> vector<64x128xf32>
    %293 = arith.addf %288, %292 : vector<64x128xf32>
    %c89 = arith.constant 89 : index
    %c0_178 = arith.constant 0 : index
    %294 = vector.load %arg16[%c89, %c0_178] : memref<352x16xbf16, #tpu.memory_space<vmem>>, vector<64x16xbf16>
    %c7_179 = arith.constant 7 : index
    %c0_180 = arith.constant 0 : index
    %c0_181 = arith.constant 0 : index
    %295 = vector.load %arg3[%c7_179, %c0_180, %c0_181] : memref<9x16x128xbf16, #tpu.memory_space<vmem>>, vector<1x16x128xbf16>
    %296 = vector.shape_cast %295 : vector<1x16x128xbf16> to vector<16x128xbf16>
    %cst_182 = arith.constant dense<0.000000e+00> : vector<64x128xf32>
    %297 = tpu.matmul %294, %296, %cst_182 {dimension_numbers = #tpu.dot_dimension_numbers<[1], [0], [0], [1], [0, 0, 1, 1], [], []>} : vector<64x16xbf16>, vector<16x128xbf16>, vector<64x128xf32> -> vector<64x128xf32>
    %298 = arith.addf %293, %297 : vector<64x128xf32>
    %c90 = arith.constant 90 : index
    %c0_183 = arith.constant 0 : index
    %299 = vector.load %arg16[%c90, %c0_183] : memref<352x16xbf16, #tpu.memory_space<vmem>>, vector<64x16xbf16>
    %c8_184 = arith.constant 8 : index
    %c0_185 = arith.constant 0 : index
    %c0_186 = arith.constant 0 : index
    %300 = vector.load %arg3[%c8_184, %c0_185, %c0_186] : memref<9x16x128xbf16, #tpu.memory_space<vmem>>, vector<1x16x128xbf16>
    %301 = vector.shape_cast %300 : vector<1x16x128xbf16> to vector<16x128xbf16>
    %cst_187 = arith.constant dense<0.000000e+00> : vector<64x128xf32>
    %302 = tpu.matmul %299, %301, %cst_187 {dimension_numbers = #tpu.dot_dimension_numbers<[1], [0], [0], [1], [0, 0, 1, 1], [], []>} : vector<64x16xbf16>, vector<16x128xbf16>, vector<64x128xf32> -> vector<64x128xf32>
    %303 = arith.addf %298, %302 : vector<64x128xf32>
    %c64_188 = arith.constant 64 : index
    %c0_189 = arith.constant 0 : index
    %304 = vector.load %arg17[%c64_188, %c0_189] : memref<320x128xf32, #tpu.memory_space<vmem>>, vector<64x128xf32>
    tpu.vector_store %arg17[%c64_188, %c0_189], %303 {strides = array<i32>} : memref<320x128xf32, #tpu.memory_space<vmem>>, vector<64x128xf32>,
    %c128 = arith.constant 128 : index
    %c0_190 = arith.constant 0 : index
    %305 = vector.load %arg16[%c128, %c0_190] : memref<352x16xbf16, #tpu.memory_space<vmem>>, vector<64x16xbf16>
    %c0_191 = arith.constant 0 : index
    %c0_192 = arith.constant 0 : index
    %c0_193 = arith.constant 0 : index
    %306 = vector.load %arg3[%c0_191, %c0_192, %c0_193] : memref<9x16x128xbf16, #tpu.memory_space<vmem>>, vector<1x16x128xbf16>
    %307 = vector.shape_cast %306 : vector<1x16x128xbf16> to vector<16x128xbf16>
    %cst_194 = arith.constant dense<0.000000e+00> : vector<64x128xf32>
    %308 = tpu.matmul %305, %307, %cst_194 {dimension_numbers = #tpu.dot_dimension_numbers<[1], [0], [0], [1], [0, 0, 1, 1], [], []>} : vector<64x16xbf16>, vector<16x128xbf16>, vector<64x128xf32> -> vector<64x128xf32>
    %c129 = arith.constant 129 : index
    %c0_195 = arith.constant 0 : index
    %309 = vector.load %arg16[%c129, %c0_195] : memref<352x16xbf16, #tpu.memory_space<vmem>>, vector<64x16xbf16>
    %c1_196 = arith.constant 1 : index
    %c0_197 = arith.constant 0 : index
    %c0_198 = arith.constant 0 : index
    %310 = vector.load %arg3[%c1_196, %c0_197, %c0_198] : memref<9x16x128xbf16, #tpu.memory_space<vmem>>, vector<1x16x128xbf16>
    %311 = vector.shape_cast %310 : vector<1x16x128xbf16> to vector<16x128xbf16>
    %cst_199 = arith.constant dense<0.000000e+00> : vector<64x128xf32>
    %312 = tpu.matmul %309, %311, %cst_199 {dimension_numbers = #tpu.dot_dimension_numbers<[1], [0], [0], [1], [0, 0, 1, 1], [], []>} : vector<64x16xbf16>, vector<16x128xbf16>, vector<64x128xf32> -> vector<64x128xf32>
    %313 = arith.addf %308, %312 : vector<64x128xf32>
    %c130 = arith.constant 130 : index
    %c0_200 = arith.constant 0 : index
    %314 = vector.load %arg16[%c130, %c0_200] : memref<352x16xbf16, #tpu.memory_space<vmem>>, vector<64x16xbf16>
    %c2_201 = arith.constant 2 : index
    %c0_202 = arith.constant 0 : index
    %c0_203 = arith.constant 0 : index
    %315 = vector.load %arg3[%c2_201, %c0_202, %c0_203] : memref<9x16x128xbf16, #tpu.memory_space<vmem>>, vector<1x16x128xbf16>
    %316 = vector.shape_cast %315 : vector<1x16x128xbf16> to vector<16x128xbf16>
    %cst_204 = arith.constant dense<0.000000e+00> : vector<64x128xf32>
    %317 = tpu.matmul %314, %316, %cst_204 {dimension_numbers = #tpu.dot_dimension_numbers<[1], [0], [0], [1], [0, 0, 1, 1], [], []>} : vector<64x16xbf16>, vector<16x128xbf16>, vector<64x128xf32> -> vector<64x128xf32>
    %318 = arith.addf %313, %317 : vector<64x128xf32>
    %c140 = arith.constant 140 : index
    %c0_205 = arith.constant 0 : index
    %319 = vector.load %arg16[%c140, %c0_205] : memref<352x16xbf16, #tpu.memory_space<vmem>>, vector<64x16xbf16>
    %c3_206 = arith.constant 3 : index
    %c0_207 = arith.constant 0 : index
    %c0_208 = arith.constant 0 : index
    %320 = vector.load %arg3[%c3_206, %c0_207, %c0_208] : memref<9x16x128xbf16, #tpu.memory_space<vmem>>, vector<1x16x128xbf16>
    %321 = vector.shape_cast %320 : vector<1x16x128xbf16> to vector<16x128xbf16>
    %cst_209 = arith.constant dense<0.000000e+00> : vector<64x128xf32>
    %322 = tpu.matmul %319, %321, %cst_209 {dimension_numbers = #tpu.dot_dimension_numbers<[1], [0], [0], [1], [0, 0, 1, 1], [], []>} : vector<64x16xbf16>, vector<16x128xbf16>, vector<64x128xf32> -> vector<64x128xf32>
    %323 = arith.addf %318, %322 : vector<64x128xf32>
    %c141 = arith.constant 141 : index
    %c0_210 = arith.constant 0 : index
    %324 = vector.load %arg16[%c141, %c0_210] : memref<352x16xbf16, #tpu.memory_space<vmem>>, vector<64x16xbf16>
    %c4_211 = arith.constant 4 : index
    %c0_212 = arith.constant 0 : index
    %c0_213 = arith.constant 0 : index
    %325 = vector.load %arg3[%c4_211, %c0_212, %c0_213] : memref<9x16x128xbf16, #tpu.memory_space<vmem>>, vector<1x16x128xbf16>
    %326 = vector.shape_cast %325 : vector<1x16x128xbf16> to vector<16x128xbf16>
    %cst_214 = arith.constant dense<0.000000e+00> : vector<64x128xf32>
    %327 = tpu.matmul %324, %326, %cst_214 {dimension_numbers = #tpu.dot_dimension_numbers<[1], [0], [0], [1], [0, 0, 1, 1], [], []>} : vector<64x16xbf16>, vector<16x128xbf16>, vector<64x128xf32> -> vector<64x128xf32>
    %328 = arith.addf %323, %327 : vector<64x128xf32>
    %c142 = arith.constant 142 : index
    %c0_215 = arith.constant 0 : index
    %329 = vector.load %arg16[%c142, %c0_215] : memref<352x16xbf16, #tpu.memory_space<vmem>>, vector<64x16xbf16>
    %c5_216 = arith.constant 5 : index
    %c0_217 = arith.constant 0 : index
    %c0_218 = arith.constant 0 : index
    %330 = vector.load %arg3[%c5_216, %c0_217, %c0_218] : memref<9x16x128xbf16, #tpu.memory_space<vmem>>, vector<1x16x128xbf16>
    %331 = vector.shape_cast %330 : vector<1x16x128xbf16> to vector<16x128xbf16>
    %cst_219 = arith.constant dense<0.000000e+00> : vector<64x128xf32>
    %332 = tpu.matmul %329, %331, %cst_219 {dimension_numbers = #tpu.dot_dimension_numbers<[1], [0], [0], [1], [0, 0, 1, 1], [], []>} : vector<64x16xbf16>, vector<16x128xbf16>, vector<64x128xf32> -> vector<64x128xf32>
    %333 = arith.addf %328, %332 : vector<64x128xf32>
    %c152 = arith.constant 152 : index
    %c0_220 = arith.constant 0 : index
    %334 = vector.load %arg16[%c152, %c0_220] : memref<352x16xbf16, #tpu.memory_space<vmem>>, vector<64x16xbf16>
    %c6_221 = arith.constant 6 : index
    %c0_222 = arith.constant 0 : index
    %c0_223 = arith.constant 0 : index
    %335 = vector.load %arg3[%c6_221, %c0_222, %c0_223] : memref<9x16x128xbf16, #tpu.memory_space<vmem>>, vector<1x16x128xbf16>
    %336 = vector.shape_cast %335 : vector<1x16x128xbf16> to vector<16x128xbf16>
    %cst_224 = arith.constant dense<0.000000e+00> : vector<64x128xf32>
    %337 = tpu.matmul %334, %336, %cst_224 {dimension_numbers = #tpu.dot_dimension_numbers<[1], [0], [0], [1], [0, 0, 1, 1], [], []>} : vector<64x16xbf16>, vector<16x128xbf16>, vector<64x128xf32> -> vector<64x128xf32>
    %338 = arith.addf %333, %337 : vector<64x128xf32>
    %c153 = arith.constant 153 : index
    %c0_225 = arith.constant 0 : index
    %339 = vector.load %arg16[%c153, %c0_225] : memref<352x16xbf16, #tpu.memory_space<vmem>>, vector<64x16xbf16>
    %c7_226 = arith.constant 7 : index
    %c0_227 = arith.constant 0 : index
    %c0_228 = arith.constant 0 : index
    %340 = vector.load %arg3[%c7_226, %c0_227, %c0_228] : memref<9x16x128xbf16, #tpu.memory_space<vmem>>, vector<1x16x128xbf16>
    %341 = vector.shape_cast %340 : vector<1x16x128xbf16> to vector<16x128xbf16>
    %cst_229 = arith.constant dense<0.000000e+00> : vector<64x128xf32>
    %342 = tpu.matmul %339, %341, %cst_229 {dimension_numbers = #tpu.dot_dimension_numbers<[1], [0], [0], [1], [0, 0, 1, 1], [], []>} : vector<64x16xbf16>, vector<16x128xbf16>, vector<64x128xf32> -> vector<64x128xf32>
    %343 = arith.addf %338, %342 : vector<64x128xf32>
    %c154 = arith.constant 154 : index
    %c0_230 = arith.constant 0 : index
    %344 = vector.load %arg16[%c154, %c0_230] : memref<352x16xbf16, #tpu.memory_space<vmem>>, vector<64x16xbf16>
    %c8_231 = arith.constant 8 : index
    %c0_232 = arith.constant 0 : index
    %c0_233 = arith.constant 0 : index
    %345 = vector.load %arg3[%c8_231, %c0_232, %c0_233] : memref<9x16x128xbf16, #tpu.memory_space<vmem>>, vector<1x16x128xbf16>
    %346 = vector.shape_cast %345 : vector<1x16x128xbf16> to vector<16x128xbf16>
    %cst_234 = arith.constant dense<0.000000e+00> : vector<64x128xf32>
    %347 = tpu.matmul %344, %346, %cst_234 {dimension_numbers = #tpu.dot_dimension_numbers<[1], [0], [0], [1], [0, 0, 1, 1], [], []>} : vector<64x16xbf16>, vector<16x128xbf16>, vector<64x128xf32> -> vector<64x128xf32>
    %348 = arith.addf %343, %347 : vector<64x128xf32>
    %c128_235 = arith.constant 128 : index
    %c0_236 = arith.constant 0 : index
    %349 = vector.load %arg17[%c128_235, %c0_236] : memref<320x128xf32, #tpu.memory_space<vmem>>, vector<64x128xf32>
    tpu.vector_store %arg17[%c128_235, %c0_236], %348 {strides = array<i32>} : memref<320x128xf32, #tpu.memory_space<vmem>>, vector<64x128xf32>,
    %c192_237 = arith.constant 192 : index
    %c0_238 = arith.constant 0 : index
    %350 = vector.load %arg16[%c192_237, %c0_238] : memref<352x16xbf16, #tpu.memory_space<vmem>>, vector<64x16xbf16>
    %c0_239 = arith.constant 0 : index
    %c0_240 = arith.constant 0 : index
    %c0_241 = arith.constant 0 : index
    %351 = vector.load %arg3[%c0_239, %c0_240, %c0_241] : memref<9x16x128xbf16, #tpu.memory_space<vmem>>, vector<1x16x128xbf16>
    %352 = vector.shape_cast %351 : vector<1x16x128xbf16> to vector<16x128xbf16>
    %cst_242 = arith.constant dense<0.000000e+00> : vector<64x128xf32>
    %353 = tpu.matmul %350, %352, %cst_242 {dimension_numbers = #tpu.dot_dimension_numbers<[1], [0], [0], [1], [0, 0, 1, 1], [], []>} : vector<64x16xbf16>, vector<16x128xbf16>, vector<64x128xf32> -> vector<64x128xf32>
    %c193 = arith.constant 193 : index
    %c0_243 = arith.constant 0 : index
    %354 = vector.load %arg16[%c193, %c0_243] : memref<352x16xbf16, #tpu.memory_space<vmem>>, vector<64x16xbf16>
    %c1_244 = arith.constant 1 : index
    %c0_245 = arith.constant 0 : index
    %c0_246 = arith.constant 0 : index
    %355 = vector.load %arg3[%c1_244, %c0_245, %c0_246] : memref<9x16x128xbf16, #tpu.memory_space<vmem>>, vector<1x16x128xbf16>
    %356 = vector.shape_cast %355 : vector<1x16x128xbf16> to vector<16x128xbf16>
    %cst_247 = arith.constant dense<0.000000e+00> : vector<64x128xf32>
    %357 = tpu.matmul %354, %356, %cst_247 {dimension_numbers = #tpu.dot_dimension_numbers<[1], [0], [0], [1], [0, 0, 1, 1], [], []>} : vector<64x16xbf16>, vector<16x128xbf16>, vector<64x128xf32> -> vector<64x128xf32>
    %358 = arith.addf %353, %357 : vector<64x128xf32>
    %c194 = arith.constant 194 : index
    %c0_248 = arith.constant 0 : index
    %359 = vector.load %arg16[%c194, %c0_248] : memref<352x16xbf16, #tpu.memory_space<vmem>>, vector<64x16xbf16>
    %c2_249 = arith.constant 2 : index
    %c0_250 = arith.constant 0 : index
    %c0_251 = arith.constant 0 : index
    %360 = vector.load %arg3[%c2_249, %c0_250, %c0_251] : memref<9x16x128xbf16, #tpu.memory_space<vmem>>, vector<1x16x128xbf16>
    %361 = vector.shape_cast %360 : vector<1x16x128xbf16> to vector<16x128xbf16>
    %cst_252 = arith.constant dense<0.000000e+00> : vector<64x128xf32>
    %362 = tpu.matmul %359, %361, %cst_252 {dimension_numbers = #tpu.dot_dimension_numbers<[1], [0], [0], [1], [0, 0, 1, 1], [], []>} : vector<64x16xbf16>, vector<16x128xbf16>, vector<64x128xf32> -> vector<64x128xf32>
    %363 = arith.addf %358, %362 : vector<64x128xf32>
    %c204_253 = arith.constant 204 : index
    %c0_254 = arith.constant 0 : index
    %364 = vector.load %arg16[%c204_253, %c0_254] : memref<352x16xbf16, #tpu.memory_space<vmem>>, vector<64x16xbf16>
    %c3_255 = arith.constant 3 : index
    %c0_256 = arith.constant 0 : index
    %c0_257 = arith.constant 0 : index
    %365 = vector.load %arg3[%c3_255, %c0_256, %c0_257] : memref<9x16x128xbf16, #tpu.memory_space<vmem>>, vector<1x16x128xbf16>
    %366 = vector.shape_cast %365 : vector<1x16x128xbf16> to vector<16x128xbf16>
    %cst_258 = arith.constant dense<0.000000e+00> : vector<64x128xf32>
    %367 = tpu.matmul %364, %366, %cst_258 {dimension_numbers = #tpu.dot_dimension_numbers<[1], [0], [0], [1], [0, 0, 1, 1], [], []>} : vector<64x16xbf16>, vector<16x128xbf16>, vector<64x128xf32> -> vector<64x128xf32>
    %368 = arith.addf %363, %367 : vector<64x128xf32>
    %c205 = arith.constant 205 : index
    %c0_259 = arith.constant 0 : index
    %369 = vector.load %arg16[%c205, %c0_259] : memref<352x16xbf16, #tpu.memory_space<vmem>>, vector<64x16xbf16>
    %c4_260 = arith.constant 4 : index
    %c0_261 = arith.constant 0 : index
    %c0_262 = arith.constant 0 : index
    %370 = vector.load %arg3[%c4_260, %c0_261, %c0_262] : memref<9x16x128xbf16, #tpu.memory_space<vmem>>, vector<1x16x128xbf16>
    %371 = vector.shape_cast %370 : vector<1x16x128xbf16> to vector<16x128xbf16>
    %cst_263 = arith.constant dense<0.000000e+00> : vector<64x128xf32>
    %372 = tpu.matmul %369, %371, %cst_263 {dimension_numbers = #tpu.dot_dimension_numbers<[1], [0], [0], [1], [0, 0, 1, 1], [], []>} : vector<64x16xbf16>, vector<16x128xbf16>, vector<64x128xf32> -> vector<64x128xf32>
    %373 = arith.addf %368, %372 : vector<64x128xf32>
    %c206 = arith.constant 206 : index
    %c0_264 = arith.constant 0 : index
    %374 = vector.load %arg16[%c206, %c0_264] : memref<352x16xbf16, #tpu.memory_space<vmem>>, vector<64x16xbf16>
    %c5_265 = arith.constant 5 : index
    %c0_266 = arith.constant 0 : index
    %c0_267 = arith.constant 0 : index
    %375 = vector.load %arg3[%c5_265, %c0_266, %c0_267] : memref<9x16x128xbf16, #tpu.memory_space<vmem>>, vector<1x16x128xbf16>
    %376 = vector.shape_cast %375 : vector<1x16x128xbf16> to vector<16x128xbf16>
    %cst_268 = arith.constant dense<0.000000e+00> : vector<64x128xf32>
    %377 = tpu.matmul %374, %376, %cst_268 {dimension_numbers = #tpu.dot_dimension_numbers<[1], [0], [0], [1], [0, 0, 1, 1], [], []>} : vector<64x16xbf16>, vector<16x128xbf16>, vector<64x128xf32> -> vector<64x128xf32>
    %378 = arith.addf %373, %377 : vector<64x128xf32>
    %c216_269 = arith.constant 216 : index
    %c0_270 = arith.constant 0 : index
    %379 = vector.load %arg16[%c216_269, %c0_270] : memref<352x16xbf16, #tpu.memory_space<vmem>>, vector<64x16xbf16>
    %c6_271 = arith.constant 6 : index
    %c0_272 = arith.constant 0 : index
    %c0_273 = arith.constant 0 : index
    %380 = vector.load %arg3[%c6_271, %c0_272, %c0_273] : memref<9x16x128xbf16, #tpu.memory_space<vmem>>, vector<1x16x128xbf16>
    %381 = vector.shape_cast %380 : vector<1x16x128xbf16> to vector<16x128xbf16>
    %cst_274 = arith.constant dense<0.000000e+00> : vector<64x128xf32>
    %382 = tpu.matmul %379, %381, %cst_274 {dimension_numbers = #tpu.dot_dimension_numbers<[1], [0], [0], [1], [0, 0, 1, 1], [], []>} : vector<64x16xbf16>, vector<16x128xbf16>, vector<64x128xf32> -> vector<64x128xf32>
    %383 = arith.addf %378, %382 : vector<64x128xf32>
    %c217 = arith.constant 217 : index
    %c0_275 = arith.constant 0 : index
    %384 = vector.load %arg16[%c217, %c0_275] : memref<352x16xbf16, #tpu.memory_space<vmem>>, vector<64x16xbf16>
    %c7_276 = arith.constant 7 : index
    %c0_277 = arith.constant 0 : index
    %c0_278 = arith.constant 0 : index
    %385 = vector.load %arg3[%c7_276, %c0_277, %c0_278] : memref<9x16x128xbf16, #tpu.memory_space<vmem>>, vector<1x16x128xbf16>
    %386 = vector.shape_cast %385 : vector<1x16x128xbf16> to vector<16x128xbf16>
    %cst_279 = arith.constant dense<0.000000e+00> : vector<64x128xf32>
    %387 = tpu.matmul %384, %386, %cst_279 {dimension_numbers = #tpu.dot_dimension_numbers<[1], [0], [0], [1], [0, 0, 1, 1], [], []>} : vector<64x16xbf16>, vector<16x128xbf16>, vector<64x128xf32> -> vector<64x128xf32>
    %388 = arith.addf %383, %387 : vector<64x128xf32>
    %c218 = arith.constant 218 : index
    %c0_280 = arith.constant 0 : index
    %389 = vector.load %arg16[%c218, %c0_280] : memref<352x16xbf16, #tpu.memory_space<vmem>>, vector<64x16xbf16>
    %c8_281 = arith.constant 8 : index
    %c0_282 = arith.constant 0 : index
    %c0_283 = arith.constant 0 : index
    %390 = vector.load %arg3[%c8_281, %c0_282, %c0_283] : memref<9x16x128xbf16, #tpu.memory_space<vmem>>, vector<1x16x128xbf16>
    %391 = vector.shape_cast %390 : vector<1x16x128xbf16> to vector<16x128xbf16>
    %cst_284 = arith.constant dense<0.000000e+00> : vector<64x128xf32>
    %392 = tpu.matmul %389, %391, %cst_284 {dimension_numbers = #tpu.dot_dimension_numbers<[1], [0], [0], [1], [0, 0, 1, 1], [], []>} : vector<64x16xbf16>, vector<16x128xbf16>, vector<64x128xf32> -> vector<64x128xf32>
    %393 = arith.addf %388, %392 : vector<64x128xf32>
    %c192_285 = arith.constant 192 : index
    %c0_286 = arith.constant 0 : index
    %394 = vector.load %arg17[%c192_285, %c0_286] : memref<320x128xf32, #tpu.memory_space<vmem>>, vector<64x128xf32>
    tpu.vector_store %arg17[%c192_285, %c0_286], %393 {strides = array<i32>} : memref<320x128xf32, #tpu.memory_space<vmem>>, vector<64x128xf32>,
    %c256 = arith.constant 256 : index
    %c0_287 = arith.constant 0 : index
    %395 = vector.load %arg16[%c256, %c0_287] : memref<352x16xbf16, #tpu.memory_space<vmem>>, vector<64x16xbf16>
    %c0_288 = arith.constant 0 : index
    %c0_289 = arith.constant 0 : index
    %c0_290 = arith.constant 0 : index
    %396 = vector.load %arg3[%c0_288, %c0_289, %c0_290] : memref<9x16x128xbf16, #tpu.memory_space<vmem>>, vector<1x16x128xbf16>
    %397 = vector.shape_cast %396 : vector<1x16x128xbf16> to vector<16x128xbf16>
    %cst_291 = arith.constant dense<0.000000e+00> : vector<64x128xf32>
    %398 = tpu.matmul %395, %397, %cst_291 {dimension_numbers = #tpu.dot_dimension_numbers<[1], [0], [0], [1], [0, 0, 1, 1], [], []>} : vector<64x16xbf16>, vector<16x128xbf16>, vector<64x128xf32> -> vector<64x128xf32>
    %c257 = arith.constant 257 : index
    %c0_292 = arith.constant 0 : index
    %399 = vector.load %arg16[%c257, %c0_292] : memref<352x16xbf16, #tpu.memory_space<vmem>>, vector<64x16xbf16>
    %c1_293 = arith.constant 1 : index
    %c0_294 = arith.constant 0 : index
    %c0_295 = arith.constant 0 : index
    %400 = vector.load %arg3[%c1_293, %c0_294, %c0_295] : memref<9x16x128xbf16, #tpu.memory_space<vmem>>, vector<1x16x128xbf16>
    %401 = vector.shape_cast %400 : vector<1x16x128xbf16> to vector<16x128xbf16>
    %cst_296 = arith.constant dense<0.000000e+00> : vector<64x128xf32>
    %402 = tpu.matmul %399, %401, %cst_296 {dimension_numbers = #tpu.dot_dimension_numbers<[1], [0], [0], [1], [0, 0, 1, 1], [], []>} : vector<64x16xbf16>, vector<16x128xbf16>, vector<64x128xf32> -> vector<64x128xf32>
    %403 = arith.addf %398, %402 : vector<64x128xf32>
    %c258 = arith.constant 258 : index
    %c0_297 = arith.constant 0 : index
    %404 = vector.load %arg16[%c258, %c0_297] : memref<352x16xbf16, #tpu.memory_space<vmem>>, vector<64x16xbf16>
    %c2_298 = arith.constant 2 : index
    %c0_299 = arith.constant 0 : index
    %c0_300 = arith.constant 0 : index
    %405 = vector.load %arg3[%c2_298, %c0_299, %c0_300] : memref<9x16x128xbf16, #tpu.memory_space<vmem>>, vector<1x16x128xbf16>
    %406 = vector.shape_cast %405 : vector<1x16x128xbf16> to vector<16x128xbf16>
    %cst_301 = arith.constant dense<0.000000e+00> : vector<64x128xf32>
    %407 = tpu.matmul %404, %406, %cst_301 {dimension_numbers = #tpu.dot_dimension_numbers<[1], [0], [0], [1], [0, 0, 1, 1], [], []>} : vector<64x16xbf16>, vector<16x128xbf16>, vector<64x128xf32> -> vector<64x128xf32>
    %408 = arith.addf %403, %407 : vector<64x128xf32>
    %c268 = arith.constant 268 : index
    %c0_302 = arith.constant 0 : index
    %409 = vector.load %arg16[%c268, %c0_302] : memref<352x16xbf16, #tpu.memory_space<vmem>>, vector<64x16xbf16>
    %c3_303 = arith.constant 3 : index
    %c0_304 = arith.constant 0 : index
    %c0_305 = arith.constant 0 : index
    %410 = vector.load %arg3[%c3_303, %c0_304, %c0_305] : memref<9x16x128xbf16, #tpu.memory_space<vmem>>, vector<1x16x128xbf16>
    %411 = vector.shape_cast %410 : vector<1x16x128xbf16> to vector<16x128xbf16>
    %cst_306 = arith.constant dense<0.000000e+00> : vector<64x128xf32>
    %412 = tpu.matmul %409, %411, %cst_306 {dimension_numbers = #tpu.dot_dimension_numbers<[1], [0], [0], [1], [0, 0, 1, 1], [], []>} : vector<64x16xbf16>, vector<16x128xbf16>, vector<64x128xf32> -> vector<64x128xf32>
    %413 = arith.addf %408, %412 : vector<64x128xf32>
    %c269 = arith.constant 269 : index
    %c0_307 = arith.constant 0 : index
    %414 = vector.load %arg16[%c269, %c0_307] : memref<352x16xbf16, #tpu.memory_space<vmem>>, vector<64x16xbf16>
    %c4_308 = arith.constant 4 : index
    %c0_309 = arith.constant 0 : index
    %c0_310 = arith.constant 0 : index
    %415 = vector.load %arg3[%c4_308, %c0_309, %c0_310] : memref<9x16x128xbf16, #tpu.memory_space<vmem>>, vector<1x16x128xbf16>
    %416 = vector.shape_cast %415 : vector<1x16x128xbf16> to vector<16x128xbf16>
    %cst_311 = arith.constant dense<0.000000e+00> : vector<64x128xf32>
    %417 = tpu.matmul %414, %416, %cst_311 {dimension_numbers = #tpu.dot_dimension_numbers<[1], [0], [0], [1], [0, 0, 1, 1], [], []>} : vector<64x16xbf16>, vector<16x128xbf16>, vector<64x128xf32> -> vector<64x128xf32>
    %418 = arith.addf %413, %417 : vector<64x128xf32>
    %c270 = arith.constant 270 : index
    %c0_312 = arith.constant 0 : index
    %419 = vector.load %arg16[%c270, %c0_312] : memref<352x16xbf16, #tpu.memory_space<vmem>>, vector<64x16xbf16>
    %c5_313 = arith.constant 5 : index
    %c0_314 = arith.constant 0 : index
    %c0_315 = arith.constant 0 : index
    %420 = vector.load %arg3[%c5_313, %c0_314, %c0_315] : memref<9x16x128xbf16, #tpu.memory_space<vmem>>, vector<1x16x128xbf16>
    %421 = vector.shape_cast %420 : vector<1x16x128xbf16> to vector<16x128xbf16>
    %cst_316 = arith.constant dense<0.000000e+00> : vector<64x128xf32>
    %422 = tpu.matmul %419, %421, %cst_316 {dimension_numbers = #tpu.dot_dimension_numbers<[1], [0], [0], [1], [0, 0, 1, 1], [], []>} : vector<64x16xbf16>, vector<16x128xbf16>, vector<64x128xf32> -> vector<64x128xf32>
    %423 = arith.addf %418, %422 : vector<64x128xf32>
    %c280 = arith.constant 280 : index
    %c0_317 = arith.constant 0 : index
    %424 = vector.load %arg16[%c280, %c0_317] : memref<352x16xbf16, #tpu.memory_space<vmem>>, vector<64x16xbf16>
    %c6_318 = arith.constant 6 : index
    %c0_319 = arith.constant 0 : index
    %c0_320 = arith.constant 0 : index
    %425 = vector.load %arg3[%c6_318, %c0_319, %c0_320] : memref<9x16x128xbf16, #tpu.memory_space<vmem>>, vector<1x16x128xbf16>
    %426 = vector.shape_cast %425 : vector<1x16x128xbf16> to vector<16x128xbf16>
    %cst_321 = arith.constant dense<0.000000e+00> : vector<64x128xf32>
    %427 = tpu.matmul %424, %426, %cst_321 {dimension_numbers = #tpu.dot_dimension_numbers<[1], [0], [0], [1], [0, 0, 1, 1], [], []>} : vector<64x16xbf16>, vector<16x128xbf16>, vector<64x128xf32> -> vector<64x128xf32>
    %428 = arith.addf %423, %427 : vector<64x128xf32>
    %c281 = arith.constant 281 : index
    %c0_322 = arith.constant 0 : index
    %429 = vector.load %arg16[%c281, %c0_322] : memref<352x16xbf16, #tpu.memory_space<vmem>>, vector<64x16xbf16>
    %c7_323 = arith.constant 7 : index
    %c0_324 = arith.constant 0 : index
    %c0_325 = arith.constant 0 : index
    %430 = vector.load %arg3[%c7_323, %c0_324, %c0_325] : memref<9x16x128xbf16, #tpu.memory_space<vmem>>, vector<1x16x128xbf16>
    %431 = vector.shape_cast %430 : vector<1x16x128xbf16> to vector<16x128xbf16>
    %cst_326 = arith.constant dense<0.000000e+00> : vector<64x128xf32>
    %432 = tpu.matmul %429, %431, %cst_326 {dimension_numbers = #tpu.dot_dimension_numbers<[1], [0], [0], [1], [0, 0, 1, 1], [], []>} : vector<64x16xbf16>, vector<16x128xbf16>, vector<64x128xf32> -> vector<64x128xf32>
    %433 = arith.addf %428, %432 : vector<64x128xf32>
    %c282 = arith.constant 282 : index
    %c0_327 = arith.constant 0 : index
    %434 = vector.load %arg16[%c282, %c0_327] : memref<352x16xbf16, #tpu.memory_space<vmem>>, vector<64x16xbf16>
    %c8_328 = arith.constant 8 : index
    %c0_329 = arith.constant 0 : index
    %c0_330 = arith.constant 0 : index
    %435 = vector.load %arg3[%c8_328, %c0_329, %c0_330] : memref<9x16x128xbf16, #tpu.memory_space<vmem>>, vector<1x16x128xbf16>
    %436 = vector.shape_cast %435 : vector<1x16x128xbf16> to vector<16x128xbf16>
    %cst_331 = arith.constant dense<0.000000e+00> : vector<64x128xf32>
    %437 = tpu.matmul %434, %436, %cst_331 {dimension_numbers = #tpu.dot_dimension_numbers<[1], [0], [0], [1], [0, 0, 1, 1], [], []>} : vector<64x16xbf16>, vector<16x128xbf16>, vector<64x128xf32> -> vector<64x128xf32>
    %438 = arith.addf %433, %437 : vector<64x128xf32>
    %c256_332 = arith.constant 256 : index
    %c0_333 = arith.constant 0 : index
    %439 = vector.load %arg17[%c256_332, %c0_333] : memref<320x128xf32, #tpu.memory_space<vmem>>, vector<64x128xf32>
    tpu.vector_store %arg17[%c256_332, %c0_333], %438 {strides = array<i32>} : memref<320x128xf32, #tpu.memory_space<vmem>>, vector<64x128xf32>,
    %cst_334 = arith.constant 0.000000e+00 : f32
    %440 = vector.broadcast %cst_334 : f32 to vector<864x128xf32>
    %c256_335 = arith.constant 256 : index
    %c0_336 = arith.constant 0 : index
    %441 = vector.load %arg18[%c256_335, %c0_336] : memref<1120x128xf32, #tpu.memory_space<vmem>>, vector<864x128xf32>
    tpu.vector_store %arg18[%c256_335, %c0_336], %440 {strides = array<i32>} : memref<1120x128xf32, #tpu.memory_space<vmem>>, vector<864x128xf32>,
    %c0_337 = arith.constant 0 : index
    %c0_338 = arith.constant 0 : index
    %442 = vector.load %arg17[%c0_337, %c0_338] : memref<320x128xf32, #tpu.memory_space<vmem>>, vector<256x128xf32>
    %c1_339 = arith.constant 1 : index
    %c0_340 = arith.constant 0 : index
    %443 = vector.load %arg17[%c1_339, %c0_340] : memref<320x128xf32, #tpu.memory_space<vmem>>, vector<256x128xf32>
    %444 = arith.maximumf %442, %443 : vector<256x128xf32>
    %c12_341 = arith.constant 12 : index
    %c0_342 = arith.constant 0 : index
    %445 = vector.load %arg17[%c12_341, %c0_342] : memref<320x128xf32, #tpu.memory_space<vmem>>, vector<256x128xf32>
    %c13_343 = arith.constant 13 : index
    %c0_344 = arith.constant 0 : index
    %446 = vector.load %arg17[%c13_343, %c0_344] : memref<320x128xf32, #tpu.memory_space<vmem>>, vector<256x128xf32>
    %447 = arith.maximumf %445, %446 : vector<256x128xf32>
    %448 = arith.maximumf %444, %447 : vector<256x128xf32>
    %c0_345 = arith.constant 0 : index
    %c0_346 = arith.constant 0 : index
    %449 = vector.load %arg4[%c0_345, %c0_346] : memref<1x128xf32, #tpu.memory_space<vmem>>, vector<1x128xf32>
    %450 = vector.broadcast %449 : vector<1x128xf32> to vector<256x128xf32>
    %451 = arith.addf %448, %450 : vector<256x128xf32>
    %cst_347 = arith.constant 0.000000e+00 : f32
    %452 = vector.broadcast %cst_347 : f32 to vector<256x128xf32>
    %453 = arith.maximumf %451, %452 : vector<256x128xf32>
    %c0_348 = arith.constant 0 : index
    %c0_349 = arith.constant 0 : index
    %454 = vector.load %arg18[%c0_348, %c0_349] : memref<1120x128xf32, #tpu.memory_space<vmem>>, vector<256x128xf32>
    tpu.vector_store %arg18[%c0_348, %c0_349], %453 {strides = array<i32>} : memref<1120x128xf32, #tpu.memory_space<vmem>>, vector<256x128xf32>,
    %c0_i32_350 = arith.constant 0 : i32
    %455 = tpu.memref_slice %arg23[%c0_i32_350] : memref<4x!tpu.dma_semaphore, #tpu.memory_space<semaphore_mem>> -> memref<1x!tpu.dma_semaphore, #tpu.memory_space<semaphore_mem>>
    %456 = tpu.memref_squeeze %455 : memref<1x!tpu.dma_semaphore, #tpu.memory_space<semaphore_mem>> -> memref<!tpu.dma_semaphore, #tpu.memory_space<semaphore_mem>>
    tpu.wait_dma2 semaphore(%456 : memref<!tpu.dma_semaphore, #tpu.memory_space<semaphore_mem>>) src(%arg5 : memref<512x384xbf16, #tpu.memory_space<any>>) dst(%arg19 : memref<512x384xbf16, #tpu.memory_space<vmem>>)
    %c0_351 = arith.constant 0 : index
    %c0_352 = arith.constant 0 : index
    %457 = tpu.strided_load %arg18[%c0_351, %c0_352] {strides = array<i32: 144, 1>} : memref<1120x128xf32, #tpu.memory_space<vmem>>, vector<8x128xf32>
    %458 = vector.extract_strided_slice %457 {offsets = [0, 0], sizes = [8, 20], strides = [1, 1]} : vector<8x128xf32> to vector<8x20xf32>
    %459 = arith.truncf %458 : vector<8x20xf32> to vector<8x20xbf16>
    %c0_353 = arith.constant 0 : index
    %c0_354 = arith.constant 0 : index
    %460 = vector.load %arg19[%c0_353, %c0_354] : memref<512x384xbf16, #tpu.memory_space<vmem>>, vector<20x384xbf16>
    %cst_355 = arith.constant dense<0.000000e+00> : vector<8x384xf32>
    %461 = tpu.matmul %459, %460, %cst_355 {dimension_numbers = #tpu.dot_dimension_numbers<[1], [0], [0], [1], [0, 0, 1, 1], [], []>} : vector<8x20xbf16>, vector<20x384xbf16>, vector<8x384xf32> -> vector<8x384xf32>
    %c2_356 = arith.constant 2 : index
    %c0_357 = arith.constant 0 : index
    %462 = tpu.strided_load %arg18[%c2_356, %c0_357] {strides = array<i32: 144, 1>} : memref<1120x128xf32, #tpu.memory_space<vmem>>, vector<8x128xf32>
    %463 = vector.extract_strided_slice %462 {offsets = [0, 0], sizes = [8, 20], strides = [1, 1]} : vector<8x128xf32> to vector<8x20xf32>
    %464 = arith.truncf %463 : vector<8x20xf32> to vector<8x20xbf16>
    %c20 = arith.constant 20 : index
    %c0_358 = arith.constant 0 : index
    %465 = vector.load %arg19[%c20, %c0_358] : memref<512x384xbf16, #tpu.memory_space<vmem>>, vector<20x384xbf16>
    %cst_359 = arith.constant dense<0.000000e+00> : vector<8x384xf32>
    %466 = tpu.matmul %464, %465, %cst_359 {dimension_numbers = #tpu.dot_dimension_numbers<[1], [0], [0], [1], [0, 0, 1, 1], [], []>} : vector<8x20xbf16>, vector<20x384xbf16>, vector<8x384xf32> -> vector<8x384xf32>
    %467 = arith.addf %461, %466 : vector<8x384xf32>
    %c4_360 = arith.constant 4 : index
    %c0_361 = arith.constant 0 : index
    %468 = tpu.strided_load %arg18[%c4_360, %c0_361] {strides = array<i32: 144, 1>} : memref<1120x128xf32, #tpu.memory_space<vmem>>, vector<8x128xf32>
    %469 = vector.extract_strided_slice %468 {offsets = [0, 0], sizes = [8, 20], strides = [1, 1]} : vector<8x128xf32> to vector<8x20xf32>
    %470 = arith.truncf %469 : vector<8x20xf32> to vector<8x20xbf16>
    %c40 = arith.constant 40 : index
    %c0_362 = arith.constant 0 : index
    %471 = vector.load %arg19[%c40, %c0_362] : memref<512x384xbf16, #tpu.memory_space<vmem>>, vector<20x384xbf16>
    %cst_363 = arith.constant dense<0.000000e+00> : vector<8x384xf32>
    %472 = tpu.matmul %470, %471, %cst_363 {dimension_numbers = #tpu.dot_dimension_numbers<[1], [0], [0], [1], [0, 0, 1, 1], [], []>} : vector<8x20xbf16>, vector<20x384xbf16>, vector<8x384xf32> -> vector<8x384xf32>
    %473 = arith.addf %467, %472 : vector<8x384xf32>
    %c6_364 = arith.constant 6 : index
    %c0_365 = arith.constant 0 : index
    %474 = tpu.strided_load %arg18[%c6_364, %c0_365] {strides = array<i32: 144, 1>} : memref<1120x128xf32, #tpu.memory_space<vmem>>, vector<8x128xf32>
    %475 = vector.extract_strided_slice %474 {offsets = [0, 0], sizes = [8, 20], strides = [1, 1]} : vector<8x128xf32> to vector<8x20xf32>
    %476 = arith.truncf %475 : vector<8x20xf32> to vector<8x20xbf16>
    %c60_366 = arith.constant 60 : index
    %c0_367 = arith.constant 0 : index
    %477 = vector.load %arg19[%c60_366, %c0_367] : memref<512x384xbf16, #tpu.memory_space<vmem>>, vector<20x384xbf16>
    %cst_368 = arith.constant dense<0.000000e+00> : vector<8x384xf32>
    %478 = tpu.matmul %476, %477, %cst_368 {dimension_numbers = #tpu.dot_dimension_numbers<[1], [0], [0], [1], [0, 0, 1, 1], [], []>} : vector<8x20xbf16>, vector<20x384xbf16>, vector<8x384xf32> -> vector<8x384xf32>
    %479 = arith.addf %473, %478 : vector<8x384xf32>
    %c8_369 = arith.constant 8 : index
    %c0_370 = arith.constant 0 : index
    %480 = tpu.strided_load %arg18[%c8_369, %c0_370] {strides = array<i32: 144, 1>} : memref<1120x128xf32, #tpu.memory_space<vmem>>, vector<8x128xf32>
    %481 = vector.extract_strided_slice %480 {offsets = [0, 0], sizes = [8, 20], strides = [1, 1]} : vector<8x128xf32> to vector<8x20xf32>
    %482 = arith.truncf %481 : vector<8x20xf32> to vector<8x20xbf16>
    %c80 = arith.constant 80 : index
    %c0_371 = arith.constant 0 : index
    %483 = vector.load %arg19[%c80, %c0_371] : memref<512x384xbf16, #tpu.memory_space<vmem>>, vector<20x384xbf16>
    %cst_372 = arith.constant dense<0.000000e+00> : vector<8x384xf32>
    %484 = tpu.matmul %482, %483, %cst_372 {dimension_numbers = #tpu.dot_dimension_numbers<[1], [0], [0], [1], [0, 0, 1, 1], [], []>} : vector<8x20xbf16>, vector<20x384xbf16>, vector<8x384xf32> -> vector<8x384xf32>
    %485 = arith.addf %479, %484 : vector<8x384xf32>
    %c24_373 = arith.constant 24 : index
    %c0_374 = arith.constant 0 : index
    %486 = tpu.strided_load %arg18[%c24_373, %c0_374] {strides = array<i32: 144, 1>} : memref<1120x128xf32, #tpu.memory_space<vmem>>, vector<8x128xf32>
    %487 = vector.extract_strided_slice %486 {offsets = [0, 0], sizes = [8, 20], strides = [1, 1]} : vector<8x128xf32> to vector<8x20xf32>
    %488 = arith.truncf %487 : vector<8x20xf32> to vector<8x20xbf16>
    %c100 = arith.constant 100 : index
    %c0_375 = arith.constant 0 : index
    %489 = vector.load %arg19[%c100, %c0_375] : memref<512x384xbf16, #tpu.memory_space<vmem>>, vector<20x384xbf16>
    %cst_376 = arith.constant dense<0.000000e+00> : vector<8x384xf32>
    %490 = tpu.matmul %488, %489, %cst_376 {dimension_numbers = #tpu.dot_dimension_numbers<[1], [0], [0], [1], [0, 0, 1, 1], [], []>} : vector<8x20xbf16>, vector<20x384xbf16>, vector<8x384xf32> -> vector<8x384xf32>
    %491 = arith.addf %485, %490 : vector<8x384xf32>
    %c26_377 = arith.constant 26 : index
    %c0_378 = arith.constant 0 : index
    %492 = tpu.strided_load %arg18[%c26_377, %c0_378] {strides = array<i32: 144, 1>} : memref<1120x128xf32, #tpu.memory_space<vmem>>, vector<8x128xf32>
    %493 = vector.extract_strided_slice %492 {offsets = [0, 0], sizes = [8, 20], strides = [1, 1]} : vector<8x128xf32> to vector<8x20xf32>
    %494 = arith.truncf %493 : vector<8x20xf32> to vector<8x20xbf16>
    %c120_379 = arith.constant 120 : index
    %c0_380 = arith.constant 0 : index
    %495 = vector.load %arg19[%c120_379, %c0_380] : memref<512x384xbf16, #tpu.memory_space<vmem>>, vector<20x384xbf16>
    %cst_381 = arith.constant dense<0.000000e+00> : vector<8x384xf32>
    %496 = tpu.matmul %494, %495, %cst_381 {dimension_numbers = #tpu.dot_dimension_numbers<[1], [0], [0], [1], [0, 0, 1, 1], [], []>} : vector<8x20xbf16>, vector<20x384xbf16>, vector<8x384xf32> -> vector<8x384xf32>
    %497 = arith.addf %491, %496 : vector<8x384xf32>
    %c28 = arith.constant 28 : index
    %c0_382 = arith.constant 0 : index
    %498 = tpu.strided_load %arg18[%c28, %c0_382] {strides = array<i32: 144, 1>} : memref<1120x128xf32, #tpu.memory_space<vmem>>, vector<8x128xf32>
    %499 = vector.extract_strided_slice %498 {offsets = [0, 0], sizes = [8, 20], strides = [1, 1]} : vector<8x128xf32> to vector<8x20xf32>
    %500 = arith.truncf %499 : vector<8x20xf32> to vector<8x20xbf16>
    %c140_383 = arith.constant 140 : index
    %c0_384 = arith.constant 0 : index
    %501 = vector.load %arg19[%c140_383, %c0_384] : memref<512x384xbf16, #tpu.memory_space<vmem>>, vector<20x384xbf16>
    %cst_385 = arith.constant dense<0.000000e+00> : vector<8x384xf32>
    %502 = tpu.matmul %500, %501, %cst_385 {dimension_numbers = #tpu.dot_dimension_numbers<[1], [0], [0], [1], [0, 0, 1, 1], [], []>} : vector<8x20xbf16>, vector<20x384xbf16>, vector<8x384xf32> -> vector<8x384xf32>
    %503 = arith.addf %497, %502 : vector<8x384xf32>
    %c30 = arith.constant 30 : index
    %c0_386 = arith.constant 0 : index
    %504 = tpu.strided_load %arg18[%c30, %c0_386] {strides = array<i32: 144, 1>} : memref<1120x128xf32, #tpu.memory_space<vmem>>, vector<8x128xf32>
    %505 = vector.extract_strided_slice %504 {offsets = [0, 0], sizes = [8, 20], strides = [1, 1]} : vector<8x128xf32> to vector<8x20xf32>
    %506 = arith.truncf %505 : vector<8x20xf32> to vector<8x20xbf16>
    %c160 = arith.constant 160 : index
    %c0_387 = arith.constant 0 : index
    %507 = vector.load %arg19[%c160, %c0_387] : memref<512x384xbf16, #tpu.memory_space<vmem>>, vector<20x384xbf16>
    %cst_388 = arith.constant dense<0.000000e+00> : vector<8x384xf32>
    %508 = tpu.matmul %506, %507, %cst_388 {dimension_numbers = #tpu.dot_dimension_numbers<[1], [0], [0], [1], [0, 0, 1, 1], [], []>} : vector<8x20xbf16>, vector<20x384xbf16>, vector<8x384xf32> -> vector<8x384xf32>
    %509 = arith.addf %503, %508 : vector<8x384xf32>
    %c32 = arith.constant 32 : index
    %c0_389 = arith.constant 0 : index
    %510 = tpu.strided_load %arg18[%c32, %c0_389] {strides = array<i32: 144, 1>} : memref<1120x128xf32, #tpu.memory_space<vmem>>, vector<8x128xf32>
    %511 = vector.extract_strided_slice %510 {offsets = [0, 0], sizes = [8, 20], strides = [1, 1]} : vector<8x128xf32> to vector<8x20xf32>
    %512 = arith.truncf %511 : vector<8x20xf32> to vector<8x20xbf16>
    %c180_390 = arith.constant 180 : index
    %c0_391 = arith.constant 0 : index
    %513 = vector.load %arg19[%c180_390, %c0_391] : memref<512x384xbf16, #tpu.memory_space<vmem>>, vector<20x384xbf16>
    %cst_392 = arith.constant dense<0.000000e+00> : vector<8x384xf32>
    %514 = tpu.matmul %512, %513, %cst_392 {dimension_numbers = #tpu.dot_dimension_numbers<[1], [0], [0], [1], [0, 0, 1, 1], [], []>} : vector<8x20xbf16>, vector<20x384xbf16>, vector<8x384xf32> -> vector<8x384xf32>
    %515 = arith.addf %509, %514 : vector<8x384xf32>
    %c48_393 = arith.constant 48 : index
    %c0_394 = arith.constant 0 : index
    %516 = tpu.strided_load %arg18[%c48_393, %c0_394] {strides = array<i32: 144, 1>} : memref<1120x128xf32, #tpu.memory_space<vmem>>, vector<8x128xf32>
    %517 = vector.extract_strided_slice %516 {offsets = [0, 0], sizes = [8, 20], strides = [1, 1]} : vector<8x128xf32> to vector<8x20xf32>
    %518 = arith.truncf %517 : vector<8x20xf32> to vector<8x20xbf16>
    %c200 = arith.constant 200 : index
    %c0_395 = arith.constant 0 : index
    %519 = vector.load %arg19[%c200, %c0_395] : memref<512x384xbf16, #tpu.memory_space<vmem>>, vector<20x384xbf16>
    %cst_396 = arith.constant dense<0.000000e+00> : vector<8x384xf32>
    %520 = tpu.matmul %518, %519, %cst_396 {dimension_numbers = #tpu.dot_dimension_numbers<[1], [0], [0], [1], [0, 0, 1, 1], [], []>} : vector<8x20xbf16>, vector<20x384xbf16>, vector<8x384xf32> -> vector<8x384xf32>
    %521 = arith.addf %515, %520 : vector<8x384xf32>
    %c50 = arith.constant 50 : index
    %c0_397 = arith.constant 0 : index
    %522 = tpu.strided_load %arg18[%c50, %c0_397] {strides = array<i32: 144, 1>} : memref<1120x128xf32, #tpu.memory_space<vmem>>, vector<8x128xf32>
    %523 = vector.extract_strided_slice %522 {offsets = [0, 0], sizes = [8, 20], strides = [1, 1]} : vector<8x128xf32> to vector<8x20xf32>
    %524 = arith.truncf %523 : vector<8x20xf32> to vector<8x20xbf16>
    %c220 = arith.constant 220 : index
    %c0_398 = arith.constant 0 : index
    %525 = vector.load %arg19[%c220, %c0_398] : memref<512x384xbf16, #tpu.memory_space<vmem>>, vector<20x384xbf16>
    %cst_399 = arith.constant dense<0.000000e+00> : vector<8x384xf32>
    %526 = tpu.matmul %524, %525, %cst_399 {dimension_numbers = #tpu.dot_dimension_numbers<[1], [0], [0], [1], [0, 0, 1, 1], [], []>} : vector<8x20xbf16>, vector<20x384xbf16>, vector<8x384xf32> -> vector<8x384xf32>
    %527 = arith.addf %521, %526 : vector<8x384xf32>
    %c52 = arith.constant 52 : index
    %c0_400 = arith.constant 0 : index
    %528 = tpu.strided_load %arg18[%c52, %c0_400] {strides = array<i32: 144, 1>} : memref<1120x128xf32, #tpu.memory_space<vmem>>, vector<8x128xf32>
    %529 = vector.extract_strided_slice %528 {offsets = [0, 0], sizes = [8, 20], strides = [1, 1]} : vector<8x128xf32> to vector<8x20xf32>
    %530 = arith.truncf %529 : vector<8x20xf32> to vector<8x20xbf16>
    %c240_401 = arith.constant 240 : index
    %c0_402 = arith.constant 0 : index
    %531 = vector.load %arg19[%c240_401, %c0_402] : memref<512x384xbf16, #tpu.memory_space<vmem>>, vector<20x384xbf16>
    %cst_403 = arith.constant dense<0.000000e+00> : vector<8x384xf32>
    %532 = tpu.matmul %530, %531, %cst_403 {dimension_numbers = #tpu.dot_dimension_numbers<[1], [0], [0], [1], [0, 0, 1, 1], [], []>} : vector<8x20xbf16>, vector<20x384xbf16>, vector<8x384xf32> -> vector<8x384xf32>
    %533 = arith.addf %527, %532 : vector<8x384xf32>
    %c54 = arith.constant 54 : index
    %c0_404 = arith.constant 0 : index
    %534 = tpu.strided_load %arg18[%c54, %c0_404] {strides = array<i32: 144, 1>} : memref<1120x128xf32, #tpu.memory_space<vmem>>, vector<8x128xf32>
    %535 = vector.extract_strided_slice %534 {offsets = [0, 0], sizes = [8, 20], strides = [1, 1]} : vector<8x128xf32> to vector<8x20xf32>
    %536 = arith.truncf %535 : vector<8x20xf32> to vector<8x20xbf16>
    %c260 = arith.constant 260 : index
    %c0_405 = arith.constant 0 : index
    %537 = vector.load %arg19[%c260, %c0_405] : memref<512x384xbf16, #tpu.memory_space<vmem>>, vector<20x384xbf16>
    %cst_406 = arith.constant dense<0.000000e+00> : vector<8x384xf32>
    %538 = tpu.matmul %536, %537, %cst_406 {dimension_numbers = #tpu.dot_dimension_numbers<[1], [0], [0], [1], [0, 0, 1, 1], [], []>} : vector<8x20xbf16>, vector<20x384xbf16>, vector<8x384xf32> -> vector<8x384xf32>
    %539 = arith.addf %533, %538 : vector<8x384xf32>
    %c56 = arith.constant 56 : index
    %c0_407 = arith.constant 0 : index
    %540 = tpu.strided_load %arg18[%c56, %c0_407] {strides = array<i32: 144, 1>} : memref<1120x128xf32, #tpu.memory_space<vmem>>, vector<8x128xf32>
    %541 = vector.extract_strided_slice %540 {offsets = [0, 0], sizes = [8, 20], strides = [1, 1]} : vector<8x128xf32> to vector<8x20xf32>
    %542 = arith.truncf %541 : vector<8x20xf32> to vector<8x20xbf16>
    %c280_408 = arith.constant 280 : index
    %c0_409 = arith.constant 0 : index
    %543 = vector.load %arg19[%c280_408, %c0_409] : memref<512x384xbf16, #tpu.memory_space<vmem>>, vector<20x384xbf16>
    %cst_410 = arith.constant dense<0.000000e+00> : vector<8x384xf32>
    %544 = tpu.matmul %542, %543, %cst_410 {dimension_numbers = #tpu.dot_dimension_numbers<[1], [0], [0], [1], [0, 0, 1, 1], [], []>} : vector<8x20xbf16>, vector<20x384xbf16>, vector<8x384xf32> -> vector<8x384xf32>
    %545 = arith.addf %539, %544 : vector<8x384xf32>
    %c72_411 = arith.constant 72 : index
    %c0_412 = arith.constant 0 : index
    %546 = tpu.strided_load %arg18[%c72_411, %c0_412] {strides = array<i32: 144, 1>} : memref<1120x128xf32, #tpu.memory_space<vmem>>, vector<8x128xf32>
    %547 = vector.extract_strided_slice %546 {offsets = [0, 0], sizes = [8, 20], strides = [1, 1]} : vector<8x128xf32> to vector<8x20xf32>
    %548 = arith.truncf %547 : vector<8x20xf32> to vector<8x20xbf16>
    %c300 = arith.constant 300 : index
    %c0_413 = arith.constant 0 : index
    %549 = vector.load %arg19[%c300, %c0_413] : memref<512x384xbf16, #tpu.memory_space<vmem>>, vector<20x384xbf16>
    %cst_414 = arith.constant dense<0.000000e+00> : vector<8x384xf32>
    %550 = tpu.matmul %548, %549, %cst_414 {dimension_numbers = #tpu.dot_dimension_numbers<[1], [0], [0], [1], [0, 0, 1, 1], [], []>} : vector<8x20xbf16>, vector<20x384xbf16>, vector<8x384xf32> -> vector<8x384xf32>
    %551 = arith.addf %545, %550 : vector<8x384xf32>
    %c74 = arith.constant 74 : index
    %c0_415 = arith.constant 0 : index
    %552 = tpu.strided_load %arg18[%c74, %c0_415] {strides = array<i32: 144, 1>} : memref<1120x128xf32, #tpu.memory_space<vmem>>, vector<8x128xf32>
    %553 = vector.extract_strided_slice %552 {offsets = [0, 0], sizes = [8, 20], strides = [1, 1]} : vector<8x128xf32> to vector<8x20xf32>
    %554 = arith.truncf %553 : vector<8x20xf32> to vector<8x20xbf16>
    %c320 = arith.constant 320 : index
    %c0_416 = arith.constant 0 : index
    %555 = vector.load %arg19[%c320, %c0_416] : memref<512x384xbf16, #tpu.memory_space<vmem>>, vector<20x384xbf16>
    %cst_417 = arith.constant dense<0.000000e+00> : vector<8x384xf32>
    %556 = tpu.matmul %554, %555, %cst_417 {dimension_numbers = #tpu.dot_dimension_numbers<[1], [0], [0], [1], [0, 0, 1, 1], [], []>} : vector<8x20xbf16>, vector<20x384xbf16>, vector<8x384xf32> -> vector<8x384xf32>
    %557 = arith.addf %551, %556 : vector<8x384xf32>
    %c76_418 = arith.constant 76 : index
    %c0_419 = arith.constant 0 : index
    %558 = tpu.strided_load %arg18[%c76_418, %c0_419] {strides = array<i32: 144, 1>} : memref<1120x128xf32, #tpu.memory_space<vmem>>, vector<8x128xf32>
    %559 = vector.extract_strided_slice %558 {offsets = [0, 0], sizes = [8, 20], strides = [1, 1]} : vector<8x128xf32> to vector<8x20xf32>
    %560 = arith.truncf %559 : vector<8x20xf32> to vector<8x20xbf16>
    %c340 = arith.constant 340 : index
    %c0_420 = arith.constant 0 : index
    %561 = vector.load %arg19[%c340, %c0_420] : memref<512x384xbf16, #tpu.memory_space<vmem>>, vector<20x384xbf16>
    %cst_421 = arith.constant dense<0.000000e+00> : vector<8x384xf32>
    %562 = tpu.matmul %560, %561, %cst_421 {dimension_numbers = #tpu.dot_dimension_numbers<[1], [0], [0], [1], [0, 0, 1, 1], [], []>} : vector<8x20xbf16>, vector<20x384xbf16>, vector<8x384xf32> -> vector<8x384xf32>
    %563 = arith.addf %557, %562 : vector<8x384xf32>
    %c78_422 = arith.constant 78 : index
    %c0_423 = arith.constant 0 : index
    %564 = tpu.strided_load %arg18[%c78_422, %c0_423] {strides = array<i32: 144, 1>} : memref<1120x128xf32, #tpu.memory_space<vmem>>, vector<8x128xf32>
    %565 = vector.extract_strided_slice %564 {offsets = [0, 0], sizes = [8, 20], strides = [1, 1]} : vector<8x128xf32> to vector<8x20xf32>
    %566 = arith.truncf %565 : vector<8x20xf32> to vector<8x20xbf16>
    %c360 = arith.constant 360 : index
    %c0_424 = arith.constant 0 : index
    %567 = vector.load %arg19[%c360, %c0_424] : memref<512x384xbf16, #tpu.memory_space<vmem>>, vector<20x384xbf16>
    %cst_425 = arith.constant dense<0.000000e+00> : vector<8x384xf32>
    %568 = tpu.matmul %566, %567, %cst_425 {dimension_numbers = #tpu.dot_dimension_numbers<[1], [0], [0], [1], [0, 0, 1, 1], [], []>} : vector<8x20xbf16>, vector<20x384xbf16>, vector<8x384xf32> -> vector<8x384xf32>
    %569 = arith.addf %563, %568 : vector<8x384xf32>
    %c80_426 = arith.constant 80 : index
    %c0_427 = arith.constant 0 : index
    %570 = tpu.strided_load %arg18[%c80_426, %c0_427] {strides = array<i32: 144, 1>} : memref<1120x128xf32, #tpu.memory_space<vmem>>, vector<8x128xf32>
    %571 = vector.extract_strided_slice %570 {offsets = [0, 0], sizes = [8, 20], strides = [1, 1]} : vector<8x128xf32> to vector<8x20xf32>
    %572 = arith.truncf %571 : vector<8x20xf32> to vector<8x20xbf16>
    %c380 = arith.constant 380 : index
    %c0_428 = arith.constant 0 : index
    %573 = vector.load %arg19[%c380, %c0_428] : memref<512x384xbf16, #tpu.memory_space<vmem>>, vector<20x384xbf16>
    %cst_429 = arith.constant dense<0.000000e+00> : vector<8x384xf32>
    %574 = tpu.matmul %572, %573, %cst_429 {dimension_numbers = #tpu.dot_dimension_numbers<[1], [0], [0], [1], [0, 0, 1, 1], [], []>} : vector<8x20xbf16>, vector<20x384xbf16>, vector<8x384xf32> -> vector<8x384xf32>
    %575 = arith.addf %569, %574 : vector<8x384xf32>
    %c96_430 = arith.constant 96 : index
    %c0_431 = arith.constant 0 : index
    %576 = tpu.strided_load %arg18[%c96_430, %c0_431] {strides = array<i32: 144, 1>} : memref<1120x128xf32, #tpu.memory_space<vmem>>, vector<8x128xf32>
    %577 = vector.extract_strided_slice %576 {offsets = [0, 0], sizes = [8, 20], strides = [1, 1]} : vector<8x128xf32> to vector<8x20xf32>
    %578 = arith.truncf %577 : vector<8x20xf32> to vector<8x20xbf16>
    %c400 = arith.constant 400 : index
    %c0_432 = arith.constant 0 : index
    %579 = vector.load %arg19[%c400, %c0_432] : memref<512x384xbf16, #tpu.memory_space<vmem>>, vector<20x384xbf16>
    %cst_433 = arith.constant dense<0.000000e+00> : vector<8x384xf32>
    %580 = tpu.matmul %578, %579, %cst_433 {dimension_numbers = #tpu.dot_dimension_numbers<[1], [0], [0], [1], [0, 0, 1, 1], [], []>} : vector<8x20xbf16>, vector<20x384xbf16>, vector<8x384xf32> -> vector<8x384xf32>
    %581 = arith.addf %575, %580 : vector<8x384xf32>
    %c98 = arith.constant 98 : index
    %c0_434 = arith.constant 0 : index
    %582 = tpu.strided_load %arg18[%c98, %c0_434] {strides = array<i32: 144, 1>} : memref<1120x128xf32, #tpu.memory_space<vmem>>, vector<8x128xf32>
    %583 = vector.extract_strided_slice %582 {offsets = [0, 0], sizes = [8, 20], strides = [1, 1]} : vector<8x128xf32> to vector<8x20xf32>
    %584 = arith.truncf %583 : vector<8x20xf32> to vector<8x20xbf16>
    %c420 = arith.constant 420 : index
    %c0_435 = arith.constant 0 : index
    %585 = vector.load %arg19[%c420, %c0_435] : memref<512x384xbf16, #tpu.memory_space<vmem>>, vector<20x384xbf16>
    %cst_436 = arith.constant dense<0.000000e+00> : vector<8x384xf32>
    %586 = tpu.matmul %584, %585, %cst_436 {dimension_numbers = #tpu.dot_dimension_numbers<[1], [0], [0], [1], [0, 0, 1, 1], [], []>} : vector<8x20xbf16>, vector<20x384xbf16>, vector<8x384xf32> -> vector<8x384xf32>
    %587 = arith.addf %581, %586 : vector<8x384xf32>
    %c100_437 = arith.constant 100 : index
    %c0_438 = arith.constant 0 : index
    %588 = tpu.strided_load %arg18[%c100_437, %c0_438] {strides = array<i32: 144, 1>} : memref<1120x128xf32, #tpu.memory_space<vmem>>, vector<8x128xf32>
    %589 = vector.extract_strided_slice %588 {offsets = [0, 0], sizes = [8, 20], strides = [1, 1]} : vector<8x128xf32> to vector<8x20xf32>
    %590 = arith.truncf %589 : vector<8x20xf32> to vector<8x20xbf16>
    %c440 = arith.constant 440 : index
    %c0_439 = arith.constant 0 : index
    %591 = vector.load %arg19[%c440, %c0_439] : memref<512x384xbf16, #tpu.memory_space<vmem>>, vector<20x384xbf16>
    %cst_440 = arith.constant dense<0.000000e+00> : vector<8x384xf32>
    %592 = tpu.matmul %590, %591, %cst_440 {dimension_numbers = #tpu.dot_dimension_numbers<[1], [0], [0], [1], [0, 0, 1, 1], [], []>} : vector<8x20xbf16>, vector<20x384xbf16>, vector<8x384xf32> -> vector<8x384xf32>
    %593 = arith.addf %587, %592 : vector<8x384xf32>
    %c102 = arith.constant 102 : index
    %c0_441 = arith.constant 0 : index
    %594 = tpu.strided_load %arg18[%c102, %c0_441] {strides = array<i32: 144, 1>} : memref<1120x128xf32, #tpu.memory_space<vmem>>, vector<8x128xf32>
    %595 = vector.extract_strided_slice %594 {offsets = [0, 0], sizes = [8, 20], strides = [1, 1]} : vector<8x128xf32> to vector<8x20xf32>
    %596 = arith.truncf %595 : vector<8x20xf32> to vector<8x20xbf16>
    %c460 = arith.constant 460 : index
    %c0_442 = arith.constant 0 : index
    %597 = vector.load %arg19[%c460, %c0_442] : memref<512x384xbf16, #tpu.memory_space<vmem>>, vector<20x384xbf16>
    %cst_443 = arith.constant dense<0.000000e+00> : vector<8x384xf32>
    %598 = tpu.matmul %596, %597, %cst_443 {dimension_numbers = #tpu.dot_dimension_numbers<[1], [0], [0], [1], [0, 0, 1, 1], [], []>} : vector<8x20xbf16>, vector<20x384xbf16>, vector<8x384xf32> -> vector<8x384xf32>
    %599 = arith.addf %593, %598 : vector<8x384xf32>
    %c104 = arith.constant 104 : index
    %c0_444 = arith.constant 0 : index
    %600 = tpu.strided_load %arg18[%c104, %c0_444] {strides = array<i32: 144, 1>} : memref<1120x128xf32, #tpu.memory_space<vmem>>, vector<8x128xf32>
    %601 = vector.extract_strided_slice %600 {offsets = [0, 0], sizes = [8, 20], strides = [1, 1]} : vector<8x128xf32> to vector<8x20xf32>
    %602 = arith.truncf %601 : vector<8x20xf32> to vector<8x20xbf16>
    %c480_445 = arith.constant 480 : index
    %c0_446 = arith.constant 0 : index
    %603 = vector.load %arg19[%c480_445, %c0_446] : memref<512x384xbf16, #tpu.memory_space<vmem>>, vector<20x384xbf16>
    %cst_447 = arith.constant dense<0.000000e+00> : vector<8x384xf32>
    %604 = tpu.matmul %602, %603, %cst_447 {dimension_numbers = #tpu.dot_dimension_numbers<[1], [0], [0], [1], [0, 0, 1, 1], [], []>} : vector<8x20xbf16>, vector<20x384xbf16>, vector<8x384xf32> -> vector<8x384xf32>
    %605 = arith.addf %599, %604 : vector<8x384xf32>
    %c0_448 = arith.constant 0 : index
    %c0_449 = arith.constant 0 : index
    %606 = vector.load %arg6[%c0_448, %c0_449] : memref<1x384xf32, #tpu.memory_space<vmem>>, vector<1x384xf32>
    %607 = vector.broadcast %606 : vector<1x384xf32> to vector<8x384xf32>
    %608 = arith.addf %605, %607 : vector<8x384xf32>
    %cst_450 = arith.constant 0.000000e+00 : f32
    %609 = vector.broadcast %cst_450 : f32 to vector<8x384xf32>
    %610 = arith.maximumf %608, %609 : vector<8x384xf32>
    %611 = arith.truncf %610 : vector<8x384xf32> to vector<8x384xbf16>
    %c1_i32_451 = arith.constant 1 : i32
    %612 = tpu.memref_slice %arg23[%c1_i32_451] : memref<4x!tpu.dma_semaphore, #tpu.memory_space<semaphore_mem>> -> memref<1x!tpu.dma_semaphore, #tpu.memory_space<semaphore_mem>>
    %613 = tpu.memref_squeeze %612 : memref<1x!tpu.dma_semaphore, #tpu.memory_space<semaphore_mem>> -> memref<!tpu.dma_semaphore, #tpu.memory_space<semaphore_mem>>
    tpu.wait_dma2 semaphore(%613 : memref<!tpu.dma_semaphore, #tpu.memory_space<semaphore_mem>>) src(%arg7 : memref<384x256xbf16, #tpu.memory_space<any>>) dst(%arg20 : memref<384x256xbf16, #tpu.memory_space<vmem>>)
    %c0_452 = arith.constant 0 : index
    %c0_453 = arith.constant 0 : index
    %614 = vector.load %arg20[%c0_452, %c0_453] : memref<384x256xbf16, #tpu.memory_space<vmem>>, vector<384x256xbf16>
    %cst_454 = arith.constant dense<0.000000e+00> : vector<8x256xf32>
    %615 = tpu.matmul %611, %614, %cst_454 {dimension_numbers = #tpu.dot_dimension_numbers<[1], [0], [0], [1], [0, 0, 1, 1], [], []>} : vector<8x384xbf16>, vector<384x256xbf16>, vector<8x256xf32> -> vector<8x256xf32>
    %c0_455 = arith.constant 0 : index
    %c0_456 = arith.constant 0 : index
    %616 = vector.load %arg8[%c0_455, %c0_456] : memref<1x256xf32, #tpu.memory_space<vmem>>, vector<1x256xf32>
    %617 = vector.broadcast %616 : vector<1x256xf32> to vector<8x256xf32>
    %618 = arith.addf %615, %617 : vector<8x256xf32>
    %cst_457 = arith.constant 0.000000e+00 : f32
    %619 = vector.broadcast %cst_457 : f32 to vector<8x256xf32>
    %620 = arith.maximumf %618, %619 : vector<8x256xf32>
    %621 = arith.truncf %620 : vector<8x256xf32> to vector<8x256xbf16>
    %c2_i32_458 = arith.constant 2 : i32
    %622 = tpu.memref_slice %arg23[%c2_i32_458] : memref<4x!tpu.dma_semaphore, #tpu.memory_space<semaphore_mem>> -> memref<1x!tpu.dma_semaphore, #tpu.memory_space<semaphore_mem>>
    %623 = tpu.memref_squeeze %622 : memref<1x!tpu.dma_semaphore, #tpu.memory_space<semaphore_mem>> -> memref<!tpu.dma_semaphore, #tpu.memory_space<semaphore_mem>>
    tpu.wait_dma2 semaphore(%623 : memref<!tpu.dma_semaphore, #tpu.memory_space<semaphore_mem>>) src(%arg9 : memref<256x128xbf16, #tpu.memory_space<any>>) dst(%arg21 : memref<256x128xbf16, #tpu.memory_space<vmem>>)
    %c0_459 = arith.constant 0 : index
    %c0_460 = arith.constant 0 : index
    %624 = vector.load %arg21[%c0_459, %c0_460] : memref<256x128xbf16, #tpu.memory_space<vmem>>, vector<256x128xbf16>
    %cst_461 = arith.constant dense<0.000000e+00> : vector<8x128xf32>
    %625 = tpu.matmul %621, %624, %cst_461 {dimension_numbers = #tpu.dot_dimension_numbers<[1], [0], [0], [1], [0, 0, 1, 1], [], []>} : vector<8x256xbf16>, vector<256x128xbf16>, vector<8x128xf32> -> vector<8x128xf32>
    %c0_462 = arith.constant 0 : index
    %c0_463 = arith.constant 0 : index
    %626 = vector.load %arg10[%c0_462, %c0_463] : memref<1x128xf32, #tpu.memory_space<vmem>>, vector<1x128xf32>
    %627 = vector.broadcast %626 : vector<1x128xf32> to vector<8x128xf32>
    %628 = arith.addf %625, %627 : vector<8x128xf32>
    %cst_464 = arith.constant 0.000000e+00 : f32
    %629 = vector.broadcast %cst_464 : f32 to vector<8x128xf32>
    %630 = arith.maximumf %628, %629 : vector<8x128xf32>
    %631 = arith.truncf %630 : vector<8x128xf32> to vector<8x128xbf16>
    %c3_i32_465 = arith.constant 3 : i32
    %632 = tpu.memref_slice %arg23[%c3_i32_465] : memref<4x!tpu.dma_semaphore, #tpu.memory_space<semaphore_mem>> -> memref<1x!tpu.dma_semaphore, #tpu.memory_space<semaphore_mem>>
    %633 = tpu.memref_squeeze %632 : memref<1x!tpu.dma_semaphore, #tpu.memory_space<semaphore_mem>> -> memref<!tpu.dma_semaphore, #tpu.memory_space<semaphore_mem>>
    tpu.wait_dma2 semaphore(%633 : memref<!tpu.dma_semaphore, #tpu.memory_space<semaphore_mem>>) src(%arg11 : memref<128x128xbf16, #tpu.memory_space<any>>) dst(%arg22 : memref<128x128xbf16, #tpu.memory_space<vmem>>)
    %c0_466 = arith.constant 0 : index
    %c0_467 = arith.constant 0 : index
    %634 = vector.load %arg22[%c0_466, %c0_467] : memref<128x128xbf16, #tpu.memory_space<vmem>>, vector<128x128xbf16>
    %cst_468 = arith.constant dense<0.000000e+00> : vector<8x128xf32>
    %635 = tpu.matmul %631, %634, %cst_468 {dimension_numbers = #tpu.dot_dimension_numbers<[1], [0], [0], [1], [0, 0, 1, 1], [], []>} : vector<8x128xbf16>, vector<128x128xbf16>, vector<8x128xf32> -> vector<8x128xf32>
    %c0_469 = arith.constant 0 : index
    %c0_470 = arith.constant 0 : index
    %636 = vector.load %arg12[%c0_469, %c0_470] : memref<1x128xf32, #tpu.memory_space<vmem>>, vector<1x128xf32>
    %637 = vector.broadcast %636 : vector<1x128xf32> to vector<8x128xf32>
    %638 = arith.addf %635, %637 : vector<8x128xf32>
    %c0_471 = arith.constant 0 : index
    %c0_472 = arith.constant 0 : index
    %639 = vector.load %arg13[%c0_471, %c0_472] : memref<8x128xf32, #tpu.memory_space<vmem>>, vector<8x128xf32>
    tpu.vector_store %arg13[%c0_471, %c0_472], %638 {strides = array<i32>} : memref<8x128xf32, #tpu.memory_space<vmem>>, vector<8x128xf32>,
    return
  }
}

</mosaic_0001>

<bundles_post_ra>
// kernel: multinet_forward.1
= control target key start
LH: loop header
LB: loop body
LE: loop exit
PB: predicated region body
PF: predicated region fallthrough
CT: control target
= control target key end

     0   :  { %s15709_s0 = inlined_call_operand.vmem [shape: bf16[1160,128], index: 0, kind: input, shape index: {}]   ;;  %s15710_s1 = inlined_call_operand.vmem [shape: bf16[128,128], index: 1, kind: input, shape index: {}]   ;;  %s15711_s2 = inlined_call_operand.vmem [shape: f32[1,16], index: 2, kind: input, shape index: {}]   ;;  %s15712_s3 = inlined_call_operand.vmem [shape: bf16[9,16,128], index: 3, kind: input, shape index: {}]   ;;  %s15713_s4 = inlined_call_operand.vmem [shape: f32[1,128], index: 4, kind: input, shape index: {}]   ;;  %s15714_s5 = inlined_call_operand.vmem [shape: bf16[512,384], index: 5, kind: input, shape index: {}]   ;;  %s15715_s6 = inlined_call_operand.vmem [shape: f32[1,384], index: 6, kind: input, shape index: {}]   ;;  %s15716_s7 = inlined_call_operand.vmem [shape: bf16[384,256], index: 7, kind: input, shape index: {}]   ;;  %s15717_s8 = inlined_call_operand.vmem [shape: f32[1,256], index: 8, kind: input, shape index: {}]   ;;  %s15718_s9 = inlined_call_operand.vmem [shape: bf16[256,128], index: 9, kind: input, shape index: {}]   ;;  %s15719_s10 = inlined_call_operand.vmem [shape: f32[1,128], index: 10, kind: input, shape index: {}]   ;;  %s15720_s11 = inlined_call_operand.vmem [shape: bf16[128,128], index: 11, kind: input, shape index: {}]   ;;  %s15721_s12 = inlined_call_operand.vmem [shape: f32[1,128], index: 12, kind: input, shape index: {}]   ;;  %s15722_s13 = inlined_call_operand.vmem [shape: f32[8,128], index: 13, kind: output, shape index: {}]  }
   0x1   :  { %v47_v0 = vld [vmem:[%s15714_s5] sm:$0xff]  ;;  %v49_v1 = vld [vmem:[%s15714_s5 + $0x8] sm:$0xff]  ;;  %v51_v2 = vld [vmem:[%s15714_s5 + $0x10] sm:$0xff] }
   0x2   :  { %48 = vst [vmem:[#allocation7] sm:$0xff] %v47_v0  ;;  %v53_v3 = vld [vmem:[%s15714_s5 + $0x18] sm:$0xff]  ;;  %v55_v4 = vld [vmem:[%s15714_s5 + $0x20] sm:$0xff]  ;;  %v57_v5 = vld [vmem:[%s15714_s5 + $0x28] sm:$0xff] }
   0x3   :  { %50 = vst [vmem:[#allocation7 + $0x8] sm:$0xff] %v49_v1  ;;  %v59_v6 = vld [vmem:[%s15714_s5 + $0x30] sm:$0xff]  ;;  %v61_v7 = vld [vmem:[%s15714_s5 + $0x38] sm:$0xff]  ;;  %v63_v8 = vld [vmem:[%s15714_s5 + $0x40] sm:$0xff] }
   0x4   :  { %52 = vst [vmem:[#allocation7 + $0x10] sm:$0xff] %v51_v2  ;;  %v65_v9 = vld [vmem:[%s15714_s5 + $0x48] sm:$0xff]  ;;  %v67_v10 = vld [vmem:[%s15714_s5 + $0x50] sm:$0xff]  ;;  %v69_v11 = vld [vmem:[%s15714_s5 + $0x58] sm:$0xff] }
   0x5   :  { %54 = vst [vmem:[#allocation7 + $0x18] sm:$0xff] %v53_v3  ;;  %v71_v12 = vld [vmem:[%s15714_s5 + $0x60] sm:$0xff]  ;;  %v73_v13 = vld [vmem:[%s15714_s5 + $0x68] sm:$0xff]  ;;  %v75_v14 = vld [vmem:[%s15714_s5 + $0x70] sm:$0xff] }
   0x6   :  { %56 = vst [vmem:[#allocation7 + $0x20] sm:$0xff] %v55_v4  ;;  %v77_v15 = vld [vmem:[%s15714_s5 + $0x78] sm:$0xff]  ;;  %v79_v16 = vld [vmem:[%s15714_s5 + $0x80] sm:$0xff]  ;;  %v81_v17 = vld [vmem:[%s15714_s5 + $0x88] sm:$0xff] }
   0x7   :  { %58 = vst [vmem:[#allocation7 + $0x28] sm:$0xff] %v57_v5  ;;  %v83_v18 = vld [vmem:[%s15714_s5 + $0x90] sm:$0xff]  ;;  %v85_v19 = vld [vmem:[%s15714_s5 + $0x98] sm:$0xff]  ;;  %v87_v20 = vld [vmem:[%s15714_s5 + $0xa0] sm:$0xff] }
   0x8   :  { %60 = vst [vmem:[#allocation7 + $0x30] sm:$0xff] %v59_v6  ;;  %v89_v21 = vld [vmem:[%s15714_s5 + $0xa8] sm:$0xff]  ;;  %v91_v22 = vld [vmem:[%s15714_s5 + $0xb0] sm:$0xff]  ;;  %v93_v23 = vld [vmem:[%s15714_s5 + $0xb8] sm:$0xff] }
   0x9   :  { %62 = vst [vmem:[#allocation7 + $0x38] sm:$0xff] %v61_v7  ;;  %v95_v24 = vld [vmem:[%s15714_s5 + $0xc0] sm:$0xff]  ;;  %v97_v25 = vld [vmem:[%s15714_s5 + $0xc8] sm:$0xff]  ;;  %v99_v26 = vld [vmem:[%s15714_s5 + $0xd0] sm:$0xff] }
   0xa   :  { %64 = vst [vmem:[#allocation7 + $0x40] sm:$0xff] %v63_v8  ;;  %v101_v27 = vld [vmem:[%s15714_s5 + $0xd8] sm:$0xff]  ;;  %v103_v28 = vld [vmem:[%s15714_s5 + $0xe0] sm:$0xff]  ;;  %v105_v29 = vld [vmem:[%s15714_s5 + $0xe8] sm:$0xff] }
   0xb   :  { %66 = vst [vmem:[#allocation7 + $0x48] sm:$0xff] %v65_v9  ;;  %v107_v30 = vld [vmem:[%s15714_s5 + $0xf0] sm:$0xff]  ;;  %v109_v31 = vld [vmem:[%s15714_s5 + $0xf8] sm:$0xff]  ;;  %v111_v32 = vld [vmem:[%s15714_s5 + $0x100] sm:$0xff] }
   0xc   :  { %68 = vst [vmem:[#allocation7 + $0x50] sm:$0xff] %v67_v10  ;;  %v113_v33 = vld [vmem:[%s15714_s5 + $0x108] sm:$0xff]  ;;  %v115_v34 = vld [vmem:[%s15714_s5 + $0x110] sm:$0xff]  ;;  %v117_v35 = vld [vmem:[%s15714_s5 + $0x118] sm:$0xff] }
   0xd   :  { %70 = vst [vmem:[#allocation7 + $0x58] sm:$0xff] %v69_v11  ;;  %v119_v36 = vld [vmem:[%s15714_s5 + $0x120] sm:$0xff]  ;;  %v121_v37 = vld [vmem:[%s15714_s5 + $0x128] sm:$0xff]  ;;  %v123_v38 = vld [vmem:[%s15714_s5 + $0x130] sm:$0xff] }
   0xe   :  { %72 = vst [vmem:[#allocation7 + $0x60] sm:$0xff] %v71_v12  ;;  %v125_v39 = vld [vmem:[%s15714_s5 + $0x138] sm:$0xff]  ;;  %v127_v40 = vld [vmem:[%s15714_s5 + $0x140] sm:$0xff]  ;;  %v129_v41 = vld [vmem:[%s15714_s5 + $0x148] sm:$0xff] }
   0xf   :  { %74 = vst [vmem:[#allocation7 + $0x68] sm:$0xff] %v73_v13  ;;  %v131_v42 = vld [vmem:[%s15714_s5 + $0x150] sm:$0xff]  ;;  %v133_v43 = vld [vmem:[%s15714_s5 + $0x158] sm:$0xff]  ;;  %v135_v44 = vld [vmem:[%s15714_s5 + $0x160] sm:$0xff] }
  0x10   :  { %76 = vst [vmem:[#allocation7 + $0x70] sm:$0xff] %v75_v14  ;;  %v137_v45 = vld [vmem:[%s15714_s5 + $0x168] sm:$0xff]  ;;  %v139_v46 = vld [vmem:[%s15714_s5 + $0x170] sm:$0xff]  ;;  %v141_v47 = vld [vmem:[%s15714_s5 + $0x178] sm:$0xff] }
  0x11   :  { %78 = vst [vmem:[#allocation7 + $0x78] sm:$0xff] %v77_v15  ;;  %v143_v48 = vld [vmem:[%s15714_s5 + $0x180] sm:$0xff]  ;;  %v145_v49 = vld [vmem:[%s15714_s5 + $0x188] sm:$0xff]  ;;  %v147_v50 = vld [vmem:[%s15714_s5 + $0x190] sm:$0xff] }
  0x12   :  { %80 = vst [vmem:[#allocation7 + $0x80] sm:$0xff] %v79_v16  ;;  %v149_v51 = vld [vmem:[%s15714_s5 + $0x198] sm:$0xff]  ;;  %v151_v52 = vld [vmem:[%s15714_s5 + $0x1a0] sm:$0xff]  ;;  %v153_v53 = vld [vmem:[%s15714_s5 + $0x1a8] sm:$0xff] }
  0x13   :  { %82 = vst [vmem:[#allocation7 + $0x88] sm:$0xff] %v81_v17  ;;  %v155_v54 = vld [vmem:[%s15714_s5 + $0x1b0] sm:$0xff]  ;;  %v157_v55 = vld [vmem:[%s15714_s5 + $0x1b8] sm:$0xff]  ;;  %v159_v56 = vld [vmem:[%s15714_s5 + $0x1c0] sm:$0xff] }
  0x14   :  { %84 = vst [vmem:[#allocation7 + $0x90] sm:$0xff] %v83_v18  ;;  %v161_v57 = vld [vmem:[%s15714_s5 + $0x1c8] sm:$0xff]  ;;  %v163_v58 = vld [vmem:[%s15714_s5 + $0x1d0] sm:$0xff]  ;;  %v165_v59 = vld [vmem:[%s15714_s5 + $0x1d8] sm:$0xff] }
  0x15   :  { %86 = vst [vmem:[#allocation7 + $0x98] sm:$0xff] %v85_v19  ;;  %v167_v60 = vld [vmem:[%s15714_s5 + $0x1e0] sm:$0xff]  ;;  %v169_v61 = vld [vmem:[%s15714_s5 + $0x1e8] sm:$0xff]  ;;  %v171_v62 = vld [vmem:[%s15714_s5 + $0x1f0] sm:$0xff] }
  0x16   :  { %88 = vst [vmem:[#allocation7 + $0xa0] sm:$0xff] %v87_v20  ;;  %v173_v63 = vld [vmem:[%s15714_s5 + $0x1f8] sm:$0xff]  ;;  %v175_v0 = vld [vmem:[%s15714_s5 + $0x200] sm:$0xff]  ;;  %v177_v1 = vld [vmem:[%s15714_s5 + $0x208] sm:$0xff] }
  0x17   :  { %90 = vst [vmem:[#allocation7 + $0xa8] sm:$0xff] %v89_v21  ;;  %v179_v2 = vld [vmem:[%s15714_s5 + $0x210] sm:$0xff]  ;;  %v181_v3 = vld [vmem:[%s15714_s5 + $0x218] sm:$0xff]  ;;  %v183_v4 = vld [vmem:[%s15714_s5 + $0x220] sm:$0xff] }
  0x18   :  { %92 = vst [vmem:[#allocation7 + $0xb0] sm:$0xff] %v91_v22  ;;  %v185_v5 = vld [vmem:[%s15714_s5 + $0x228] sm:$0xff]  ;;  %v187_v6 = vld [vmem:[%s15714_s5 + $0x230] sm:$0xff]  ;;  %v189_v7 = vld [vmem:[%s15714_s5 + $0x238] sm:$0xff] }
  0x19   :  { %94 = vst [vmem:[#allocation7 + $0xb8] sm:$0xff] %v93_v23  ;;  %v191_v8 = vld [vmem:[%s15714_s5 + $0x240] sm:$0xff]  ;;  %v193_v9 = vld [vmem:[%s15714_s5 + $0x248] sm:$0xff]  ;;  %v195_v10 = vld [vmem:[%s15714_s5 + $0x250] sm:$0xff] }
  0x1a   :  { %96 = vst [vmem:[#allocation7 + $0xc0] sm:$0xff] %v95_v24  ;;  %v197_v11 = vld [vmem:[%s15714_s5 + $0x258] sm:$0xff]  ;;  %v199_v12 = vld [vmem:[%s15714_s5 + $0x260] sm:$0xff]  ;;  %v201_v13 = vld [vmem:[%s15714_s5 + $0x268] sm:$0xff] }
  0x1b   :  { %98 = vst [vmem:[#allocation7 + $0xc8] sm:$0xff] %v97_v25  ;;  %v203_v14 = vld [vmem:[%s15714_s5 + $0x270] sm:$0xff]  ;;  %v205_v15 = vld [vmem:[%s15714_s5 + $0x278] sm:$0xff]  ;;  %v207_v16 = vld [vmem:[%s15714_s5 + $0x280] sm:$0xff] }
  0x1c   :  { %100 = vst [vmem:[#allocation7 + $0xd0] sm:$0xff] %v99_v26  ;;  %v209_v17 = vld [vmem:[%s15714_s5 + $0x288] sm:$0xff]  ;;  %v211_v18 = vld [vmem:[%s15714_s5 + $0x290] sm:$0xff]  ;;  %v213_v19 = vld [vmem:[%s15714_s5 + $0x298] sm:$0xff] }
  0x1d   :  { %102 = vst [vmem:[#allocation7 + $0xd8] sm:$0xff] %v101_v27  ;;  %v215_v20 = vld [vmem:[%s15714_s5 + $0x2a0] sm:$0xff]  ;;  %v217_v21 = vld [vmem:[%s15714_s5 + $0x2a8] sm:$0xff]  ;;  %v219_v22 = vld [vmem:[%s15714_s5 + $0x2b0] sm:$0xff] }
  0x1e   :  { %104 = vst [vmem:[#allocation7 + $0xe0] sm:$0xff] %v103_v28  ;;  %v221_v23 = vld [vmem:[%s15714_s5 + $0x2b8] sm:$0xff]  ;;  %v223_v24 = vld [vmem:[%s15714_s5 + $0x2c0] sm:$0xff]  ;;  %v225_v25 = vld [vmem:[%s15714_s5 + $0x2c8] sm:$0xff] }
  0x1f   :  { %106 = vst [vmem:[#allocation7 + $0xe8] sm:$0xff] %v105_v29  ;;  %v227_v26 = vld [vmem:[%s15714_s5 + $0x2d0] sm:$0xff]  ;;  %v229_v27 = vld [vmem:[%s15714_s5 + $0x2d8] sm:$0xff]  ;;  %v231_v28 = vld [vmem:[%s15714_s5 + $0x2e0] sm:$0xff] }
  0x20   :  { %108 = vst [vmem:[#allocation7 + $0xf0] sm:$0xff] %v107_v30  ;;  %v233_v29 = vld [vmem:[%s15714_s5 + $0x2e8] sm:$0xff]  ;;  %v235_v30 = vld [vmem:[%s15714_s5 + $0x2f0] sm:$0xff] }
  0x21   :  { %110 = vst [vmem:[#allocation7 + $0xf8] sm:$0xff] %v109_v31 }
  0x22   :  { %112 = vst [vmem:[#allocation7 + $0x100] sm:$0xff] %v111_v32 }
  0x23   :  { %114 = vst [vmem:[#allocation7 + $0x108] sm:$0xff] %v113_v33 }
  0x24   :  { %116 = vst [vmem:[#allocation7 + $0x110] sm:$0xff] %v115_v34 }
  0x25   :  { %118 = vst [vmem:[#allocation7 + $0x118] sm:$0xff] %v117_v35 }
  0x26   :  { %120 = vst [vmem:[#allocation7 + $0x120] sm:$0xff] %v119_v36 }
  0x27   :  { %122 = vst [vmem:[#allocation7 + $0x128] sm:$0xff] %v121_v37 }
  0x28   :  { %124 = vst [vmem:[#allocation7 + $0x130] sm:$0xff] %v123_v38 }
  0x29   :  { %126 = vst [vmem:[#allocation7 + $0x138] sm:$0xff] %v125_v39 }
  0x2a   :  { %128 = vst [vmem:[#allocation7 + $0x140] sm:$0xff] %v127_v40 }
  0x2b   :  { %130 = vst [vmem:[#allocation7 + $0x148] sm:$0xff] %v129_v41 }
  0x2c   :  { %132 = vst [vmem:[#allocation7 + $0x150] sm:$0xff] %v131_v42 }
  0x2d   :  { %134 = vst [vmem:[#allocation7 + $0x158] sm:$0xff] %v133_v43 }
  0x2e   :  { %136 = vst [vmem:[#allocation7 + $0x160] sm:$0xff] %v135_v44 }
  0x2f   :  { %138 = vst [vmem:[#allocation7 + $0x168] sm:$0xff] %v137_v45 }
  0x30   :  { %140 = vst [vmem:[#allocation7 + $0x170] sm:$0xff] %v139_v46 }
  0x31   :  { %142 = vst [vmem:[#allocation7 + $0x178] sm:$0xff] %v141_v47 }
  0x32   :  { %144 = vst [vmem:[#allocation7 + $0x180] sm:$0xff] %v143_v48 }
  0x33   :  { %146 = vst [vmem:[#allocation7 + $0x188] sm:$0xff] %v145_v49 }
  0x34   :  { %148 = vst [vmem:[#allocation7 + $0x190] sm:$0xff] %v147_v50 }
  0x35   :  { %150 = vst [vmem:[#allocation7 + $0x198] sm:$0xff] %v149_v51 }
  0x36   :  { %152 = vst [vmem:[#allocation7 + $0x1a0] sm:$0xff] %v151_v52 }
  0x37   :  { %154 = vst [vmem:[#allocation7 + $0x1a8] sm:$0xff] %v153_v53 }
  0x38   :  { %156 = vst [vmem:[#allocation7 + $0x1b0] sm:$0xff] %v155_v54 }
  0x39   :  { %158 = vst [vmem:[#allocation7 + $0x1b8] sm:$0xff] %v157_v55 }
  0x3a   :  { %160 = vst [vmem:[#allocation7 + $0x1c0] sm:$0xff] %v159_v56 }
  0x3b   :  { %162 = vst [vmem:[#allocation7 + $0x1c8] sm:$0xff] %v161_v57 }
  0x3c   :  { %164 = vst [vmem:[#allocation7 + $0x1d0] sm:$0xff] %v163_v58 }
  0x3d   :  { %166 = vst [vmem:[#allocation7 + $0x1d8] sm:$0xff] %v165_v59 }
  0x3e   :  { %168 = vst [vmem:[#allocation7 + $0x1e0] sm:$0xff] %v167_v60 }
  0x3f   :  { %170 = vst [vmem:[#allocation7 + $0x1e8] sm:$0xff] %v169_v61 }
  0x40   :  { %172 = vst [vmem:[#allocation7 + $0x1f0] sm:$0xff] %v171_v62 }
  0x41   :  { %174 = vst [vmem:[#allocation7 + $0x1f8] sm:$0xff] %v173_v63 }
  0x42   :  { %176 = vst [vmem:[#allocation7 + $0x200] sm:$0xff] %v175_v0 }
  0x43   :  { %178 = vst [vmem:[#allocation7 + $0x208] sm:$0xff] %v177_v1 }
  0x44   :  { %180 = vst [vmem:[#allocation7 + $0x210] sm:$0xff] %v179_v2 }
  0x45   :  { %182 = vst [vmem:[#allocation7 + $0x218] sm:$0xff] %v181_v3 }
  0x46   :  { %184 = vst [vmem:[#allocation7 + $0x220] sm:$0xff] %v183_v4 }
  0x47   :  { %186 = vst [vmem:[#allocation7 + $0x228] sm:$0xff] %v185_v5 }
  0x48   :  { %188 = vst [vmem:[#allocation7 + $0x230] sm:$0xff] %v187_v6 }
  0x49   :  { %190 = vst [vmem:[#allocation7 + $0x238] sm:$0xff] %v189_v7 }
  0x4a   :  { %192 = vst [vmem:[#allocation7 + $0x240] sm:$0xff] %v191_v8 }
  0x4b   :  { %194 = vst [vmem:[#allocation7 + $0x248] sm:$0xff] %v193_v9 }
  0x4c   :  { %196 = vst [vmem:[#allocation7 + $0x250] sm:$0xff] %v195_v10 }
  0x4d   :  { %198 = vst [vmem:[#allocation7 + $0x258] sm:$0xff] %v197_v11 }
  0x4e   :  { %200 = vst [vmem:[#allocation7 + $0x260] sm:$0xff] %v199_v12 }
  0x4f   :  { %202 = vst [vmem:[#allocation7 + $0x268] sm:$0xff] %v201_v13 }
  0x50   :  { %204 = vst [vmem:[#allocation7 + $0x270] sm:$0xff] %v203_v14 }
  0x51   :  { %206 = vst [vmem:[#allocation7 + $0x278] sm:$0xff] %v205_v15 }
  0x52   :  { %208 = vst [vmem:[#allocation7 + $0x280] sm:$0xff] %v207_v16 }
  0x53   :  { %210 = vst [vmem:[#allocation7 + $0x288] sm:$0xff] %v209_v17 }
  0x54   :  { %212 = vst [vmem:[#allocation7 + $0x290] sm:$0xff] %v211_v18 }
  0x55   :  { %214 = vst [vmem:[#allocation7 + $0x298] sm:$0xff] %v213_v19 }
  0x56   :  { %216 = vst [vmem:[#allocation7 + $0x2a0] sm:$0xff] %v215_v20 }
  0x57   :  { %218 = vst [vmem:[#allocation7 + $0x2a8] sm:$0xff] %v217_v21 }
  0x58   :  { %220 = vst [vmem:[#allocation7 + $0x2b0] sm:$0xff] %v219_v22 }
  0x59   :  { %222 = vst [vmem:[#allocation7 + $0x2b8] sm:$0xff] %v221_v23 }
  0x5a   :  { %224 = vst [vmem:[#allocation7 + $0x2c0] sm:$0xff] %v223_v24 }
  0x5b   :  { %226 = vst [vmem:[#allocation7 + $0x2c8] sm:$0xff] %v225_v25 }
  0x5c   :  { %228 = vst [vmem:[#allocation7 + $0x2d0] sm:$0xff] %v227_v26 }
  0x5d   :  { %230 = vst [vmem:[#allocation7 + $0x2d8] sm:$0xff] %v229_v27 }
  0x5e   :  { %232 = vst [vmem:[#allocation7 + $0x2e0] sm:$0xff] %v231_v28 }
  0x5f   :  { %234 = vst [vmem:[#allocation7 + $0x2e8] sm:$0xff] %v233_v29 }
  0x60   :  { %236 = vst [vmem:[#allocation7 + $0x2f0] sm:$0xff] %v235_v30 }
  0x61   :  { %244 = vsyncadd [#allocation11], 12288  ;;  %v256_v31 = vld [vmem:[%s15716_s7] sm:$0xff]  ;;  %v258_v32 = vld [vmem:[%s15716_s7 + $0x8] sm:$0xff] }
  0x62   :  { %257 = vst [vmem:[#allocation8] sm:$0xff] %v256_v31  ;;  %v260_v33 = vld [vmem:[%s15716_s7 + $0x10] sm:$0xff]  ;;  %v262_v34 = vld [vmem:[%s15716_s7 + $0x18] sm:$0xff]  ;;  %v264_v35 = vld [vmem:[%s15716_s7 + $0x20] sm:$0xff] }
  0x63   :  { %259 = vst [vmem:[#allocation8 + $0x8] sm:$0xff] %v258_v32  ;;  %v266_v36 = vld [vmem:[%s15716_s7 + $0x28] sm:$0xff]  ;;  %v268_v37 = vld [vmem:[%s15716_s7 + $0x30] sm:$0xff]  ;;  %v270_v38 = vld [vmem:[%s15716_s7 + $0x38] sm:$0xff] }
  0x64   :  { %261 = vst [vmem:[#allocation8 + $0x10] sm:$0xff] %v260_v33  ;;  %v272_v39 = vld [vmem:[%s15716_s7 + $0x40] sm:$0xff]  ;;  %v274_v40 = vld [vmem:[%s15716_s7 + $0x48] sm:$0xff]  ;;  %v276_v41 = vld [vmem:[%s15716_s7 + $0x50] sm:$0xff] }
  0x65   :  { %263 = vst [vmem:[#allocation8 + $0x18] sm:$0xff] %v262_v34  ;;  %v278_v42 = vld [vmem:[%s15716_s7 + $0x58] sm:$0xff]  ;;  %v280_v43 = vld [vmem:[%s15716_s7 + $0x60] sm:$0xff]  ;;  %v282_v44 = vld [vmem:[%s15716_s7 + $0x68] sm:$0xff] }
  0x66   :  { %265 = vst [vmem:[#allocation8 + $0x20] sm:$0xff] %v264_v35  ;;  %v284_v45 = vld [vmem:[%s15716_s7 + $0x70] sm:$0xff]  ;;  %v286_v46 = vld [vmem:[%s15716_s7 + $0x78] sm:$0xff]  ;;  %v288_v47 = vld [vmem:[%s15716_s7 + $0x80] sm:$0xff] }
  0x67   :  { %267 = vst [vmem:[#allocation8 + $0x28] sm:$0xff] %v266_v36  ;;  %v290_v48 = vld [vmem:[%s15716_s7 + $0x88] sm:$0xff]  ;;  %v292_v49 = vld [vmem:[%s15716_s7 + $0x90] sm:$0xff]  ;;  %v294_v50 = vld [vmem:[%s15716_s7 + $0x98] sm:$0xff] }
  0x68   :  { %269 = vst [vmem:[#allocation8 + $0x30] sm:$0xff] %v268_v37  ;;  %v296_v51 = vld [vmem:[%s15716_s7 + $0xa0] sm:$0xff]  ;;  %v298_v52 = vld [vmem:[%s15716_s7 + $0xa8] sm:$0xff]  ;;  %v300_v53 = vld [vmem:[%s15716_s7 + $0xb0] sm:$0xff] }
  0x69   :  { %271 = vst [vmem:[#allocation8 + $0x38] sm:$0xff] %v270_v38  ;;  %v302_v54 = vld [vmem:[%s15716_s7 + $0xb8] sm:$0xff]  ;;  %v304_v55 = vld [vmem:[%s15716_s7 + $0xc0] sm:$0xff]  ;;  %v306_v56 = vld [vmem:[%s15716_s7 + $0xc8] sm:$0xff] }
  0x6a   :  { %273 = vst [vmem:[#allocation8 + $0x40] sm:$0xff] %v272_v39  ;;  %v308_v57 = vld [vmem:[%s15716_s7 + $0xd0] sm:$0xff]  ;;  %v310_v58 = vld [vmem:[%s15716_s7 + $0xd8] sm:$0xff]  ;;  %v312_v59 = vld [vmem:[%s15716_s7 + $0xe0] sm:$0xff] }
  0x6b   :  { %275 = vst [vmem:[#allocation8 + $0x48] sm:$0xff] %v274_v40  ;;  %v314_v60 = vld [vmem:[%s15716_s7 + $0xe8] sm:$0xff]  ;;  %v316_v61 = vld [vmem:[%s15716_s7 + $0xf0] sm:$0xff]  ;;  %v318_v62 = vld [vmem:[%s15716_s7 + $0xf8] sm:$0xff] }
  0x6c   :  { %277 = vst [vmem:[#allocation8 + $0x50] sm:$0xff] %v276_v41  ;;  %v320_v63 = vld [vmem:[%s15716_s7 + $0x100] sm:$0xff]  ;;  %v322_v0 = vld [vmem:[%s15716_s7 + $0x108] sm:$0xff]  ;;  %v324_v1 = vld [vmem:[%s15716_s7 + $0x110] sm:$0xff] }
  0x6d   :  { %279 = vst [vmem:[#allocation8 + $0x58] sm:$0xff] %v278_v42  ;;  %v326_v2 = vld [vmem:[%s15716_s7 + $0x118] sm:$0xff]  ;;  %v328_v3 = vld [vmem:[%s15716_s7 + $0x120] sm:$0xff]  ;;  %v330_v4 = vld [vmem:[%s15716_s7 + $0x128] sm:$0xff] }
  0x6e   :  { %281 = vst [vmem:[#allocation8 + $0x60] sm:$0xff] %v280_v43  ;;  %v332_v5 = vld [vmem:[%s15716_s7 + $0x130] sm:$0xff]  ;;  %v334_v6 = vld [vmem:[%s15716_s7 + $0x138] sm:$0xff]  ;;  %v336_v7 = vld [vmem:[%s15716_s7 + $0x140] sm:$0xff] }
  0x6f   :  { %283 = vst [vmem:[#allocation8 + $0x68] sm:$0xff] %v282_v44  ;;  %v338_v8 = vld [vmem:[%s15716_s7 + $0x148] sm:$0xff]  ;;  %v340_v9 = vld [vmem:[%s15716_s7 + $0x150] sm:$0xff]  ;;  %v342_v10 = vld [vmem:[%s15716_s7 + $0x158] sm:$0xff] }
  0x70   :  { %285 = vst [vmem:[#allocation8 + $0x70] sm:$0xff] %v284_v45  ;;  %v344_v11 = vld [vmem:[%s15716_s7 + $0x160] sm:$0xff]  ;;  %v346_v12 = vld [vmem:[%s15716_s7 + $0x168] sm:$0xff]  ;;  %v348_v13 = vld [vmem:[%s15716_s7 + $0x170] sm:$0xff] }
  0x71   :  { %287 = vst [vmem:[#allocation8 + $0x78] sm:$0xff] %v286_v46  ;;  %v350_v14 = vld [vmem:[%s15716_s7 + $0x178] sm:$0xff] }
  0x72   :  { %289 = vst [vmem:[#allocation8 + $0x80] sm:$0xff] %v288_v47 }
  0x73   :  { %291 = vst [vmem:[#allocation8 + $0x88] sm:$0xff] %v290_v48 }
  0x74   :  { %293 = vst [vmem:[#allocation8 + $0x90] sm:$0xff] %v292_v49 }
  0x75   :  { %295 = vst [vmem:[#allocation8 + $0x98] sm:$0xff] %v294_v50 }
  0x76   :  { %297 = vst [vmem:[#allocation8 + $0xa0] sm:$0xff] %v296_v51 }
  0x77   :  { %299 = vst [vmem:[#allocation8 + $0xa8] sm:$0xff] %v298_v52 }
  0x78   :  { %301 = vst [vmem:[#allocation8 + $0xb0] sm:$0xff] %v300_v53 }
  0x79   :  { %303 = vst [vmem:[#allocation8 + $0xb8] sm:$0xff] %v302_v54 }
  0x7a   :  { %305 = vst [vmem:[#allocation8 + $0xc0] sm:$0xff] %v304_v55 }
  0x7b   :  { %307 = vst [vmem:[#allocation8 + $0xc8] sm:$0xff] %v306_v56 }
  0x7c   :  { %309 = vst [vmem:[#allocation8 + $0xd0] sm:$0xff] %v308_v57 }
  0x7d   :  { %311 = vst [vmem:[#allocation8 + $0xd8] sm:$0xff] %v310_v58 }
  0x7e   :  { %313 = vst [vmem:[#allocation8 + $0xe0] sm:$0xff] %v312_v59 }
  0x7f   :  { %315 = vst [vmem:[#allocation8 + $0xe8] sm:$0xff] %v314_v60 }
  0x80   :  { %317 = vst [vmem:[#allocation8 + $0xf0] sm:$0xff] %v316_v61 }
  0x81   :  { %319 = vst [vmem:[#allocation8 + $0xf8] sm:$0xff] %v318_v62 }
  0x82   :  { %321 = vst [vmem:[#allocation8 + $0x100] sm:$0xff] %v320_v63 }
  0x83   :  { %323 = vst [vmem:[#allocation8 + $0x108] sm:$0xff] %v322_v0 }
  0x84   :  { %325 = vst [vmem:[#allocation8 + $0x110] sm:$0xff] %v324_v1 }
  0x85   :  { %327 = vst [vmem:[#allocation8 + $0x118] sm:$0xff] %v326_v2 }
  0x86   :  { %329 = vst [vmem:[#allocation8 + $0x120] sm:$0xff] %v328_v3 }
  0x87   :  { %331 = vst [vmem:[#allocation8 + $0x128] sm:$0xff] %v330_v4 }
  0x88   :  { %333 = vst [vmem:[#allocation8 + $0x130] sm:$0xff] %v332_v5 }
  0x89   :  { %335 = vst [vmem:[#allocation8 + $0x138] sm:$0xff] %v334_v6 }
  0x8a   :  { %337 = vst [vmem:[#allocation8 + $0x140] sm:$0xff] %v336_v7 }
  0x8b   :  { %339 = vst [vmem:[#allocation8 + $0x148] sm:$0xff] %v338_v8 }
  0x8c   :  { %341 = vst [vmem:[#allocation8 + $0x150] sm:$0xff] %v340_v9 }
  0x8d   :  { %343 = vst [vmem:[#allocation8 + $0x158] sm:$0xff] %v342_v10 }
  0x8e   :  { %345 = vst [vmem:[#allocation8 + $0x160] sm:$0xff] %v344_v11 }
  0x8f   :  { %347 = vst [vmem:[#allocation8 + $0x168] sm:$0xff] %v346_v12 }
  0x90   :  { %349 = vst [vmem:[#allocation8 + $0x170] sm:$0xff] %v348_v13 }
  0x91   :  { %351 = vst [vmem:[#allocation8 + $0x178] sm:$0xff] %v350_v14 }
  0x92   :  { %357 = vsyncadd [#allocation11 + $0x1], 6144  ;;  %v369_v15 = vld [vmem:[%s15718_s9] sm:$0xff]  ;;  %v371_v16 = vld [vmem:[%s15718_s9 + $0x8] sm:$0xff] }
  0x93   :  { %370 = vst [vmem:[#allocation9 + $0x30] sm:$0xff] %v369_v15  ;;  %v373_v17 = vld [vmem:[%s15718_s9 + $0x10] sm:$0xff]  ;;  %v375_v18 = vld [vmem:[%s15718_s9 + $0x18] sm:$0xff]  ;;  %v377_v19 = vld [vmem:[%s15718_s9 + $0x20] sm:$0xff] }
  0x94   :  { %372 = vst [vmem:[#allocation9] sm:$0xff] %v371_v16  ;;  %v379_v20 = vld [vmem:[%s15718_s9 + $0x28] sm:$0xff]  ;;  %v381_v21 = vld [vmem:[%s15718_s9 + $0x30] sm:$0xff]  ;;  %v383_v22 = vld [vmem:[%s15718_s9 + $0x38] sm:$0xff] }
  0x95   :  { %374 = vst [vmem:[#allocation9 + $0x58] sm:$0xff] %v373_v17  ;;  %v385_v23 = vld [vmem:[%s15718_s9 + $0x40] sm:$0xff]  ;;  %v387_v24 = vld [vmem:[%s15718_s9 + $0x48] sm:$0xff]  ;;  %v389_v25 = vld [vmem:[%s15718_s9 + $0x50] sm:$0xff] }
  0x96   :  { %376 = vst [vmem:[#allocation9 + $0x18] sm:$0xff] %v375_v18  ;;  %v391_v26 = vld [vmem:[%s15718_s9 + $0x58] sm:$0xff]  ;;  %v393_v27 = vld [vmem:[%s15718_s9 + $0x60] sm:$0xff]  ;;  %v395_v28 = vld [vmem:[%s15718_s9 + $0x68] sm:$0xff] }
  0x97   :  { %378 = vst [vmem:[#allocation9 + $0x50] sm:$0xff] %v377_v19  ;;  %v397_v29 = vld [vmem:[%s15718_s9 + $0x70] sm:$0xff]  ;;  %v399_v30 = vld [vmem:[%s15718_s9 + $0x78] sm:$0xff] }
  0x98   :  { %380 = vst [vmem:[#allocation9 + $0x68] sm:$0xff] %v379_v20 }
  0x99   :  { %382 = vst [vmem:[#allocation9 + $0x8] sm:$0xff] %v381_v21 }
  0x9a   :  { %384 = vst [vmem:[#allocation9 + $0x48] sm:$0xff] %v383_v22 }
  0x9b   :  { %386 = vst [vmem:[#allocation9 + $0x40] sm:$0xff] %v385_v23 }
  0x9c   :  { %388 = vst [vmem:[#allocation9 + $0x20] sm:$0xff] %v387_v24 }
  0x9d   :  { %390 = vst [vmem:[#allocation9 + $0x10] sm:$0xff] %v389_v25 }
  0x9e   :  { %392 = vst [vmem:[#allocation9 + $0x38] sm:$0xff] %v391_v26 }
  0x9f   :  { %394 = vst [vmem:[#allocation9 + $0x60] sm:$0xff] %v393_v27 }
  0xa0   :  { %396 = vst [vmem:[#allocation9 + $0x70] sm:$0xff] %v395_v28 }
  0xa1   :  { %398 = vst [vmem:[#allocation9 + $0x78] sm:$0xff] %v397_v29 }
  0xa2   :  { %400 = vst [vmem:[#allocation9 + $0x28] sm:$0xff] %v399_v30 }
  0xa3   :  { %406 = vsyncadd [#allocation11 + $0x2], 2048  ;;  %v418_v31 = vld [vmem:[%s15720_s11] sm:$0xff]  ;;  %v420_v32 = vld [vmem:[%s15720_s11 + $0x8] sm:$0xff] }
  0xa4   :  { %419 = vst [vmem:[#allocation10 + $0x28] sm:$0xff] %v418_v31  ;;  %v422_v33 = vld [vmem:[%s15720_s11 + $0x10] sm:$0xff]  ;;  %v424_v34 = vld [vmem:[%s15720_s11 + $0x18] sm:$0xff]  ;;  %v426_v35 = vld [vmem:[%s15720_s11 + $0x20] sm:$0xff] }
  0xa5   :  { %421 = vst [vmem:[#allocation10] sm:$0xff] %v420_v32  ;;  %v428_v36 = vld [vmem:[%s15720_s11 + $0x28] sm:$0xff]  ;;  %v430_v37 = vld [vmem:[%s15720_s11 + $0x30] sm:$0xff]  ;;  %v432_v38 = vld [vmem:[%s15720_s11 + $0x38] sm:$0xff] }
  0xa6   :  { %423 = vst [vmem:[#allocation10 + $0x10] sm:$0xff] %v422_v33 }
  0xa7   :  { %425 = vst [vmem:[#allocation10 + $0x20] sm:$0xff] %v424_v34 }
  0xa8   :  { %427 = vst [vmem:[#allocation10 + $0x18] sm:$0xff] %v426_v35 }
  0xa9   :  { %429 = vst [vmem:[#allocation10 + $0x8] sm:$0xff] %v428_v36 }
  0xaa   :  { %431 = vst [vmem:[#allocation10 + $0x38] sm:$0xff] %v430_v37 }
  0xab   :  { %433 = vst [vmem:[#allocation10 + $0x30] sm:$0xff] %v432_v38 }
  0xac   :  { %439 = vsyncadd [#allocation11 + $0x3], 1024  ;;  %v12021_v39 = vld [vmem:[%s15710_s1 + $0x38] sm:$0xff]  ;;  %v12020_v40 = vld [vmem:[%s15710_s1 + $0x30] sm:$0xff]  ;;  %vm2330_vm0 = vcmask 125952   ;;  %vm2332_vm1 = vcmask 123904  }
  0xad   :  { %1085 = vmatpush.bf16.msra.mxu0 %v12021_v39  ;;  %v12019_v41 = vld [vmem:[%s15710_s1 + $0x28] sm:$0xff]  ;;  %v12018_v42 = vld [vmem:[%s15710_s1 + $0x20] sm:$0xff]  ;;  %v12017_v43 = vld [vmem:[%s15710_s1 + $0x18] sm:$0xff]  ;;  %vm2355_vm2 = vcmask 125954   ;;  %vm2346_vm3 = vcmask 1041408   ;;  %vm2347_vm4 = vcmask 1045508  }
  0xae   :  { %v12016_v44 = vld [vmem:[%s15710_s1 + $0x10] sm:$0xff]  ;;  %v12015_v45 = vld [vmem:[%s15710_s1 + $0x8] sm:$0xff]  ;;  %v12014_v46 = vld [vmem:[%s15710_s1] sm:$0xff]  ;;  %vm2798_vm6 = vcmask 130048   ;;  %vm2755_vm7 = vsmask.f32 7424 }
  0xaf   :  { %v11942_v47 = vld [vmem:[%s15709_s0] sm:$0xff]  ;;  %v11943_v48 = vld [vmem:[%s15709_s0 + $0x8] sm:$0xff]  ;;  %v11944_v49 = vld [vmem:[%s15709_s0 + $0x10] sm:$0xff]  ;;  %vm2990_vm8 = vcmask 1045504   ;;  %vm3169_vm9 = vcmask 1044480   ;;  %vm2890_vm10 = vcmask 1046528  }
  0xb0   :  { %v11945_v50 = vld [vmem:[%s15709_s0 + $0x18] sm:$0xff]  ;;  %v11946_v51 = vld [vmem:[%s15709_s0 + $0x20] sm:$0xff]  ;;  %v11947_v52 = vld [vmem:[%s15709_s0 + $0x28] sm:$0xff]  ;;  %vm3062_vm11 = vsmask.f32 5376 }
  0xb1   :  { %1086 = vmatpush.bf16.msra.mxu0 %v12020_v40  ;;  %v11948_v53 = vld [vmem:[%s15709_s0 + $0x30] sm:$0xff]  ;;  %v11949_v54 = vld [vmem:[%s15709_s0 + $0x38] sm:$0xff]  ;;  %v11950_v55 = vld [vmem:[%s15709_s0 + $0x40] sm:$0xff] }
  0xb2   :  { %v11951_v58 = vld [vmem:[%s15709_s0 + $0x48] sm:$0xff]  ;;  %v11952_v61 = vld [vmem:[%s15709_s0 + $0x50] sm:$0xff]  ;;  %v11953_v6 = vld [vmem:[%s15709_s0 + $0x58] sm:$0xff] }
  0xb3   :  { %v12987_v17 = vld [vmem:[%s15711_s2] ss:$0 sm:$0xff]  ;;  %v11955_v34 = vld [vmem:[%s15709_s0 + $0x68] sm:$0xff]  ;;  %vm13012_vm5 = vmor %vm2346_vm3, %vm2347_vm4 }
  0xb4   :  { %v11954_v21 = vld [vmem:[%s15709_s0 + $0x60] sm:$0xff] }
  0xb5   :  { %1087 = vmatpush.bf16.msra.mxu0 %v12019_v41  ;;  %v12025_v40 = vld [vmem:[%s15712_s3] sm:$0xff] }
  0xb6   :  { %2861 = vmatpush.bf16.msra.mxu2 %v12025_v40  ;;  %12318 = vmatpush.bf16.msra.mxu3 %v12025_v40 }
  0xb9   :  { %1088 = vmatpush.bf16.msra.mxu0 %v12018_v42 }
  0xbd   :  { %1089 = vmatpush.bf16.msra.mxu0 %v12017_v43  ;;  %v11956_v43 = vld [vmem:[%s15709_s0 + $0x70] sm:$0xff] }
  0xc1   :  { %1090 = vmatpush.bf16.msra.mxu0 %v12016_v44 }
  0xc5   :  { %1091 = vmatpush.bf16.msra.mxu0 %v12015_v45 }
  0xc9   :  { %1092 = vmatpush.bf16.msra.mxu0 %v12014_v46 }
  0xcc   :  { %1093 = vmatmul.bf16.vlgmr.msra.gmra.mxu0 %v11942_v47 }
  0xdc   :  { %1098 = vmatmul.bf16.gmra.mxu0 %v11943_v48 }
  0xec   :  { %1103 = vmatmul.bf16.gmra.mxu0 %v11944_v49 }
  0xfc   :  { %1108 = vmatmul.bf16.gmra.mxu0 %v11945_v50 }
 0x10c   :  { %1113 = vmatmul.bf16.gmra.mxu0 %v11946_v51 }
 0x11c   :  { %1118 = vmatmul.bf16.gmra.mxu0 %v11947_v52 }
 0x12c   :  { %1123 = vmatmul.bf16.gmra.mxu0 %v11948_v53 }
 0x13c   :  { %1128 = vmatmul.bf16.gmra.mxu0 %v11949_v54  ;;  %v11957_v54 = vld [vmem:[%s15709_s0 + $0x78] sm:$0xff] }
 0x149   :  { %v1094_v56 = vpop.f32.mrf.mxu0 }
 0x14a   :  { %1458 = vst [vmem:[#allocation2] sm:$0xff] %v1094_v56 }
 0x14c   :  { %1133 = vmatmul.bf16.gmra.mxu0 %v11950_v55 }
 0x151   :  { %v1096_v57 = vpop.f32.mrf.mxu0 }
 0x152   :  { %1459 = vst [vmem:[#allocation2 + $0x8] sm:$0xff] %v1096_v57 }
 0x159   :  { %v1099_v59 = vpop.f32.mrf.mxu0  ;;  %v1744_v63 = vld [vmem:[#allocation2 + $0x1] sm:$0xff] }
 0x15a   :  { %1460 = vst [vmem:[#allocation2 + $0x10] sm:$0xff] %v1099_v59  ;;  %v1885_v2 = vmax.f32 %v1094_v56, %v1744_v63 }
 0x15c   :  { %1138 = vmatmul.bf16.gmra.mxu0 %v11951_v58 }
 0x161   :  { %v1101_v60 = vpop.f32.mrf.mxu0  ;;  %v1745_v5 = vld [vmem:[#allocation2 + $0x9] sm:$0xff] }
 0x162   :  { %1461 = vst [vmem:[#allocation2 + $0x18] sm:$0xff] %v1101_v60  ;;  %v1886_v9 = vmax.f32 %v1096_v57, %v1745_v5 }
 0x169   :  { %v1104_v62 = vpop.f32.mrf.mxu0  ;;  %v1746_v12 = vld [vmem:[#allocation2 + $0x11] sm:$0xff] }
 0x16a   :  { %1462 = vst [vmem:[#allocation2 + $0x20] sm:$0xff] %v1104_v62  ;;  %v1887_v15 = vmax.f32 %v1099_v59, %v1746_v12 }
 0x16c   :  { %1143 = vmatmul.bf16.gmra.mxu0 %v11952_v61 }
 0x171   :  { %v1747_v0 = vld [vmem:[#allocation2 + $0x19] sm:$0xff]  ;;  %v1106_v1 = vpop.f32.mrf.mxu0 }
 0x172   :  { %v1888_v3 = vmax.f32 %v1101_v60, %v1747_v0  ;;  %1463 = vst [vmem:[#allocation2 + $0x28] sm:$0xff] %v1106_v1 }
 0x174   :  { %v2035_v4 = vmax.f32 %v1885_v2, %v1888_v3 }
 0x176   :  { %2176 = vst [vmem:[#allocation3] sm:$0xff] %v2035_v4 }
 0x179   :  { %v1748_v7 = vld [vmem:[#allocation2 + $0x21] sm:$0xff]  ;;  %v1109_v8 = vpop.f32.mrf.mxu0 }
 0x17a   :  { %v1889_v10 = vmax.f32 %v1104_v62, %v1748_v7  ;;  %1464 = vst [vmem:[#allocation2 + $0x30] sm:$0xff] %v1109_v8 }
 0x17c   :  { %v2036_v11 = vmax.f32 %v1886_v9, %v1889_v10  ;;  %1148 = vmatmul.bf16.gmra.mxu0 %v11953_v6  ;;  %v11958_v9 = vld [vmem:[%s15709_s0 + $0x80] sm:$0xff] }
 0x17e   :  { %2177 = vst [vmem:[#allocation3 + $0x8] sm:$0xff] %v2036_v11 }
 0x181   :  { %v1749_v13 = vld [vmem:[#allocation2 + $0x29] sm:$0xff]  ;;  %v1111_v14 = vpop.f32.mrf.mxu0 }
 0x182   :  { %v1890_v16 = vmax.f32 %v1106_v1, %v1749_v13  ;;  %1465 = vst [vmem:[#allocation2 + $0x38] sm:$0xff] %v1111_v14 }
 0x184   :  { %v2037_v18 = vmax.f32 %v1887_v15, %v1890_v16 }
 0x185   :  { %v2318_v19 = vld [vmem:[#allocation3] ss:$2 sm:$0xff] }
 0x186   :  { %2178 = vst [vmem:[#allocation3 + $0x10] sm:$0xff] %v2037_v18  ;;  %v2324_v20 = vadd.f32 %v12987_v17, %v2318_v19  ;;  %v12026_v18 = vld [vmem:[%s15712_s3 + $0x8] sm:$0xff] }
 0x187   :  { %v11959_v19 = vld [vmem:[%s15709_s0 + $0x88] sm:$0xff]  ;;  %2818 = vmatpush.bf16.msra.mxu1 %v12026_v18 }
 0x188   :  { %v2326_v22 = vmax.f32 %v2324_v20, 0.0 }
 0x189   :  { %v1750_v23 = vld [vmem:[#allocation2 + $0x31] sm:$0xff]  ;;  %v1114_v24 = vpop.f32.mrf.mxu0 }
 0x18a   :  { %v1891_v25 = vmax.f32 %v1109_v8, %v1750_v23  ;;  %1466 = vst [vmem:[#allocation2 + $0x40] sm:$0xff] %v1114_v24  ;;  %v2328_v26 = vpack.c.bf16 %v2326_v22, %v2326_v22 }
 0x18c   :  { %1153 = vmatmul.bf16.gmra.mxu0 %v11954_v21  ;;  %2331 = vst.msk [vmem:[#allocation4] sm:$0xf] %vm2330_vm0, %v2328_v26 }
 0x18d   :  { %v2320_v27 = vld [vmem:[#allocation3 + $0x10] ss:$2 sm:$0xf] }
 0x18e   :  { %v2325_v28 = vadd.f32 %v12987_v17, %v2320_v27 }
 0x190   :  { %v2327_v29 = vmax.f32 %v2325_v28, 0.0 }
 0x191   :  { %v1751_v30 = vld [vmem:[#allocation2 + $0x39] sm:$0xff]  ;;  %v1116_v31 = vpop.f32.mrf.mxu0 }
 0x192   :  { %v1892_v32 = vmax.f32 %v1111_v14, %v1751_v30  ;;  %1467 = vst [vmem:[#allocation2 + $0x48] sm:$0xff] %v1116_v31  ;;  %v2329_v33 = vpack.c.bf16 %v2327_v29, %v2327_v29  ;;  %v11960_v30 = vld [vmem:[%s15709_s0 + $0x90] sm:$0xff] }
 0x194   :  { %2333 = vst.msk [vmem:[#allocation4 + $0x4] sm:$0x3] %vm2332_vm1, %v2329_v33 }
 0x199   :  { %v1752_v35 = vld [vmem:[#allocation2 + $0x41] sm:$0xff]  ;;  %v1119_v36 = vpop.f32.mrf.mxu0 }
 0x19a   :  { %v1893_v37 = vmax.f32 %v1114_v24, %v1752_v35  ;;  %1468 = vst [vmem:[#allocation2 + $0x50] sm:$0xff] %v1119_v36 }
 0x19c   :  { %1158 = vmatmul.bf16.gmra.mxu0 %v11955_v34 }
 0x1a1   :  { %v1753_v38 = vld [vmem:[#allocation2 + $0x49] sm:$0xff]  ;;  %v1121_v39 = vpop.f32.mrf.mxu0 }
 0x1a2   :  { %v1894_v41 = vmax.f32 %v1116_v31, %v1753_v38  ;;  %1469 = vst [vmem:[#allocation2 + $0x58] sm:$0xff] %v1121_v39 }
 0x1a4   :  { %v2041_v42 = vmax.f32 %v1891_v25, %v1894_v41 }
 0x1a6   :  { %2182 = vst [vmem:[#allocation3 + $0x30] sm:$0xff] %v2041_v42 }
 0x1a9   :  { %v1754_v44 = vld [vmem:[#allocation2 + $0x51] sm:$0xff]  ;;  %v1124_v45 = vpop.f32.mrf.mxu0 }
 0x1aa   :  { %v1895_v46 = vmax.f32 %v1119_v36, %v1754_v44  ;;  %1470 = vst [vmem:[#allocation2 + $0x60] sm:$0xff] %v1124_v45 }
 0x1ac   :  { %v2042_v47 = vmax.f32 %v1892_v32, %v1895_v46  ;;  %1163 = vmatmul.bf16.gmra.mxu0 %v11956_v43 }
 0x1ae   :  { %2183 = vst [vmem:[#allocation3 + $0x38] sm:$0xff] %v2042_v47 }
 0x1b1   :  { %v1755_v48 = vld [vmem:[#allocation2 + $0x59] sm:$0xff]  ;;  %v1126_v49 = vpop.f32.mrf.mxu0 }
 0x1b2   :  { %v1896_v50 = vmax.f32 %v1121_v39, %v1755_v48  ;;  %1471 = vst [vmem:[#allocation2 + $0x68] sm:$0xff] %v1126_v49 }
 0x1b4   :  { %v2043_v51 = vmax.f32 %v1893_v37, %v1896_v50  ;;  %v11961_v50 = vld [vmem:[%s15709_s0 + $0x98] sm:$0xff] }
 0x1b5   :  { %v2335_v52 = vld [vmem:[#allocation3 + $0x30] ss:$2 sm:$0xff] }
 0x1b6   :  { %2184 = vst [vmem:[#allocation3 + $0x40] sm:$0xff] %v2043_v51  ;;  %v2338_v53 = vadd.f32 %v12987_v17, %v2335_v52 }
 0x1b8   :  { %v2340_v55 = vmax.f32 %v2338_v53, 0.0 }
 0x1b9   :  { %v1756_v56 = vld [vmem:[#allocation2 + $0x61] sm:$0xff]  ;;  %v1129_v57 = vpop.f32.mrf.mxu0 }
 0x1ba   :  { %v1897_v58 = vmax.f32 %v1124_v45, %v1756_v56  ;;  %1472 = vst [vmem:[#allocation2 + $0x70] sm:$0xff] %v1129_v57  ;;  %v2342_v59 = vpack.c.bf16 %v2340_v55, %v2340_v55 }
 0x1bc   :  { %1168 = vmatmul.bf16.gmra.mxu0 %v11957_v54  ;;  %v2349_v60 = vrot.slane %v2342_v59, 6  ;;  %v11962_v59 = vld [vmem:[%s15709_s0 + $0xa0] sm:$0xff] }
 0x1bd   :  { %v2337_v61 = vld [vmem:[#allocation3 + $0x40] ss:$2 sm:$0xf] }
 0x1be   :  { %v2339_v62 = vadd.f32 %v12987_v17, %v2337_v61  ;;  %2356 = vst.msk [vmem:[#allocation4 + $0x4] sm:$0xc] %vm2355_vm2, %v2349_v60  ;;  %v2350_v5 = vrot.slane %v2349_v60, 4 }
 0x1c0   :  { %v2341_v63 = vmax.f32 %v2339_v62, 0.0 }
 0x1c1   :  { %v1757_v0 = vld [vmem:[#allocation2 + $0x69] sm:$0xff]  ;;  %v1131_v1 = vpop.f32.mrf.mxu0 }
 0x1c2   :  { %v1898_v2 = vmax.f32 %v1126_v49, %v1757_v0  ;;  %1473 = vst [vmem:[#allocation2 + $0x78] sm:$0xff] %v1131_v1  ;;  %v2343_v3 = vpack.c.bf16 %v2341_v63, %v2341_v63 }
 0x1c4   :  { %v2351_v6 = vrot.slane %v2343_v3, 6 }
 0x1c5   :  { %v12280_v7 = vld [vmem:[#allocation4] sm:$0xff]  }
 0x1c6   :  { %v2352_v8 = vsel %vm13012_vm5, %v2350_v5, %v2351_v6  ;;  %10601 = vmatmul.msk.bf16.vlgmr.msra.gmra.mxu2 %vm2798_vm6, %v12280_v7  ;;  %v2759_v38 = vshll.u32 %v12280_v7, 16  ;;  %v2757_v46 = vshrl.u32 %v12280_v7, 16  ;;  %v11963_v7 = vld [vmem:[%s15709_s0 + $0xa8] sm:$0xff] }
 0x1c7   :  { %2357 = vst.msk [vmem:[#allocation4 + $0x8] sm:$0xf] %vm2330_vm0, %v2352_v8 }
 0x1c8   :  { %v2761_v44 = vrot.slane %v2759_v38, 1 }
 0x1c9   :  { %v1758_v10 = vld [vmem:[#allocation2 + $0x71] sm:$0xff]  ;;  %v1134_v11 = vpop.f32.mrf.mxu0 }
 0x1ca   :  { %v1899_v12 = vmax.f32 %v1129_v57, %v1758_v10  ;;  %1474 = vst [vmem:[#allocation2 + $0x80] sm:$0xff] %v1134_v11  ;;  %v2762_v48 = vor.u32 %v2761_v44, %v2757_v46 }
 0x1cc   :  { %1173 = vmatmul.bf16.gmra.mxu0 %v11958_v9 }
 0x1d1   :  { %v1759_v13 = vld [vmem:[#allocation2 + $0x79] sm:$0xff]  ;;  %v1136_v14 = vpop.f32.mrf.mxu0 }
 0x1d2   :  { %v1900_v15 = vmax.f32 %v1131_v1, %v1759_v13  ;;  %1475 = vst [vmem:[#allocation2 + $0x88] sm:$0xff] %v1136_v14 }
 0x1d4   :  { %v2047_v16 = vmax.f32 %v1897_v58, %v1900_v15 }
 0x1d6   :  { %2188 = vst [vmem:[#allocation3 + $0x60] sm:$0xff] %v2047_v16  ;;  %v2956_v16 = vld [vmem:[#allocation4 + $0x8] sm:$0xf] }
 0x1d9   :  { %v1760_v20 = vld [vmem:[#allocation2 + $0x81] sm:$0xff]  ;;  %v1139_v21 = vpop.f32.mrf.mxu0 }
 0x1da   :  { %v1901_v22 = vmax.f32 %v1134_v11, %v1760_v20  ;;  %1476 = vst [vmem:[#allocation2 + $0x90] sm:$0xff] %v1139_v21 }
 0x1dc   :  { %v2048_v23 = vmax.f32 %v1898_v2, %v1901_v22  ;;  %1178 = vmatmul.bf16.gmra.mxu0 %v11959_v19  ;;  %v2955_v19 = vld [vmem:[#allocation4 + $0x4] sm:$0xc] }
 0x1dd   :  { %v3162_v22 = vld [vmem:[#allocation4 + $0x4] sm:$0x8] }
 0x1de   :  { %2189 = vst [vmem:[#allocation3 + $0x68] sm:$0xff] %v2048_v23 }
 0x1e1   :  { %v1761_v24 = vld [vmem:[#allocation2 + $0x89] sm:$0xff]  ;;  %v1141_v25 = vpop.f32.mrf.mxu0 }
 0x1e2   :  { %v1902_v26 = vmax.f32 %v1136_v14, %v1761_v24  ;;  %1477 = vst [vmem:[#allocation2 + $0x98] sm:$0xff] %v1141_v25  ;;  %v12032_v14 = vld [vmem:[%s15712_s3 + $0x20] sm:$0xff] }
 0x1e3   :  { %3132 = vmatpush.bf16.msrb.mxu2 %v12032_v14 }
 0x1e4   :  { %v2049_v27 = vmax.f32 %v1899_v12, %v1902_v26 }
 0x1e5   :  { %v2359_v28 = vld [vmem:[#allocation3 + $0x60] ss:$2 sm:$0xff] }
 0x1e6   :  { %2190 = vst [vmem:[#allocation3 + $0x70] sm:$0xff] %v2049_v27  ;;  %v2362_v29 = vadd.f32 %v12987_v17, %v2359_v28  ;;  %v2976_v27 = vunpack.c.l.b16 %v2955_v19  ;;  %v3167_v28 = vunpack.c.l.b16 %v3162_v22 }
 0x1e8   :  { %v2364_v31 = vmax.f32 %v2362_v29, 0.0 }
 0x1e9   :  { %v1762_v32 = vld [vmem:[#allocation2 + $0x91] sm:$0xff]  ;;  %v1144_v33 = vpop.f32.mrf.mxu0 }
 0x1ea   :  { %v1903_v34 = vmax.f32 %v1139_v21, %v1762_v32  ;;  %1478 = vst [vmem:[#allocation2 + $0xa0] sm:$0xff] %v1144_v33  ;;  %v2366_v35 = vpack.c.bf16 %v2364_v31, %v2364_v31  ;;  %v2977_v21 = vunpack.c.l.b16 %v2956_v16 }
 0x1ec   :  { %1183 = vmatmul.bf16.gmra.mxu0 %v11960_v30  ;;  %2368 = vst.msk [vmem:[#allocation4 + $0xc] sm:$0xf] %vm2330_vm0, %v2366_v35  ;;  %v2985_v31 = vpack.c.b16 %v2977_v21, %v2976_v27  ;;  %v3168_v32 = vpack.c.b16 %v2977_v21, %v3167_v28  ;;  %v11964_v35 = vld [vmem:[%s15709_s0 + $0xb0] sm:$0xff]  ;;  %v11966_v21 = vld [vmem:[%s15709_s0 + $0xc0] sm:$0xff] }
 0x1ed   :  { %v2361_v36 = vld [vmem:[#allocation3 + $0x70] ss:$2 sm:$0xf] }
 0x1ee   :  { %v2363_v37 = vadd.f32 %v12987_v17, %v2361_v36  ;;  %v2991_v36 = vrot.slane %v2985_v31, 2 }
 0x1f0   :  { %v2365_v39 = vmax.f32 %v2363_v37, 0.0 }
 0x1f1   :  { %v1763_v40 = vld [vmem:[#allocation2 + $0x99] sm:$0xff]  ;;  %v1146_v41 = vpop.f32.mrf.mxu0 }
 0x1f2   :  { %v1904_v42 = vmax.f32 %v1141_v25, %v1763_v40  ;;  %1479 = vst [vmem:[#allocation2 + $0xa8] sm:$0xff] %v1146_v41  ;;  %v2367_v43 = vpack.c.bf16 %v2365_v39, %v2365_v39 }
 0x1f3   :  { %v13035_v45 = vld [vmem:[#allocation4 + $0x8] sm:$0xff] }
 0x1f4   :  { %2369 = vst.msk [vmem:[#allocation4 + $0x10] sm:$0x3] %vm2332_vm1, %v2367_v43  ;;  %10602 = vmatmul.msk.bf16.gmra.mxu2 %vm2798_vm6, %v13035_v45  ;;  %v2764_v47 = vshll.u32 %v13035_v45, 16 }
 0x1f6   :  { %v13041_v49 = vrot.slane %v2764_v47, 1  ;;  %v2768_v47 = vshrl.u32 %v13035_v45, 16 }
 0x1f8   :  { %v2767_v53 = vsel %vm2755_vm7, %v2762_v48, %v13041_v49 }
 0x1f9   :  { %v1764_v51 = vld [vmem:[#allocation2 + $0xa1] sm:$0xff]  ;;  %v1149_v52 = vpop.f32.mrf.mxu0  ;;  %10593 = vmatmul.msk.bf16.vlgmr.msra.gmra.mxu1 %vm2798_vm6, %v2767_v53 }
 0x1fa   :  { %v1905_v54 = vmax.f32 %v1144_v33, %v1764_v51  ;;  %1480 = vst [vmem:[#allocation2 + $0xb0] sm:$0xff] %v1149_v52 }
 0x1fc   :  { %1188 = vmatmul.bf16.gmra.mxu0 %v11961_v50  ;;  %v2892_v50 = vrot.slane %v13035_v45, 1 }
 0x201   :  { %v1765_v55 = vld [vmem:[#allocation2 + $0xa9] sm:$0xff]  ;;  %v1151_v56 = vpop.f32.mrf.mxu0 }
 0x202   :  { %v1906_v57 = vmax.f32 %v1146_v41, %v1765_v55  ;;  %1481 = vst [vmem:[#allocation2 + $0xb8] sm:$0xff] %v1151_v56  ;;  %v3170_v41 = vrot.slane %v3168_v32, 3 }
 0x204   :  { %v2053_v58 = vmax.f32 %v1903_v34, %v1906_v57 }
 0x206   :  { %2194 = vst [vmem:[#allocation3 + $0x90] sm:$0xff] %v2053_v58 }
 0x209   :  { %v1766_v60 = vld [vmem:[#allocation2 + $0xb1] sm:$0xff]  ;;  %v13052_v61 = vpop.f32.mrf.mxu0 }
 0x20a   :  { %v1907_v62 = vmax.f32 %v1149_v52, %v1766_v60  ;;  %1482 = vst [vmem:[#allocation2 + $0xc0] sm:$0xff] %v13052_v61 }
 0x20c   :  { %v2054_v63 = vmax.f32 %v1904_v42, %v1907_v62  ;;  %1193 = vmatmul.bf16.gmra.mxu0 %v11962_v59 }
 0x20e   :  { %2195 = vst [vmem:[#allocation3 + $0x98] sm:$0xff] %v2054_v63  ;;  %v3064_v63 = vshrl.u32 %v2985_v31, 16 }
 0x211   :  { %v1767_v0 = vld [vmem:[#allocation2 + $0xb9] sm:$0xff]  ;;  %v13055_v1 = vpop.f32.mrf.mxu0 }
 0x212   :  { %v1908_v2 = vmax.f32 %v1151_v56, %v1767_v0  ;;  %1483 = vst [vmem:[#allocation2 + $0xc8] sm:$0xff] %v13055_v1  ;;  %v3067_v0 = vshll.u32 %v2985_v31, 16 }
 0x214   :  { %v2055_v3 = vmax.f32 %v1905_v54, %v1908_v2  ;;  %v2770_v54 = vor.u32 %v2768_v47, %v13041_v49 }
 0x215   :  { %v2371_v5 = vld [vmem:[#allocation3 + $0x90] ss:$2 sm:$0xff] }
 0x216   :  { %2196 = vst [vmem:[#allocation3 + $0xa0] sm:$0xff] %v2055_v3  ;;  %v2374_v6 = vadd.f32 %v12987_v17, %v2371_v5  ;;  %v11965_v3 = vld [vmem:[%s15709_s0 + $0xb8] sm:$0xff] }
 0x218   :  { %v2376_v8 = vmax.f32 %v2374_v6, 0.0 }
 0x219   :  { %v13062_v9 = vld [vmem:[#allocation2 + $0xc1] sm:$0xff]  ;;  %v13064_v10 = vpop.f32.mrf.mxu0 }
 0x21a   :  { %v1909_v11 = vmax.f32 %v13052_v61, %v13062_v9  ;;  %1484 = vst [vmem:[#allocation2 + $0xd0] sm:$0xff] %v13064_v10  ;;  %v2378_v12 = vpack.c.bf16 %v2376_v8, %v2376_v8  ;;  %v3069_v8 = vrot.slane %v3067_v0, 3 }
 0x21c   :  { %1198 = vmatmul.bf16.gmra.mxu0 %v11963_v7  ;;  %v2382_v13 = vrot.slane %v2378_v12, 6  ;;  %v3066_v7 = vrot.slane %v3064_v63, 2 }
 0x21d   :  { %v2373_v15 = vld [vmem:[#allocation3 + $0xa0] ss:$2 sm:$0xf] }
 0x21e   :  { %v2375_v18 = vadd.f32 %v12987_v17, %v2373_v15  ;;  %2388 = vst.msk [vmem:[#allocation4 + $0x10] sm:$0xc] %vm2355_vm2, %v2382_v13  ;;  %v2383_v29 = vrot.slane %v2382_v13, 4  ;;  %v3070_v12 = vor.u32 %v3069_v8, %v3066_v7 }
 0x220   :  { %v2377_v20 = vmax.f32 %v2375_v18, 0.0 }
 0x221   :  { %v13074_v23 = vld [vmem:[#allocation2 + $0xc9] sm:$0xff]  ;;  %v1161_v24 = vpop.f32.mrf.mxu0 }
 0x222   :  { %v1910_v25 = vmax.f32 %v13055_v1, %v13074_v23  ;;  %1485 = vst [vmem:[#allocation2 + $0xd8] sm:$0xff] %v1161_v24  ;;  %v2379_v26 = vpack.c.bf16 %v2377_v20, %v2377_v20 }
 0x224   :  { %v2384_v30 = vrot.slane %v2379_v26, 6 }
 0x225   :  { %v13080_v34 = vld [vmem:[#allocation4 + $0xc] sm:$0xff] }
 0x226   :  { %v2385_v33 = vsel %vm13012_vm5, %v2383_v29, %v2384_v30  ;;  %v2992_v37 = vrot.slane %v13080_v34, 2  ;;  %v3171_v38 = vrot.slane %v13080_v34, 3  ;;  %v3072_v59 = vshrl.u32 %v13080_v34, 16  ;;  %v13138_v27 = vld [vmem:[#allocation4 + $0xc] sm:$0xff]  }
 0x227   :  { %2389 = vst.msk [vmem:[#allocation4 + $0x14] sm:$0xf] %vm2330_vm0, %v2385_v33  ;;  %v3075_v60 = vshll.u32 %v13080_v34, 16  ;;  %v12348_v28 = vld [vmem:[#allocation4 + $0xc] sm:$0xf0] }
 0x228   :  { %v13092_v43 = vsel %vm2990_vm8, %v2991_v36, %v2992_v37  ;;  %v13097_v44 = vsel %vm3169_vm9, %v3170_v41, %v3171_v38  ;;  %v3074_v1 = vrot.slane %v3072_v59, 2  ;;  %v12349_v30 = vld [vmem:[#allocation4 + $0xc] sm:$0xe] }
 0x229   :  { %v1770_v39 = vld [vmem:[#allocation2 + $0xd1] sm:$0xff]  ;;  %v1164_v40 = vpop.f32.mrf.mxu0  ;;  %v3077_v2 = vrot.slane %v3075_v60, 3  ;;  %v11967_v60 = vld [vmem:[%s15709_s0 + $0xc8] sm:$0xff] }
 0x22a   :  { %v1911_v42 = vmax.f32 %v13064_v10, %v1770_v39  ;;  %1486 = vst [vmem:[#allocation2 + $0xe0] sm:$0xff] %v1164_v40 }
 0x22b   :  { %v3078_v10 = vor.u32 %v3077_v2, %v3074_v1 }
 0x22c   :  { %1203 = vmatmul.bf16.gmra.mxu0 %v11964_v35 }
 0x22d   :  { %v3079_v13 = vsel %vm3062_vm11, %v3070_v12, %v3078_v10 }
 0x22e   :  { %v13099_v46 = vld [vmem:[#allocation4 + $0x10] sm:$0xff] }
 0x22f   :  { %10603 = vmatmul.msk.bf16.gmra.mxu2 %vm2798_vm6, %v13099_v46  ;;  %v2772_v48 = vshll.u32 %v13099_v46, 16  ;;  %v2894_v51 = vrot.slane %v13099_v46, 1  ;;  %v2776_v57 = vshrl.u32 %v13099_v46, 16 }
 0x231   :  { %v1771_v52 = vld [vmem:[#allocation2 + $0xd9] sm:$0xff]  ;;  %v1166_v53 = vpop.f32.mrf.mxu0  ;;  %v2774_v56 = vrot.slane %v2772_v48, 1  ;;  %v13114_v58 = vsel %vm2890_vm10, %v2892_v50, %v2894_v51 }
 0x232   :  { %v1912_v55 = vmax.f32 %v1161_v24, %v1771_v52  ;;  %1487 = vst [vmem:[#allocation2 + $0xe8] sm:$0xff] %v1166_v53 }
 0x233   :  { %v2775_v49 = vsel %vm2755_vm7, %v2770_v54, %v2774_v56  ;;  %v13119_v62 = vor.u32 %v2776_v57, %v2774_v56 }
 0x234   :  { %v2059_v61 = vmax.f32 %v1909_v11, %v1912_v55  ;;  %10594 = vmatmul.msk.bf16.gmra.mxu1 %vm2798_vm6, %v2775_v49 }
 0x236   :  { %2200 = vst [vmem:[#allocation3 + $0xc0] sm:$0xff] %v2059_v61 }
 0x239   :  { %v1772_v5 = vld [vmem:[#allocation2 + $0xe1] sm:$0xff]  ;;  %v13125_v6 = vpop.f32.mrf.mxu0 }
 0x23a   :  { %v1913_v9 = vmax.f32 %v1164_v40, %v1772_v5  ;;  %1488 = vst [vmem:[#allocation2 + $0xf0] sm:$0xff] %v13125_v6  ;;  %v12350_v40 = vor.u32 %v12349_v30, %v12348_v28 }
 0x23c   :  { %v2060_v11 = vmax.f32 %v1910_v25, %v1913_v9  ;;  %1208 = vmatmul.bf16.gmra.mxu0 %v11965_v3  ;;  %v3453_v54 = vrot.slane %v12350_v40, 1 }
 0x23e   :  { %2201 = vst [vmem:[#allocation3 + $0xc8] sm:$0xff] %v2060_v11 }
 0x23f   :  { %10643 = vmatmul.msk.bf16.vlgmr.msrb.gmra.mxu2 %vm2798_vm6, %v3079_v13 }
 0x241   :  { %v1773_v14 = vld [vmem:[#allocation2 + $0xe9] sm:$0xff]  ;;  %v13130_v15 = vpop.f32.mrf.mxu0 }
 0x242   :  { %v1914_v16 = vmax.f32 %v1166_v53, %v1773_v14  ;;  %1489 = vst [vmem:[#allocation2 + $0xf8] sm:$0xff] %v13130_v15  ;;  %v12027_v14 = vld [vmem:[%s15712_s3 + $0x10] sm:$0xff] }
 0x243   :  { %2925 = vmatpush.bf16.msrb.mxu3 %v12027_v14 }
 0x244   :  { %v2061_v18 = vmax.f32 %v1911_v42, %v1914_v16 }
 0x245   :  { %v2391_v19 = vld [vmem:[#allocation3 + $0xc0] ss:$2 sm:$0xff] }
 0x246   :  { %2202 = vst [vmem:[#allocation3 + $0xd0] sm:$0xff] %v2061_v18  ;;  %v2394_v20 = vadd.f32 %v12987_v17, %v2391_v19 }
 0x248   :  { %v2396_v22 = vmax.f32 %v2394_v20, 0.0 }
 0x249   :  { %v1774_v23 = vld [vmem:[#allocation2 + $0xf1] sm:$0xff]  ;;  %v1174_v24 = vpop.f32.mrf.mxu0  ;;  %v2863_v19 = vpop.f32.mrf.mxu2 }
 0x24a   :  { %v1915_v25 = vmax.f32 %v13125_v6, %v1774_v23  ;;  %1490 = vst [vmem:[#allocation2 + $0x100] sm:$0xff] %v1174_v24  ;;  %v2398_v26 = vpack.c.bf16 %v2396_v22, %v2396_v22  ;;  %v11968_v6 = vld [vmem:[%s15709_s0 + $0xd0] sm:$0xff]  ;;  %v11969_v22 = vld [vmem:[%s15709_s0 + $0xd8] sm:$0xff] }
 0x24c   :  { %1213 = vmatmul.bf16.gmra.mxu0 %v11966_v21  ;;  %2400 = vst.msk [vmem:[#allocation4 + $0x18] sm:$0xf] %vm2330_vm0, %v2398_v26 }
 0x24d   :  { %v2393_v29 = vld [vmem:[#allocation3 + $0xd0] ss:$2 sm:$0xf] }
 0x24e   :  { %v2395_v31 = vadd.f32 %v12987_v17, %v2393_v29 }
 0x250   :  { %v2397_v32 = vmax.f32 %v2395_v31, 0.0 }
 0x251   :  { %v1775_v33 = vld [vmem:[#allocation2 + $0xf9] sm:$0xff]  ;;  %v1176_v35 = vpop.f32.mrf.mxu0 }
 0x252   :  { %v1916_v36 = vmax.f32 %v13130_v15, %v1775_v33  ;;  %1491 = vst [vmem:[#allocation2 + $0x108] sm:$0xff] %v1176_v35  ;;  %v2399_v39 = vpack.c.bf16 %v2397_v32, %v2397_v32 }
 0x253   :  { %v13143_v41 = vld [vmem:[#allocation4 + $0x14] sm:$0xff] }
 0x254   :  { %v13145_v42 = vld [vmem:[#allocation4 + $0x14] sm:$0xff]  ;;  %2401 = vst.msk [vmem:[#allocation4 + $0x1c] sm:$0x3] %vm2332_vm1, %v2399_v39  ;;  %v3081_v47 = vshrl.u32 %v13143_v41, 16  ;;  %v3084_v48 = vshll.u32 %v13143_v41, 16  ;;  %v2994_v52 = vrot.slane %v13143_v41, 2 }
 0x255   :  { %v3173_v53 = vrot.slane %v13143_v41, 3  ;;  %v3454_v55 = vrot.slane %v13145_v42, 1 }
 0x256   :  { %v3083_v56 = vrot.slane %v3081_v47, 2  ;;  %v3086_v57 = vrot.slane %v3084_v48, 3  ;;  %v13158_v59 = vsel %vm2990_vm8, %v2992_v37, %v2994_v52 }
 0x257   :  { %v13168_v61 = vsel %vm3169_vm9, %v3171_v38, %v3173_v53  ;;  %v13173_v49 = vsel %vm2890_vm10, %v3453_v54, %v3454_v55 }
 0x258   :  { %v13175_v37 = vor.u32 %v3086_v57, %v3083_v56  ;;  %v11970_v56 = vld [vmem:[%s15709_s0 + $0xe0] sm:$0xff] }
 0x259   :  { %v1776_v63 = vld [vmem:[#allocation2 + $0x101] sm:$0xff]  ;;  %v1179_v0 = vpop.f32.mrf.mxu0 }
 0x25a   :  { %v1917_v1 = vmax.f32 %v1174_v24, %v1776_v63  ;;  %1492 = vst [vmem:[#allocation2 + $0x110] sm:$0xff] %v1179_v0  ;;  %v3088_v2 = vsel %vm3062_vm11, %v3078_v10, %v13175_v37 }
 0x25b   :  { %10644 = vmatmul.msk.bf16.gmra.mxu2 %vm2798_vm6, %v3088_v2 }
 0x25c   :  { %1218 = vmatmul.bf16.gmra.mxu0 %v11967_v60  ;;  %v12031_v60 = vld [vmem:[%s15712_s3 + $0x18] sm:$0xff] }
 0x25d   :  { %3025 = vmatpush.bf16.msrb.mxu1 %v12031_v60 }
 0x261   :  { %v1777_v34 = vld [vmem:[#allocation2 + $0x109] sm:$0xff]  ;;  %v1181_v38 = vpop.f32.mrf.mxu0 }
 0x262   :  { %v1918_v3 = vmax.f32 %v1176_v35, %v1777_v34  ;;  %1493 = vst [vmem:[#allocation2 + $0x118] sm:$0xff] %v1181_v38 }
 0x264   :  { %v2065_v5 = vmax.f32 %v1915_v25, %v1918_v3 }
 0x266   :  { %2206 = vst [vmem:[#allocation3 + $0xf0] sm:$0xff] %v2065_v5 }
 0x269   :  { %v1778_v7 = vld [vmem:[#allocation2 + $0x111] sm:$0xff]  ;;  %v13183_v8 = vpop.f32.mrf.mxu0 }
 0x26a   :  { %v1919_v9 = vmax.f32 %v1179_v0, %v1778_v7  ;;  %1494 = vst [vmem:[#allocation2 + $0x120] sm:$0xff] %v13183_v8 }
 0x26c   :  { %v2066_v10 = vmax.f32 %v1916_v36, %v1919_v9  ;;  %1223 = vmatmul.bf16.gmra.mxu0 %v11968_v6 }
 0x26e   :  { %2207 = vst [vmem:[#allocation3 + $0xf8] sm:$0xff] %v2066_v10 }
 0x271   :  { %v1779_v11 = vld [vmem:[#allocation2 + $0x119] sm:$0xff]  ;;  %v13186_v12 = vpop.f32.mrf.mxu0 }
 0x272   :  { %v1920_v13 = vmax.f32 %v1181_v38, %v1779_v11  ;;  %1495 = vst [vmem:[#allocation2 + $0x128] sm:$0xff] %v13186_v12  ;;  %v12299_v38 = vld [vmem:[#allocation4] sm:$0xf0] }
 0x274   :  { %v2067_v15 = vmax.f32 %v1917_v1, %v1920_v13 }
 0x275   :  { %v2403_v16 = vld [vmem:[#allocation3 + $0xf0] ss:$2 sm:$0xff] }
 0x276   :  { %2208 = vst [vmem:[#allocation3 + $0x100] sm:$0xff] %v2067_v15  ;;  %v2406_v18 = vadd.f32 %v12987_v17, %v2403_v16  ;;  %v2820_v20 = vpop.f32.mrf.mxu1 }
 0x277   :  { %v13193_v21 = vadd.f32 %v2863_v19, %v2820_v20 }
 0x278   :  { %v2408_v23 = vmax.f32 %v2406_v18, 0.0 }
 0x279   :  { %v1780_v24 = vld [vmem:[#allocation2 + $0x121] sm:$0xff]  ;;  %v13198_v25 = vpop.f32.mrf.mxu0 }
 0x27a   :  { %v1921_v26 = vmax.f32 %v13183_v8, %v1780_v24  ;;  %1496 = vst [vmem:[#allocation2 + $0x130] sm:$0xff] %v13198_v25  ;;  %v2410_v28 = vpack.c.bf16 %v2408_v23, %v2408_v23  ;;  %v12300_v8 = vld [vmem:[#allocation4] sm:$0xe] }
 0x27b   :  { %v12301_v13 = vor.u32 %v12300_v8, %v12299_v38 }
 0x27c   :  { %1228 = vmatmul.bf16.gmra.mxu0 %v11969_v22  ;;  %v2414_v29 = vrot.slane %v2410_v28, 6 }
 0x27d   :  { %v2405_v30 = vld [vmem:[#allocation3 + $0x100] ss:$2 sm:$0xf]  ;;  %v2891_v28 = vrot.slane %v12301_v13, 1 }
 0x27e   :  { %v2407_v31 = vadd.f32 %v12987_v17, %v2405_v30  ;;  %2420 = vst.msk [vmem:[#allocation4 + $0x1c] sm:$0xc] %vm2355_vm2, %v2414_v29  ;;  %v2415_v40 = vrot.slane %v2414_v29, 4 }
 0x280   :  { %v2409_v32 = vmax.f32 %v2407_v31, 0.0 }
 0x281   :  { %v1781_v33 = vld [vmem:[#allocation2 + $0x129] sm:$0xff]  ;;  %v1191_v35 = vpop.f32.mrf.mxu0 }
 0x282   :  { %v1922_v36 = vmax.f32 %v13186_v12, %v1781_v33  ;;  %1497 = vst [vmem:[#allocation2 + $0x138] sm:$0xff] %v1191_v35  ;;  %v2411_v39 = vpack.c.bf16 %v2409_v32, %v2409_v32 }
 0x284   :  { %v2416_v47 = vrot.slane %v2411_v39, 6 }
 0x285   :  { %v13207_v54 = vld [vmem:[#allocation4 + $0x18] sm:$0xff] }
 0x286   :  { %v2417_v48 = vsel %vm13012_vm5, %v2415_v40, %v2416_v47  ;;  %10604 = vmatmul.msk.bf16.vlgmr.msra.gmra.mxu3 %vm2798_vm6, %v13207_v54  ;;  %v2780_v57 = vshll.u32 %v13207_v54, 16 }
 0x287   :  { %2421 = vst.msk [vmem:[#allocation4 + $0x20] sm:$0xf] %vm2330_vm0, %v2417_v48 }
 0x288   :  { %v2782_v2 = vrot.slane %v2780_v57, 1 }
 0x289   :  { %v1782_v63 = vld [vmem:[#allocation2 + $0x131] sm:$0xff]  ;;  %v1194_v0 = vpop.f32.mrf.mxu0 }
 0x28a   :  { %v1923_v1 = vmax.f32 %v13198_v25, %v1782_v63  ;;  %1498 = vst [vmem:[#allocation2 + $0x140] sm:$0xff] %v1194_v0  ;;  %v2783_v34 = vsel %vm2755_vm7, %v13119_v62, %v2782_v2 }
 0x28b   :  { %10595 = vmatmul.msk.bf16.gmra.mxu1 %vm2798_vm6, %v2783_v34 }
 0x28c   :  { %1233 = vmatmul.bf16.gmra.mxu0 %v11970_v56 }
 0x28e   :  { %v13223_v3 = vld [vmem:[#allocation4 + $0x1c] sm:$0xff] }
 0x28f   :  { %v2728_v5 = vld [vmem:[#allocation4 + $0x20] sm:$0x1]  ;;  %v3090_v9 = vshrl.u32 %v13223_v3, 16  ;;  %v3093_v10 = vshll.u32 %v13223_v3, 16  ;;  %v3175_v62 = vrot.slane %v13223_v3, 3 }
 0x290   :  { %v13225_v6 = vld [vmem:[#allocation4 + $0x1c] sm:$0xff]  ;;  %v2749_v7 = vunpack.c.l.b16 %v2728_v5 }
 0x291   :  { %v1783_v11 = vld [vmem:[#allocation2 + $0x139] sm:$0xff]  ;;  %v1196_v12 = vpop.f32.mrf.mxu0  ;;  %v3456_v15 = vrot.slane %v13225_v6, 1  ;;  %v3092_v18 = vrot.slane %v3090_v9, 2  ;;  %v3095_v19 = vrot.slane %v3093_v10, 3  ;;  %v13238_v20 = vsel %vm3169_vm9, %v3173_v53, %v3175_v62 }
 0x292   :  { %v13229_v14 = vpack.c.b16 %v2749_v7, %v2749_v7  ;;  %v1924_v16 = vmax.f32 %v1191_v35, %v1783_v11  ;;  %1499 = vst [vmem:[#allocation2 + $0x148] sm:$0xff] %v1196_v12  ;;  %v2893_v53 = vsel %vm2890_vm10, %v2891_v28, %v2892_v50 }
 0x293   :  { %v13240_v23 = vor.u32 %v3095_v19, %v3092_v18  ;;  %v13248_v25 = vsel %vm2890_vm10, %v3454_v55, %v3456_v15  ;;  %v2784_v55 = vshrl.u32 %v13207_v54, 16  ;;  %v2896_v18 = vrot.slane %v13207_v54, 1  ;;  %v11973_v54 = vld [vmem:[%s15709_s0 + $0xf8] sm:$0xff] }
 0x294   :  { %v2071_v22 = vmax.f32 %v1921_v26, %v1924_v16  ;;  %v2788_v24 = vshll.u32 %v13229_v14, 16  ;;  %v11971_v26 = vld [vmem:[%s15709_s0 + $0xe8] sm:$0xff] }
 0x295   :  { %v3097_v29 = vsel %vm3062_vm11, %v13175_v37, %v13240_v23  ;;  %v2786_v45 = vor.u32 %v2784_v55, %v2782_v2  ;;  %v13280_v2 = vpop.f32.mrf.mxu1 }
 0x296   :  { %2212 = vst [vmem:[#allocation3 + $0x120] sm:$0xff] %v2071_v22  ;;  %10645 = vmatmul.msk.bf16.gmra.mxu2 %vm2798_vm6, %v3097_v29  ;;  %10611 = vmatmul.msk.bf16.vlgmr.msrb.gmra.mxu3 %vm2798_vm6, %v2893_v53  ;;  %v2790_v30 = vrot.slane %v2788_v24, 1  ;;  %v2897_v24 = vsel %vm2890_vm10, %v2894_v51, %v2896_v18 }
 0x298   :  { %v2791_v50 = vsel %vm2755_vm7, %v2786_v45, %v2790_v30 }
 0x299   :  { %v1784_v31 = vld [vmem:[#allocation2 + $0x141] sm:$0xff]  ;;  %v13262_v32 = vpop.f32.mrf.mxu0 }
 0x29a   :  { %v1925_v33 = vmax.f32 %v1194_v0, %v1784_v31  ;;  %1500 = vst [vmem:[#allocation2 + $0x150] sm:$0xff] %v13262_v32  ;;  %v13278_v0 = vpop.f32.mrf.mxu2 }
 0x29b   :  { %10596 = vmatmul.msk.bf16.gmra.mxu1 %vm2798_vm6, %v2791_v50 }
 0x29c   :  { %v2072_v37 = vmax.f32 %v1922_v36, %v1925_v33  ;;  %1238 = vmatmul.bf16.gmra.mxu0 %v11971_v26  ;;  %v11972_v36 = vld [vmem:[%s15709_s0 + $0xf0] sm:$0xff] }
 0x29e   :  { %2213 = vst [vmem:[#allocation3 + $0x128] sm:$0xff] %v2072_v37 }
 0x2a1   :  { %v1785_v35 = vld [vmem:[#allocation2 + $0x149] sm:$0xff]  ;;  %v13267_v39 = vpop.f32.mrf.mxu0 }
 0x2a2   :  { %v1926_v40 = vmax.f32 %v1196_v12, %v1785_v35  ;;  %1501 = vst [vmem:[#allocation2 + $0x158] sm:$0xff] %v13267_v39  ;;  %v2868_v10 = vpop.f32.mrf.mxu2  ;;  %v2898_v35 = vrot.slane %v13229_v14, 1  ;;  %v12038_v14 = vld [vmem:[%s15712_s3 + $0x30] sm:$0xff] }
 0x2a3   :  { %3290 = vmatpush.bf16.msra.mxu1 %v12038_v14 }
 0x2a4   :  { %v2073_v47 = vmax.f32 %v1923_v1, %v1926_v40  ;;  %v3363_v40 = vshll.u32 %v13145_v42, 16 }
 0x2a5   :  { %v2423_v48 = vld [vmem:[#allocation3 + $0x120] ss:$2 sm:$0xff] }
 0x2a6   :  { %2214 = vst [vmem:[#allocation3 + $0x130] sm:$0xff] %v2073_v47  ;;  %v2426_v56 = vadd.f32 %v12987_v17, %v2423_v48  ;;  %10612 = vmatmul.msk.bf16.gmra.mxu3 %vm2798_vm6, %v13114_v58  ;;  %v12042_v58 = vld [vmem:[%s15712_s3 + $0x38] sm:$0xff]  ;;  %v2899_v47 = vsel %vm2890_vm10, %v2896_v18, %v2898_v35 }
 0x2a7   :  { %3416 = vmatpush.bf16.msra.mxu2 %v12042_v58 }
 0x2a8   :  { %v2428_v57 = vmax.f32 %v2426_v56, 0.0 }
 0x2a9   :  { %v1786_v60 = vld [vmem:[#allocation2 + $0x151] sm:$0xff]  ;;  %v13276_v63 = vpop.f32.mrf.mxu0 }
 0x2aa   :  { %v1927_v1 = vmax.f32 %v13262_v32, %v1786_v60  ;;  %1502 = vst [vmem:[#allocation2 + $0x160] sm:$0xff] %v13276_v63  ;;  %v2430_v34 = vpack.c.bf16 %v2428_v57, %v2428_v57  ;;  %v3356_v60 = vshrl.u32 %v13138_v27, 16 }
 0x2ab   :  { %10633 = vmatmul.msk.bf16.vlgmr.msrb.gmra.mxu1 %vm2798_vm6, %v13092_v43  ;;  %v12033_v43 = vld [vmem:[%s15712_s3 + $0x28] sm:$0xff] }
 0x2ac   :  { %1243 = vmatmul.bf16.gmra.mxu0 %v11972_v36  ;;  %2432 = vst.msk [vmem:[#allocation4 + $0x24] sm:$0xf] %vm2330_vm0, %v2430_v34  ;;  %3204 = vmatpush.bf16.msra.mxu3 %v12033_v43 }
 0x2ad   :  { %v2425_v38 = vld [vmem:[#allocation3 + $0x130] ss:$2 sm:$0xf] }
 0x2ae   :  { %v2427_v5 = vadd.f32 %v12987_v17, %v2425_v38 }
 0x2b0   :  { %v2429_v7 = vmax.f32 %v2427_v5, 0.0 }
 0x2b1   :  { %v1787_v8 = vld [vmem:[#allocation2 + $0x159] sm:$0xff]  ;;  %v1206_v9 = vpop.f32.mrf.mxu0  ;;  %v2825_v12 = vpop.f32.mrf.mxu1 }
 0x2b2   :  { %v1928_v11 = vmax.f32 %v13267_v39, %v1787_v8  ;;  %1503 = vst [vmem:[#allocation2 + $0x168] sm:$0xff] %v1206_v9  ;;  %v2431_v13 = vpack.c.bf16 %v2429_v7, %v2429_v7  ;;  %v13292_v16 = vadd.f32 %v2868_v10, %v2825_v12 }
 0x2b3   :  { %v3055_v19 = vld [vmem:[#allocation4 + $0x24] sm:$0x7] }
 0x2b4   :  { %v3060_v22 = vunpack.c.l.b16 %v3055_v19  ;;  %2433 = vst.msk [vmem:[#allocation4 + $0x28] sm:$0x3] %vm2332_vm1, %v2431_v13  ;;  %v2963_v58 = vld [vmem:[#allocation4 + $0x24] sm:$0x3]  ;;  %v11975_v13 = vld [vmem:[%s15709_s0 + $0x108] sm:$0xff] }
 0x2b5   :  { %v2984_v5 = vunpack.c.l.b16 %v2963_v58 }
 0x2b6   :  { %v3061_v17 = vpack.c.b16 %v3060_v22, %v3060_v22  ;;  %10613 = vmatmul.msk.bf16.gmra.mxu3 %vm2798_vm6, %v2897_v24  ;;  %v3367_v24 = vshrl.u32 %v13145_v42, 16 }
 0x2b7   :  { %v2989_v41 = vpack.c.b16 %v2984_v5, %v2984_v5 }
 0x2b8   :  { %v3099_v28 = vshrl.u32 %v3061_v17, 16  ;;  %v3102_v29 = vshll.u32 %v3061_v17, 16  ;;  %v3177_v53 = vrot.slane %v3061_v17, 3 }
 0x2b9   :  { %v1788_v26 = vld [vmem:[#allocation2 + $0x161] sm:$0xff]  ;;  %v1209_v55 = vpop.f32.mrf.mxu0  ;;  %v2998_v18 = vrot.slane %v2989_v41, 2 }
 0x2ba   :  { %v1929_v30 = vmax.f32 %v13276_v63, %v1788_v26  ;;  %1504 = vst [vmem:[#allocation2 + $0x170] sm:$0xff] %v1209_v55  ;;  %v3101_v31 = vrot.slane %v3099_v28, 2  ;;  %v3104_v32 = vrot.slane %v3102_v29, 3  ;;  %v13310_v46 = vsel %vm3169_vm9, %v3175_v62, %v3177_v53 }
 0x2bb   :  { %10634 = vmatmul.msk.bf16.gmra.mxu1 %vm2798_vm6, %v13158_v59  ;;  %v3358_v62 = vshll.u32 %v13138_v27, 16  ;;  %v11974_v59 = vld [vmem:[%s15709_s0 + $0x100] sm:$0xff]  ;;  %v3365_v63 = vrot.slane %v3363_v40, 1 }
 0x2bc   :  { %1248 = vmatmul.bf16.gmra.mxu0 %v11973_v54  ;;  %v3105_v51 = vor.u32 %v3104_v32, %v3101_v31 }
 0x2bd   :  { %v3360_v48 = vrot.slane %v3358_v62, 1  ;;  %v3369_v29 = vor.u32 %v3367_v24, %v3365_v63 }
 0x2be   :  { %v3106_v33 = vsel %vm3062_vm11, %v13240_v23, %v3105_v51  ;;  %v2996_v23 = vrot.slane %v13223_v3, 2 }
 0x2bf   :  { %10646 = vmatmul.msk.bf16.gmra.mxu2 %vm2798_vm6, %v3106_v33  ;;  %v3361_v34 = vor.u32 %v3360_v48, %v3356_v60  ;;  %v3375_v48 = vshrl.u32 %v13225_v6, 16 }
 0x2c0   :  { %v2997_v3 = vsel %vm2990_vm8, %v2994_v52, %v2996_v23  ;;  %v3371_v52 = vshll.u32 %v13225_v6, 16 }
 0x2c1   :  { %v1789_v45 = vld [vmem:[#allocation2 + $0x169] sm:$0xff]  ;;  %v1211_v37 = vpop.f32.mrf.mxu0  ;;  %v3366_v38 = vsel %vm2755_vm7, %v3361_v34, %v3365_v63 }
 0x2c2   :  { %v1930_v50 = vmax.f32 %v1206_v9, %v1789_v45  ;;  %1505 = vst [vmem:[#allocation2 + $0x178] sm:$0xff] %v1211_v37  ;;  %v3373_v54 = vrot.slane %v3371_v52, 1 }
 0x2c4   :  { %v2077_v39 = vmax.f32 %v1927_v1, %v1930_v50  ;;  %v3377_v14 = vor.u32 %v3375_v48, %v3373_v54 }
 0x2c6   :  { %2218 = vst [vmem:[#allocation3 + $0x150] sm:$0xff] %v2077_v39  ;;  %10614 = vmatmul.msk.bf16.gmra.mxu3 %vm2798_vm6, %v2899_v47  ;;  %v11976_v39 = vld [vmem:[%s15709_s0 + $0x110] sm:$0xff] }
 0x2c9   :  { %v1790_v56 = vld [vmem:[#allocation2 + $0x171] sm:$0xff]  ;;  %v13326_v36 = vpop.f32.mrf.mxu0 }
 0x2ca   :  { %v1931_v57 = vmax.f32 %v1209_v55, %v1790_v56  ;;  %1506 = vst [vmem:[#allocation2 + $0x180] sm:$0xff] %v13326_v36  ;;  %v3374_v55 = vsel %vm2755_vm7, %v3369_v29, %v3373_v54  ;;  %v13410_v54 = vpop.f32.mrf.mxu1 }
 0x2cb   :  { %10635 = vmatmul.msk.bf16.gmra.mxu1 %vm2798_vm6, %v2997_v3 }
 0x2cc   :  { %v2078_v1 = vmax.f32 %v1928_v11, %v1931_v57  ;;  %1253 = vmatmul.bf16.gmra.mxu0 %v11974_v59  ;;  %v13346_v11 = vld [vmem:[%s15711_s2] ss:$0 sm:$0xff] }
 0x2cd   :  { %v12047_v57 = vld [vmem:[%s15712_s3] sm:$0xff] }
 0x2ce   :  { %2219 = vst [vmem:[#allocation3 + $0x158] sm:$0xff] %v2078_v1  ;;  %3665 = vmatpush.bf16.msrb.mxu2 %v12047_v57 }
 0x2cf   :  { %10701 = vmatmul.msk.bf16.vlgmr.msra.gmra.mxu2 %vm2798_vm6, %v3366_v38  ;;  %v13387_v38 = vpop.f32.mrf.mxu2 }
 0x2d1   :  { %v1791_v7 = vld [vmem:[#allocation2 + $0x179] sm:$0xff]  ;;  %v13339_v27 = vpop.f32.mrf.mxu0 }
 0x2d2   :  { %v1932_v8 = vmax.f32 %v1211_v37, %v1791_v7  ;;  %1507 = vst [vmem:[#allocation2 + $0x188] sm:$0xff] %v13339_v27  ;;  %v12043_v7 = vld [vmem:[%s15712_s3 + $0x40] sm:$0xff] }
 0x2d3   :  { %3487 = vmatpush.bf16.msrb.mxu3 %v12043_v7 }
 0x2d4   :  { %v2079_v9 = vmax.f32 %v1929_v30, %v1932_v8 }
 0x2d5   :  { %v2435_v10 = vld [vmem:[#allocation3 + $0x150] ss:$2 sm:$0xff] }
 0x2d6   :  { %2220 = vst [vmem:[#allocation3 + $0x160] sm:$0xff] %v2079_v9  ;;  %v2438_v12 = vadd.f32 %v13346_v11, %v2435_v10  ;;  %10653 = vmatmul.msk.bf16.vlgmr.msra.gmra.mxu3 %vm2798_vm6, %v13097_v44  ;;  %v2999_v44 = vsel %vm2990_vm8, %v2996_v23, %v2998_v18  ;;  %v11977_v9 = vld [vmem:[%s15709_s0 + $0x118] sm:$0xff]  ;;  %v12035_v18 = vld [vmem:[#allocation4 + $0x14] sm:$0xff] }
 0x2d8   :  { %v2440_v19 = vmax.f32 %v2438_v12, 0.0 }
 0x2d9   :  { %v1792_v43 = vld [vmem:[#allocation2 + $0x181] sm:$0xff]  ;;  %v13354_v22 = vpop.f32.mrf.mxu0 }
 0x2da   :  { %v1933_v17 = vmax.f32 %v13326_v36, %v1792_v43  ;;  %1508 = vst [vmem:[#allocation2 + $0x190] sm:$0xff] %v13354_v22  ;;  %v2442_v28 = vpack.c.bf16 %v2440_v19, %v2440_v19  ;;  %v13403_v19 = vpop.f32.mrf.mxu2 }
 0x2db   :  { %10636 = vmatmul.msk.bf16.gmra.mxu1 %vm2798_vm6, %v2999_v44 }
 0x2dc   :  { %1258 = vmatmul.bf16.gmra.mxu0 %v11975_v13  ;;  %v2446_v53 = vrot.slane %v2442_v28, 6 }
 0x2dd   :  { %v2437_v26 = vld [vmem:[#allocation3 + $0x160] ss:$2 sm:$0xf] }
 0x2de   :  { %v2439_v30 = vadd.f32 %v13346_v11, %v2437_v26  ;;  %2452 = vst.msk [vmem:[#allocation4 + $0x28] sm:$0xc] %vm2355_vm2, %v2446_v53  ;;  %v2447_v45 = vrot.slane %v2446_v53, 4 }
 0x2df   :  { %10702 = vmatmul.msk.bf16.gmra.mxu2 %vm2798_vm6, %v3374_v55  ;;  %v11978_v55 = vld [vmem:[%s15709_s0 + $0x120] sm:$0xff] }
 0x2e0   :  { %v2441_v31 = vmax.f32 %v2439_v30, 0.0 }
 0x2e1   :  { %v1793_v42 = vld [vmem:[#allocation2 + $0x189] sm:$0xff]  ;;  %v1221_v32 = vpop.f32.mrf.mxu0 }
 0x2e2   :  { %v1934_v51 = vmax.f32 %v13339_v27, %v1793_v42  ;;  %1509 = vst [vmem:[#allocation2 + $0x198] sm:$0xff] %v1221_v32  ;;  %v2443_v33 = vpack.c.bf16 %v2441_v31, %v2441_v31  ;;  %v13413_v53 = vpop.f32.mrf.mxu2 }
 0x2e3   :  { %15726 = vst [vmem:[#allocation20_spill] sm:$0xff] %v13413_v53 }
 0x2e4   :  { %v2448_v37 = vrot.slane %v2443_v33, 6 }
 0x2e5   :  { %v12041_v50 = vld [vmem:[#allocation4 + $0x24] sm:$0xff] }
 0x2e6   :  { %v2449_v35 = vsel %vm13012_vm5, %v2447_v45, %v2448_v37  ;;  %10654 = vmatmul.msk.bf16.gmra.mxu3 %vm2798_vm6, %v13168_v61  ;;  %v3379_v62 = vshll.u32 %v12041_v50, 16  ;;  %v3458_v40 = vrot.slane %v12041_v50, 1  ;;  %v12034_v61 = vld [vmem:[#allocation4 + $0xc] sm:$0xff]  ;;  %v3383_v12 = vshrl.u32 %v12041_v50, 16  ;;  %v12036_v37 = vld [vmem:[#allocation4 + $0x1c] sm:$0xff] }
 0x2e7   :  { %2453 = vst.msk [vmem:[#allocation4 + $0x2c] sm:$0xf] %vm2330_vm0, %v2449_v35  ;;  %v12302_v35 = vld [vmem:[#allocation4 + $0x20] sm:$0xff]  }
 0x2e8   :  { %v3381_v56 = vrot.slane %v3379_v62, 1  ;;  %v13379_v36 = vsel %vm2890_vm10, %v3456_v15, %v3458_v40 }
 0x2e9   :  { %v1794_v47 = vld [vmem:[#allocation2 + $0x191] sm:$0xff]  ;;  %v1224_v59 = vpop.f32.mrf.mxu0 }
 0x2ea   :  { %v1935_v23 = vmax.f32 %v13354_v22, %v1794_v47  ;;  %1510 = vst [vmem:[#allocation2 + $0x1a0] sm:$0xff] %v1224_v59  ;;  %v3382_v60 = vsel %vm2755_vm7, %v3377_v14, %v3381_v56  ;;  %v3385_v22 = vor.u32 %v3383_v12, %v3381_v56  ;;  %v13434_v62 = vpop.f32.mrf.mxu2  ;;  %v11979_v14 = vld [vmem:[%s15709_s0 + $0x128] sm:$0xff] }
 0x2eb   :  { %10679 = vmatmul.msk.bf16.vlgmr.msra.gmra.mxu1 %vm2798_vm6, %v12034_v61 }
 0x2ec   :  { %1263 = vmatmul.bf16.gmra.mxu0 %v11976_v39 }
 0x2ee   :  { %v3328_v63 = vld [vmem:[#allocation4 + $0x2c] sm:$0x1] }
 0x2ef   :  { %10703 = vmatmul.msk.bf16.gmra.mxu2 %vm2798_vm6, %v3382_v60  ;;  %v3349_v1 = vunpack.c.l.b16 %v3328_v63 }
 0x2f1   :  { %v1795_v6 = vld [vmem:[#allocation2 + $0x199] sm:$0xff]  ;;  %v1226_v3 = vpop.f32.mrf.mxu0  ;;  %v3354_v15 = vpack.c.b16 %v3349_v1, %v3349_v1 }
 0x2f2   :  { %v1936_v34 = vmax.f32 %v1221_v32, %v1795_v6  ;;  %1511 = vst [vmem:[#allocation2 + $0x1a8] sm:$0xff] %v1226_v3  ;;  %v12048_v32 = vld [vmem:[%s15712_s3 + $0x8] sm:$0xff]  ;;  %v13447_v63 = vpop.f32.mrf.mxu2 }
 0x2f3   :  { %v3460_v58 = vrot.slane %v3354_v15, 1  ;;  %v3387_v8 = vshll.u32 %v3354_v15, 16  ;;  %3622 = vmatpush.bf16.msrb.mxu1 %v12048_v32 }
 0x2f4   :  { %v2083_v5 = vmax.f32 %v1933_v17, %v1936_v34  ;;  %v12037_v34 = vld [vmem:[#allocation4 + $0x24] sm:$0xff] }
 0x2f5   :  { %v13393_v27 = vsel %vm2890_vm10, %v3458_v40, %v3460_v58  ;;  %v3389_v13 = vrot.slane %v3387_v8, 1 }
 0x2f6   :  { %2224 = vst [vmem:[#allocation3 + $0x180] sm:$0xff] %v2083_v5  ;;  %10655 = vmatmul.msk.bf16.gmra.mxu3 %vm2798_vm6, %v13238_v20 }
 0x2f7   :  { %v3390_v20 = vsel %vm2755_vm7, %v3385_v22, %v3389_v13 }
 0x2f9   :  { %v1796_v41 = vld [vmem:[#allocation2 + $0x1a1] sm:$0xff]  ;;  %v13400_v10 = vpop.f32.mrf.mxu0 }
 0x2fa   :  { %v1937_v52 = vmax.f32 %v1224_v59, %v1796_v41  ;;  %1512 = vst [vmem:[#allocation2 + $0x1b0] sm:$0xff] %v13400_v10  ;;  %v13460_v8 = vpop.f32.mrf.mxu2 }
 0x2fb   :  { %10680 = vmatmul.msk.bf16.gmra.mxu1 %vm2798_vm6, %v12035_v18  ;;  %v3562_v18 = vshrl.u32 %v12302_v35, 16 }
 0x2fc   :  { %v2084_v43 = vmax.f32 %v1934_v51, %v1937_v52  ;;  %1268 = vmatmul.bf16.gmra.mxu0 %v11977_v9  ;;  %v3564_v9 = vshll.u32 %v12302_v35, 16 }
 0x2fe   :  { %2225 = vst [vmem:[#allocation3 + $0x188] sm:$0xff] %v2084_v43  ;;  %v3566_v13 = vrot.slane %v3564_v9, 1  ;;  %v11980_v43 = vld [vmem:[%s15709_s0 + $0x130] sm:$0xff] }
 0x2ff   :  { %10704 = vmatmul.msk.bf16.gmra.mxu2 %vm2798_vm6, %v3390_v20 }
 0x301   :  { %v1797_v17 = vld [vmem:[#allocation2 + $0x1a9] sm:$0xff]  ;;  %v13408_v24 = vpop.f32.mrf.mxu0 }
 0x302   :  { %v1938_v28 = vmax.f32 %v1226_v3, %v1797_v17  ;;  %1513 = vst [vmem:[#allocation2 + $0x1b8] sm:$0xff] %v13408_v24 }
 0x304   :  { %v2085_v44 = vmax.f32 %v1935_v23, %v1938_v28 }
 0x305   :  { %v2455_v29 = vld [vmem:[#allocation3 + $0x180] ss:$2 sm:$0xff] }
 0x306   :  { %2226 = vst [vmem:[#allocation3 + $0x190] sm:$0xff] %v2085_v44  ;;  %v2458_v26 = vadd.f32 %v13346_v11, %v2455_v29  ;;  %10656 = vmatmul.msk.bf16.gmra.mxu3 %vm2798_vm6, %v13310_v46 }
 0x308   :  { %v2460_v30 = vmax.f32 %v2458_v26, 0.0  ;;  %v13428_v33 = vpop.f32.mrf.mxu1  ;;  %v13479_v26 = vpop.f32.mrf.mxu2 }
 0x309   :  { %v1798_v31 = vld [vmem:[#allocation2 + $0x1b1] sm:$0xff]  ;;  %v13421_v42 = vpop.f32.mrf.mxu0  ;;  %v2878_v46 = vpop.f32.mrf.mxu3 }
 0x30a   :  { %v1939_v51 = vmax.f32 %v13400_v10, %v1798_v31  ;;  %1514 = vst [vmem:[#allocation2 + $0x1c0] sm:$0xff] %v13421_v42  ;;  %v2462_v45 = vpack.c.bf16 %v2460_v30, %v2460_v30 }
 0x30b   :  { %10681 = vmatmul.msk.bf16.gmra.mxu1 %vm2798_vm6, %v12036_v37  ;;  %v12049_v37 = vld [vmem:[%s15712_s3 + $0x10] sm:$0xff] }
 0x30c   :  { %1273 = vmatmul.bf16.gmra.mxu0 %v11978_v55  ;;  %2464 = vst.msk [vmem:[#allocation4 + $0x30] sm:$0xf] %vm2330_vm0, %v2462_v45  ;;  %3727 = vmatpush.bf16.msra.mxu3 %v12049_v37 }
 0x30d   :  { %v2457_v50 = vld [vmem:[#allocation3 + $0x190] ss:$2 sm:$0xf] }
 0x30e   :  { %v2459_v39 = vadd.f32 %v13346_v11, %v2457_v50 }
 0x30f   :  { %10741 = vmatmul.msk.bf16.vlgmr.msrb.gmra.mxu2 %vm2798_vm6, %v12302_v35 }
 0x310   :  { %v2461_v40 = vmax.f32 %v2459_v39, 0.0  ;;  %v13437_v48 = vpop.f32.mrf.mxu1  ;;  %v11981_v39 = vld [vmem:[%s15709_s0 + $0x138] sm:$0xff] }
 0x311   :  { %v1799_v47 = vld [vmem:[#allocation2 + $0x1b9] sm:$0xff]  ;;  %v1236_v59 = vpop.f32.mrf.mxu0  ;;  %15727 = vst [vmem:[#allocation21_spill] sm:$0xff] %v13437_v48  ;;  %v13439_v61 = vpop.f32.mrf.mxu3 }
 0x312   :  { %v1940_v23 = vmax.f32 %v13408_v24, %v1799_v47  ;;  %1515 = vst [vmem:[#allocation2 + $0x1c8] sm:$0xff] %v1236_v59  ;;  %v2463_v56 = vpack.c.bf16 %v2461_v40, %v2461_v40  ;;  %v3567_v24 = vor.u32 %v3566_v13, %v3562_v18 }
 0x314   :  { %2465 = vst.msk [vmem:[#allocation4 + $0x34] sm:$0x3] %vm2332_vm1, %v2463_v56 }
 0x316   :  { %10711 = vmatmul.msk.bf16.vlgmr.msrb.gmra.mxu3 %vm2798_vm6, %v13173_v49  ;;  %v13456_v49 = vld [vmem:[#allocation4 + $0x28] sm:$0xff] }
 0x317   :  { %v3569_v12 = vshll.u32 %v13456_v49, 16 }
 0x318   :  { %v2835_v6 = vpop.f32.mrf.mxu1 }
 0x319   :  { %v1800_v57 = vld [vmem:[#allocation2 + $0x1c1] sm:$0xff]  ;;  %v1239_v60 = vpop.f32.mrf.mxu0  ;;  %v13450_v3 = vadd.f32 %v2878_v46, %v2835_v6  ;;  %v2927_v15 = vpop.f32.mrf.mxu3  ;;  %v13472_v22 = vrot.slane %v3569_v12, 1 }
 0x31a   :  { %v1941_v1 = vmax.f32 %v13421_v42, %v1800_v57  ;;  %1516 = vst [vmem:[#allocation2 + $0x1d0] sm:$0xff] %v1239_v60  ;;  %v13453_v58 = vadd.f32 %v2927_v15, %v13193_v21  ;;  %v13494_v46 = vpop.f32.mrf.mxu2 }
 0x31b   :  { %10682 = vmatmul.msk.bf16.gmra.mxu1 %vm2798_vm6, %v12037_v34  ;;  %v3572_v30 = vsel %vm2755_vm7, %v3567_v24, %v13472_v22  ;;  %15728 = vst [vmem:[#allocation22_spill] sm:$0xff] %v13494_v46  ;;  %v3573_v24 = vshrl.u32 %v13456_v49, 16 }
 0x31c   :  { %1278 = vmatmul.bf16.gmra.mxu0 %v11979_v14 }
 0x31f   :  { %10742 = vmatmul.msk.bf16.gmra.mxu2 %vm2798_vm6, %v13456_v49 }
 0x320   :  { %v13462_v10 = vpop.f32.mrf.mxu1 }
 0x321   :  { %v1801_v5 = vld [vmem:[#allocation2 + $0x1c9] sm:$0xff]  ;;  %v1241_v7 = vpop.f32.mrf.mxu0  ;;  %v13464_v52 = vpop.f32.mrf.mxu3 }
 0x322   :  { %v1942_v41 = vmax.f32 %v1236_v59, %v1801_v5  ;;  %1517 = vst [vmem:[#allocation2 + $0x1d8] sm:$0xff] %v1241_v7  ;;  %v13515_v15 = vpop.f32.mrf.mxu2 }
 0x323   :  { %15729 = vst [vmem:[#allocation23_spill] sm:$0xff] %v13515_v15 }
 0x324   :  { %v2089_v21 = vmax.f32 %v1939_v51, %v1942_v41 }
 0x326   :  { %2230 = vst [vmem:[#allocation3 + $0x1b0] sm:$0xff] %v2089_v21  ;;  %10712 = vmatmul.msk.bf16.gmra.mxu3 %vm2798_vm6, %v13248_v25 }
 0x328   :  { %v13477_v44 = vpop.f32.mrf.mxu1 }
 0x329   :  { %v1802_v20 = vld [vmem:[#allocation2 + $0x1d1] sm:$0xff]  ;;  %v13474_v17 = vpop.f32.mrf.mxu0  ;;  %v2932_v29 = vpop.f32.mrf.mxu3 }
 0x32a   :  { %v1943_v28 = vmax.f32 %v1239_v60, %v1802_v20  ;;  %1518 = vst [vmem:[#allocation2 + $0x1e0] sm:$0xff] %v13474_v17  ;;  %v13482_v25 = vadd.f32 %v2932_v29, %v13292_v16 }
 0x32b   :  { %10733 = vmatmul.msk.bf16.vlgmr.msrb.gmra.mxu1 %vm2798_vm6, %v3572_v30 }
 0x32c   :  { %v2090_v55 = vmax.f32 %v1940_v23, %v1943_v28  ;;  %1283 = vmatmul.bf16.gmra.mxu0 %v11980_v43  ;;  %v2874_v23 = vadd.f32 %v13403_v19, %v13428_v33 }
 0x32e   :  { %2231 = vst [vmem:[#allocation3 + $0x1b8] sm:$0xff] %v2090_v55 }
 0x330   :  { %v13490_v51 = vpop.f32.mrf.mxu1 }
 0x331   :  { %v1803_v31 = vld [vmem:[#allocation2 + $0x1d9] sm:$0xff]  ;;  %v13487_v42 = vpop.f32.mrf.mxu0  ;;  %v13492_v45 = vpop.f32.mrf.mxu3 }
 0x332   :  { %v1944_v32 = vmax.f32 %v1241_v7, %v1803_v31  ;;  %1519 = vst [vmem:[#allocation2 + $0x1e8] sm:$0xff] %v13487_v42 }
 0x334   :  { %v2091_v16 = vmax.f32 %v1941_v1, %v1944_v32 }
 0x335   :  { %v2467_v50 = vld [vmem:[#allocation3 + $0x1b0] ss:$2 sm:$0xff] }
 0x336   :  { %2232 = vst [vmem:[#allocation3 + $0x1c0] sm:$0xff] %v2091_v16  ;;  %v2470_v35 = vadd.f32 %v13346_v11, %v2467_v50  ;;  %10713 = vmatmul.msk.bf16.gmra.mxu3 %vm2798_vm6, %v13379_v36  ;;  %v12303_v50 = vld [vmem:[#allocation4 + $0x20] sm:$0xf0] }
 0x338   :  { %v2472_v40 = vmax.f32 %v2470_v35, 0.0  ;;  %v13511_v14 = vpop.f32.mrf.mxu1 }
 0x339   :  { %v1804_v47 = vld [vmem:[#allocation2 + $0x1e1] sm:$0xff]  ;;  %v13505_v59 = vpop.f32.mrf.mxu0  ;;  %v2937_v60 = vpop.f32.mrf.mxu3 }
 0x33a   :  { %v1945_v56 = vmax.f32 %v13474_v17, %v1804_v47  ;;  %1520 = vst [vmem:[#allocation2 + $0x1f0] sm:$0xff] %v13505_v59  ;;  %v2474_v57 = vpack.c.bf16 %v2472_v40, %v2472_v40  ;;  %v13513_v36 = vadd.f32 %v2937_v60, %v2874_v23  ;;  %v11982_v17 = vld [vmem:[%s15709_s0 + $0x140] sm:$0xff]  ;;  %v3694_v60 = vrot.slane %v13456_v49, 1 }
 0x33c   :  { %1288 = vmatmul.bf16.gmra.mxu0 %v11981_v39  ;;  %v2478_v1 = vrot.slane %v2474_v57, 6  ;;  %v12304_v39 = vld [vmem:[#allocation4 + $0x20] sm:$0xe] }
 0x33d   :  { %v2469_v6 = vld [vmem:[#allocation3 + $0x1c0] ss:$2 sm:$0xf] }
 0x33e   :  { %v2471_v34 = vadd.f32 %v13346_v11, %v2469_v6  ;;  %2484 = vst.msk [vmem:[#allocation4 + $0x34] sm:$0xc] %vm2355_vm2, %v2478_v1  ;;  %v2479_v12 = vrot.slane %v2478_v1, 4 }
 0x340   :  { %v2473_v19 = vmax.f32 %v2471_v34, 0.0  ;;  %v13520_v9 = vpop.f32.mrf.mxu1 }
 0x341   :  { %v1805_v33 = vld [vmem:[#allocation2 + $0x1e9] sm:$0xff]  ;;  %v1251_v5 = vpop.f32.mrf.mxu0  ;;  %v13522_v21 = vpop.f32.mrf.mxu3 }
 0x342   :  { %v1946_v7 = vmax.f32 %v13487_v42, %v1805_v33  ;;  %1521 = vst [vmem:[#allocation2 + $0x1f8] sm:$0xff] %v1251_v5  ;;  %v2475_v41 = vpack.c.bf16 %v2473_v19, %v2473_v19  ;;  %v13524_v18 = vpop.f32.mrf.mxu2 }
 0x343   :  { %15730 = vst [vmem:[#allocation24_spill] sm:$0xff] %v13522_v21 }
 0x344   :  { %v2480_v13 = vrot.slane %v2475_v41, 6  ;;  %15731 = vst [vmem:[#allocation25_spill] sm:$0xff] %v13524_v18 }
 0x345   :  { %v13526_v43 = vld [vmem:[#allocation4 + $0x30] sm:$0xff] }
 0x346   :  { %v2481_v20 = vsel %vm13012_vm5, %v2479_v12, %v2480_v13  ;;  %10714 = vmatmul.msk.bf16.gmra.mxu3 %vm2798_vm6, %v13393_v27  ;;  %10743 = vmatmul.msk.bf16.gmra.mxu2 %vm2798_vm6, %v13526_v43  ;;  %v3577_v28 = vshll.u32 %v13526_v43, 16  ;;  %v3575_v27 = vor.u32 %v3573_v24, %v13472_v22  ;;  %v2881_v22 = vadd.f32 %v13439_v61, %v13462_v10  ;;  %v11983_v61 = vld [vmem:[%s15709_s0 + $0x148] sm:$0xff] }
 0x347   :  { %2485 = vst.msk [vmem:[#allocation4 + $0x38] sm:$0xf] %vm2330_vm0, %v2481_v20 }
 0x348   :  { %v13541_v31 = vpop.f32.mrf.mxu1  ;;  %v13544_v42 = vrot.slane %v3577_v28, 1  ;;  %v12054_v28 = vld [vmem:[%s15712_s3 + $0x20] sm:$0xff] }
 0x349   :  { %v1806_v29 = vld [vmem:[#allocation2 + $0x1f1] sm:$0xff]  ;;  %v1254_v55 = vpop.f32.mrf.mxu0  ;;  %15732 = vst [vmem:[#allocation26_spill] sm:$0xff] %v13541_v31  ;;  %v2942_v32 = vpop.f32.mrf.mxu3  ;;  %3930 = vmatpush.bf16.msra.mxu2 %v12054_v28 }
 0x34a   :  { %v1947_v30 = vmax.f32 %v13505_v59, %v1806_v29  ;;  %1522 = vst [vmem:[#allocation2 + $0x200] sm:$0xff] %v1254_v55  ;;  %v13547_v16 = vadd.f32 %v2942_v32, %v13450_v3  ;;  %v3580_v37 = vsel %vm2755_vm7, %v3575_v27, %v13544_v42  ;;  %v13552_v35 = vpop.f32.mrf.mxu2  ;;  %v12305_v59 = vor.u32 %v12304_v39, %v12303_v50  ;;  %v11984_v39 = vld [vmem:[%s15709_s0 + $0x150] sm:$0xff] }
 0x34b   :  { %10734 = vmatmul.msk.bf16.gmra.mxu1 %vm2798_vm6, %v3580_v37  ;;  %15734 = vst [vmem:[#allocation28_spill] sm:$0xff] %v13552_v35  ;;  %v11985_v35 = vld [vmem:[%s15709_s0 + $0x158] sm:$0xff] }
 0x34c   :  { %15733 = vst [vmem:[#allocation27_spill] sm:$0xff] %v13547_v16  ;;  %1293 = vmatmul.bf16.gmra.mxu0 %v11982_v17  ;;  %v3693_v34 = vrot.slane %v12305_v59, 1 }
 0x34e   :  { %v3695_v19 = vsel %vm2890_vm10, %v3693_v34, %v3694_v60 }
 0x350   :  { %v13556_v3 = vpop.f32.mrf.mxu1 }
 0x351   :  { %v1807_v40 = vld [vmem:[#allocation2 + $0x1f9] sm:$0xff]  ;;  %v1256_v47 = vpop.f32.mrf.mxu0  ;;  %15735 = vst [vmem:[#allocation29_spill] sm:$0xff] %v13556_v3  ;;  %v2944_v57 = vpop.f32.mrf.mxu3 }
 0x352   :  { %v1948_v23 = vmax.f32 %v1251_v5, %v1807_v40  ;;  %1523 = vst [vmem:[#allocation2 + $0x208] sm:$0xff] %v1256_v47  ;;  %v13559_v6 = vadd.f32 %v2944_v57, %v2881_v22  ;;  %v13568_v41 = vpop.f32.mrf.mxu2 }
 0x354   :  { %v2095_v1 = vmax.f32 %v1945_v56, %v1948_v23  ;;  %15736 = vst [vmem:[#allocation30_spill] sm:$0xff] %v13559_v6 }
 0x356   :  { %2236 = vst [vmem:[#allocation3 + $0x1e0] sm:$0xff] %v2095_v1  ;;  %10751 = vmatmul.msk.bf16.vlgmr.msra.gmra.mxu3 %vm2798_vm6, %v3695_v19  ;;  %v13609_v19 = vld [vmem:[#allocation4 + $0x28] sm:$0xf] }
 0x357   :  { %v15723_v28 = vunpack.c.l.b16 %v13609_v19 }
 0x358   :  { %v13571_v49 = vpop.f32.mrf.mxu1 }
 0x359   :  { %v1808_v10 = vld [vmem:[#allocation2 + $0x201] sm:$0xff]  ;;  %v13566_v33 = vpop.f32.mrf.mxu0  ;;  %15737 = vst [vmem:[#allocation31_spill] sm:$0xff] %v13571_v49  ;;  %v13573_v56 = vpop.f32.mrf.mxu3 }
 0x35a   :  { %v1949_v5 = vmax.f32 %v1254_v55, %v1808_v10  ;;  %1524 = vst [vmem:[#allocation2 + $0x210] sm:$0xff] %v13566_v33  ;;  %v3696_v55 = vrot.slane %v13526_v43, 1 }
 0x35c   :  { %v2096_v12 = vmax.f32 %v1946_v7, %v1949_v5  ;;  %1298 = vmatmul.bf16.gmra.mxu0 %v11983_v61  ;;  %v13586_v7 = vpop.f32.mrf.mxu2  ;;  %v3697_v50 = vsel %vm2890_vm10, %v3694_v60, %v3696_v55 }
 0x35e   :  { %2237 = vst [vmem:[#allocation3 + $0x1e8] sm:$0xff] %v2096_v12  ;;  %v3757_v12 = vld [vmem:[#allocation4 + $0x24] sm:$0xc] }
 0x360   :  { %v13578_v24 = vpop.f32.mrf.mxu1 }
 0x361   :  { %v1809_v13 = vld [vmem:[#allocation2 + $0x209] sm:$0xff]  ;;  %v13575_v20 = vpop.f32.mrf.mxu0  ;;  %15738 = vst [vmem:[#allocation32_spill] sm:$0xff] %v13578_v24  ;;  %v13583_v29 = vpop.f32.mrf.mxu3 }
 0x362   :  { %v1950_v17 = vmax.f32 %v1256_v47, %v1809_v13  ;;  %1525 = vst [vmem:[#allocation2 + $0x218] sm:$0xff] %v13575_v20 }
 0x364   :  { %v2097_v27 = vmax.f32 %v1947_v30, %v1950_v17  ;;  %v13606_v1 = vpop.f32.mrf.mxu2 }
 0x365   :  { %v2487_v32 = vld [vmem:[#allocation3 + $0x1e0] ss:$2 sm:$0xff] }
 0x366   :  { %2238 = vst [vmem:[#allocation3 + $0x1f0] sm:$0xff] %v2097_v27  ;;  %v2490_v37 = vadd.f32 %v13346_v11, %v2487_v32  ;;  %10752 = vmatmul.msk.bf16.gmra.mxu3 %vm2798_vm6, %v3697_v50  ;;  %v13620_v50 = vld [vmem:[#allocation4 + $0x2c] sm:$0xff] }
 0x368   :  { %v2492_v40 = vmax.f32 %v2490_v37, 0.0  ;;  %v13601_v22 = vpop.f32.mrf.mxu1 }
 0x369   :  { %v13594_v47 = vld [vmem:[#allocation2 + $0x211] sm:$0xff]  ;;  %v13596_v59 = vpop.f32.mrf.mxu0  ;;  %v13603_v57 = vpop.f32.mrf.mxu3 }
 0x36a   :  { %1526 = vst [vmem:[#allocation2 + $0x220] sm:$0xff] %v13596_v59  ;;  %v2494_v23 = vpack.c.bf16 %v2492_v40, %v2492_v40 }
 0x36c   :  { %1303 = vmatmul.bf16.gmra.mxu0 %v11984_v39  ;;  %2496 = vst.msk [vmem:[#allocation4 + $0x3c] sm:$0xf] %vm2330_vm0, %v2494_v23  ;;  %v3777_v39 = vunpack.c.l.b16 %v3757_v12  ;;  %v3581_v23 = vshrl.u32 %v13526_v43, 16  ;;  %v13637_v43 = vpop.f32.mrf.mxu2 }
 0x36d   :  { %v2489_v60 = vld [vmem:[#allocation3 + $0x1f0] ss:$2 sm:$0xf]  ;;  %15739 = vst [vmem:[#allocation33_spill] sm:$0xff] %v13637_v43 }
 0x36e   :  { %v2491_v34 = vadd.f32 %v13346_v11, %v2489_v60  ;;  %v3583_v12 = vor.u32 %v3581_v23, %v13544_v42 }
 0x370   :  { %v2493_v61 = vmax.f32 %v2491_v34, 0.0  ;;  %v13615_v17 = vpop.f32.mrf.mxu1  ;;  %v12055_v34 = vld [vmem:[%s15712_s3 + $0x28] sm:$0xff] }
 0x371   :  { %v13611_v10 = vld [vmem:[#allocation2 + $0x219] sm:$0xff]  ;;  %v1266_v5 = vpop.f32.mrf.mxu0  ;;  %v13618_v32 = vpop.f32.mrf.mxu3  ;;  %4000 = vmatpush.bf16.msrb.mxu3 %v12055_v34 }
 0x372   :  { %1527 = vst [vmem:[#allocation2 + $0x228] sm:$0xff] %v1266_v5  ;;  %v2495_v27 = vpack.c.bf16 %v2493_v61, %v2493_v61  ;;  %v13630_v61 = vpack.c.b16 %v15723_v28, %v3777_v39  ;;  %v3870_v39 = vshrl.u32 %v13620_v50, 16 }
 0x373   :  { %v12046_v37 = vld [vmem:[#allocation4 + $0x38] sm:$0xff] }
 0x374   :  { %2497 = vst.msk [vmem:[#allocation4 + $0x40] sm:$0x3] %vm2332_vm1, %v2495_v27  ;;  %10744 = vmatmul.msk.bf16.gmra.mxu2 %vm2798_vm6, %v12046_v37  ;;  %v3698_v40 = vrot.slane %v12046_v37, 1  ;;  %v3585_v60 = vshll.u32 %v12046_v37, 16  ;;  %v12053_v27 = vld [vmem:[%s15712_s3 + $0x18] sm:$0xff]  ;;  %v3865_v24 = vshll.u32 %v13630_v61, 16  ;;  %v13657_v53 = vpop.f32.mrf.mxu2 }
 0x375   :  { %3825 = vmatpush.bf16.msra.mxu1 %v12053_v27  ;;  %v3872_v49 = vrot.slane %v3870_v39, 2 }
 0x376   :  { %v3699_v13 = vsel %vm2890_vm10, %v3696_v55, %v3698_v40  ;;  %v3587_v30 = vrot.slane %v3585_v60, 1  ;;  %v3873_v55 = vshll.u32 %v13620_v50, 16  ;;  %v3867_v15 = vrot.slane %v3865_v24, 3 }
 0x377   :  { %10753 = vmatmul.msk.bf16.gmra.mxu3 %vm2798_vm6, %v3699_v13  ;;  %v3862_v13 = vshrl.u32 %v13630_v61, 16 }
 0x378   :  { %v3588_v23 = vsel %vm2755_vm7, %v3583_v12, %v3587_v30  ;;  %v13650_v34 = vpop.f32.mrf.mxu1  ;;  %v3875_v16 = vrot.slane %v3873_v55, 3 }
 0x379   :  { %v13645_v28 = vld [vmem:[#allocation2 + $0x221] sm:$0xff]  ;;  %v1269_v42 = vpop.f32.mrf.mxu0  ;;  %10735 = vmatmul.msk.bf16.gmra.mxu1 %vm2798_vm6, %v3588_v23  ;;  %v13655_v6 = vpop.f32.mrf.mxu3  ;;  %v3864_v27 = vrot.slane %v3862_v13, 2 }
 0x37a   :  { %1528 = vst [vmem:[#allocation2 + $0x230] sm:$0xff] %v1269_v42  ;;  %v3876_v60 = vor.u32 %v3875_v16, %v3872_v49  ;;  %v13667_v16 = vld [vmem:[#allocation4 + $0x34] sm:$0xff]  ;;  %v3589_v49 = vshrl.u32 %v12046_v37, 16 }
 0x37b   :  { %15740 = vst [vmem:[#allocation34_spill] sm:$0xff] %v13655_v6  ;;  %v3535_v18 = vld [vmem:[#allocation4 + $0x40] sm:$0x1]  ;;  %v3868_v31 = vor.u32 %v3867_v15, %v3864_v27  ;;  %v11986_v15 = vld [vmem:[%s15709_s0 + $0x160] sm:$0xff] }
 0x37c   :  { %1308 = vmatmul.bf16.gmra.mxu0 %v11985_v35  ;;  %v3555_v12 = vunpack.c.l.b16 %v3535_v18  ;;  %v15741_v18 = vmax.f32 %v13566_v33, %v13594_v47  ;;  %v13686_v13 = vpop.f32.mrf.mxu2 }
 0x37d   :  { %v3877_v24 = vsel %vm3062_vm11, %v3868_v31, %v3876_v60  ;;  %v3882_v31 = vshll.u32 %v13667_v16, 16 }
 0x37e   :  { %v3560_v3 = vpack.c.b16 %v3555_v12, %v3555_v12  ;;  %v15742_v12 = vmax.f32 %v13575_v20, %v13611_v10  ;;  %v15743_v20 = vunpack.c.l.b16 %v13609_v19 }
 0x380   :  { %v3593_v46 = vshll.u32 %v3560_v3, 16  ;;  %v13659_v48 = vpop.f32.mrf.mxu1  ;;  %v3700_v35 = vrot.slane %v3560_v3, 1  ;;  %v3879_v3 = vshrl.u32 %v13667_v16, 16 }
 0x381   :  { %v1813_v21 = vld [vmem:[#allocation2 + $0x229] sm:$0xff]  ;;  %v1271_v43 = vpop.f32.mrf.mxu0  ;;  %v13661_v6 = vpop.f32.mrf.mxu3 }
 0x382   :  { %v1954_v23 = vmax.f32 %v1266_v5, %v1813_v21  ;;  %1529 = vst [vmem:[#allocation2 + $0x238] sm:$0xff] %v1271_v43  ;;  %v3595_v55 = vrot.slane %v3593_v46, 1  ;;  %v3701_v21 = vsel %vm2890_vm10, %v3698_v40, %v3700_v35  ;;  %v3591_v5 = vor.u32 %v3589_v49, %v3587_v30 }
 0x383   :  { %v3884_v35 = vrot.slane %v3882_v31, 3  ;;  %v2866_v49 = vadd.f32 %v13278_v0, %v13280_v2  ;;  %v3967_v31 = vrot.slane %v13620_v50, 3  ;;  %v15744_v2 = vmax.f32 %v13596_v59, %v13645_v28 }
 0x384   :  { %v2101_v39 = vmax.f32 %v15741_v18, %v1954_v23  ;;  %10783 = vmatmul.msk.bf16.vlgmr.msra.gmra.mxu2 %vm2798_vm6, %v3877_v24  ;;  %v3596_v37 = vsel %vm2755_vm7, %v3591_v5, %v3595_v55  ;;  %v3881_v23 = vrot.slane %v3879_v3, 2  ;;  %v3960_v18 = vld [vmem:[#allocation4 + $0x24] sm:$0x8]  ;;  %v3791_v28 = vrot.slane %v13630_v61, 2 }
 0x386   :  { %2242 = vst [vmem:[#allocation3 + $0x210] sm:$0xff] %v2101_v39  ;;  %v3964_v39 = vunpack.c.l.b16 %v3960_v18  ;;  %v13693_v24 = vor.u32 %v3884_v35, %v3881_v23 }
 0x387   :  { %10754 = vmatmul.msk.bf16.gmra.mxu3 %vm2798_vm6, %v3701_v21 }
 0x388   :  { %v13681_v40 = vpop.f32.mrf.mxu1  ;;  %v3965_v10 = vpack.c.b16 %v15743_v20, %v3964_v39 }
 0x389   :  { %v1814_v33 = vld [vmem:[#allocation2 + $0x231] sm:$0xff]  ;;  %v13677_v47 = vpop.f32.mrf.mxu0  ;;  %10736 = vmatmul.msk.bf16.gmra.mxu1 %vm2798_vm6, %v3596_v37  ;;  %v13684_v30 = vpop.f32.mrf.mxu3 }
 0x38a   :  { %v1955_v46 = vmax.f32 %v1269_v42, %v1814_v33  ;;  %1530 = vst [vmem:[#allocation2 + $0x240] sm:$0xff] %v13677_v47  ;;  %v3047_v42 = vadd.f32 %v13477_v44, %v13453_v58  ;;  %v2948_v58 = vadd.f32 %v13464_v52, %v2866_v49  ;;  %v3966_v33 = vrot.slane %v3965_v10, 3 }
 0x38b   :  { %v3792_v52 = vrot.slane %v13620_v50, 2  ;;  %v3049_v10 = vadd.f32 %v13511_v14, %v13482_v25 }
 0x38c   :  { %v2102_v27 = vmax.f32 %v15742_v12, %v1955_v46  ;;  %1313 = vmatmul.bf16.gmra.mxu0 %v11986_v15  ;;  %v3154_v5 = vadd.f32 %v13434_v62, %v3047_v42  ;;  %v3886_v62 = vsel %vm3062_vm11, %v3876_v60, %v13693_v24  ;;  %v13719_v12 = vpop.f32.mrf.mxu2  ;;  %v3968_v59 = vsel %vm3169_vm9, %v3966_v33, %v3967_v31 }
 0x38d   :  { %v3793_v35 = vsel %vm2990_vm8, %v3791_v28, %v3792_v52 }
 0x38e   :  { %2243 = vst [vmem:[#allocation3 + $0x218] sm:$0xff] %v2102_v27  ;;  %v3226_v0 = vadd.f32 %v13573_v56, %v3154_v5 }
 0x390   :  { %v13703_v3 = vpop.f32.mrf.mxu1  ;;  %v3312_v46 = vadd.f32 %v13601_v22, %v3226_v0 }
 0x391   :  { %v1815_v55 = vld [vmem:[#allocation2 + $0x239] sm:$0xff]  ;;  %v13697_v21 = vpop.f32.mrf.mxu0  ;;  %v13706_v44 = vpop.f32.mrf.mxu3 }
 0x392   :  { %v1956_v15 = vmax.f32 %v1271_v43, %v1815_v55  ;;  %1531 = vst [vmem:[#allocation2 + $0x248] sm:$0xff] %v13697_v21  ;;  %v3048_v43 = vadd.f32 %v13490_v51, %v2948_v58  ;;  %v11987_v51 = vld [vmem:[%s15709_s0 + $0x168] sm:$0xff]  ;;  %v3438_v42 = vadd.f32 %v13568_v41, %v3312_v46 }
 0x394   :  { %v2103_v19 = vmax.f32 %v15744_v2, %v1956_v15  ;;  %10784 = vmatmul.msk.bf16.gmra.mxu2 %vm2798_vm6, %v3886_v62  ;;  %v3155_v22 = vadd.f32 %v13447_v63, %v3048_v43  ;;  %v13753_v41 = vpop.f32.mrf.mxu2  ;;  %v3156_v2 = vadd.f32 %v13460_v8, %v3049_v10  ;;  %v3969_v8 = vrot.slane %v13667_v16, 3 }
 0x395   :  { %v2499_v37 = vld [vmem:[#allocation3 + $0x210] ss:$2 sm:$0xff] }
 0x396   :  { %2244 = vst [vmem:[#allocation3 + $0x220] sm:$0xff] %v2103_v19  ;;  %v2502_v56 = vadd.f32 %v13346_v11, %v2499_v37  ;;  %v3227_v49 = vadd.f32 %v13583_v29, %v3155_v22  ;;  %v2871_v29 = vadd.f32 %v13387_v38, %v13410_v54  ;;  %v3228_v38 = vadd.f32 %v13603_v57, %v3156_v2 }
 0x397   :  { %10793 = vmatmul.msk.bf16.vlgmr.msrb.gmra.mxu3 %vm2798_vm6, %v3968_v59 }
 0x398   :  { %v2504_v60 = vmax.f32 %v2502_v56, 0.0  ;;  %v13741_v18 = vpop.f32.mrf.mxu1  ;;  %v3313_v15 = vadd.f32 %v13615_v17, %v3227_v49  ;;  %v2950_v43 = vadd.f32 %v13492_v45, %v2871_v29  ;;  %v3794_v56 = vrot.slane %v13667_v16, 2 }
 0x399   :  { %v13731_v27 = vld [vmem:[#allocation2 + $0x241] sm:$0xff]  ;;  %v13733_v23 = vpop.f32.mrf.mxu0  ;;  %10773 = vmatmul.msk.bf16.vlgmr.msra.gmra.mxu1 %vm2798_vm6, %v3793_v35  ;;  %v3489_v39 = vpop.f32.mrf.mxu3  ;;  %v3314_v28 = vadd.f32 %v13650_v34, %v3228_v38  ;;  %v3970_v45 = vsel %vm3169_vm9, %v3967_v31, %v3969_v8 }
 0x39a   :  { %v1957_v61 = vmax.f32 %v13677_v47, %v13731_v27  ;;  %1532 = vst [vmem:[#allocation2 + $0x250] sm:$0xff] %v13733_v23  ;;  %v2506_v63 = vpack.c.bf16 %v2504_v60, %v2504_v60  ;;  %v13746_v55 = vadd.f32 %v3489_v39, %v3438_v42  ;;  %v3439_v17 = vadd.f32 %v13586_v7, %v3313_v15 }
 0x39b   :  { %v3050_v59 = vadd.f32 %v13520_v9, %v2950_v43  ;;  %v11988_v9 = vld [vmem:[%s15709_s0 + $0x170] sm:$0xff]  ;;  %v3795_v31 = vsel %vm2990_vm8, %v3792_v52, %v3794_v56  ;;  %v3440_v49 = vadd.f32 %v13606_v1, %v3314_v28  ;;  %v15747_v43 = vld [vmem:[#allocation20_spill] sm:$0xff] }
 0x39c   :  { %1318 = vmatmul.bf16.gmra.mxu0 %v11987_v51  ;;  %v2510_v20 = vrot.slane %v2506_v63, 6  ;;  %3517 = vst [vmem:[#allocation5] sm:$0xff] %v13746_v55  ;;  %v3667_v42 = vpop.f32.mrf.mxu2 }
 0x39d   :  { %v2501_v5 = vld [vmem:[#allocation3 + $0x220] ss:$2 sm:$0xf]  ;;  %v3157_v35 = vadd.f32 %v13479_v26, %v3050_v59  ;;  %v12064_v26 = vld [vmem:[%s15712_s3 + $0x38] sm:$0xff] }
 0x39e   :  { %v2503_v58 = vadd.f32 %v13346_v11, %v2501_v5  ;;  %2516 = vst.msk [vmem:[#allocation4 + $0x40] sm:$0xc] %vm2355_vm2, %v2510_v20  ;;  %v2511_v37 = vrot.slane %v2510_v20, 4  ;;  %4210 = vmatpush.bf16.msrb.mxu2 %v12064_v26  ;;  %v15749_v59 = vld [vmem:[#allocation33_spill] sm:$0xff] }
 0x39f   :  { %v3229_v5 = vadd.f32 %v13618_v32, %v3157_v35 }
 0x3a0   :  { %v2505_v0 = vmax.f32 %v2503_v58, 0.0  ;;  %v13766_v11 = vpop.f32.mrf.mxu1  ;;  %v15745_v58 = vld [vmem:[#allocation26_spill] sm:$0xff] }
 0x3a1   :  { %v13759_v19 = vld [vmem:[#allocation2 + $0x249] sm:$0xff]  ;;  %v13761_v25 = vpop.f32.mrf.mxu0  ;;  %v3491_v54 = vpop.f32.mrf.mxu3  ;;  %v3315_v1 = vadd.f32 %v13659_v48, %v3229_v5 }
 0x3a2   :  { %v1958_v14 = vmax.f32 %v13697_v21, %v13759_v19  ;;  %1533 = vst [vmem:[#allocation2 + $0x258] sm:$0xff] %v13761_v25  ;;  %v2507_v62 = vpack.c.bf16 %v2505_v0, %v2505_v0  ;;  %v13772_v33 = vadd.f32 %v3491_v54, %v3439_v17  ;;  %v3051_v0 = vadd.f32 %v15745_v58, %v13513_v36  ;;  %v15748_v54 = vld [vmem:[#allocation22_spill] sm:$0xff]  ;;  %v13856_v58 = vld [vmem:[%s15713_s4] ss:$0 sm:$0xff] }
 0x3a3   :  { %v3441_v28 = vadd.f32 %v15749_v59, %v3315_v1  ;;  %v12065_v1 = vld [vmem:[%s15712_s3 + $0x40] sm:$0xff] }
 0x3a4   :  { %v2512_v46 = vrot.slane %v2507_v62, 6  ;;  %3518 = vst [vmem:[#allocation5 + $0x8] sm:$0xff] %v13772_v33  ;;  %v15746_v62 = vld [vmem:[#allocation21_spill] sm:$0xff]  ;;  %4280 = vmatpush.bf16.msra.mxu3 %v12065_v1  ;;  %v13898_v19 = vpop.f32.mrf.mxu2 }
 0x3a5   :  { %v13785_v57 = vld [vmem:[#allocation4 + $0x3c] sm:$0xff]  ;;  %v2876_v38 = vadd.f32 %v15747_v43, %v15746_v62 }
 0x3a6   :  { %v2513_v7 = vsel %vm13012_vm5, %v2511_v37, %v2512_v46  ;;  %v3888_v60 = vshrl.u32 %v13785_v57, 16  ;;  %v3891_v22 = vshll.u32 %v13785_v57, 16  ;;  %v3158_v37 = vadd.f32 %v15748_v54, %v3051_v0  ;;  %v15753_v54 = vld [vmem:[#allocation23_spill] sm:$0xff] }
 0x3a7   :  { %10794 = vmatmul.msk.bf16.gmra.mxu3 %vm2798_vm6, %v3970_v45  ;;  %2517 = vst.msk [vmem:[#allocation4 + $0x44] sm:$0xf] %vm2330_vm0, %v2513_v7  ;;  %v15750_v45 = vld [vmem:[#allocation24_spill] sm:$0xff] }
 0x3a8   :  { %v3624_v39 = vpop.f32.mrf.mxu1  ;;  %v3890_v20 = vrot.slane %v3888_v60, 2  ;;  %v3893_v10 = vrot.slane %v3891_v22, 3 }
 0x3a9   :  { %v13792_v34 = vld [vmem:[#allocation2 + $0x251] sm:$0xff]  ;;  %v13794_v51 = vpop.f32.mrf.mxu0  ;;  %10774 = vmatmul.msk.bf16.gmra.mxu1 %vm2798_vm6, %v3795_v31  ;;  %v13809_v50 = vadd.f32 %v3667_v42, %v3624_v39  ;;  %v3494_v52 = vpop.f32.mrf.mxu3 }
 0x3aa   :  { %v1959_v63 = vmax.f32 %v13733_v23, %v13792_v34  ;;  %1534 = vst [vmem:[#allocation2 + $0x260] sm:$0xff] %v13794_v51  ;;  %v3511_v15 = vadd.f32 %v3494_v52, %v3440_v49  ;;  %v13817_v29 = vor.u32 %v3893_v10, %v3890_v20  ;;  %v15751_v31 = vld [vmem:[#allocation34_spill] sm:$0xff]  ;;  %v3796_v52 = vrot.slane %v13785_v57, 2  ;;  %v15752_v20 = vld [vmem:[#allocation29_spill] sm:$0xff] }
 0x3ab   :  { %v3230_v60 = vadd.f32 %v15751_v31, %v3158_v37  ;;  %v6837_v35 = vld [vmem:[#allocation5 + $0x1] sm:$0xff] }
 0x3ac   :  { %1323 = vmatmul.bf16.gmra.mxu0 %v11988_v9  ;;  %3519 = vst [vmem:[#allocation5 + $0x10] sm:$0xff] %v3511_v15  ;;  %v3895_v2 = vsel %vm3062_vm11, %v13693_v24, %v13817_v29  ;;  %v3971_v24 = vrot.slane %v13785_v57, 3  ;;  %v2952_v9 = vadd.f32 %v15750_v45, %v2876_v38  ;;  %v6869_v27 = vmax.f32 %v13746_v55, %v6837_v35  ;;  %v11989_v55 = vld [vmem:[%s15709_s0 + $0x178] sm:$0xff] }
 0x3ad   :  { %10785 = vmatmul.msk.bf16.gmra.mxu2 %vm2798_vm6, %v3895_v2  ;;  %v3316_v5 = vadd.f32 %v13681_v40, %v3230_v60  ;;  %v13868_v2 = vld [vmem:[#allocation4 + $0x2c] sm:$0xf0]  ;;  %v3797_v38 = vsel %vm2990_vm8, %v3794_v56, %v3796_v52  ;;  %v15754_v60 = vld [vmem:[#allocation27_spill] sm:$0xff] }
 0x3ae   :  { %v3855_v32 = vld [vmem:[#allocation4 + $0x44] sm:$0x7]  ;;  %v3052_v10 = vadd.f32 %v15752_v20, %v2952_v9  ;;  %v3972_v47 = vsel %vm3169_vm9, %v3969_v8, %v3971_v24  ;;  %v13866_v8 = vld [vmem:[#allocation4 + $0x2c] sm:$0xff]  }
 0x3af   :  { %v3859_v17 = vunpack.c.l.b16 %v3855_v32  ;;  %v12060_v32 = vld [vmem:[%s15712_s3 + $0x30] sm:$0xff]  ;;  %v4150_v57 = vshrl.u32 %v13866_v8, 16 }
 0x3b0   :  { %v3159_v37 = vadd.f32 %v15753_v54, %v3052_v10  ;;  %v3765_v59 = vld [vmem:[#allocation4 + $0x44] sm:$0x3]  ;;  %4085 = vmatpush.bf16.msrb.mxu1 %v12060_v32 }
 0x3b1   :  { %v1819_v36 = vld [vmem:[#allocation2 + $0x259] sm:$0xff]  ;;  %v13827_v46 = vpop.f32.mrf.mxu0  ;;  %v13833_v7 = vpack.c.b16 %v3859_v17, %v3859_v17  ;;  %v3496_v22 = vpop.f32.mrf.mxu3 }
 0x3b2   :  { %v1960_v48 = vmax.f32 %v13761_v25, %v1819_v36  ;;  %1535 = vst [vmem:[#allocation2 + $0x268] sm:$0xff] %v13827_v46  ;;  %v13840_v39 = vadd.f32 %v3496_v22, %v3441_v28  ;;  %v3231_v16 = vadd.f32 %v13661_v6, %v3159_v37 }
 0x3b3   :  { %v3897_v25 = vshrl.u32 %v13833_v7, 16  ;;  %v3900_v49 = vshll.u32 %v13833_v7, 16  ;;  %v6901_v15 = vld [vmem:[#allocation5 + $0xc] sm:$0xff]  ;;  %v3973_v1 = vrot.slane %v13833_v7, 3  ;;  %v13925_v7 = vld [vmem:[%s15711_s2] ss:$0 sm:$0xff] }
 0x3b4   :  { %v2107_v42 = vmax.f32 %v1957_v61, %v1960_v48  ;;  %v6933_v26 = vld [vmem:[#allocation5 + $0xd] sm:$0xff]  ;;  %3520 = vst [vmem:[#allocation5 + $0x18] sm:$0xff] %v13840_v39  ;;  %v3442_v48 = vadd.f32 %v13657_v53, %v3316_v5  ;;  %v15755_v53 = vld [vmem:[#allocation31_spill] sm:$0xff] }
 0x3b5   :  { %v6965_v61 = vmax.f32 %v6901_v15, %v6933_v26  ;;  %v3899_v40 = vrot.slane %v3897_v25, 2  ;;  %v3902_v0 = vrot.slane %v3900_v49, 3  ;;  %v6838_v56 = vld [vmem:[#allocation5 + $0x9] sm:$0xff]  ;;  %v3053_v22 = vadd.f32 %v15755_v53, %v15754_v60 }
 0x3b6   :  { %2248 = vst [vmem:[#allocation3 + $0x240] sm:$0xff] %v2107_v42  ;;  %v3785_v42 = vunpack.c.l.b16 %v3765_v59  ;;  %v3317_v25 = vadd.f32 %v13703_v3, %v3231_v16  ;;  %v6870_v6 = vmax.f32 %v13772_v33, %v6838_v56  ;;  %v3974_v34 = vsel %vm3169_vm9, %v3971_v24, %v3973_v1  ;;  %v15759_v59 = vld [vmem:[#allocation28_spill] sm:$0xff] }
 0x3b7   :  { %10795 = vmatmul.msk.bf16.gmra.mxu3 %vm2798_vm6, %v3972_v47  ;;  %v6997_v17 = vmax.f32 %v6869_v27, %v6965_v61  ;;  %v3903_v9 = vor.u32 %v3902_v0, %v3899_v40  ;;  %v13905_v27 = vpop.f32.mrf.mxu1 }
 0x3b8   :  { %v3790_v47 = vpack.c.b16 %v3785_v42, %v3785_v42 }
 0x3b9   :  { %v1820_v62 = vld [vmem:[#allocation2 + $0x261] sm:$0xff]  ;;  %v13873_v43 = vpop.f32.mrf.mxu0  ;;  %10775 = vmatmul.msk.bf16.gmra.mxu1 %vm2798_vm6, %v3797_v38  ;;  %v7033_v28 = vadd.f32 %v13856_v58, %v6997_v17  ;;  %v3499_v45 = vpop.f32.mrf.mxu3  ;;  %v3904_v21 = vsel %vm3062_vm11, %v13817_v29, %v3903_v9  ;;  %v3443_v29 = vadd.f32 %v13686_v13, %v3317_v25 }
 0x3ba   :  { %v1961_v36 = vmax.f32 %v13794_v51, %v1820_v62  ;;  %1536 = vst [vmem:[#allocation2 + $0x270] sm:$0xff] %v13873_v43  ;;  %v13890_v51 = vadd.f32 %v3499_v45, %v3442_v48  ;;  %v15757_v62 = vld [vmem:[#allocation30_spill] sm:$0xff]  ;;  %v15758_v38 = vld [vmem:[#allocation32_spill] sm:$0xff]  ;;  %v3798_v37 = vrot.slane %v3790_v47, 2 }
 0x3bb   :  { %v7065_v35 = vmax.f32 %v7033_v28, 0.0  ;;  %v6902_v49 = vld [vmem:[#allocation5 + $0x14] sm:$0xff]  ;;  %v3054_v54 = vadd.f32 %v15758_v38, %v15757_v62 }
 0x3bc   :  { %v2108_v31 = vmax.f32 %v1958_v14, %v1961_v36  ;;  %1328 = vmatmul.bf16.gmra.mxu0 %v11989_v55  ;;  %v6934_v20 = vld [vmem:[#allocation5 + $0x15] sm:$0xff]  ;;  %3521 = vst [vmem:[#allocation5 + $0x20] sm:$0xff] %v13890_v51  ;;  %v15756_v14 = vld [vmem:[#allocation25_spill] sm:$0xff]  ;;  %v3799_v24 = vsel %vm2990_vm8, %v3796_v52, %v3798_v37 }
 0x3bd   :  { %7097 = vst [vmem:[#allocation6] sm:$0xff] %v7065_v35  ;;  %v6966_v10 = vmax.f32 %v6902_v49, %v6934_v20  ;;  %10786 = vmatmul.msk.bf16.gmra.mxu2 %vm2798_vm6, %v3904_v21  ;;  %v3160_v5 = vadd.f32 %v15756_v14, %v3053_v22  ;;  %v13913_v55 = vld [vmem:[#allocation4 + $0x34] sm:$0xff]  ;;  %v3161_v28 = vadd.f32 %v15759_v59, %v3054_v54  ;;  %v12335_v49 = vld [vmem:[#allocation4 + $0x2c] sm:$0xe] }
 0x3be   :  { %2249 = vst [vmem:[#allocation3 + $0x248] sm:$0xff] %v2108_v31  ;;  %v3672_v31 = vpop.f32.mrf.mxu2 }
 0x3bf   :  { %v6998_v15 = vmax.f32 %v6870_v6, %v6966_v10  ;;  %v3232_v61 = vadd.f32 %v13684_v30, %v3160_v5  ;;  %v3233_v35 = vadd.f32 %v13706_v44, %v3161_v28 }
 0x3c1   :  { %v1821_v3 = vld [vmem:[#allocation2 + $0x269] sm:$0xff]  ;;  %v13903_v26 = vpop.f32.mrf.mxu0  ;;  %v7034_v40 = vadd.f32 %v13856_v58, %v6998_v15  ;;  %v3501_v0 = vpop.f32.mrf.mxu3  ;;  %v3318_v13 = vadd.f32 %v13741_v18, %v3232_v61  ;;  %v11990_v18 = vld [vmem:[%s15709_s0 + $0x180] sm:$0xff]  ;;  %v3319_v21 = vadd.f32 %v13766_v11, %v3233_v35  ;;  %v12336_v61 = vor.u32 %v12335_v49, %v13868_v2 }
 0x3c2   :  { %v1962_v33 = vmax.f32 %v13827_v46, %v1821_v3  ;;  %1537 = vst [vmem:[#allocation2 + $0x278] sm:$0xff] %v13903_v26  ;;  %v3514_v17 = vadd.f32 %v3501_v0, %v3443_v29  ;;  %v4152_v46 = vshll.u32 %v13866_v8, 16 }
 0x3c3   :  { %v7066_v30 = vmax.f32 %v7034_v40, 0.0  ;;  %v3444_v16 = vadd.f32 %v13719_v12, %v3318_v13  ;;  %v6840_v20 = vld [vmem:[#allocation5 + $0x19] sm:$0xff]  ;;  %v3445_v0 = vadd.f32 %v13753_v41, %v3319_v21  ;;  %v4246_v2 = vrot.slane %v12336_v61, 1 }
 0x3c4   :  { %v2109_v32 = vmax.f32 %v1959_v63, %v1962_v33  ;;  %v4157_v63 = vshll.u32 %v13913_v55, 16  ;;  %3522 = vst [vmem:[#allocation5 + $0x28] sm:$0xff] %v3514_v17  ;;  %v4154_v56 = vrot.slane %v4152_v46, 1  ;;  %v6872_v15 = vmax.f32 %v13840_v39, %v6840_v20  ;;  %v13969_v17 = vld [vmem:[#allocation4 + $0x3c] sm:$0xff] }
 0x3c5   :  { %v2519_v36 = vld [vmem:[#allocation3 + $0x240] ss:$2 sm:$0xff]  ;;  %7098 = vst [vmem:[#allocation6 + $0x8] sm:$0xff] %v7066_v30  ;;  %v4247_v39 = vrot.slane %v13913_v55, 1 }
 0x3c6   :  { %2250 = vst [vmem:[#allocation3 + $0x250] sm:$0xff] %v2109_v32  ;;  %v2522_v23 = vadd.f32 %v13925_v7, %v2519_v36  ;;  %v4159_v25 = vrot.slane %v4157_v63, 1  ;;  %v4155_v6 = vor.u32 %v4154_v56, %v4150_v57  ;;  %v11991_v63 = vld [vmem:[%s15709_s0 + $0x188] sm:$0xff]  ;;  %v13990_v35 = vpop.f32.mrf.mxu2 }
 0x3c7   :  { %10796 = vmatmul.msk.bf16.gmra.mxu3 %vm2798_vm6, %v3974_v34  ;;  %v4248_v36 = vsel %vm2890_vm10, %v4246_v2, %v4247_v39  ;;  %v12056_v34 = vld [vmem:[#allocation4 + $0x2c] sm:$0xff] }
 0x3c8   :  { %v2524_v48 = vmax.f32 %v2522_v23, 0.0  ;;  %v3629_v53 = vpop.f32.mrf.mxu1  ;;  %v4160_v8 = vsel %vm2755_vm7, %v4155_v6, %v4159_v25  ;;  %v4165_v23 = vshll.u32 %v13969_v17, 16 }
 0x3c9   :  { %v13937_v45 = vld [vmem:[#allocation2 + $0x271] sm:$0xff]  ;;  %v13939_v9 = vpop.f32.mrf.mxu0  ;;  %10776 = vmatmul.msk.bf16.gmra.mxu1 %vm2798_vm6, %v3799_v24  ;;  %v13950_v42 = vadd.f32 %v3672_v31, %v3629_v53  ;;  %v3504_v12 = vpop.f32.mrf.mxu3  ;;  %v4161_v24 = vshrl.u32 %v13913_v55, 16  ;;  %v4249_v55 = vrot.slane %v13969_v17, 1 }
 0x3ca   :  { %v1963_v60 = vmax.f32 %v13873_v43, %v13937_v45  ;;  %1538 = vst [vmem:[#allocation2 + $0x280] sm:$0xff] %v13939_v9  ;;  %v2526_v22 = vpack.c.bf16 %v2524_v48, %v2524_v48  ;;  %v13953_v52 = vadd.f32 %v3504_v12, %v3444_v16  ;;  %v4167_v56 = vrot.slane %v4165_v23, 1  ;;  %v12058_v23 = vld [vmem:[#allocation4 + $0x3c] sm:$0xff] }
 0x3cb   :  { %v6904_v44 = vld [vmem:[#allocation5 + $0x24] sm:$0xff]  ;;  %v4169_v45 = vshrl.u32 %v13969_v17, 16 }
 0x3cc   :  { %1333 = vmatmul.bf16.gmra.mxu0 %v11990_v18  ;;  %2528 = vst.msk [vmem:[#allocation4 + $0x48] sm:$0xf] %vm2330_vm0, %v2526_v22  ;;  %v6936_v5 = vld [vmem:[#allocation5 + $0x25] sm:$0xff]  ;;  %v4163_v22 = vor.u32 %v4161_v24, %v4159_v25 }
 0x3cd   :  { %v2521_v10 = vld [vmem:[#allocation3 + $0x250] ss:$2 sm:$0xf]  ;;  %3523 = vst [vmem:[#allocation5 + $0x30] sm:$0xff] %v13953_v52  ;;  %v6968_v3 = vmax.f32 %v6904_v44, %v6936_v5  ;;  %10841 = vmatmul.msk.bf16.vlgmr.msrb.gmra.mxu2 %vm2798_vm6, %v4160_v8  ;;  %v6841_v46 = vld [vmem:[#allocation5 + $0x21] sm:$0xff]  ;;  %v11992_v44 = vld [vmem:[%s15709_s0 + $0x190] sm:$0xff]  ;;  %v4171_v61 = vor.u32 %v4169_v45, %v4167_v56 }
 0x3ce   :  { %v2523_v14 = vadd.f32 %v13925_v7, %v2521_v10  ;;  %v6873_v37 = vmax.f32 %v13890_v51, %v6841_v46  ;;  %v3677_v6 = vpop.f32.mrf.mxu2  ;;  %v4250_v10 = vsel %vm2890_vm10, %v4247_v39, %v4249_v55 }
 0x3cf   :  { %v7000_v11 = vmax.f32 %v6872_v15, %v6968_v3 }
 0x3d0   :  { %v2525_v47 = vmax.f32 %v2523_v14, 0.0  ;;  %v12057_v14 = vld [vmem:[#allocation4 + $0x34] sm:$0xff] }
 0x3d1   :  { %v13962_v33 = vld [vmem:[#allocation2 + $0x279] sm:$0xff]  ;;  %v1296_v29 = vpop.f32.mrf.mxu0  ;;  %v3506_v32 = vpop.f32.mrf.mxu3  ;;  %v7036_v62 = vadd.f32 %v13856_v58, %v7000_v11 }
 0x3d2   :  { %v1964_v40 = vmax.f32 %v13903_v26, %v13962_v33  ;;  %1539 = vst [vmem:[#allocation2 + $0x288] sm:$0xff] %v1296_v29  ;;  %v2527_v1 = vpack.c.bf16 %v2525_v47, %v2525_v47  ;;  %v13972_v38 = vadd.f32 %v3506_v32, %v3445_v0  ;;  %v12069_v11 = vld [vmem:[%s15712_s3] sm:$0xff]  ;;  %v14022_v0 = vpop.f32.mrf.mxu1 }
 0x3d3   :  { %v7068_v54 = vmax.f32 %v7036_v62, 0.0  ;;  %4458 = vmatpush.bf16.msra.mxu2 %v12069_v11  ;;  %v11994_v11 = vld [vmem:[%s15709_s0 + $0x1a0] sm:$0xff] }
 0x3d4   :  { %2529 = vst.msk [vmem:[#allocation4 + $0x4c] sm:$0x3] %vm2332_vm1, %v2527_v1  ;;  %v6905_v13 = vld [vmem:[#allocation5 + $0x2c] sm:$0xff] }
 0x3d5   :  { %v6937_v30 = vld [vmem:[#allocation5 + $0x2d] sm:$0xff]  ;;  %3524 = vst [vmem:[#allocation5 + $0x38] sm:$0xff] %v13972_v38 }
 0x3d6   :  { %v6969_v41 = vmax.f32 %v6905_v13, %v6937_v30  ;;  %7100 = vst [vmem:[#allocation6 + $0x18] sm:$0xff] %v7068_v54  ;;  %v14026_v26 = vpop.f32.mrf.mxu2 }
 0x3d7   :  { %10851 = vmatmul.msk.bf16.vlgmr.msra.gmra.mxu3 %vm2798_vm6, %v4248_v36 }
 0x3d8   :  { %v7001_v18 = vmax.f32 %v6873_v37, %v6969_v41  ;;  %v12071_v41 = vld [vmem:[%s15712_s3 + $0x10] sm:$0xff] }
 0x3d9   :  { %v1824_v48 = vld [vmem:[#allocation2 + $0x281] sm:$0xff]  ;;  %v1299_v59 = vpop.f32.mrf.mxu0  ;;  %10819 = vmatmul.msk.bf16.vlgmr.msrb.gmra.mxu1 %vm2798_vm6, %v12056_v34  ;;  %v3729_v16 = vpop.f32.mrf.mxu3  ;;  %v11993_v34 = vld [vmem:[%s15709_s0 + $0x198] sm:$0xff]  ;;  %4520 = vmatpush.bf16.msrb.mxu3 %v12071_v41 }
 0x3da   :  { %v1965_v51 = vmax.f32 %v13939_v9, %v1824_v48  ;;  %1540 = vst [vmem:[#allocation2 + $0x290] sm:$0xff] %v1299_v59  ;;  %v7037_v28 = vadd.f32 %v13856_v58, %v7001_v18  ;;  %v13988_v31 = vadd.f32 %v3729_v16, %v13809_v50  ;;  %v4168_v9 = vsel %vm2755_vm7, %v4163_v22, %v4167_v56  ;;  %v13997_v50 = vld [vmem:[#allocation4 + $0x44] sm:$0xff] }
 0x3db   :  { %v4173_v21 = vshll.u32 %v13997_v50, 16  ;;  %v4251_v17 = vrot.slane %v13997_v50, 1  ;;  %v4177_v56 = vshrl.u32 %v13997_v50, 16 }
 0x3dc   :  { %1338 = vmatmul.bf16.gmra.mxu0 %v11991_v63  ;;  %v7069_v53 = vmax.f32 %v7037_v28, 0.0 }
 0x3dd   :  { %10842 = vmatmul.msk.bf16.gmra.mxu2 %vm2798_vm6, %v4168_v9  ;;  %v4252_v30 = vsel %vm2890_vm10, %v4249_v55, %v4251_v17 }
 0x3de   :  { %7101 = vst [vmem:[#allocation6 + $0x20] sm:$0xff] %v7069_v53 }
 0x3e1   :  { %v1825_v12 = vld [vmem:[#allocation2 + $0x289] sm:$0xff]  ;;  %v1301_v57 = vpop.f32.mrf.mxu0  ;;  %v13994_v20 = vpop.f32.mrf.mxu3 }
 0x3e2   :  { %v1966_v49 = vmax.f32 %v1296_v29, %v1825_v12  ;;  %1541 = vst [vmem:[#allocation2 + $0x298] sm:$0xff] %v1301_v57  ;;  %v4123_v29 = vld [vmem:[#allocation4 + $0x4c] sm:$0x1] }
 0x3e3   :  { %v4143_v32 = vunpack.c.l.b16 %v4123_v29 }
 0x3e4   :  { %v2113_v25 = vmax.f32 %v1963_v60, %v1966_v49  ;;  %v4175_v60 = vrot.slane %v4173_v21, 1 }
 0x3e5   :  { %v4148_v46 = vpack.c.b16 %v4143_v32, %v4143_v32 }
 0x3e6   :  { %2254 = vst [vmem:[#allocation3 + $0x270] sm:$0xff] %v2113_v25  ;;  %v4176_v1 = vsel %vm2755_vm7, %v4171_v61, %v4175_v60  ;;  %v4179_v12 = vor.u32 %v4177_v56, %v4175_v60  ;;  %v12059_v61 = vld [vmem:[#allocation4 + $0x44] sm:$0xff] }
 0x3e7   :  { %10852 = vmatmul.msk.bf16.gmra.mxu3 %vm2798_vm6, %v4250_v10  ;;  %v4181_v37 = vshll.u32 %v4148_v46, 16 }
 0x3e9   :  { %v1826_v5 = vld [vmem:[#allocation2 + $0x291] sm:$0xff]  ;;  %v14008_v8 = vpop.f32.mrf.mxu0  ;;  %10820 = vmatmul.msk.bf16.gmra.mxu1 %vm2798_vm6, %v12057_v14  ;;  %v3734_v43 = vpop.f32.mrf.mxu3  ;;  %v4183_v53 = vrot.slane %v4181_v37, 1 }
 0x3ea   :  { %v1967_v15 = vmax.f32 %v1299_v59, %v1826_v5  ;;  %1542 = vst [vmem:[#allocation2 + $0x2a0] sm:$0xff] %v14008_v8  ;;  %v14017_v47 = vadd.f32 %v3734_v43, %v13950_v42 }
 0x3eb   :  { %v4184_v55 = vsel %vm2755_vm7, %v4179_v12, %v4183_v53 }
 0x3ec   :  { %v2114_v3 = vmax.f32 %v1964_v40, %v1967_v15  ;;  %1343 = vmatmul.bf16.gmra.mxu0 %v11992_v44 }
 0x3ed   :  { %10843 = vmatmul.msk.bf16.gmra.mxu2 %vm2798_vm6, %v4176_v1 }
 0x3ee   :  { %2255 = vst [vmem:[#allocation3 + $0x278] sm:$0xff] %v2114_v3 }
 0x3f1   :  { %v1827_v42 = vld [vmem:[#allocation2 + $0x299] sm:$0xff]  ;;  %v14028_v33 = vpop.f32.mrf.mxu0  ;;  %v14031_v39 = vpop.f32.mrf.mxu3 }
 0x3f2   :  { %v1968_v40 = vmax.f32 %v1301_v57, %v1827_v42  ;;  %1543 = vst [vmem:[#allocation2 + $0x2a8] sm:$0xff] %v14028_v33 }
 0x3f4   :  { %v2115_v62 = vmax.f32 %v1965_v51, %v1968_v40  ;;  %v12070_v51 = vld [vmem:[%s15712_s3 + $0x8] sm:$0xff] }
 0x3f5   :  { %v2531_v2 = vld [vmem:[#allocation3 + $0x270] ss:$2 sm:$0xff]  ;;  %4415 = vmatpush.bf16.msra.mxu1 %v12070_v51 }
 0x3f6   :  { %2256 = vst [vmem:[#allocation3 + $0x280] sm:$0xff] %v2115_v62  ;;  %v2534_v54 = vadd.f32 %v13925_v7, %v2531_v2  ;;  %v3634_v13 = vpop.f32.mrf.mxu1  ;;  %v12307_v2 = vld [vmem:[#allocation4 + $0x40] sm:$0xf0] }
 0x3f7   :  { %v3678_v36 = vadd.f32 %v3677_v6, %v3634_v13  ;;  %10853 = vmatmul.msk.bf16.gmra.mxu3 %vm2798_vm6, %v4252_v30  ;;  %v3682_v59 = vpop.f32.mrf.mxu2  ;;  %v12308_v30 = vld [vmem:[#allocation4 + $0x40] sm:$0xe] }
 0x3f8   :  { %v2536_v63 = vmax.f32 %v2534_v54, 0.0 }
 0x3f9   :  { %v14043_v18 = vld [vmem:[#allocation2 + $0x2a1] sm:$0xff]  ;;  %v14045_v48 = vpop.f32.mrf.mxu0  ;;  %10821 = vmatmul.msk.bf16.gmra.mxu1 %vm2798_vm6, %v12058_v23 }
 0x3fa   :  { %v1969_v28 = vmax.f32 %v14008_v8, %v14043_v18  ;;  %1544 = vst [vmem:[#allocation2 + $0x2b0] sm:$0xff] %v14045_v48  ;;  %v2538_v16 = vpack.c.bf16 %v2536_v63, %v2536_v63  ;;  %v3739_v24 = vpop.f32.mrf.mxu3  ;;  %v4253_v8 = vrot.slane %v4148_v46, 1 }
 0x3fb   :  { %v14055_v22 = vadd.f32 %v3739_v24, %v3678_v36  ;;  %v12309_v36 = vor.u32 %v12308_v30, %v12307_v2 }
 0x3fc   :  { %1348 = vmatmul.bf16.gmra.mxu0 %v11993_v34  ;;  %v2542_v9 = vrot.slane %v2538_v16, 6  ;;  %v4254_v3 = vsel %vm2890_vm10, %v4251_v17, %v4253_v8  ;;  %v12306_v17 = vld [vmem:[#allocation4 + $0x40] sm:$0xff]  }
 0x3fd   :  { %v2533_v57 = vld [vmem:[#allocation3 + $0x280] ss:$2 sm:$0xf]  ;;  %10844 = vmatmul.msk.bf16.gmra.mxu2 %vm2798_vm6, %v4184_v55  ;;  %v4357_v54 = vshll.u32 %v12306_v17, 16  ;;  %v4355_v51 = vshrl.u32 %v12306_v17, 16  ;;  %v4486_v16 = vrot.slane %v12309_v36, 1 }
 0x3fe   :  { %v2535_v49 = vadd.f32 %v13925_v7, %v2533_v57  ;;  %v14059_v25 = vpop.f32.mrf.mxu1  ;;  %2548 = vst.msk [vmem:[#allocation4 + $0x4c] sm:$0xc] %vm2355_vm2, %v2542_v9  ;;  %v2543_v15 = vrot.slane %v2542_v9, 4  ;;  %v11995_v57 = vld [vmem:[%s15709_s0 + $0x1a8] sm:$0xff] }
 0x3ff   :  { %v14064_v44 = vpop.f32.mrf.mxu2  ;;  %v4359_v63 = vrot.slane %v4357_v54, 1 }
 0x400   :  { %v2537_v6 = vmax.f32 %v2535_v49, 0.0 }
 0x401   :  { %v1829_v50 = vld [vmem:[#allocation2 + $0x2a9] sm:$0xff]  ;;  %v1311_v10 = vpop.f32.mrf.mxu0  ;;  %v4360_v56 = vor.u32 %v4359_v63, %v4355_v51 }
 0x402   :  { %v1970_v21 = vmax.f32 %v14028_v33, %v1829_v50  ;;  %1545 = vst [vmem:[#allocation2 + $0x2b8] sm:$0xff] %v1311_v10  ;;  %v2539_v14 = vpack.c.bf16 %v2537_v6, %v2537_v6  ;;  %v14066_v5 = vpop.f32.mrf.mxu3 }
 0x404   :  { %v2544_v43 = vrot.slane %v2539_v14, 6 }
 0x405   :  { %v14082_v62 = vld [vmem:[#allocation4 + $0x48] sm:$0xff] }
 0x406   :  { %v2545_v45 = vsel %vm13012_vm5, %v2543_v15, %v2544_v43  ;;  %v3639_v60 = vpop.f32.mrf.mxu1  ;;  %v4362_v23 = vshll.u32 %v14082_v62, 16 }
 0x407   :  { %2549 = vst.msk [vmem:[#allocation4 + $0x50] sm:$0xf] %vm2330_vm0, %v2545_v45  ;;  %v3683_v29 = vadd.f32 %v3682_v59, %v3639_v60  ;;  %10854 = vmatmul.msk.bf16.gmra.mxu3 %vm2798_vm6, %v4254_v3  ;;  %v14080_v46 = vpop.f32.mrf.mxu2 }
 0x408   :  { %v4364_v24 = vrot.slane %v4362_v23, 1 }
 0x409   :  { %v1830_v1 = vld [vmem:[#allocation2 + $0x2b1] sm:$0xff]  ;;  %v1314_v32 = vpop.f32.mrf.mxu0  ;;  %10822 = vmatmul.msk.bf16.gmra.mxu1 %vm2798_vm6, %v12059_v61 }
 0x40a   :  { %v1971_v42 = vmax.f32 %v14045_v48, %v1830_v1  ;;  %1546 = vst [vmem:[#allocation2 + $0x2c0] sm:$0xff] %v1314_v32  ;;  %v3744_v33 = vpop.f32.mrf.mxu3  ;;  %v4487_v48 = vrot.slane %v14082_v62, 1  ;;  %v4365_v55 = vsel %vm2755_vm7, %v4360_v56, %v4364_v24 }
 0x40b   :  { %v14078_v40 = vadd.f32 %v3744_v33, %v3683_v29 }
 0x40c   :  { %1353 = vmatmul.bf16.gmra.mxu0 %v11994_v11  ;;  %v4488_v12 = vsel %vm2890_vm10, %v4486_v16, %v4487_v48  ;;  %v11996_v11 = vld [vmem:[%s15709_s0 + $0x1b0] sm:$0xff] }
 0x40d   :  { %10881 = vmatmul.msk.bf16.vlgmr.msra.gmra.mxu2 %vm2798_vm6, %v12306_v17 }
 0x40e   :  { %v14084_v13 = vpop.f32.mrf.mxu1 }
 0x40f   :  { %v14091_v53 = vpop.f32.mrf.mxu2 }
 0x411   :  { %v1831_v37 = vld [vmem:[#allocation2 + $0x2b9] sm:$0xff]  ;;  %v1316_v41 = vpop.f32.mrf.mxu0 }
 0x412   :  { %v1972_v34 = vmax.f32 %v1311_v10, %v1831_v37  ;;  %1547 = vst [vmem:[#allocation2 + $0x2c8] sm:$0xff] %v1316_v41  ;;  %v14088_v18 = vpop.f32.mrf.mxu3 }
 0x414   :  { %v2119_v59 = vmax.f32 %v1969_v28, %v1972_v34 }
 0x416   :  { %2260 = vst [vmem:[#allocation3 + $0x2a0] sm:$0xff] %v2119_v59  ;;  %v14093_v9 = vpop.f32.mrf.mxu1 }
 0x417   :  { %10891 = vmatmul.msk.bf16.vlgmr.msrb.gmra.mxu3 %vm2798_vm6, %v4488_v12  ;;  %v14113_v15 = vpop.f32.mrf.mxu2 }
 0x419   :  { %v1832_v28 = vld [vmem:[#allocation2 + $0x2c1] sm:$0xff]  ;;  %v14102_v49 = vpop.f32.mrf.mxu0  ;;  %10873 = vmatmul.msk.bf16.vlgmr.msra.gmra.mxu1 %vm2798_vm6, %v4365_v55 }
 0x41a   :  { %v1973_v6 = vmax.f32 %v1314_v32, %v1832_v28  ;;  %1548 = vst [vmem:[#allocation2 + $0x2d0] sm:$0xff] %v14102_v49  ;;  %v14107_v50 = vpop.f32.mrf.mxu3 }
 0x41c   :  { %v2120_v10 = vmax.f32 %v1970_v21, %v1973_v6  ;;  %1358 = vmatmul.bf16.gmra.mxu0 %v11995_v57  ;;  %v4366_v57 = vshrl.u32 %v14082_v62, 16 }
 0x41d   :  { %10882 = vmatmul.msk.bf16.gmra.mxu2 %vm2798_vm6, %v14082_v62 }
 0x41e   :  { %2261 = vst [vmem:[#allocation3 + $0x2a8] sm:$0xff] %v2120_v10  ;;  %v14109_v14 = vpop.f32.mrf.mxu1  ;;  %v4368_v6 = vor.u32 %v4366_v57, %v4364_v24 }
 0x421   :  { %v1833_v8 = vld [vmem:[#allocation2 + $0x2c9] sm:$0xff]  ;;  %v14115_v43 = vpop.f32.mrf.mxu0 }
 0x422   :  { %v1974_v45 = vmax.f32 %v1316_v41, %v1833_v8  ;;  %1549 = vst [vmem:[#allocation2 + $0x2d8] sm:$0xff] %v14115_v43  ;;  %v14118_v60 = vpop.f32.mrf.mxu3  ;;  %v11997_v8 = vld [vmem:[%s15709_s0 + $0x1b8] sm:$0xff] }
 0x424   :  { %v2121_v3 = vmax.f32 %v1971_v42, %v1974_v45  ;;  %v14130_v42 = vpop.f32.mrf.mxu2 }
 0x425   :  { %v2551_v29 = vld [vmem:[#allocation3 + $0x2a0] ss:$2 sm:$0xff] }
 0x426   :  { %2262 = vst [vmem:[#allocation3 + $0x2b0] sm:$0xff] %v2121_v3  ;;  %v2554_v21 = vadd.f32 %v13925_v7, %v2551_v29  ;;  %v14121_v61 = vpop.f32.mrf.mxu1 }
 0x428   :  { %v2556_v1 = vmax.f32 %v2554_v21, 0.0 }
 0x429   :  { %v1834_v32 = vld [vmem:[#allocation2 + $0x2d1] sm:$0xff]  ;;  %v14126_v33 = vpop.f32.mrf.mxu0 }
 0x42a   :  { %v1975_v17 = vmax.f32 %v14102_v49, %v1834_v32  ;;  %1550 = vst [vmem:[#allocation2 + $0x2e0] sm:$0xff] %v14126_v33  ;;  %v2558_v2 = vpack.c.bf16 %v2556_v1, %v2556_v1  ;;  %v14132_v54 = vpop.f32.mrf.mxu3 }
 0x42c   :  { %1363 = vmatmul.bf16.gmra.mxu0 %v11996_v11  ;;  %2560 = vst.msk [vmem:[#allocation4 + $0x54] sm:$0xf] %vm2330_vm0, %v2558_v2 }
 0x42d   :  { %v2553_v30 = vld [vmem:[#allocation3 + $0x2b0] ss:$2 sm:$0xf] }
 0x42e   :  { %v2555_v37 = vadd.f32 %v13925_v7, %v2553_v30  ;;  %v14136_v41 = vpop.f32.mrf.mxu1 }
 0x430   :  { %v2557_v36 = vmax.f32 %v2555_v37, 0.0  ;;  %v14139_v51 = vpop.f32.mrf.mxu2  ;;  %v11998_v37 = vld [vmem:[%s15709_s0 + $0x1c0] sm:$0xff] }
 0x431   :  { %v1835_v23 = vld [vmem:[#allocation2 + $0x2d9] sm:$0xff]  ;;  %v1326_v34 = vpop.f32.mrf.mxu0 }
 0x432   :  { %v1976_v63 = vmax.f32 %v14115_v43, %v1835_v23  ;;  %1551 = vst [vmem:[#allocation2 + $0x2e8] sm:$0xff] %v1326_v34  ;;  %v2559_v59 = vpack.c.bf16 %v2557_v36, %v2557_v36  ;;  %v14141_v16 = vpop.f32.mrf.mxu3 }
 0x433   :  { %v14143_v56 = vld [vmem:[#allocation4 + $0x50] sm:$0xff] }
 0x434   :  { %2561 = vst.msk [vmem:[#allocation4 + $0x58] sm:$0x3] %vm2332_vm1, %v2559_v59  ;;  %10883 = vmatmul.msk.bf16.gmra.mxu2 %vm2798_vm6, %v14143_v56  ;;  %v4489_v12 = vrot.slane %v14143_v56, 1  ;;  %v4370_v28 = vshll.u32 %v14143_v56, 16 }
 0x436   :  { %v14151_v49 = vpop.f32.mrf.mxu1  ;;  %v4490_v55 = vsel %vm2890_vm10, %v4487_v48, %v4489_v12  ;;  %v14158_v10 = vrot.slane %v4370_v28, 1 }
 0x437   :  { %10892 = vmatmul.msk.bf16.gmra.mxu3 %vm2798_vm6, %v4490_v55 }
 0x438   :  { %v4373_v3 = vsel %vm2755_vm7, %v4368_v6, %v14158_v10  ;;  %v14168_v62 = vpop.f32.mrf.mxu2 }
 0x439   :  { %v1836_v43 = vld [vmem:[#allocation2 + $0x2e1] sm:$0xff]  ;;  %v1329_v45 = vpop.f32.mrf.mxu0  ;;  %10874 = vmatmul.msk.bf16.gmra.mxu1 %vm2798_vm6, %v4373_v3 }
 0x43a   :  { %v1977_v29 = vmax.f32 %v14126_v33, %v1836_v43  ;;  %1552 = vst [vmem:[#allocation2 + $0x2f0] sm:$0xff] %v1329_v45  ;;  %v14170_v48 = vpop.f32.mrf.mxu3  ;;  %v3670_v43 = vadd.f32 %v13898_v19, %v13905_v27 }
 0x43c   :  { %1368 = vmatmul.bf16.gmra.mxu0 %v11997_v8 }
 0x43e   :  { %v14172_v24 = vpop.f32.mrf.mxu1 }
 0x440   :  { %v14174_v32 = vpop.f32.mrf.mxu2 }
 0x441   :  { %v1837_v21 = vld [vmem:[#allocation2 + $0x2e9] sm:$0xff]  ;;  %v1331_v11 = vpop.f32.mrf.mxu0 }
 0x442   :  { %v1978_v1 = vmax.f32 %v1326_v34, %v1837_v21  ;;  %1553 = vst [vmem:[#allocation2 + $0x2f8] sm:$0xff] %v1331_v11  ;;  %v14176_v2 = vpop.f32.mrf.mxu3 }
 0x444   :  { %v2125_v30 = vmax.f32 %v1975_v17, %v1978_v1  ;;  %v3847_v17 = vadd.f32 %v14093_v9, %v13988_v31  ;;  %v3750_v1 = vadd.f32 %v13994_v20, %v3670_v43 }
 0x446   :  { %2266 = vst [vmem:[#allocation3 + $0x2d0] sm:$0xff] %v2125_v30  ;;  %v14178_v33 = vpop.f32.mrf.mxu1 }
 0x448   :  { %v14186_v34 = vpop.f32.mrf.mxu2 }
 0x449   :  { %v1838_v36 = vld [vmem:[#allocation2 + $0x2f1] sm:$0xff]  ;;  %v14183_v23 = vpop.f32.mrf.mxu0 }
 0x44a   :  { %v1979_v59 = vmax.f32 %v1329_v45, %v1838_v36  ;;  %1554 = vst [vmem:[#allocation2 + $0x300] sm:$0xff] %v14183_v23  ;;  %v14188_v57 = vpop.f32.mrf.mxu3  ;;  %v3952_v45 = vadd.f32 %v14080_v46, %v3847_v17  ;;  %v11999_v46 = vld [vmem:[%s15709_s0 + $0x1c8] sm:$0xff] }
 0x44c   :  { %v2126_v28 = vmax.f32 %v1976_v63, %v1979_v59  ;;  %1373 = vmatmul.bf16.gmra.mxu0 %v11998_v37  ;;  %v4022_v30 = vadd.f32 %v14107_v50, %v3952_v45  ;;  %v3848_v37 = vadd.f32 %v14109_v14, %v3750_v1 }
 0x44e   :  { %2267 = vst [vmem:[#allocation3 + $0x2d8] sm:$0xff] %v2126_v28  ;;  %v14192_v55 = vpop.f32.mrf.mxu1  ;;  %v3953_v20 = vadd.f32 %v14091_v53, %v3848_v37 }
 0x450   :  { %v4212_v21 = vpop.f32.mrf.mxu2  ;;  %v4023_v1 = vadd.f32 %v14118_v60, %v3953_v20 }
 0x451   :  { %v1839_v6 = vld [vmem:[#allocation2 + $0x2f9] sm:$0xff]  ;;  %v14194_v8 = vpop.f32.mrf.mxu0 }
 0x452   :  { %v1980_v3 = vmax.f32 %v1331_v11, %v1839_v6  ;;  %1555 = vst [vmem:[#allocation2 + $0x308] sm:$0xff] %v14194_v8  ;;  %v14200_v63 = vpop.f32.mrf.mxu3 }
 0x454   :  { %v2127_v31 = vmax.f32 %v1977_v29, %v1980_v3 }
 0x455   :  { %v2563_v9 = vld [vmem:[#allocation3 + $0x2d0] ss:$2 sm:$0xff] }
 0x456   :  { %2268 = vst [vmem:[#allocation3 + $0x2e0] sm:$0xff] %v2127_v31  ;;  %v2566_v36 = vadd.f32 %v13925_v7, %v2563_v9  ;;  %v4087_v19 = vpop.f32.mrf.mxu1  ;;  %v3849_v31 = vadd.f32 %v14121_v61, %v14017_v47 }
 0x457   :  { %v4107_v27 = vadd.f32 %v4087_v19, %v4022_v30 }
 0x458   :  { %v2568_v11 = vmax.f32 %v2566_v36, 0.0  ;;  %v4214_v17 = vpop.f32.mrf.mxu2  ;;  %v3675_v36 = vadd.f32 %v13990_v35, %v14022_v0 }
 0x459   :  { %v14209_v59 = vld [vmem:[#allocation2 + $0x301] sm:$0xff]  ;;  %v14211_v28 = vpop.f32.mrf.mxu0  ;;  %v4232_v14 = vadd.f32 %v4212_v21, %v4107_v27 }
 0x45a   :  { %v1981_v50 = vmax.f32 %v14183_v23, %v14209_v59  ;;  %1556 = vst [vmem:[#allocation2 + $0x310] sm:$0xff] %v14211_v28  ;;  %v2570_v29 = vpack.c.bf16 %v2568_v11, %v2568_v11  ;;  %v4282_v6 = vpop.f32.mrf.mxu3  ;;  %v12076_v21 = vld [vmem:[%s15712_s3 + $0x20] sm:$0xff] }
 0x45b   :  { %v4302_v43 = vadd.f32 %v4282_v6, %v4232_v14  ;;  %4723 = vmatpush.bf16.msrb.mxu2 %v12076_v21  ;;  %v6843_v14 = vld [vmem:[#allocation5 + $0x31] sm:$0xff] }
 0x45c   :  { %1378 = vmatmul.bf16.gmra.mxu0 %v11999_v46  ;;  %v2574_v45 = vrot.slane %v2570_v29, 6  ;;  %v3752_v46 = vadd.f32 %v14031_v39, %v3675_v36  ;;  %v14252_v21 = vld [vmem:[#allocation4 + $0x48] sm:$0xf] }
 0x45d   :  { %v2565_v3 = vld [vmem:[#allocation3 + $0x2e0] ss:$2 sm:$0xf]  ;;  %4310 = vst [vmem:[#allocation5 + $0x40] sm:$0xff] %v4302_v43 }
 0x45e   :  { %v2567_v53 = vadd.f32 %v13925_v7, %v2565_v3  ;;  %v4089_v9 = vpop.f32.mrf.mxu1  ;;  %2580 = vst.msk [vmem:[#allocation4 + $0x58] sm:$0xc] %vm2355_vm2, %v2574_v45  ;;  %v3954_v7 = vadd.f32 %v14113_v15, %v3849_v31  ;;  %v2575_v0 = vrot.slane %v2574_v45, 4  ;;  %v3850_v15 = vadd.f32 %v14136_v41, %v3752_v46  ;;  %v12000_v45 = vld [vmem:[%s15709_s0 + $0x1d0] sm:$0xff] }
 0x45f   :  { %v4108_v30 = vadd.f32 %v4089_v9, %v4023_v1 }
 0x460   :  { %v2569_v37 = vmax.f32 %v2567_v53, 0.0  ;;  %v4217_v11 = vpop.f32.mrf.mxu2  ;;  %v4024_v6 = vadd.f32 %v14132_v54, %v3954_v7 }
 0x461   :  { %v14227_v19 = vld [vmem:[#allocation2 + $0x309] sm:$0xff]  ;;  %v14229_v60 = vpop.f32.mrf.mxu0  ;;  %v4233_v61 = vadd.f32 %v4214_v17, %v4108_v30  ;;  %v6875_v17 = vmax.f32 %v13953_v52, %v6843_v14  ;;  %v3955_v52 = vadd.f32 %v14130_v42, %v3850_v15  ;;  %v4571_v14 = vunpack.c.l.b16 %v14252_v21 }
 0x462   :  { %v1982_v47 = vmax.f32 %v14194_v8, %v14227_v19  ;;  %1557 = vst [vmem:[#allocation2 + $0x318] sm:$0xff] %v14229_v60  ;;  %v2571_v27 = vpack.c.bf16 %v2569_v37, %v2569_v37  ;;  %v4284_v20 = vpop.f32.mrf.mxu3 }
 0x463   :  { %v14236_v35 = vadd.f32 %v4284_v20, %v4233_v61  ;;  %v4025_v42 = vadd.f32 %v14141_v16, %v3955_v52 }
 0x464   :  { %v2576_v29 = vrot.slane %v2571_v27, 6  ;;  %v6907_v43 = vld [vmem:[#allocation5 + $0x3c] sm:$0xff]  ;;  %v4550_v27 = vld [vmem:[#allocation4 + $0x44] sm:$0xc] }
 0x465   :  { %v6939_v3 = vld [vmem:[#allocation5 + $0x3d] sm:$0xff]  ;;  %4311 = vst [vmem:[#allocation5 + $0x48] sm:$0xff] %v14236_v35 }
 0x466   :  { %v2577_v1 = vsel %vm13012_vm5, %v2575_v0, %v2576_v29  ;;  %v6971_v31 = vmax.f32 %v6907_v43, %v6939_v3  ;;  %v4092_v39 = vpop.f32.mrf.mxu1  ;;  %v6844_v46 = vld [vmem:[#allocation5 + $0x39] sm:$0xff]  ;;  %v3851_v29 = vadd.f32 %v14151_v49, %v14055_v22  ;;  %v14334_v8 = vld [vmem:[#allocation4 + $0x54] sm:$0xff] }
 0x467   :  { %v4109_v53 = vadd.f32 %v4092_v39, %v4024_v6  ;;  %2581 = vst.msk [vmem:[#allocation4 + $0x5c] sm:$0xf] %vm2330_vm0, %v2577_v1  ;;  %v6876_v43 = vmax.f32 %v13972_v38, %v6844_v46 }
 0x468   :  { %v7003_v54 = vmax.f32 %v6875_v17, %v6971_v31  ;;  %v4219_v7 = vpop.f32.mrf.mxu2  ;;  %v3680_v31 = vadd.f32 %v14026_v26, %v14059_v25  ;;  %v3956_v25 = vadd.f32 %v14139_v51, %v3851_v29 }
 0x469   :  { %v14248_v41 = vld [vmem:[#allocation2 + $0x311] sm:$0xff]  ;;  %v14250_v9 = vpop.f32.mrf.mxu0  ;;  %v4234_v37 = vadd.f32 %v4217_v11, %v4109_v53  ;;  %v14265_v11 = vld [vmem:[#allocation4 + $0x4c] sm:$0xff] }
 0x46a   :  { %v1983_v30 = vmax.f32 %v14211_v28, %v14248_v41  ;;  %1558 = vst [vmem:[#allocation2 + $0x320] sm:$0xff] %v14250_v9  ;;  %v7039_v36 = vadd.f32 %v13856_v58, %v7003_v54  ;;  %v4287_v61 = vpop.f32.mrf.mxu3  ;;  %v4570_v58 = vunpack.c.l.b16 %v4550_v27 }
 0x46b   :  { %v14259_v20 = vadd.f32 %v4287_v61, %v4234_v37  ;;  %v4663_v37 = vshrl.u32 %v14265_v11, 16 }
 0x46c   :  { %1383 = vmatmul.bf16.gmra.mxu0 %v12000_v45  ;;  %v7071_v0 = vmax.f32 %v7039_v36, 0.0  ;;  %v6908_v6 = vld [vmem:[#allocation5 + $0x44] sm:$0xff]  ;;  %v14275_v22 = vpack.c.b16 %v4571_v14, %v4570_v58  ;;  %v4374_v45 = vshrl.u32 %v14143_v56, 16  ;;  %v14291_v36 = vld [vmem:[%s15713_s4] ss:$0 sm:$0xff]  ;;  %v4026_v58 = vadd.f32 %v14170_v48, %v3956_v25 }
 0x46d   :  { %v6940_v15 = vld [vmem:[#allocation5 + $0x45] sm:$0xff]  ;;  %4312 = vst [vmem:[#allocation5 + $0x50] sm:$0xff] %v14259_v20  ;;  %v4665_v59 = vrot.slane %v4663_v37, 2 }
 0x46e   :  { %7103 = vst [vmem:[#allocation6 + $0x30] sm:$0xff] %v7071_v0  ;;  %v6972_v3 = vmax.f32 %v6908_v6, %v6940_v15  ;;  %v4094_v1 = vpop.f32.mrf.mxu1  ;;  %v14268_v17 = vld [vmem:[#allocation4 + $0x58] sm:$0xff]  ;;  %v3754_v0 = vadd.f32 %v14066_v5, %v3680_v31  ;;  %v4666_v6 = vshll.u32 %v14265_v11, 16 }
 0x46f   :  { %v4110_v16 = vadd.f32 %v4094_v1, %v4025_v42  ;;  %10884 = vmatmul.msk.bf16.gmra.mxu2 %vm2798_vm6, %v14268_v17  ;;  %v4491_v38 = vrot.slane %v14268_v17, 1  ;;  %v4378_v26 = vshll.u32 %v14268_v17, 16 }
 0x470   :  { %v7004_v49 = vmax.f32 %v6876_v43, %v6972_v3  ;;  %v4222_v27 = vpop.f32.mrf.mxu2  ;;  %v3852_v5 = vadd.f32 %v14172_v24, %v3754_v0  ;;  %v12001_v43 = vld [vmem:[%s15709_s0 + $0x1d8] sm:$0xff]  ;;  %v4668_v3 = vrot.slane %v4666_v6, 3 }
 0x471   :  { %v1843_v39 = vld [vmem:[#allocation2 + $0x319] sm:$0xff]  ;;  %v14277_v53 = vpop.f32.mrf.mxu0  ;;  %v4235_v52 = vadd.f32 %v4219_v7, %v4110_v16  ;;  %v4492_v51 = vsel %vm2890_vm10, %v4489_v12, %v4491_v38  ;;  %v14300_v7 = vrot.slane %v4378_v26, 1  ;;  %v4655_v12 = vshrl.u32 %v14275_v22, 16 }
 0x472   :  { %v1984_v54 = vmax.f32 %v14229_v60, %v1843_v39  ;;  %1559 = vst [vmem:[#allocation2 + $0x328] sm:$0xff] %v14277_v53  ;;  %v7040_v61 = vadd.f32 %v14291_v36, %v7004_v49  ;;  %v4289_v46 = vpop.f32.mrf.mxu3  ;;  %v4376_v60 = vor.u32 %v4374_v45, %v14158_v10  ;;  %10893 = vmatmul.msk.bf16.gmra.mxu3 %vm2798_vm6, %v4492_v51  ;;  %v4658_v10 = vshll.u32 %v14275_v22, 16 }
 0x473   :  { %v4305_v29 = vadd.f32 %v4289_v46, %v4235_v52  ;;  %v4657_v16 = vrot.slane %v4655_v12, 2  ;;  %v3957_v24 = vadd.f32 %v14168_v62, %v3852_v5  ;;  %v14328_v52 = vor.u32 %v4668_v3, %v4665_v59  ;;  %v14361_v3 = vld [vmem:[%s15711_s2] ss:$0 sm:$0xff] }
 0x474   :  { %v2131_v42 = vmax.f32 %v1981_v50, %v1984_v54  ;;  %v7072_v15 = vmax.f32 %v7040_v61, 0.0  ;;  %v4381_v56 = vsel %vm2755_vm7, %v4376_v60, %v14300_v7  ;;  %v4660_v48 = vrot.slane %v4658_v10, 3  ;;  %v6846_v37 = vld [vmem:[#allocation5 + $0x49] sm:$0xff] }
 0x475   :  { %10875 = vmatmul.msk.bf16.gmra.mxu1 %vm2798_vm6, %v4381_v56  ;;  %4313 = vst [vmem:[#allocation5 + $0x58] sm:$0xff] %v4305_v29  ;;  %v4027_v61 = vadd.f32 %v14176_v2, %v3957_v24  ;;  %v3853_v62 = vadd.f32 %v14178_v33, %v14078_v40  ;;  %v6878_v19 = vmax.f32 %v14236_v35, %v6846_v37  ;;  %v4672_v10 = vshrl.u32 %v14334_v8, 16 }
 0x476   :  { %2272 = vst [vmem:[#allocation3 + $0x300] sm:$0xff] %v2131_v42  ;;  %v4097_v23 = vpop.f32.mrf.mxu1  ;;  %v3685_v2 = vadd.f32 %v14064_v44, %v14084_v13 }
 0x477   :  { %7104 = vst [vmem:[#allocation6 + $0x38] sm:$0xff] %v7072_v15  ;;  %v4111_v50 = vadd.f32 %v4097_v23, %v4026_v58  ;;  %v3958_v42 = vadd.f32 %v14174_v32, %v3853_v62 }
 0x478   :  { %v4224_v45 = vpop.f32.mrf.mxu2  ;;  %v3756_v15 = vadd.f32 %v14088_v18, %v3685_v2 }
 0x479   :  { %v1844_v1 = vld [vmem:[#allocation2 + $0x321] sm:$0xff]  ;;  %v14318_v31 = vpop.f32.mrf.mxu0  ;;  %v4236_v39 = vadd.f32 %v4222_v27, %v4111_v50  ;;  %v4028_v23 = vadd.f32 %v14188_v57, %v3958_v42 }
 0x47a   :  { %v1985_v49 = vmax.f32 %v14250_v9, %v1844_v1  ;;  %1560 = vst [vmem:[#allocation2 + $0x330] sm:$0xff] %v14318_v31  ;;  %v4292_v26 = vpop.f32.mrf.mxu3  ;;  %v4661_v9 = vor.u32 %v4660_v48, %v4657_v16  ;;  %v3854_v18 = vadd.f32 %v14192_v55, %v3756_v15  ;;  %v12002_v55 = vld [vmem:[%s15709_s0 + $0x1e0] sm:$0xff]  ;;  %v4674_v16 = vrot.slane %v4672_v10, 2 }
 0x47b   :  { %v14326_v54 = vadd.f32 %v4292_v26, %v4236_v39 }
 0x47c   :  { %v2132_v25 = vmax.f32 %v1982_v47, %v1985_v49  ;;  %1388 = vmatmul.bf16.gmra.mxu0 %v12001_v43  ;;  %v6910_v27 = vld [vmem:[#allocation5 + $0x54] sm:$0xff]  ;;  %v4670_v0 = vsel %vm3062_vm11, %v4661_v9, %v14328_v52 }
 0x47d   :  { %v6942_v46 = vld [vmem:[#allocation5 + $0x55] sm:$0xff]  ;;  %4314 = vst [vmem:[#allocation5 + $0x60] sm:$0xff] %v14326_v54 }
 0x47e   :  { %2273 = vst [vmem:[#allocation3 + $0x308] sm:$0xff] %v2132_v25  ;;  %v4099_v51 = vpop.f32.mrf.mxu1  ;;  %v6974_v47 = vmax.f32 %v6910_v27, %v6942_v46  ;;  %v6847_v44 = vld [vmem:[#allocation5 + $0x51] sm:$0xff] }
 0x47f   :  { %v4112_v60 = vadd.f32 %v4099_v51, %v4027_v61  ;;  %10923 = vmatmul.msk.bf16.vlgmr.msrb.gmra.mxu2 %vm2798_vm6, %v4670_v0  ;;  %v6879_v41 = vmax.f32 %v14259_v20, %v6847_v44  ;;  %v3959_v20 = vadd.f32 %v14186_v34, %v3854_v18  ;;  %v12077_v61 = vld [vmem:[%s15712_s3 + $0x28] sm:$0xff]  ;;  %v12075_v34 = vld [vmem:[%s15712_s3 + $0x18] sm:$0xff] }
 0x480   :  { %v7006_v29 = vmax.f32 %v6878_v19, %v6974_v47  ;;  %v4227_v56 = vpop.f32.mrf.mxu2  ;;  %4793 = vmatpush.bf16.msra.mxu3 %v12077_v61  ;;  %4618 = vmatpush.bf16.msrb.mxu1 %v12075_v34 }
 0x481   :  { %v1845_v40 = vld [vmem:[#allocation2 + $0x329] sm:$0xff]  ;;  %v14341_v33 = vpop.f32.mrf.mxu0  ;;  %v4237_v35 = vadd.f32 %v4224_v45, %v4112_v60  ;;  %v4029_v60 = vadd.f32 %v14200_v63, %v3959_v20 }
 0x482   :  { %v1986_v6 = vmax.f32 %v14277_v53, %v1845_v40  ;;  %1561 = vst [vmem:[#allocation2 + $0x338] sm:$0xff] %v14341_v33  ;;  %v4294_v12 = vpop.f32.mrf.mxu3  ;;  %v7042_v13 = vadd.f32 %v14291_v36, %v7006_v29  ;;  %v4675_v53 = vshll.u32 %v14334_v8, 16 }
 0x483   :  { %v14353_v32 = vadd.f32 %v4294_v12, %v4237_v35 }
 0x484   :  { %v2133_v58 = vmax.f32 %v1983_v30, %v1986_v6  ;;  %v7074_v59 = vmax.f32 %v7042_v13, 0.0  ;;  %v6911_v50 = vld [vmem:[#allocation5 + $0x5c] sm:$0xff]  ;;  %v4677_v48 = vrot.slane %v4675_v53, 3 }
 0x485   :  { %v2583_v5 = vld [vmem:[#allocation3 + $0x300] ss:$2 sm:$0xff]  ;;  %v6943_v43 = vld [vmem:[#allocation5 + $0x5d] sm:$0xff]  ;;  %4315 = vst [vmem:[#allocation5 + $0x68] sm:$0xff] %v14353_v32 }
 0x486   :  { %2274 = vst [vmem:[#allocation3 + $0x310] sm:$0xff] %v2133_v58  ;;  %v2586_v28 = vadd.f32 %v14361_v3, %v2583_v5  ;;  %v6975_v30 = vmax.f32 %v6911_v50, %v6943_v43  ;;  %v4102_v1 = vpop.f32.mrf.mxu1  ;;  %v14381_v46 = vor.u32 %v4677_v48, %v4674_v16 }
 0x487   :  { %7106 = vst [vmem:[#allocation6 + $0x48] sm:$0xff] %v7074_v59  ;;  %v4113_v57 = vadd.f32 %v4102_v1, %v4028_v23 }
 0x488   :  { %v2588_v24 = vmax.f32 %v2586_v28, 0.0  ;;  %v7007_v49 = vmax.f32 %v6879_v41, %v6975_v30  ;;  %v4229_v19 = vpop.f32.mrf.mxu2  ;;  %v4679_v42 = vsel %vm3062_vm11, %v14328_v52, %v14381_v46 }
 0x489   :  { %v14369_v39 = vld [vmem:[#allocation2 + $0x331] sm:$0xff]  ;;  %v14371_v45 = vpop.f32.mrf.mxu0  ;;  %v4238_v25 = vadd.f32 %v4227_v56, %v4113_v57 }
 0x48a   :  { %v1987_v26 = vmax.f32 %v14318_v31, %v14369_v39  ;;  %1562 = vst [vmem:[#allocation2 + $0x340] sm:$0xff] %v14371_v45  ;;  %v2590_v37 = vpack.c.bf16 %v2588_v24, %v2588_v24  ;;  %v7043_v62 = vadd.f32 %v14291_v36, %v7007_v49  ;;  %v4297_v9 = vpop.f32.mrf.mxu3  ;;  %v4382_v49 = vshrl.u32 %v14268_v17, 16 }
 0x48b   :  { %v4308_v27 = vadd.f32 %v4297_v9, %v4238_v25 }
 0x48c   :  { %1393 = vmatmul.bf16.gmra.mxu0 %v12002_v55  ;;  %2592 = vst.msk [vmem:[#allocation4 + $0x60] sm:$0xf] %vm2330_vm0, %v2590_v37  ;;  %v7075_v51 = vmax.f32 %v7043_v62, 0.0  ;;  %v6849_v13 = vld [vmem:[#allocation5 + $0x61] sm:$0xff]  ;;  %v4384_v62 = vor.u32 %v4382_v49, %v14300_v7 }
 0x48d   :  { %v2585_v47 = vld [vmem:[#allocation3 + $0x310] ss:$2 sm:$0xf]  ;;  %4316 = vst [vmem:[#allocation5 + $0x70] sm:$0xff] %v4308_v27  ;;  %v6881_v18 = vmax.f32 %v14326_v54, %v6849_v13  ;;  %v12003_v55 = vld [vmem:[%s15709_s0 + $0x1e8] sm:$0xff] }
 0x48e   :  { %v2587_v0 = vadd.f32 %v14361_v3, %v2585_v47  ;;  %7107 = vst [vmem:[#allocation6 + $0x50] sm:$0xff] %v7075_v51  ;;  %v4104_v2 = vpop.f32.mrf.mxu1 }
 0x48f   :  { %v4114_v40 = vadd.f32 %v4104_v2, %v4029_v60  ;;  %10924 = vmatmul.msk.bf16.gmra.mxu2 %vm2798_vm6, %v4679_v42  ;;  %v4753_v60 = vld [vmem:[#allocation4 + $0x44] sm:$0x8] }
 0x490   :  { %v2589_v29 = vmax.f32 %v2587_v0, 0.0  ;;  %v4460_v43 = vpop.f32.mrf.mxu2 }
 0x491   :  { %v14392_v6 = vld [vmem:[#allocation2 + $0x339] sm:$0xff]  ;;  %v14394_v35 = vpop.f32.mrf.mxu0  ;;  %v4239_v15 = vadd.f32 %v4229_v19, %v4114_v40 }
 0x492   :  { %v1988_v63 = vmax.f32 %v14341_v33, %v14392_v6  ;;  %1563 = vst [vmem:[#allocation2 + $0x348] sm:$0xff] %v14394_v35  ;;  %v2591_v56 = vpack.c.bf16 %v2589_v29, %v2589_v29  ;;  %v4299_v12 = vpop.f32.mrf.mxu3 }
 0x493   :  { %v4328_v10 = vld [vmem:[#allocation4 + $0x60] sm:$0x1]  ;;  %v4309_v52 = vadd.f32 %v4299_v12, %v4239_v15 }
 0x494   :  { %v14400_v44 = vld [vmem:[#allocation4 + $0x5c] sm:$0xff]  ;;  %v4348_v58 = vunpack.c.l.b16 %v4328_v10  ;;  %2593 = vst.msk [vmem:[#allocation4 + $0x64] sm:$0x3] %vm2332_vm1, %v2591_v56  ;;  %v4757_v56 = vunpack.c.l.b16 %v4753_v60 }
 0x495   :  { %v4681_v53 = vshrl.u32 %v14400_v44, 16  ;;  %v4684_v5 = vshll.u32 %v14400_v44, 16  ;;  %v6913_v59 = vld [vmem:[#allocation5 + $0x6c] sm:$0xff]  ;;  %4317 = vst [vmem:[#allocation5 + $0x78] sm:$0xff] %v4309_v52  ;;  %v4764_v60 = vrot.slane %v14400_v44, 3 }
 0x496   :  { %v4353_v23 = vpack.c.b16 %v4348_v58, %v4348_v58  ;;  %v6945_v50 = vld [vmem:[#allocation5 + $0x6d] sm:$0xff]  ;;  %v4417_v28 = vpop.f32.mrf.mxu1  ;;  %v4758_v10 = vpack.c.b16 %v4571_v14, %v4757_v56  ;;  %v4584_v14 = vrot.slane %v14275_v22, 2 }
 0x497   :  { %v4683_v41 = vrot.slane %v4681_v53, 2  ;;  %v6977_v30 = vmax.f32 %v6913_v59, %v6945_v50  ;;  %v4461_v1 = vadd.f32 %v4460_v43, %v4417_v28  ;;  %v4686_v16 = vrot.slane %v4684_v5, 3  ;;  %v6850_v19 = vld [vmem:[#allocation5 + $0x69] sm:$0xff] }
 0x498   :  { %v4493_v57 = vrot.slane %v4353_v23, 1  ;;  %v4386_v54 = vshll.u32 %v4353_v23, 16  ;;  %v6882_v0 = vmax.f32 %v14353_v32, %v6850_v19  ;;  %v4759_v52 = vrot.slane %v4758_v10, 3  ;;  %v12087_v10 = vld [vmem:[%s15712_s3 + $0x40] sm:$0xff] }
 0x499   :  { %v14409_v48 = vld [vmem:[#allocation2 + $0x341] sm:$0xff]  ;;  %v1359_v24 = vpop.f32.mrf.mxu0  ;;  %v7009_v20 = vmax.f32 %v6881_v18, %v6977_v30  ;;  %v14422_v51 = vor.u32 %v4686_v16, %v4683_v41  ;;  %v12005_v30 = vld [vmem:[%s15709_s0 + $0x1f8] sm:$0xff]  ;;  %v4587_v16 = vrot.slane %v14334_v8, 2  ;;  %5073 = vmatpush.bf16.msrb.mxu3 %v12087_v10 }
 0x49a   :  { %v1989_v25 = vmax.f32 %v14371_v45, %v14409_v48  ;;  %1564 = vst [vmem:[#allocation2 + $0x350] sm:$0xff] %v1359_v24  ;;  %v4494_v37 = vsel %vm2890_vm10, %v4491_v38, %v4493_v57  ;;  %v4522_v61 = vpop.f32.mrf.mxu3  ;;  %v4388_v9 = vrot.slane %v4386_v54, 1 }
 0x49b   :  { %10894 = vmatmul.msk.bf16.gmra.mxu3 %vm2798_vm6, %v4494_v37  ;;  %v7045_v27 = vadd.f32 %v14291_v36, %v7009_v20  ;;  %v14420_v34 = vadd.f32 %v4522_v61, %v4461_v1  ;;  %v4688_v2 = vsel %vm3062_vm11, %v14381_v46, %v14422_v51  ;;  %v4760_v46 = vrot.slane %v14265_v11, 3 }
 0x49c   :  { %1398 = vmatmul.bf16.gmra.mxu0 %v12003_v55  ;;  %v4389_v45 = vsel %vm2755_vm7, %v4384_v62, %v4388_v9  ;;  %v6914_v17 = vld [vmem:[#allocation5 + $0x74] sm:$0xff] }
 0x49d   :  { %v7077_v47 = vmax.f32 %v7045_v27, 0.0  ;;  %10876 = vmatmul.msk.bf16.gmra.mxu1 %vm2798_vm6, %v4389_v45  ;;  %v6946_v38 = vld [vmem:[#allocation5 + $0x75] sm:$0xff]  ;;  %v4761_v21 = vsel %vm3169_vm9, %v4759_v52, %v4760_v46 }
 0x49e   :  { %v6978_v7 = vmax.f32 %v6914_v17, %v6946_v38  ;;  %v12086_v62 = vld [vmem:[%s15712_s3 + $0x38] sm:$0xff] }
 0x49f   :  { %7109 = vst [vmem:[#allocation6 + $0x60] sm:$0xff] %v7077_v47  ;;  %10925 = vmatmul.msk.bf16.gmra.mxu2 %vm2798_vm6, %v4688_v2  ;;  %v4908_v52 = vld [vmem:[#allocation4 + $0x4c] sm:$0xff]  }
 0x4a0   :  { %v7010_v29 = vmax.f32 %v6882_v0, %v6978_v7  ;;  %5003 = vmatpush.bf16.msra.mxu2 %v12086_v62 }
 0x4a1   :  { %v1849_v40 = vld [vmem:[#allocation2 + $0x349] sm:$0xff]  ;;  %v1361_v42 = vpop.f32.mrf.mxu0 }
 0x4a2   :  { %v1990_v15 = vmax.f32 %v14394_v35, %v1849_v40  ;;  %1565 = vst [vmem:[#allocation2 + $0x358] sm:$0xff] %v1361_v42  ;;  %v7046_v12 = vadd.f32 %v14291_v36, %v7010_v29  ;;  %v12004_v35 = vld [vmem:[%s15709_s0 + $0x1f0] sm:$0xff]  ;;  %v4585_v36 = vrot.slane %v14265_v11, 2  ;;  %v14456_v11 = vpop.f32.mrf.mxu1  ;;  %v14461_v22 = vpop.f32.mrf.mxu3  ;;  %v12006_v40 = vld [vmem:[%s15709_s0 + $0x200] sm:$0xff] }
 0x4a4   :  { %v2137_v32 = vmax.f32 %v1987_v26, %v1990_v15  ;;  %v7078_v13 = vmax.f32 %v7046_v12, 0.0  ;;  %v14452_v26 = vpop.f32.mrf.mxu2  ;;  %v4586_v5 = vsel %vm2990_vm8, %v4584_v14, %v4585_v36  ;;  %v4588_v37 = vsel %vm2990_vm8, %v4585_v36, %v4587_v16 }
 0x4a5   :  { %v4589_v15 = vrot.slane %v14400_v44, 2  ;;  %v12082_v44 = vld [vmem:[%s15712_s3 + $0x30] sm:$0xff] }
 0x4a6   :  { %2278 = vst [vmem:[#allocation3 + $0x330] sm:$0xff] %v2137_v32  ;;  %4878 = vmatpush.bf16.msra.mxu1 %v12082_v44 }
 0x4a7   :  { %7110 = vst [vmem:[#allocation6 + $0x68] sm:$0xff] %v7078_v13 }
 0x4a9   :  { %v1850_v58 = vld [vmem:[#allocation2 + $0x351] sm:$0xff]  ;;  %v14442_v53 = vpop.f32.mrf.mxu0 }
 0x4aa   :  { %v1991_v31 = vmax.f32 %v1359_v24, %v1850_v58  ;;  %1566 = vst [vmem:[#allocation2 + $0x360] sm:$0xff] %v14442_v53  ;;  %v4590_v58 = vsel %vm2990_vm8, %v4587_v16, %v4589_v15 }
 0x4ab   :  { %10933 = vmatmul.msk.bf16.vlgmr.msra.gmra.mxu3 %vm2798_vm6, %v4761_v21 }
 0x4ac   :  { %v2138_v39 = vmax.f32 %v1988_v63, %v1991_v31  ;;  %1403 = vmatmul.bf16.gmra.mxu0 %v12004_v35  ;;  %v4762_v63 = vrot.slane %v14334_v8, 3  ;;  %v4465_v43 = vpop.f32.mrf.mxu2  ;;  %v12337_v35 = vld [vmem:[#allocation4 + $0x4c] sm:$0xf0]  ;;  %v4558_v31 = vld [vmem:[#allocation4 + $0x64] sm:$0x3] }
 0x4ad   :  { %10913 = vmatmul.msk.bf16.vlgmr.msrb.gmra.mxu1 %vm2798_vm6, %v4586_v5 }
 0x4ae   :  { %2279 = vst [vmem:[#allocation3 + $0x338] sm:$0xff] %v2138_v39  ;;  %v4763_v24 = vsel %vm3169_vm9, %v4760_v46, %v4762_v63  ;;  %v4765_v32 = vsel %vm3169_vm9, %v4762_v63, %v4764_v60 }
 0x4b1   :  { %v1851_v23 = vld [vmem:[#allocation2 + $0x359] sm:$0xff]  ;;  %v14458_v18 = vpop.f32.mrf.mxu0 }
 0x4b2   :  { %v1992_v59 = vmax.f32 %v1361_v42, %v1851_v23  ;;  %1567 = vst [vmem:[#allocation2 + $0x368] sm:$0xff] %v14458_v18  ;;  %v4578_v23 = vunpack.c.l.b16 %v4558_v31 }
 0x4b4   :  { %v2139_v33 = vmax.f32 %v1989_v25, %v1992_v59 }
 0x4b5   :  { %v2595_v6 = vld [vmem:[#allocation3 + $0x330] ss:$2 sm:$0xff] }
 0x4b6   :  { %2280 = vst [vmem:[#allocation3 + $0x340] sm:$0xff] %v2139_v33  ;;  %v2598_v50 = vadd.f32 %v14361_v3, %v2595_v6  ;;  %v4422_v28 = vpop.f32.mrf.mxu1  ;;  %v4583_v33 = vpack.c.b16 %v4578_v23, %v4578_v23  ;;  %v14510_v6 = vld [vmem:[#allocation4 + $0x54] sm:$0xff] }
 0x4b7   :  { %v4466_v41 = vadd.f32 %v4465_v43, %v4422_v28  ;;  %v12007_v43 = vld [vmem:[%s15709_s0 + $0x208] sm:$0xff]  ;;  %v4954_v10 = vshrl.u32 %v14510_v6, 16 }
 0x4b8   :  { %v2600_v1 = vmax.f32 %v2598_v50, 0.0  ;;  %v4945_v50 = vshll.u32 %v4908_v52, 16 }
 0x4b9   :  { %v14468_v57 = vld [vmem:[#allocation2 + $0x361] sm:$0xff]  ;;  %v14470_v55 = vpop.f32.mrf.mxu0 }
 0x4ba   :  { %v1993_v48 = vmax.f32 %v14442_v53, %v14468_v57  ;;  %1568 = vst [vmem:[#allocation2 + $0x370] sm:$0xff] %v14470_v55  ;;  %v2602_v49 = vpack.c.bf16 %v2600_v1, %v2600_v1  ;;  %v4527_v54 = vpop.f32.mrf.mxu3 }
 0x4bb   :  { %10934 = vmatmul.msk.bf16.gmra.mxu3 %vm2798_vm6, %v4763_v24  ;;  %v14478_v20 = vadd.f32 %v4527_v54, %v4466_v41  ;;  %v4943_v24 = vshrl.u32 %v4908_v52, 16 }
 0x4bc   :  { %1408 = vmatmul.bf16.gmra.mxu0 %v12005_v30  ;;  %v2606_v25 = vrot.slane %v2602_v49, 6  ;;  %v4950_v30 = vshll.u32 %v14510_v6, 16 }
 0x4bd   :  { %v2597_v61 = vld [vmem:[#allocation3 + $0x340] ss:$2 sm:$0xf]  ;;  %10914 = vmatmul.msk.bf16.gmra.mxu1 %vm2798_vm6, %v4588_v37 }
 0x4be   :  { %v2599_v8 = vadd.f32 %v14361_v3, %v2597_v61  ;;  %2612 = vst.msk [vmem:[#allocation4 + $0x64] sm:$0xc] %vm2355_vm2, %v2606_v25  ;;  %v2607_v17 = vrot.slane %v2606_v25, 4  ;;  %v4952_v49 = vrot.slane %v4950_v30, 1  ;;  %v12338_v25 = vld [vmem:[#allocation4 + $0x4c] sm:$0xe] }
 0x4bf   :  { %v12079_v30 = vld [vmem:[#allocation4 + $0x54] sm:$0xff] }
 0x4c0   :  { %v2601_v9 = vmax.f32 %v2599_v8, 0.0  ;;  %v4956_v44 = vor.u32 %v4954_v10, %v4952_v49 }
 0x4c1   :  { %v1853_v27 = vld [vmem:[#allocation2 + $0x369] sm:$0xff]  ;;  %v1371_v19 = vpop.f32.mrf.mxu0 }
 0x4c2   :  { %v1994_v45 = vmax.f32 %v14458_v18, %v1853_v27  ;;  %1569 = vst [vmem:[#allocation2 + $0x378] sm:$0xff] %v1371_v19  ;;  %v2603_v47 = vpack.c.bf16 %v2601_v9, %v2601_v9  ;;  %v12339_v27 = vor.u32 %v12338_v25, %v12337_v35  ;;  %v14550_v35 = vpop.f32.mrf.mxu3 }
 0x4c4   :  { %v2608_v38 = vrot.slane %v2603_v47, 6  ;;  %v5040_v47 = vrot.slane %v14510_v6, 1 }
 0x4c5   :  { %v4648_v0 = vld [vmem:[#allocation4 + $0x64] sm:$0x7] }
 0x4c6   :  { %v2609_v7 = vsel %vm13012_vm5, %v2607_v17, %v2608_v38  ;;  %v4652_v2 = vunpack.c.l.b16 %v4648_v0  ;;  %v5039_v38 = vrot.slane %v12339_v27, 1 }
 0x4c7   :  { %2613 = vst.msk [vmem:[#allocation4 + $0x68] sm:$0xf] %vm2330_vm0, %v2609_v7 }
 0x4c8   :  { %v4653_v56 = vpack.c.b16 %v4652_v2, %v4652_v2 }
 0x4c9   :  { %v1854_v42 = vld [vmem:[#allocation2 + $0x371] sm:$0xff]  ;;  %v1374_v29 = vpop.f32.mrf.mxu0 }
 0x4ca   :  { %v1995_v12 = vmax.f32 %v14470_v55, %v1854_v42  ;;  %1570 = vst [vmem:[#allocation2 + $0x380] sm:$0xff] %v1374_v29  ;;  %v4690_v13 = vshrl.u32 %v4653_v56, 16  ;;  %v4693_v46 = vshll.u32 %v4653_v56, 16  ;;  %v4766_v63 = vrot.slane %v4653_v56, 3  ;;  %v14541_v56 = vpop.f32.mrf.mxu2 }
 0x4cb   :  { %10935 = vmatmul.msk.bf16.gmra.mxu3 %vm2798_vm6, %v4765_v32  ;;  %v4947_v55 = vrot.slane %v4945_v50, 1  ;;  %v12078_v32 = vld [vmem:[#allocation4 + $0x4c] sm:$0xff] }
 0x4cc   :  { %1413 = vmatmul.bf16.gmra.mxu0 %v12006_v40  ;;  %v4692_v53 = vrot.slane %v4690_v13, 2  ;;  %v4695_v36 = vrot.slane %v4693_v46, 3  ;;  %v4767_v57 = vsel %vm3169_vm9, %v4764_v60, %v4766_v63  ;;  %v12008_v60 = vld [vmem:[%s15709_s0 + $0x210] sm:$0xff]  ;;  %v12009_v63 = vld [vmem:[%s15709_s0 + $0x218] sm:$0xff] }
 0x4cd   :  { %10915 = vmatmul.msk.bf16.gmra.mxu1 %vm2798_vm6, %v4590_v58  ;;  %v4948_v54 = vor.u32 %v4947_v55, %v4943_v24 }
 0x4ce   :  { %v4696_v21 = vor.u32 %v4695_v36, %v4692_v53 }
 0x4cf   :  { %v4953_v8 = vsel %vm2755_vm7, %v4948_v54, %v4952_v49 }
 0x4d0   :  { %v4697_v5 = vsel %vm3062_vm11, %v14422_v51, %v4696_v21  ;;  %v4591_v51 = vrot.slane %v4583_v33, 2 }
 0x4d1   :  { %v1855_v14 = vld [vmem:[#allocation2 + $0x379] sm:$0xff]  ;;  %v1376_v39 = vpop.f32.mrf.mxu0  ;;  %10926 = vmatmul.msk.bf16.gmra.mxu2 %vm2798_vm6, %v4697_v5 }
 0x4d2   :  { %v1996_v18 = vmax.f32 %v1371_v19, %v1855_v14  ;;  %1571 = vst [vmem:[#allocation2 + $0x388] sm:$0xff] %v1376_v39  ;;  %v14528_v19 = vld [vmem:[#allocation4 + $0x5c] sm:$0xff] }
 0x4d3   :  { %v4958_v40 = vshll.u32 %v14528_v19, 16 }
 0x4d4   :  { %v2143_v59 = vmax.f32 %v1993_v48, %v1996_v18  ;;  %v4592_v48 = vsel %vm2990_vm8, %v4589_v15, %v4591_v51  ;;  %v14556_v18 = vld [vmem:[#allocation4 + $0x64] sm:$0xff] }
 0x4d5   :  { %v4960_v13 = vrot.slane %v4958_v40, 1  ;;  %v4970_v40 = vshrl.u32 %v14556_v18, 16 }
 0x4d6   :  { %2284 = vst [vmem:[#allocation3 + $0x360] sm:$0xff] %v2143_v59  ;;  %v5042_v59 = vrot.slane %v14528_v19, 1 }
 0x4d7   :  { %v4961_v31 = vsel %vm2755_vm7, %v4956_v44, %v4960_v13 }
 0x4d8   :  { %v5043_v51 = vsel %vm2890_vm10, %v5040_v47, %v5042_v59 }
 0x4d9   :  { %v1856_v28 = vld [vmem:[#allocation2 + $0x381] sm:$0xff]  ;;  %v14515_v41 = vpop.f32.mrf.mxu0 }
 0x4da   :  { %v1997_v1 = vmax.f32 %v1374_v29, %v1856_v28  ;;  %1572 = vst [vmem:[#allocation2 + $0x390] sm:$0xff] %v14515_v41  ;;  %v5041_v29 = vsel %vm2890_vm10, %v5039_v38, %v5040_v47  ;;  %v4966_v28 = vshll.u32 %v14556_v18, 16 }
 0x4db   :  { %10936 = vmatmul.msk.bf16.gmra.mxu3 %vm2798_vm6, %v4767_v57 }
 0x4dc   :  { %v2144_v16 = vmax.f32 %v1994_v45, %v1997_v1  ;;  %1418 = vmatmul.bf16.gmra.mxu0 %v12007_v43  ;;  %v4962_v1 = vshrl.u32 %v14528_v19, 16  ;;  %v4968_v57 = vrot.slane %v4966_v28, 1  ;;  %v12010_v19 = vld [vmem:[%s15709_s0 + $0x220] sm:$0xff]  ;;  %v12081_v28 = vld [vmem:[#allocation4 + $0x64] sm:$0xff] }
 0x4dd   :  { %10916 = vmatmul.msk.bf16.gmra.mxu1 %vm2798_vm6, %v4592_v48 }
 0x4de   :  { %2285 = vst [vmem:[#allocation3 + $0x368] sm:$0xff] %v2144_v16  ;;  %v4964_v48 = vor.u32 %v4962_v1, %v4960_v13 }
 0x4e0   :  { %v4969_v54 = vsel %vm2755_vm7, %v4964_v48, %v4968_v57 }
 0x4e1   :  { %v1857_v37 = vld [vmem:[#allocation2 + $0x389] sm:$0xff]  ;;  %v14523_v61 = vpop.f32.mrf.mxu0  ;;  %10981 = vmatmul.msk.bf16.vlgmr.msra.gmra.mxu2 %vm2798_vm6, %v4953_v8 }
 0x4e2   :  { %v1998_v62 = vmax.f32 %v1376_v39, %v1857_v37  ;;  %1573 = vst [vmem:[#allocation2 + $0x398] sm:$0xff] %v14523_v61  ;;  %v4470_v39 = vpop.f32.mrf.mxu2 }
 0x4e4   :  { %v2145_v9 = vmax.f32 %v1995_v12, %v1998_v62  ;;  %v14543_v12 = vpop.f32.mrf.mxu1 }
 0x4e5   :  { %v2615_v45 = vld [vmem:[#allocation3 + $0x360] ss:$2 sm:$0xff] }
 0x4e6   :  { %2286 = vst [vmem:[#allocation3 + $0x370] sm:$0xff] %v2145_v9  ;;  %v2618_v17 = vadd.f32 %v14361_v3, %v2615_v45  ;;  %v5044_v9 = vrot.slane %v14556_v18, 1 }
 0x4e8   :  { %v2620_v0 = vmax.f32 %v2618_v17, 0.0 }
 0x4e9   :  { %v1858_v7 = vld [vmem:[#allocation2 + $0x391] sm:$0xff]  ;;  %v14535_v2 = vpop.f32.mrf.mxu0 }
 0x4ea   :  { %v1999_v42 = vmax.f32 %v14515_v41, %v1858_v7  ;;  %1574 = vst [vmem:[#allocation2 + $0x3a0] sm:$0xff] %v14535_v2  ;;  %v2622_v15 = vpack.c.bf16 %v2620_v0, %v2620_v0  ;;  %v14570_v16 = vpop.f32.mrf.mxu2  ;;  %v12080_v7 = vld [vmem:[#allocation4 + $0x5c] sm:$0xff] }
 0x4eb   :  { %10991 = vmatmul.msk.bf16.vlgmr.msrb.gmra.mxu3 %vm2798_vm6, %v5041_v29  ;;  %v12092_v29 = vld [vmem:[%s15712_s3 + $0x8] sm:$0xff] }
 0x4ec   :  { %1423 = vmatmul.bf16.gmra.mxu0 %v12008_v60  ;;  %2624 = vst.msk [vmem:[#allocation4 + $0x6c] sm:$0xf] %vm2330_vm0, %v2622_v15  ;;  %v5045_v60 = vsel %vm2890_vm10, %v5042_v59, %v5044_v9  ;;  %v4972_v15 = vor.u32 %v4970_v40, %v4968_v57  ;;  %5208 = vmatpush.bf16.msrb.mxu1 %v12092_v29 }
 0x4ed   :  { %v2617_v46 = vld [vmem:[#allocation3 + $0x370] ss:$2 sm:$0xf]  ;;  %10959 = vmatmul.msk.bf16.vlgmr.msra.gmra.mxu1 %vm2798_vm6, %v12078_v32 }
 0x4ee   :  { %v2619_v52 = vadd.f32 %v14361_v3, %v2617_v46 }
 0x4f0   :  { %v2621_v58 = vmax.f32 %v2619_v52, 0.0 }
 0x4f1   :  { %v1859_v53 = vld [vmem:[#allocation2 + $0x399] sm:$0xff]  ;;  %v1386_v36 = vpop.f32.mrf.mxu0  ;;  %10982 = vmatmul.msk.bf16.gmra.mxu2 %vm2798_vm6, %v4961_v31 }
 0x4f2   :  { %v2000_v21 = vmax.f32 %v14523_v61, %v1859_v53  ;;  %1575 = vst [vmem:[#allocation2 + $0x3a8] sm:$0xff] %v1386_v36  ;;  %v2623_v14 = vpack.c.bf16 %v2621_v58, %v2621_v58  ;;  %v4427_v5 = vpop.f32.mrf.mxu1  ;;  %v12091_v61 = vld [vmem:[%s15712_s3] sm:$0xff]  ;;  %v4475_v27 = vpop.f32.mrf.mxu2 }
 0x4f3   :  { %v4471_v23 = vadd.f32 %v4470_v39, %v4427_v5  ;;  %v4916_v55 = vld [vmem:[#allocation4 + $0x6c] sm:$0x1]  ;;  %5251 = vmatpush.bf16.msrb.mxu2 %v12091_v61 }
 0x4f4   :  { %2625 = vst.msk [vmem:[#allocation4 + $0x70] sm:$0x3] %vm2332_vm1, %v2623_v14  ;;  %v4936_v25 = vunpack.c.l.b16 %v4916_v55  ;;  %v12011_v14 = vld [vmem:[%s15709_s0 + $0x228] sm:$0xff]  ;;  %v12310_v55 = vld [vmem:[#allocation4 + $0x60] sm:$0xff]  }
 0x4f5   :  { %v4532_v33 = vpop.f32.mrf.mxu3 }
 0x4f6   :  { %v14559_v6 = vadd.f32 %v4532_v33, %v4471_v23  ;;  %v4941_v62 = vpack.c.b16 %v4936_v25, %v4936_v25  ;;  %v12088_v25 = vld [vmem:[#allocation4 + $0x68] sm:$0xff] }
 0x4f8   :  { %v4974_v17 = vshll.u32 %v4941_v62, 16  ;;  %v5046_v31 = vrot.slane %v4941_v62, 1 }
 0x4f9   :  { %v1860_v50 = vld [vmem:[#allocation2 + $0x3a1] sm:$0xff]  ;;  %v1389_v43 = vpop.f32.mrf.mxu0 }
 0x4fa   :  { %v2001_v41 = vmax.f32 %v14535_v2, %v1860_v50  ;;  %1576 = vst [vmem:[#allocation2 + $0x3b0] sm:$0xff] %v1389_v43  ;;  %v12093_v2 = vld [vmem:[%s15712_s3 + $0x10] sm:$0xff]  ;;  %v14594_v32 = vpop.f32.mrf.mxu2  ;;  %v14601_v44 = vpop.f32.mrf.mxu1  ;;  %v5047_v59 = vsel %vm2890_vm10, %v5044_v9, %v5046_v31 }
 0x4fb   :  { %10992 = vmatmul.msk.bf16.gmra.mxu3 %vm2798_vm6, %v5043_v51  ;;  %v12312_v9 = vld [vmem:[#allocation4 + $0x60] sm:$0xe] }
 0x4fc   :  { %1428 = vmatmul.bf16.gmra.mxu0 %v12009_v63  ;;  %5313 = vmatpush.bf16.msra.mxu3 %v12093_v2 }
 0x4fd   :  { %10960 = vmatmul.msk.bf16.gmra.mxu1 %vm2798_vm6, %v12079_v30 }
 0x501   :  { %v1861_v24 = vld [vmem:[#allocation2 + $0x3a9] sm:$0xff]  ;;  %v1391_v49 = vpop.f32.mrf.mxu0  ;;  %10983 = vmatmul.msk.bf16.gmra.mxu2 %vm2798_vm6, %v4969_v54  ;;  %v12311_v54 = vld [vmem:[#allocation4 + $0x60] sm:$0xf0] }
 0x502   :  { %v2002_v37 = vmax.f32 %v1386_v36, %v1861_v24  ;;  %1577 = vst [vmem:[#allocation2 + $0x3b8] sm:$0xff] %v1391_v49  ;;  %v14603_v36 = vpop.f32.mrf.mxu3  ;;  %v14617_v63 = vpop.f32.mrf.mxu2 }
 0x504   :  { %v2149_v8 = vmax.f32 %v1999_v42, %v2002_v37  ;;  %v4976_v42 = vrot.slane %v4974_v17, 1 }
 0x506   :  { %2290 = vst [vmem:[#allocation3 + $0x390] sm:$0xff] %v2149_v8  ;;  %v4977_v46 = vsel %vm2755_vm7, %v4972_v15, %v4976_v42  ;;  %v5150_v8 = vshll.u32 %v12310_v55, 16  ;;  %v12012_v42 = vld [vmem:[%s15709_s0 + $0x230] sm:$0xff]  ;;  %v5148_v15 = vshrl.u32 %v12310_v55, 16 }
 0x508   :  { %v5152_v2 = vrot.slane %v5150_v8, 1 }
 0x509   :  { %v1862_v45 = vld [vmem:[#allocation2 + $0x3b1] sm:$0xff]  ;;  %v14581_v47 = vpop.f32.mrf.mxu0 }
 0x50a   :  { %v2003_v38 = vmax.f32 %v1389_v43, %v1862_v45  ;;  %1578 = vst [vmem:[#allocation2 + $0x3c0] sm:$0xff] %v14581_v47  ;;  %v14632_v17 = vpop.f32.mrf.mxu2 }
 0x50b   :  { %10993 = vmatmul.msk.bf16.gmra.mxu3 %vm2798_vm6, %v5045_v60 }
 0x50c   :  { %v2150_v0 = vmax.f32 %v2000_v21, %v2003_v38  ;;  %1433 = vmatmul.bf16.gmra.mxu0 %v12010_v19  ;;  %v5155_v38 = vshll.u32 %v12088_v25, 16 }
 0x50d   :  { %10961 = vmatmul.msk.bf16.gmra.mxu1 %vm2798_vm6, %v12080_v7 }
 0x50e   :  { %2291 = vst [vmem:[#allocation3 + $0x398] sm:$0xff] %v2150_v0  ;;  %v5280_v0 = vrot.slane %v12088_v25, 1 }
 0x511   :  { %v1863_v10 = vld [vmem:[#allocation2 + $0x3b9] sm:$0xff]  ;;  %v14596_v13 = vpop.f32.mrf.mxu0  ;;  %10984 = vmatmul.msk.bf16.gmra.mxu2 %vm2798_vm6, %v4977_v46 }
 0x512   :  { %v2004_v52 = vmax.f32 %v1391_v49, %v1863_v10  ;;  %1579 = vst [vmem:[#allocation2 + $0x3c8] sm:$0xff] %v14596_v13 }
 0x514   :  { %v2151_v58 = vmax.f32 %v2001_v41, %v2004_v52 }
 0x515   :  { %v2627_v53 = vld [vmem:[#allocation3 + $0x390] ss:$2 sm:$0xff] }
 0x516   :  { %2292 = vst [vmem:[#allocation3 + $0x3a0] sm:$0xff] %v2151_v58  ;;  %v2630_v21 = vadd.f32 %v14361_v3, %v2627_v53  ;;  %v5153_v58 = vor.u32 %v5152_v2, %v5148_v15 }
 0x518   :  { %v2632_v39 = vmax.f32 %v2630_v21, 0.0 }
 0x519   :  { %v14609_v5 = vld [vmem:[#allocation2 + $0x3c1] sm:$0xff]  ;;  %v14611_v23 = vpop.f32.mrf.mxu0 }
 0x51a   :  { %v2005_v18 = vmax.f32 %v14581_v47, %v14609_v5  ;;  %1580 = vst [vmem:[#allocation2 + $0x3d0] sm:$0xff] %v14611_v23  ;;  %v2634_v33 = vpack.c.bf16 %v2632_v39, %v2632_v39  ;;  %v4432_v50 = vpop.f32.mrf.mxu1  ;;  %v14653_v39 = vpop.f32.mrf.mxu2 }
 0x51b   :  { %10994 = vmatmul.msk.bf16.gmra.mxu3 %vm2798_vm6, %v5047_v59  ;;  %v4476_v43 = vadd.f32 %v4475_v27, %v4432_v50  ;;  %v12313_v27 = vor.u32 %v12312_v9, %v12311_v54 }
 0x51c   :  { %1438 = vmatmul.bf16.gmra.mxu0 %v12011_v14  ;;  %v2638_v41 = vrot.slane %v2634_v33, 6 }
 0x51d   :  { %v2629_v51 = vld [vmem:[#allocation3 + $0x3a0] ss:$2 sm:$0xf]  ;;  %10962 = vmatmul.msk.bf16.gmra.mxu1 %vm2798_vm6, %v12081_v28  ;;  %v5279_v40 = vrot.slane %v12313_v27, 1 }
 0x51e   :  { %v4537_v30 = vpop.f32.mrf.mxu3  ;;  %v2631_v1 = vadd.f32 %v14361_v3, %v2629_v51  ;;  %2644 = vst.msk [vmem:[#allocation4 + $0x70] sm:$0xc] %vm2355_vm2, %v2638_v41  ;;  %v2639_v19 = vrot.slane %v2638_v41, 4 }
 0x51f   :  { %v14622_v57 = vadd.f32 %v4537_v30, %v4476_v43  ;;  %v5281_v52 = vsel %vm2890_vm10, %v5279_v40, %v5280_v0 }
 0x520   :  { %v2633_v48 = vmax.f32 %v2631_v1, 0.0 }
 0x521   :  { %v14625_v24 = vld [vmem:[#allocation2 + $0x3c9] sm:$0xff]  ;;  %v1401_v49 = vpop.f32.mrf.mxu0  ;;  %11021 = vmatmul.msk.bf16.vlgmr.msrb.gmra.mxu2 %vm2798_vm6, %v12310_v55 }
 0x522   :  { %v2006_v37 = vmax.f32 %v14596_v13, %v14625_v24  ;;  %1581 = vst [vmem:[#allocation2 + $0x3d8] sm:$0xff] %v1401_v49  ;;  %v2635_v61 = vpack.c.bf16 %v2633_v48, %v2633_v48  ;;  %v14630_v62 = vpop.f32.mrf.mxu1  ;;  %v5157_v13 = vrot.slane %v5155_v38, 1  ;;  %v12013_v48 = vld [vmem:[%s15709_s0 + $0x238] sm:$0xff]  ;;  %v14671_v24 = vpop.f32.mrf.mxu2  ;;  %v584_v38 = vld [vmem:[%s15709_s0 + $0x240] sm:$0xf] }
 0x523   :  { %v890_v40 = vunpack.c.l.b16 %v584_v38 }
 0x524   :  { %v2640_v45 = vrot.slane %v2635_v61, 6  ;;  %v5158_v31 = vsel %vm2755_vm7, %v5153_v58, %v5157_v13  ;;  %v5159_v61 = vshrl.u32 %v12088_v25, 16 }
 0x526   :  { %v14634_v60 = vpop.f32.mrf.mxu3  ;;  %v2641_v7 = vsel %vm13012_vm5, %v2639_v19, %v2640_v45 }
 0x527   :  { %2645 = vst.msk [vmem:[#allocation4 + $0x74] sm:$0xf] %vm2330_vm0, %v2641_v7 }
 0x529   :  { %v1866_v29 = vld [vmem:[#allocation2 + $0x3d1] sm:$0xff]  ;;  %v1404_v10 = vpop.f32.mrf.mxu0 }
 0x52a   :  { %v2007_v46 = vmax.f32 %v14611_v23, %v1866_v29  ;;  %1582 = vst [vmem:[#allocation2 + $0x3e0] sm:$0xff] %v1404_v10  ;;  %v14644_v53 = vpop.f32.mrf.mxu1 }
 0x52b   :  { %11031 = vmatmul.msk.bf16.vlgmr.msra.gmra.mxu3 %vm2798_vm6, %v5281_v52 }
 0x52c   :  { %1443 = vmatmul.bf16.gmra.mxu0 %v12012_v42 }
 0x52d   :  { %11013 = vmatmul.msk.bf16.vlgmr.msrb.gmra.mxu1 %vm2798_vm6, %v5158_v31 }
 0x52e   :  { %v14649_v21 = vpop.f32.mrf.mxu3  ;;  %v14651_v14 = vld [vmem:[#allocation4 + $0x70] sm:$0xff] }
 0x52f   :  { %v5163_v23 = vshll.u32 %v14651_v14, 16  ;;  %v5167_v28 = vshrl.u32 %v14651_v14, 16  ;;  %v5282_v55 = vrot.slane %v14651_v14, 1 }
 0x531   :  { %v1867_v59 = vld [vmem:[#allocation2 + $0x3d9] sm:$0xff]  ;;  %v1406_v33 = vpop.f32.mrf.mxu0  ;;  %11022 = vmatmul.msk.bf16.gmra.mxu2 %vm2798_vm6, %v12088_v25  ;;  %v5165_v43 = vrot.slane %v5163_v23, 1  ;;  %v5283_v47 = vsel %vm2890_vm10, %v5280_v0, %v5282_v55 }
 0x532   :  { %v2008_v50 = vmax.f32 %v1401_v49, %v1867_v59  ;;  %1583 = vst [vmem:[#allocation2 + $0x3e8] sm:$0xff] %v1406_v33  ;;  %v14658_v41 = vpop.f32.mrf.mxu1 }
 0x533   :  { %v14663_v30 = vor.u32 %v5167_v28, %v5165_v43 }
 0x534   :  { %v2155_v51 = vmax.f32 %v2005_v18, %v2008_v50  ;;  %v5161_v18 = vor.u32 %v5159_v61, %v5157_v13 }
 0x536   :  { %2296 = vst [vmem:[#allocation3 + $0x3c0] sm:$0xff] %v2155_v51  ;;  %v14665_v1 = vpop.f32.mrf.mxu3  ;;  %v5166_v27 = vsel %vm2755_vm7, %v5161_v18, %v5165_v43  ;;  %v12098_v18 = vld [vmem:[%s15712_s3 + $0x20] sm:$0xff] }
 0x537   :  { %5516 = vmatpush.bf16.msra.mxu2 %v12098_v18 }
 0x539   :  { %v1868_v49 = vld [vmem:[#allocation2 + $0x3e1] sm:$0xff]  ;;  %v14673_v54 = vpop.f32.mrf.mxu0 }
 0x53a   :  { %v2009_v8 = vmax.f32 %v1404_v10, %v1868_v49  ;;  %1584 = vst [vmem:[#allocation2 + $0x3f0] sm:$0xff] %v14673_v54  ;;  %v14679_v5 = vpop.f32.mrf.mxu1  ;;  %v963_v10 = vpack.c.b16 %v890_v40, %v890_v40 }
 0x53b   :  { %11032 = vmatmul.msk.bf16.gmra.mxu3 %vm2798_vm6, %v5283_v47 }
 0x53c   :  { %v2156_v9 = vmax.f32 %v2006_v37, %v2009_v8  ;;  %1448 = vmatmul.bf16.gmra.mxu0 %v12013_v48  ;;  %v14694_v37 = vpop.f32.mrf.mxu2 }
 0x53d   :  { %11014 = vmatmul.msk.bf16.gmra.mxu1 %vm2798_vm6, %v5166_v27 }
 0x53e   :  { %2297 = vst [vmem:[#allocation3 + $0x3c8] sm:$0xff] %v2156_v9  ;;  %v14684_v25 = vpop.f32.mrf.mxu3  ;;  %v12097_v9 = vld [vmem:[%s15712_s3 + $0x18] sm:$0xff] }
 0x53f   :  { %5411 = vmatpush.bf16.msra.mxu1 %v12097_v9 }
 0x541   :  { %v1869_v19 = vld [vmem:[#allocation2 + $0x3e9] sm:$0xff]  ;;  %v14686_v45 = vpop.f32.mrf.mxu0  ;;  %11023 = vmatmul.msk.bf16.gmra.mxu2 %vm2798_vm6, %v14651_v14 }
 0x542   :  { %v2010_v0 = vmax.f32 %v1406_v33, %v1869_v19  ;;  %1585 = vst [vmem:[#allocation2 + $0x3f8] sm:$0xff] %v14686_v45  ;;  %v14696_v7 = vpop.f32.mrf.mxu1 }
 0x544   :  { %v2157_v2 = vmax.f32 %v2007_v46, %v2010_v0  ;;  %v14708_v46 = vpop.f32.mrf.mxu2 }
 0x545   :  { %v2647_v42 = vld [vmem:[#allocation3 + $0x3c0] ss:$2 sm:$0xff] }
 0x546   :  { %2298 = vst [vmem:[#allocation3 + $0x3d0] sm:$0xff] %v2157_v2  ;;  %v14698_v29 = vpop.f32.mrf.mxu3  ;;  %v2650_v15 = vadd.f32 %v14361_v3, %v2647_v42 }
 0x548   :  { %v2652_v13 = vmax.f32 %v2650_v15, 0.0  ;;  %v4640_v15 = vadd.f32 %v14644_v53, %v14420_v34 }
 0x549   :  { %v1870_v52 = vld [vmem:[#allocation2 + $0x3f1] sm:$0xff]  ;;  %v14701_v58 = vpop.f32.mrf.mxu0 }
 0x54a   :  { %v2011_v31 = vmax.f32 %v14673_v54, %v1870_v52  ;;  %1586 = vst [vmem:[#allocation2 + $0x400] sm:$0xff] %v14701_v58  ;;  %v2654_v23 = vpack.c.bf16 %v2652_v13, %v2652_v13  ;;  %v14705_v59 = vpop.f32.mrf.mxu1 }
 0x54c   :  { %1453 = vmatmul.bf16.gmra.mxu0 %v963_v10  ;;  %2656 = vst.msk [vmem:[#allocation4 + $0x78] sm:$0xf] %vm2330_vm0, %v2654_v23 }
 0x54d   :  { %v2649_v33 = vld [vmem:[#allocation3 + $0x3d0] ss:$2 sm:$0xf] }
 0x54e   :  { %v14710_v50 = vpop.f32.mrf.mxu3  ;;  %v2651_v43 = vadd.f32 %v14361_v3, %v2649_v33  ;;  %v12099_v3 = vld [vmem:[%s15712_s3 + $0x28] sm:$0xff]  ;;  %v4745_v33 = vadd.f32 %v14617_v63, %v4640_v15 }
 0x54f   :  { %5586 = vmatpush.bf16.msrb.mxu3 %v12099_v3 }
 0x550   :  { %v2653_v28 = vmax.f32 %v2651_v43, 0.0  ;;  %v4815_v34 = vadd.f32 %v14649_v21, %v4745_v33 }
 0x551   :  { %v1871_v51 = vld [vmem:[#allocation2 + $0x3f9] sm:$0xff]  ;;  %v1416_v48 = vpop.f32.mrf.mxu0 }
 0x552   :  { %v2012_v49 = vmax.f32 %v14686_v45, %v1871_v51  ;;  %1587 = vst [vmem:[#allocation2 + $0x408] sm:$0xff] %v1416_v48  ;;  %v2655_v54 = vpack.c.bf16 %v2653_v28, %v2653_v28  ;;  %v14714_v61 = vpop.f32.mrf.mxu1 }
 0x554   :  { %2657 = vst.msk [vmem:[#allocation4 + $0x7c] sm:$0x3] %vm2332_vm1, %v2655_v54  ;;  %v14717_v8 = vpop.f32.mrf.mxu2 }
 0x556   :  { %v14719_v47 = vpop.f32.mrf.mxu3 }
 0x559   :  { %v1872_v27 = vld [vmem:[#allocation2 + $0x401] sm:$0xff]  ;;  %v1419_v19 = vpop.f32.mrf.mxu0 }
 0x55a   :  { %v2013_v45 = vmax.f32 %v14701_v58, %v1872_v27  ;;  %1588 = vst [vmem:[#allocation2 + $0x410] sm:$0xff] %v1419_v19  ;;  %v14731_v38 = vpop.f32.mrf.mxu1  ;;  %v4463_v58 = vadd.f32 %v14452_v26, %v14456_v11 }
 0x55c   :  { %v14733_v0 = vpop.f32.mrf.mxu2  ;;  %v4543_v28 = vadd.f32 %v14461_v22, %v4463_v58 }
 0x55e   :  { %v14735_v2 = vpop.f32.mrf.mxu3  ;;  %v4641_v53 = vadd.f32 %v14658_v41, %v4543_v28  ;;  %v4642_v41 = vadd.f32 %v14679_v5, %v14478_v20  ;;  %v14765_v20 = vld [vmem:[%s15711_s2] ss:$0 sm:$0xff] }
 0x560   :  { %v4746_v63 = vadd.f32 %v14632_v17, %v4641_v53  ;;  %v4468_v17 = vadd.f32 %v14541_v56, %v14543_v12  ;;  %v4747_v58 = vadd.f32 %v14653_v39, %v4642_v41  ;;  %v4644_v41 = vadd.f32 %v14705_v59, %v14559_v6 }
 0x561   :  { %v1873_v40 = vld [vmem:[#allocation2 + $0x409] sm:$0xff]  ;;  %v1421_v42 = vpop.f32.mrf.mxu0  ;;  %v4473_v6 = vadd.f32 %v14570_v16, %v14601_v44 }
 0x562   :  { %v2014_v10 = vmax.f32 %v1416_v48, %v1873_v40  ;;  %1589 = vst [vmem:[#allocation2 + $0x418] sm:$0xff] %v1421_v42  ;;  %v14739_v13 = vpop.f32.mrf.mxu1  ;;  %v4816_v21 = vadd.f32 %v14665_v1, %v4746_v63  ;;  %v4817_v39 = vadd.f32 %v14684_v25, %v4747_v58  ;;  %v14782_v25 = vld [vmem:[%s15713_s4] ss:$0 sm:$0xff] }
 0x563   :  { %v4547_v44 = vadd.f32 %v14603_v36, %v4473_v6 }
 0x564   :  { %v2161_v52 = vmax.f32 %v2011_v31, %v2014_v10  ;;  %v5005_v23 = vpop.f32.mrf.mxu2 }
 0x566   :  { %2302 = vst [vmem:[#allocation3 + $0x3f0] sm:$0xff] %v2161_v52  ;;  %v14744_v43 = vpop.f32.mrf.mxu3 }
 0x569   :  { %v1874_v51 = vld [vmem:[#allocation2 + $0x411] sm:$0xff]  ;;  %v14747_v54 = vpop.f32.mrf.mxu0 }
 0x56a   :  { %v2015_v48 = vmax.f32 %v1419_v19, %v1874_v51  ;;  %1590 = vst [vmem:[#allocation2 + $0x420] sm:$0xff] %v14747_v54  ;;  %v4880_v31 = vpop.f32.mrf.mxu1 }
 0x56b   :  { %v4900_v26 = vadd.f32 %v4880_v31, %v4815_v34 }
 0x56c   :  { %v2162_v18 = vmax.f32 %v2012_v49, %v2015_v48  ;;  %v5007_v11 = vpop.f32.mrf.mxu2 }
 0x56d   :  { %v5025_v3 = vadd.f32 %v5005_v23, %v4900_v26 }
 0x56e   :  { %2303 = vst [vmem:[#allocation3 + $0x3f8] sm:$0xff] %v2162_v18  ;;  %v5075_v9 = vpop.f32.mrf.mxu3 }
 0x56f   :  { %v5095_v22 = vadd.f32 %v5075_v9, %v5025_v3 }
 0x571   :  { %v1875_v27 = vld [vmem:[#allocation2 + $0x419] sm:$0xff]  ;;  %v14753_v40 = vpop.f32.mrf.mxu0  ;;  %5103 = vst [vmem:[#allocation5 + $0x80] sm:$0xff] %v5095_v22 }
 0x572   :  { %v2016_v19 = vmax.f32 %v1421_v42, %v1875_v27  ;;  %1591 = vst [vmem:[#allocation2 + $0x428] sm:$0xff] %v14753_v40  ;;  %v4882_v49 = vpop.f32.mrf.mxu1  ;;  %v14788_v22 = vld [vmem:[#allocation4 + $0x68] sm:$0xff]  }
 0x573   :  { %v4901_v10 = vadd.f32 %v4882_v49, %v4816_v21  ;;  %v5343_v49 = vld [vmem:[#allocation4 + $0x64] sm:$0xc] }
 0x574   :  { %v2163_v15 = vmax.f32 %v2013_v45, %v2016_v19  ;;  %v5010_v52 = vpop.f32.mrf.mxu2  ;;  %v4545_v45 = vadd.f32 %v14550_v35, %v4468_v17 }
 0x575   :  { %v2659_v23 = vld [vmem:[#allocation3 + $0x3f0] ss:$2 sm:$0xff]  ;;  %v5026_v33 = vadd.f32 %v5007_v11, %v4901_v10 }
 0x576   :  { %2304 = vst [vmem:[#allocation3 + $0x400] sm:$0xff] %v2163_v15  ;;  %v5077_v1 = vpop.f32.mrf.mxu3  ;;  %v2662_v5 = vadd.f32 %v14765_v20, %v2659_v23  ;;  %v4643_v56 = vadd.f32 %v14696_v7, %v4545_v45  ;;  %v4749_v45 = vadd.f32 %v14694_v37, %v4644_v41 }
 0x577   :  { %v5096_v42 = vadd.f32 %v5077_v1, %v5026_v33  ;;  %v14806_v1 = vld [vmem:[#allocation4 + $0x6c] sm:$0xff] }
 0x578   :  { %v2664_v28 = vmax.f32 %v2662_v5, 0.0  ;;  %v4748_v18 = vadd.f32 %v14671_v24, %v4643_v56  ;;  %v5363_v5 = vunpack.c.l.b16 %v5343_v49  ;;  %v5456_v36 = vshrl.u32 %v14806_v1, 16 }
 0x579   :  { %v14770_v12 = vpop.f32.mrf.mxu0  ;;  %v14773_v51 = vld [vmem:[#allocation2 + $0x421] sm:$0xff]  ;;  %5104 = vst [vmem:[#allocation5 + $0x88] sm:$0xff] %v5096_v42 }
 0x57a   :  { %v2666_v34 = vpack.c.bf16 %v2664_v28, %v2664_v28  ;;  %v2017_v53 = vmax.f32 %v14747_v54, %v14773_v51  ;;  %1592 = vst [vmem:[#allocation2 + $0x430] sm:$0xff] %v14770_v12  ;;  %v4885_v48 = vpop.f32.mrf.mxu1  ;;  %v4818_v24 = vadd.f32 %v14698_v29, %v4748_v18  ;;  %v4819_v18 = vadd.f32 %v14710_v50, %v4749_v45 }
 0x57b   :  { %v4902_v31 = vadd.f32 %v4885_v48, %v4817_v39 }
 0x57c   :  { %v2670_v35 = vrot.slane %v2666_v34, 6  ;;  %v5012_v26 = vpop.f32.mrf.mxu2 }
 0x57d   :  { %v2661_v7 = vld [vmem:[#allocation3 + $0x400] ss:$2 sm:$0xf]  ;;  %v5027_v11 = vadd.f32 %v5010_v52, %v4902_v31  ;;  %v5364_v52 = vunpack.c.l.b16 %v14788_v22 }
 0x57e   :  { %v5080_v63 = vpop.f32.mrf.mxu3  ;;  %2676 = vst.msk [vmem:[#allocation4 + $0x7c] sm:$0xc] %vm2355_vm2, %v2670_v35  ;;  %v2663_v3 = vadd.f32 %v14765_v20, %v2661_v7  ;;  %v2671_v23 = vrot.slane %v2670_v35, 4  ;;  %v5459_v7 = vshll.u32 %v14806_v1, 16 }
 0x57f   :  { %v14786_v9 = vadd.f32 %v5080_v63, %v5027_v11  ;;  %v14820_v48 = vpack.c.b16 %v5364_v52, %v5363_v5  ;;  %v4646_v5 = vadd.f32 %v14731_v38, %v14622_v57 }
 0x580   :  { %v2665_v27 = vmax.f32 %v2663_v3, 0.0 }
 0x581   :  { %v14791_v21 = vpop.f32.mrf.mxu0  ;;  %v14795_v19 = vld [vmem:[#allocation2 + $0x429] sm:$0xff]  ;;  %5105 = vst [vmem:[#allocation5 + $0x90] sm:$0xff] %v14786_v9  ;;  %v5451_v3 = vshll.u32 %v14820_v48, 16  ;;  %v4751_v57 = vadd.f32 %v14717_v8, %v4646_v5 }
 0x582   :  { %v2667_v15 = vpack.c.bf16 %v2665_v27, %v2665_v27  ;;  %v2018_v10 = vmax.f32 %v14753_v40, %v14795_v19  ;;  %v4887_v17 = vpop.f32.mrf.mxu1  ;;  %1593 = vst [vmem:[#allocation2 + $0x438] sm:$0xff] %v14791_v21 }
 0x583   :  { %v4903_v29 = vadd.f32 %v4887_v17, %v4818_v24  ;;  %v5458_v24 = vrot.slane %v5456_v36, 2  ;;  %v5461_v17 = vrot.slane %v5459_v7, 3  ;;  %v4821_v54 = vadd.f32 %v14735_v2, %v4751_v57 }
 0x584   :  { %v2672_v58 = vrot.slane %v2667_v15, 6  ;;  %v5015_v59 = vpop.f32.mrf.mxu2 }
 0x585   :  { %v14804_v33 = vld [vmem:[#allocation4 + $0x78] sm:$0xff]  ;;  %v5028_v42 = vadd.f32 %v5012_v26, %v4903_v29  ;;  %v4645_v26 = vadd.f32 %v14714_v61, %v4547_v44  ;;  %v5448_v61 = vshrl.u32 %v14820_v48, 16 }
 0x586   :  { %v5082_v28 = vpop.f32.mrf.mxu3  ;;  %v2673_v56 = vsel %vm13012_vm5, %v2671_v23, %v2672_v58  ;;  %11024 = vmatmul.msk.bf16.gmra.mxu2 %vm2798_vm6, %v14804_v33  ;;  %v5284_v39 = vrot.slane %v14804_v33, 1  ;;  %v5171_v16 = vshll.u32 %v14804_v33, 16  ;;  %v5453_v58 = vrot.slane %v5451_v3, 3 }
 0x587   :  { %v14816_v34 = vadd.f32 %v5082_v28, %v5028_v42  ;;  %2677 = vst.msk [vmem:[#allocation4 + $0x80] sm:$0xf] %vm2330_vm0, %v2673_v56  ;;  %v4750_v41 = vadd.f32 %v14708_v46, %v4645_v26  ;;  %v5450_v23 = vrot.slane %v5448_v61, 2  ;;  %v14855_v28 = vor.u32 %v5461_v17, %v5458_v24 }
 0x588   :  { %v5285_v31 = vsel %vm2890_vm10, %v5282_v55, %v5284_v39  ;;  %v14830_v35 = vrot.slane %v5171_v16, 1  ;;  %v5175_v61 = vshrl.u32 %v14804_v33, 16  ;;  %v12108_v33 = vld [vmem:[%s15712_s3 + $0x38] sm:$0xff] }
 0x589   :  { %v14823_v37 = vpop.f32.mrf.mxu0  ;;  %11033 = vmatmul.msk.bf16.gmra.mxu3 %vm2798_vm6, %v5285_v31  ;;  %v14837_v11 = vld [vmem:[#allocation2 + $0x431] sm:$0xff]  ;;  %5106 = vst [vmem:[#allocation5 + $0x98] sm:$0xff] %v14816_v34  ;;  %v4820_v42 = vadd.f32 %v14719_v47, %v4750_v41  ;;  %v5454_v31 = vor.u32 %v5453_v58, %v5450_v23  ;;  %v4478_v47 = vadd.f32 %v14594_v32, %v14630_v62 }
 0x58a   :  { %v4890_v63 = vpop.f32.mrf.mxu1  ;;  %v5174_v14 = vsel %vm2755_vm7, %v14663_v30, %v14830_v35  ;;  %v2019_v55 = vmax.f32 %v14770_v12, %v14837_v11  ;;  %1594 = vst [vmem:[#allocation2 + $0x440] sm:$0xff] %v14823_v37  ;;  %v12104_v23 = vld [vmem:[%s15712_s3 + $0x30] sm:$0xff]  ;;  %5796 = vmatpush.bf16.msrb.mxu2 %v12108_v33 }
 0x58b   :  { %v4904_v50 = vadd.f32 %v4890_v63, %v4819_v18  ;;  %11015 = vmatmul.msk.bf16.gmra.mxu1 %vm2798_vm6, %v5174_v14  ;;  %v14859_v18 = vld [vmem:[#allocation4 + $0x74] sm:$0xff]  ;;  %v5463_v14 = vsel %vm3062_vm11, %v5454_v31, %v14855_v28  ;;  %v4549_v3 = vadd.f32 %v14634_v60, %v4478_v47 }
 0x58c   :  { %v5017_v27 = vpop.f32.mrf.mxu2  ;;  %v5465_v32 = vshrl.u32 %v14859_v18, 16  ;;  %v5468_v62 = vshll.u32 %v14859_v18, 16  ;;  %5671 = vmatpush.bf16.msrb.mxu1 %v12104_v23 }
 0x58d   :  { %v5029_v49 = vadd.f32 %v5015_v59, %v4904_v50  ;;  %v4647_v60 = vadd.f32 %v14739_v13, %v4549_v3 }
 0x58e   :  { %v5085_v15 = vpop.f32.mrf.mxu3  ;;  %v5121_v30 = vld [vmem:[#allocation4 + $0x80] sm:$0x1]  ;;  %v5470_v5 = vrot.slane %v5468_v62, 3 }
 0x58f   :  { %v5099_v29 = vadd.f32 %v5085_v15, %v5029_v49  ;;  %v5141_v6 = vunpack.c.l.b16 %v5121_v30  ;;  %v5177_v49 = vor.u32 %v5175_v61, %v14830_v35  ;;  %v14926_v62 = vld [vmem:[#allocation4 + $0x7c] sm:$0xff] }
 0x590   :  { %v6855_v50 = vld [vmem:[#allocation5 + $0x91] sm:$0xff] }
 0x591   :  { %v14852_v45 = vpop.f32.mrf.mxu0  ;;  %5107 = vst [vmem:[#allocation5 + $0xa0] sm:$0xff] %v5099_v29  ;;  %v5146_v56 = vpack.c.b16 %v5141_v6, %v5141_v6  ;;  %v1879_v46 = vld [vmem:[#allocation2 + $0x439] sm:$0xff]  ;;  %v6887_v15 = vmax.f32 %v14786_v9, %v6855_v50  ;;  %v5467_v6 = vrot.slane %v5465_v32, 2 }
 0x592   :  { %v4892_v59 = vpop.f32.mrf.mxu1  ;;  %v2020_v16 = vmax.f32 %v14791_v21, %v1879_v46  ;;  %1595 = vst [vmem:[#allocation2 + $0x448] sm:$0xff] %v14852_v45 }
 0x593   :  { %v4905_v44 = vadd.f32 %v4892_v59, %v4820_v42  ;;  %v5179_v36 = vshll.u32 %v5146_v56, 16  ;;  %v5286_v26 = vrot.slane %v5146_v56, 1  ;;  %v4752_v42 = vadd.f32 %v14733_v0, %v4647_v60 }
 0x594   :  { %v5020_v38 = vpop.f32.mrf.mxu2  ;;  %v2167_v7 = vmax.f32 %v2017_v53, %v2020_v16  ;;  %v5546_v16 = vld [vmem:[#allocation4 + $0x64] sm:$0x8]  ;;  %v14911_v19 = vor.u32 %v5470_v5, %v5467_v6  ;;  %v5474_v60 = vshrl.u32 %v14926_v62, 16 }
 0x595   :  { %v5030_v63 = vadd.f32 %v5017_v27, %v4905_v44  ;;  %v5181_v8 = vrot.slane %v5179_v36, 1  ;;  %v5287_v41 = vsel %vm2890_vm10, %v5284_v39, %v5286_v26  ;;  %v12109_v39 = vld [vmem:[%s15712_s3 + $0x40] sm:$0xff]  ;;  %v5550_v0 = vunpack.c.l.b16 %v5546_v16 }
 0x596   :  { %v5087_v21 = vpop.f32.mrf.mxu3  ;;  %11063 = vmatmul.msk.bf16.vlgmr.msra.gmra.mxu2 %vm2798_vm6, %v5463_v14  ;;  %2308 = vst [vmem:[#allocation3 + $0x420] sm:$0xff] %v2167_v7  ;;  %5866 = vmatpush.bf16.msra.mxu3 %v12109_v39  ;;  %v4822_v7 = vadd.f32 %v14744_v43, %v4752_v42  ;;  %v5553_v43 = vrot.slane %v14806_v1, 3 }
 0x597   :  { %v14872_v24 = vadd.f32 %v5087_v21, %v5030_v63  ;;  %v5182_v29 = vsel %vm2755_vm7, %v5177_v49, %v5181_v8  ;;  %v5551_v21 = vpack.c.b16 %v5364_v52, %v5550_v0  ;;  %v5472_v52 = vsel %vm3062_vm11, %v14855_v28, %v14911_v19 }
 0x598   :  { %v6919_v51 = vld [vmem:[#allocation5 + $0x9c] sm:$0xff]  ;;  %v5377_v28 = vrot.slane %v14820_v48, 2 }
 0x599   :  { %v6951_v53 = vld [vmem:[#allocation5 + $0x9d] sm:$0xff]  ;;  %v14877_v27 = vpop.f32.mrf.mxu0  ;;  %5108 = vst [vmem:[#allocation5 + $0xa8] sm:$0xff] %v14872_v24  ;;  %11034 = vmatmul.msk.bf16.gmra.mxu3 %vm2798_vm6, %v5287_v41 }
 0x59a   :  { %v6983_v17 = vmax.f32 %v6919_v51, %v6951_v53  ;;  %v1880_v2 = vld [vmem:[#allocation2 + $0x441] sm:$0xff]  ;;  %v4895_v30 = vpop.f32.mrf.mxu1  ;;  %1596 = vst [vmem:[#allocation2 + $0x450] sm:$0xff] %v14877_v27  ;;  %v6856_v44 = vld [vmem:[#allocation5 + $0x99] sm:$0xff]  ;;  %v5378_v51 = vrot.slane %v14806_v1, 2 }
 0x59b   :  { %v2021_v9 = vmax.f32 %v14823_v37, %v1880_v2  ;;  %v4906_v35 = vadd.f32 %v4895_v30, %v4821_v54  ;;  %11016 = vmatmul.msk.bf16.gmra.mxu1 %vm2798_vm6, %v5182_v29  ;;  %v6888_v63 = vmax.f32 %v14816_v34, %v6856_v44  ;;  %v5552_v54 = vrot.slane %v5551_v21, 3 }
 0x59c   :  { %v7015_v13 = vmax.f32 %v6887_v15, %v6983_v17  ;;  %v5022_v58 = vpop.f32.mrf.mxu2  ;;  %v5477_v15 = vshll.u32 %v14926_v62, 16  ;;  %v5379_v29 = vsel %vm2990_vm8, %v5377_v28, %v5378_v51 }
 0x59d   :  { %v2168_v37 = vmax.f32 %v2018_v10, %v2021_v9  ;;  %v5031_v46 = vadd.f32 %v5020_v38, %v4906_v35  ;;  %v5476_v9 = vrot.slane %v5474_v60, 2 }
 0x59e   :  { %v7051_v56 = vadd.f32 %v14782_v25, %v7015_v13  ;;  %v5090_v59 = vpop.f32.mrf.mxu3  ;;  %v5479_v35 = vrot.slane %v5477_v15, 3 }
 0x59f   :  { %2309 = vst [vmem:[#allocation3 + $0x428] sm:$0xff] %v2168_v37  ;;  %v14905_v36 = vadd.f32 %v5090_v59, %v5031_v46 }
 0x5a0   :  { %v7083_v31 = vmax.f32 %v7051_v56, 0.0  ;;  %v6920_v57 = vld [vmem:[#allocation5 + $0xa4] sm:$0xff]  ;;  %v5480_v46 = vor.u32 %v5479_v35, %v5476_v9 }
 0x5a1   :  { %v6952_v26 = vld [vmem:[#allocation5 + $0xa5] sm:$0xff]  ;;  %v14907_v47 = vpop.f32.mrf.mxu0  ;;  %5109 = vst [vmem:[#allocation5 + $0xb0] sm:$0xff] %v14905_v36 }
 0x5a2   :  { %7115 = vst [vmem:[#allocation6 + $0x90] sm:$0xff] %v7083_v31  ;;  %v6984_v40 = vmax.f32 %v6920_v57, %v6952_v26  ;;  %v1881_v10 = vld [vmem:[#allocation2 + $0x449] sm:$0xff]  ;;  %v4897_v38 = vpop.f32.mrf.mxu1 }
 0x5a3   :  { %v2022_v50 = vmax.f32 %v14852_v45, %v1881_v10  ;;  %1597 = vst [vmem:[#allocation2 + $0x458] sm:$0xff] %v14907_v47  ;;  %v4907_v61 = vadd.f32 %v4897_v38, %v4822_v7  ;;  %v5481_v38 = vsel %vm3062_vm11, %v14911_v19, %v5480_v46 }
 0x5a4   :  { %v7016_v14 = vmax.f32 %v6888_v63, %v6984_v40  ;;  %v5253_v45 = vpop.f32.mrf.mxu2  ;;  %v5555_v63 = vrot.slane %v14859_v18, 3 }
 0x5a5   :  { %v2169_v8 = vmax.f32 %v2019_v55, %v2022_v50  ;;  %v5032_v3 = vadd.f32 %v5022_v58, %v4907_v61  ;;  %v5554_v55 = vsel %vm3169_vm9, %v5552_v54, %v5553_v43 }
 0x5a6   :  { %v7052_v34 = vadd.f32 %v14782_v25, %v7016_v14  ;;  %v5092_v32 = vpop.f32.mrf.mxu3  ;;  %11064 = vmatmul.msk.bf16.gmra.mxu2 %vm2798_vm6, %v5472_v52  ;;  %v2679_v53 = vld [vmem:[#allocation3 + $0x420] ss:$2 sm:$0xff]  ;;  %v5380_v14 = vrot.slane %v14859_v18, 2 }
 0x5a7   :  { %2310 = vst [vmem:[#allocation3 + $0x430] sm:$0xff] %v2169_v8  ;;  %v5102_v49 = vadd.f32 %v5092_v32, %v5032_v3  ;;  %v2682_v12 = vadd.f32 %v14765_v20, %v2679_v53  ;;  %v5556_v8 = vsel %vm3169_vm9, %v5553_v43, %v5555_v63 }
 0x5a8   :  { %v7084_v41 = vmax.f32 %v7052_v34, 0.0  ;;  %v6858_v6 = vld [vmem:[#allocation5 + $0xa9] sm:$0xff]  ;;  %v5381_v52 = vsel %vm2990_vm8, %v5378_v51, %v5380_v14  ;;  %v5557_v51 = vrot.slane %v14926_v62, 3 }
 0x5a9   :  { %v14931_v11 = vpop.f32.mrf.mxu0  ;;  %11073 = vmatmul.msk.bf16.vlgmr.msrb.gmra.mxu3 %vm2798_vm6, %v5554_v55  ;;  %v2684_v17 = vmax.f32 %v2682_v12, 0.0  ;;  %5110 = vst [vmem:[#allocation5 + $0xb8] sm:$0xff] %v5102_v49  ;;  %v6890_v16 = vmax.f32 %v14872_v24, %v6858_v6  ;;  %v14986_v55 = vld [vmem:[#allocation4 + $0x70] sm:$0xf] }
 0x5aa   :  { %7116 = vst [vmem:[#allocation6 + $0x98] sm:$0xff] %v7084_v41  ;;  %v14940_v2 = vld [vmem:[#allocation2 + $0x451] sm:$0xff]  ;;  %v5210_v30 = vpop.f32.mrf.mxu1  ;;  %v5722_v1 = vunpack.c.l.b16 %v14986_v55  ;;  %v12100_v55 = vld [vmem:[#allocation4 + $0x6c] sm:$0xff] }
 0x5ab   :  { %v2023_v33 = vmax.f32 %v14877_v27, %v14940_v2  ;;  %1598 = vst [vmem:[#allocation2 + $0x460] sm:$0xff] %v14931_v11  ;;  %v5254_v48 = vadd.f32 %v5253_v45, %v5210_v30  ;;  %11053 = vmatmul.msk.bf16.vlgmr.msra.gmra.mxu1 %vm2798_vm6, %v5379_v29  ;;  %v2686_v39 = vpack.c.bf16 %v2684_v17, %v2684_v17  ;;  %v5721_v2 = vunpack.c.h.b16 %v14788_v22  ;;  %v12113_v29 = vld [vmem:[%s15712_s3] sm:$0xff] }
 0x5ac   :  { %v14953_v42 = vpop.f32.mrf.mxu2  ;;  %v5382_v30 = vrot.slane %v14926_v62, 2  ;;  %6044 = vmatpush.bf16.msra.mxu2 %v12113_v29  ;;  %v15001_v22 = vld [vmem:[#allocation4 + $0x74] sm:$0xff]  ;;  %v12115_v62 = vld [vmem:[%s15712_s3 + $0x10] sm:$0xff] }
 0x5ad   :  { %2688 = vst.msk [vmem:[#allocation4 + $0x84] sm:$0xf] %vm2330_vm0, %v2686_v39  ;;  %6106 = vmatpush.bf16.msrb.mxu3 %v12115_v62 }
 0x5ae   :  { %v5315_v13 = vpop.f32.mrf.mxu3  ;;  %v2681_v58 = vld [vmem:[#allocation3 + $0x430] ss:$2 sm:$0xf]  ;;  %v5383_v35 = vsel %vm2990_vm8, %v5380_v14, %v5382_v30 }
 0x5af   :  { %v14950_v23 = vadd.f32 %v5315_v13, %v5254_v48  ;;  %v2683_v5 = vadd.f32 %v14765_v20, %v2681_v58  ;;  %v5558_v13 = vsel %vm3169_vm9, %v5555_v63, %v5557_v51 }
 0x5b0   :  { %v6922_v56 = vld [vmem:[#allocation5 + $0xb4] sm:$0xff] }
 0x5b1   :  { %v1446_v27 = vpop.f32.mrf.mxu0  ;;  %v6954_v37 = vld [vmem:[#allocation5 + $0xb5] sm:$0xff]  ;;  %v2685_v59 = vmax.f32 %v2683_v5, 0.0 }
 0x5b2   :  { %1599 = vst [vmem:[#allocation2 + $0x468] sm:$0xff] %v1446_v27  ;;  %v6986_v44 = vmax.f32 %v6922_v56, %v6954_v37  ;;  %v1883_v31 = vld [vmem:[#allocation2 + $0x459] sm:$0xff]  ;;  %v14956_v57 = vpop.f32.mrf.mxu1  ;;  %v5743_v56 = vshll.u32 %v15001_v22, 16 }
 0x5b3   :  { %v2024_v26 = vmax.f32 %v14907_v47, %v1883_v31  ;;  %v2687_v0 = vpack.c.bf16 %v2685_v59, %v2685_v59 }
 0x5b4   :  { %v7018_v7 = vmax.f32 %v6890_v16, %v6986_v44  ;;  %v5441_v40 = vld [vmem:[#allocation4 + $0x84] sm:$0x7]  ;;  %v5258_v3 = vpop.f32.mrf.mxu2 }
 0x5b5   :  { %v5445_v21 = vunpack.c.l.b16 %v5441_v40  ;;  %2689 = vst.msk [vmem:[#allocation4 + $0x88] sm:$0x3] %vm2332_vm1, %v2687_v0  ;;  %v5351_v5 = vld [vmem:[#allocation4 + $0x84] sm:$0x3]  ;;  %v5745_v0 = vrot.slane %v5743_v56, 1 }
 0x5b6   :  { %v14960_v10 = vpop.f32.mrf.mxu3  ;;  %v7054_v24 = vadd.f32 %v14782_v25, %v7018_v7  ;;  %11065 = vmatmul.msk.bf16.gmra.mxu2 %vm2798_vm6, %v5481_v38  ;;  %v5371_v37 = vunpack.c.l.b16 %v5351_v5 }
 0x5b7   :  { %v14968_v47 = vpack.c.b16 %v5445_v21, %v5445_v21 }
 0x5b8   :  { %v7086_v50 = vmax.f32 %v7054_v24, 0.0  ;;  %v5376_v7 = vpack.c.b16 %v5371_v37, %v5371_v37 }
 0x5b9   :  { %v14970_v61 = vld [vmem:[#allocation2 + $0x461] sm:$0xff]  ;;  %v1449_v34 = vpop.f32.mrf.mxu0  ;;  %11074 = vmatmul.msk.bf16.gmra.mxu3 %vm2798_vm6, %v5556_v8  ;;  %v5483_v25 = vshrl.u32 %v14968_v47, 16  ;;  %v5486_v18 = vshll.u32 %v14968_v47, 16  ;;  %v5559_v38 = vrot.slane %v14968_v47, 3 }
 0x5ba   :  { %v2025_v19 = vmax.f32 %v14931_v11, %v14970_v61  ;;  %1600 = vst [vmem:[#allocation2 + $0x470] sm:$0xff] %v1449_v34  ;;  %v5215_v32 = vpop.f32.mrf.mxu1 }
 0x5bb   :  { %7118 = vst [vmem:[#allocation6 + $0xa8] sm:$0xff] %v7086_v50  ;;  %v5259_v45 = vadd.f32 %v5258_v3, %v5215_v32  ;;  %11054 = vmatmul.msk.bf16.gmra.mxu1 %vm2798_vm6, %v5381_v52  ;;  %v5485_v54 = vrot.slane %v5483_v25, 2  ;;  %v5488_v53 = vrot.slane %v5486_v18, 3  ;;  %v5384_v50 = vrot.slane %v5376_v7, 2  ;;  %v5826_v3 = vld [vmem:[#allocation4 + $0x6c] sm:$0xe] }
 0x5bc   :  { %v5560_v61 = vsel %vm3169_vm9, %v5557_v51, %v5559_v38  ;;  %v12102_v38 = vld [vmem:[#allocation4 + $0x7c] sm:$0xff] }
 0x5bd   :  { %v5489_v60 = vor.u32 %v5488_v53, %v5485_v54  ;;  %v5385_v8 = vsel %vm2990_vm8, %v5382_v30, %v5384_v50  ;;  %v15045_v30 = vpop.f32.mrf.mxu2 }
 0x5be   :  { %v5320_v43 = vpop.f32.mrf.mxu3 }
 0x5bf   :  { %v14984_v41 = vadd.f32 %v5320_v43, %v5259_v45  ;;  %v5490_v17 = vsel %vm3062_vm11, %v5480_v46, %v5489_v60  ;;  %v12351_v46 = vmov 0   ;;  %v5830_v45 = vunpack.c.l.b16 %v5826_v3 }
 0x5c0   :  { %2710 = vst.msk [vmem:[#allocation4 + $0x90] sm:$0xf] %vm2330_vm0, %v12351_v46  ;;  %v5747_v43 = vshrl.u32 %v15001_v22, 16 }
 0x5c1   :  { %v2029_v49 = vld [vmem:[#allocation2 + $0x469] sm:$0xff]  ;;  %v1451_v12 = vpop.f32.mrf.mxu0  ;;  %2711 = vst.msk [vmem:[#allocation4 + $0x94] sm:$0xf] %vm2330_vm0, %v12351_v46 }
 0x5c2   :  { %v2032_v28 = vmax.f32 %v1446_v27, %v2029_v49  ;;  %1601 = vst [vmem:[#allocation2 + $0x478] sm:$0xff] %v1451_v12  ;;  %v12114_v27 = vld [vmem:[%s15712_s3 + $0x8] sm:$0xff]  ;;  %v5831_v49 = vpack.c.b16 %v5722_v1, %v5830_v45 }
 0x5c3   :  { %6001 = vmatpush.bf16.msra.mxu1 %v12114_v27  ;;  %2712 = vst.msk [vmem:[#allocation4 + $0x98] sm:$0xf] %vm2330_vm0, %v12351_v46  ;;  %v15052_v27 = vpop.f32.mrf.mxu1 }
 0x5c4   :  { %v2173_v15 = vmax.f32 %v2023_v33, %v2032_v28  ;;  %v5730_v33 = vpack.c.b16 %v5722_v1, %v5721_v2  ;;  %2713 = vst.msk [vmem:[#allocation4 + $0x9c] sm:$0xf] %vm2330_vm0, %v12351_v46 }
 0x5c5   :  { %2714 = vst.msk [vmem:[#allocation4 + $0xa0] sm:$0xf] %vm2330_vm0, %v12351_v46  ;;  %v5263_v62 = vpop.f32.mrf.mxu2 }
 0x5c6   :  { %2314 = vst [vmem:[#allocation3 + $0x450] sm:$0xff] %v2173_v15  ;;  %11066 = vmatmul.msk.bf16.gmra.mxu2 %vm2798_vm6, %v5490_v17  ;;  %v5738_v6 = vshll.u32 %v5730_v33, 16  ;;  %v5833_v15 = vrot.slane %v15001_v22, 1 }
 0x5c7   :  { %2715 = vst.msk [vmem:[#allocation4 + $0xa4] sm:$0xf] %vm2330_vm0, %v12351_v46 }
 0x5c8   :  { %v5740_v59 = vrot.slane %v5738_v6, 1  ;;  %2716 = vst.msk [vmem:[#allocation4 + $0xa8] sm:$0xf] %vm2330_vm0, %v12351_v46 }
 0x5c9   :  { %v2030_v48 = vld [vmem:[#allocation2 + $0x471] sm:$0xff]  ;;  %v1454_v39 = vpop.f32.mrf.mxu0  ;;  %11075 = vmatmul.msk.bf16.gmra.mxu3 %vm2798_vm6, %v5558_v13  ;;  %2717 = vst.msk [vmem:[#allocation4 + $0xac] sm:$0xf] %vm2330_vm0, %v12351_v46 }
 0x5ca   :  { %v2033_v9 = vmax.f32 %v1449_v34, %v2030_v48  ;;  %1602 = vst [vmem:[#allocation2 + $0x480] sm:$0xff] %v1454_v39  ;;  %v12106_v34 = vld [vmem:[#allocation4 + $0x7c] sm:$0xff] }
 0x5cb   :  { %11055 = vmatmul.msk.bf16.gmra.mxu1 %vm2798_vm6, %v5383_v35  ;;  %v5751_v18 = vshll.u32 %v12106_v34, 16  ;;  %v5835_v13 = vrot.slane %v12106_v34, 1 }
 0x5cc   :  { %v2174_v58 = vmax.f32 %v2024_v26, %v2033_v9  ;;  %v5736_v26 = vshrl.u32 %v5730_v33, 16  ;;  %v5755_v33 = vshrl.u32 %v12106_v34, 16 }
 0x5cd   :  { %v5753_v54 = vrot.slane %v5751_v18, 1  ;;  %v5836_v35 = vsel %vm2890_vm10, %v5833_v15, %v5835_v13  ;;  %v5265_v56 = vpop.f32.mrf.mxu2 }
 0x5ce   :  { %2315 = vst [vmem:[#allocation3 + $0x458] sm:$0xff] %v2174_v58  ;;  %v5741_v40 = vor.u32 %v5740_v59, %v5736_v26  ;;  %v12101_v58 = vld [vmem:[#allocation4 + $0x74] sm:$0xff] }
 0x5cf   :  { %v5757_v39 = vor.u32 %v5755_v33, %v5753_v54  ;;  %v12120_v26 = vld [vmem:[%s15712_s3 + $0x20] sm:$0xff] }
 0x5d0   :  { %v5746_v24 = vsel %vm2755_vm7, %v5741_v40, %v5745_v0 }
 0x5d1   :  { %v2031_v16 = vld [vmem:[#allocation2 + $0x479] sm:$0xff]  ;;  %v1456_v44 = vpop.f32.mrf.mxu0 }
 0x5d2   :  { %v2034_v31 = vmax.f32 %v1451_v12, %v2031_v16  ;;  %v5749_v12 = vor.u32 %v5747_v43, %v5745_v0  ;;  %v15054_v16 = vpop.f32.mrf.mxu3 }
 0x5d4   :  { %v2175_v63 = vmax.f32 %v2025_v19, %v2034_v31  ;;  %v5754_v51 = vsel %vm2755_vm7, %v5749_v12, %v5753_v54 }
 0x5d5   :  { %v2691_v21 = vld [vmem:[#allocation3 + $0x450] ss:$2 sm:$0xff] }
 0x5d6   :  { %2316 = vst [vmem:[#allocation3 + $0x460] sm:$0xff] %v2175_v63  ;;  %v2694_v14 = vadd.f32 %v14765_v20, %v2691_v21  ;;  %11121 = vmatmul.msk.bf16.vlgmr.msrb.gmra.mxu2 %vm2798_vm6, %v5746_v24  ;;  %v12121_v21 = vld [vmem:[%s15712_s3 + $0x28] sm:$0xff]  ;;  %v12119_v24 = vld [vmem:[%s15712_s3 + $0x18] sm:$0xff] }
 0x5d7   :  { %6309 = vmatpush.bf16.msrb.mxu2 %v12120_v26 }
 0x5d8   :  { %v2696_v11 = vmax.f32 %v2694_v14, 0.0 }
 0x5d9   :  { %11076 = vmatmul.msk.bf16.gmra.mxu3 %vm2798_vm6, %v5560_v61 }
 0x5da   :  { %v2698_v47 = vpack.c.bf16 %v2696_v11, %v2696_v11 }
 0x5db   :  { %11056 = vmatmul.msk.bf16.gmra.mxu1 %vm2798_vm6, %v5385_v8 }
 0x5dc   :  { %v2702_v19 = vrot.slane %v2698_v47, 6 }
 0x5dd   :  { %v2693_v25 = vld [vmem:[#allocation3 + $0x460] ss:$2 sm:$0xf] }
 0x5de   :  { %2708 = vst.msk [vmem:[#allocation4 + $0x88] sm:$0xc] %vm2355_vm2, %v2702_v19  ;;  %v2695_v32 = vadd.f32 %v14765_v20, %v2693_v25  ;;  %v2703_v28 = vrot.slane %v2702_v19, 4  ;;  %v5832_v20 = vrot.slane %v5831_v49, 1  ;;  %v12314_v25 = vld [vmem:[#allocation4 + $0x80] sm:$0xff]  }
 0x5df   :  { %v12315_v49 = vld [vmem:[#allocation4 + $0x80] sm:$0xf0]  ;;  %v5943_v12 = vshll.u32 %v12314_v25, 16  ;;  %v5941_v33 = vshrl.u32 %v12314_v25, 16 }
 0x5e0   :  { %v2697_v52 = vmax.f32 %v2695_v32, 0.0  ;;  %v5834_v2 = vsel %vm2890_vm10, %v5832_v20, %v5833_v15 }
 0x5e2   :  { %v2699_v53 = vpack.c.bf16 %v2697_v52, %v2697_v52 }
 0x5e4   :  { %v2704_v60 = vrot.slane %v2699_v53, 6 }
 0x5e5   :  { %v12107_v1 = vld [vmem:[#allocation4 + $0x84] sm:$0xff] }
 0x5e6   :  { %v2705_v17 = vsel %vm13012_vm5, %v2703_v28, %v2704_v60  ;;  %11122 = vmatmul.msk.bf16.gmra.mxu2 %vm2798_vm6, %v5754_v51  ;;  %v5759_v29 = vshll.u32 %v12107_v1, 16  ;;  %v5763_v37 = vshrl.u32 %v12107_v1, 16  ;;  %v5837_v44 = vrot.slane %v12107_v1, 1  ;;  %v12103_v45 = vld [vmem:[#allocation4 + $0x84] sm:$0xff]  ;;  %v12316_v51 = vld [vmem:[#allocation4 + $0x80] sm:$0xe] }
 0x5e7   :  { %2709 = vst.msk [vmem:[#allocation4 + $0x8c] sm:$0xf] %vm2330_vm0, %v2705_v17  ;;  %v12317_v17 = vor.u32 %v12316_v51, %v12315_v49  ;;  %v12130_v49 = vld [vmem:[%s15712_s3 + $0x38] sm:$0xff] }
 0x5e8   :  { %v5761_v48 = vrot.slane %v5759_v29, 1  ;;  %v5838_v7 = vsel %vm2890_vm10, %v5835_v13, %v5837_v44 }
 0x5e9   :  { %11131 = vmatmul.msk.bf16.vlgmr.msra.gmra.mxu3 %vm2798_vm6, %v5834_v2  ;;  %v5945_v2 = vrot.slane %v5943_v12, 1 }
 0x5ea   :  { %v5762_v9 = vsel %vm2755_vm7, %v5757_v39, %v5761_v48  ;;  %v5765_v59 = vor.u32 %v5763_v37, %v5761_v48  ;;  %6379 = vmatpush.bf16.msra.mxu3 %v12121_v21  ;;  %v6072_v48 = vrot.slane %v12317_v17, 1 }
 0x5eb   :  { %11099 = vmatmul.msk.bf16.vlgmr.msrb.gmra.mxu1 %vm2798_vm6, %v12100_v55  ;;  %v5946_v39 = vor.u32 %v5945_v2, %v5941_v33 }
 0x5ec   :  { %6204 = vmatpush.bf16.msrb.mxu1 %v12119_v24 }
 0x5ee   :  { %v5709_v4 = vld [vmem:[#allocation4 + $0x8c] sm:$0x1] }
 0x5ef   :  { %v5729_v22 = vunpack.c.l.b16 %v5709_v4  ;;  %v12110_v53 = vld [vmem:[#allocation4 + $0x88] sm:$0xff] }
 0x5f0   :  { %v5948_v20 = vshll.u32 %v12110_v53, 16  ;;  %v6073_v1 = vrot.slane %v12110_v53, 1  ;;  %v15114_v21 = vld [vmem:[#allocation4 + $0x88] sm:$0xff]  }
 0x5f1   :  { %v5734_v6 = vpack.c.b16 %v5729_v22, %v5729_v22  ;;  %v15130_v12 = vld [vmem:[#allocation4 + $0x8c] sm:$0xff] }
 0x5f2   :  { %v5950_v4 = vrot.slane %v5948_v20, 1  ;;  %v6252_v33 = vshll.u32 %v15130_v12, 16 }
 0x5f3   :  { %v5767_v5 = vshll.u32 %v5734_v6, 16  ;;  %v5839_v8 = vrot.slane %v5734_v6, 1  ;;  %v12111_v6 = vld [vmem:[#allocation4 + $0x90] sm:$0xff] }
 0x5f5   :  { %v5769_v46 = vrot.slane %v5767_v5, 1  ;;  %v5840_v3 = vsel %vm2890_vm10, %v5837_v44, %v5839_v8 }
 0x5f6   :  { %11123 = vmatmul.msk.bf16.gmra.mxu2 %vm2798_vm6, %v5762_v9  ;;  %v6074_v9 = vsel %vm2890_vm10, %v6072_v48, %v6073_v1  ;;  %v12126_v48 = vld [vmem:[%s15712_s3 + $0x30] sm:$0xff] }
 0x5f7   :  { %v5770_v31 = vsel %vm2755_vm7, %v5765_v59, %v5769_v46  ;;  %v6075_v46 = vrot.slane %v12111_v6, 1  ;;  %v5952_v59 = vshrl.u32 %v12110_v53, 16 }
 0x5f9   :  { %11132 = vmatmul.msk.bf16.gmra.mxu3 %vm2798_vm6, %v5836_v35  ;;  %v5954_v44 = vor.u32 %v5952_v59, %v5950_v4 }
 0x5fb   :  { %11100 = vmatmul.msk.bf16.gmra.mxu1 %vm2798_vm6, %v12101_v58 }
 0x606   :  { %11124 = vmatmul.msk.bf16.gmra.mxu2 %vm2798_vm6, %v5770_v31 }
 0x608   :  { %v5220_v0 = vpop.f32.mrf.mxu1 }
 0x609   :  { %v5264_v63 = vadd.f32 %v5263_v62, %v5220_v0  ;;  %v5268_v40 = vpop.f32.mrf.mxu2  ;;  %11133 = vmatmul.msk.bf16.gmra.mxu3 %vm2798_vm6, %v5838_v7  ;;  %v5951_v62 = vsel %vm2755_vm7, %v5946_v39, %v5950_v4  ;;  %v6076_v0 = vsel %vm2890_vm10, %v6073_v1, %v6075_v46  ;;  %v6249_v1 = vshrl.u32 %v15130_v12, 16 }
 0x60b   :  { %11101 = vmatmul.msk.bf16.gmra.mxu1 %vm2798_vm6, %v12102_v38  ;;  %v12112_v38 = vld [vmem:[#allocation4 + $0x98] sm:$0xff] }
 0x60c   :  { %v5325_v14 = vpop.f32.mrf.mxu3  ;;  %v6077_v8 = vrot.slane %v12112_v38, 1  ;;  %v5968_v59 = vshrl.u32 %v12112_v38, 16 }
 0x60d   :  { %v15070_v50 = vadd.f32 %v5325_v14, %v5264_v63  ;;  %v5960_v14 = vshrl.u32 %v12111_v6, 16 }
 0x610   :  { %v5222_v11 = vpop.f32.mrf.mxu1 }
 0x611   :  { %v5266_v61 = vadd.f32 %v5265_v56, %v5222_v11  ;;  %v5270_v34 = vpop.f32.mrf.mxu2  ;;  %v5956_v56 = vshll.u32 %v12111_v6, 16  ;;  %v5964_v11 = vshll.u32 %v12112_v38, 16 }
 0x613   :  { %v5958_v31 = vrot.slane %v5956_v56, 1  ;;  %v6254_v56 = vrot.slane %v6252_v33, 3 }
 0x614   :  { %v5327_v47 = vpop.f32.mrf.mxu3 }
 0x615   :  { %v15072_v19 = vadd.f32 %v5327_v47, %v5266_v61  ;;  %v5959_v63 = vsel %vm2755_vm7, %v5954_v44, %v5958_v31  ;;  %v6136_v61 = vld [vmem:[#allocation4 + $0x84] sm:$0xc]  ;;  %v6157_v47 = vunpack.c.l.b16 %v15114_v21 }
 0x616   :  { %11161 = vmatmul.msk.bf16.vlgmr.msra.gmra.mxu2 %vm2798_vm6, %v12314_v25  ;;  %v6156_v25 = vunpack.c.l.b16 %v6136_v61 }
 0x617   :  { %6589 = vmatpush.bf16.msra.mxu2 %v12130_v49 }
 0x618   :  { %v5225_v18 = vpop.f32.mrf.mxu1 }
 0x619   :  { %v5269_v32 = vadd.f32 %v5268_v40, %v5225_v18  ;;  %v15076_v52 = vpop.f32.mrf.mxu2  ;;  %11134 = vmatmul.msk.bf16.gmra.mxu3 %vm2798_vm6, %v5840_v3  ;;  %v5962_v3 = vor.u32 %v5960_v14, %v5958_v31 }
 0x61b   :  { %11102 = vmatmul.msk.bf16.gmra.mxu1 %vm2798_vm6, %v12103_v45  ;;  %v15123_v45 = vpack.c.b16 %v6157_v47, %v6156_v25 }
 0x61c   :  { %v5330_v43 = vpop.f32.mrf.mxu3 }
 0x61d   :  { %v15080_v54 = vadd.f32 %v5330_v43, %v5269_v32  ;;  %v5966_v32 = vrot.slane %v5964_v11, 1  ;;  %v5914_v43 = vld [vmem:[#allocation4 + $0xa0] sm:$0x1]  ;;  %v6241_v20 = vshrl.u32 %v15123_v45, 16  ;;  %v6244_v2 = vshll.u32 %v15123_v45, 16 }
 0x61e   :  { %v5934_v51 = vunpack.c.l.b16 %v5914_v43  ;;  %v15158_v43 = vld [vmem:[#allocation4 + $0x94] sm:$0xff] }
 0x61f   :  { %v5970_v61 = vor.u32 %v5968_v59, %v5966_v32  ;;  %v15178_v59 = vld [vmem:[#allocation4 + $0x9c] sm:$0xff] }
 0x620   :  { %v5227_v28 = vpop.f32.mrf.mxu1  ;;  %v5939_v39 = vpack.c.b16 %v5934_v51, %v5934_v51  ;;  %v6258_v51 = vshrl.u32 %v15158_v43, 16 }
 0x621   :  { %v5271_v60 = vadd.f32 %v5270_v34, %v5227_v28  ;;  %v15082_v15 = vpop.f32.mrf.mxu2 }
 0x622   :  { %v5972_v44 = vshll.u32 %v5939_v39, 16 }
 0x624   :  { %v5332_v55 = vpop.f32.mrf.mxu3  ;;  %v5974_v25 = vrot.slane %v5972_v44, 1 }
 0x625   :  { %v15084_v29 = vadd.f32 %v5332_v55, %v5271_v60  ;;  %v5967_v60 = vsel %vm2755_vm7, %v5962_v3, %v5966_v32  ;;  %v12131_v55 = vld [vmem:[%s15712_s3 + $0x40] sm:$0xff]  ;;  %v6261_v32 = vshll.u32 %v15158_v43, 16 }
 0x626   :  { %11162 = vmatmul.msk.bf16.gmra.mxu2 %vm2798_vm6, %v12110_v53  ;;  %v6078_v53 = vsel %vm2890_vm10, %v6075_v46, %v6077_v8 }
 0x628   :  { %v15087_v13 = vpop.f32.mrf.mxu1 }
 0x629   :  { %v15090_v22 = vpop.f32.mrf.mxu2  ;;  %11171 = vmatmul.msk.bf16.vlgmr.msrb.gmra.mxu3 %vm2798_vm6, %v6074_v9  ;;  %v6243_v9 = vrot.slane %v6241_v20, 2  ;;  %v6339_v20 = vld [vmem:[#allocation4 + $0x84] sm:$0x8] }
 0x62a   :  { %6659 = vmatpush.bf16.msrb.mxu3 %v12131_v55  ;;  %v6260_v55 = vrot.slane %v6258_v51, 2  ;;  %v6343_v33 = vunpack.c.l.b16 %v6339_v20  ;;  %v6234_v20 = vld [vmem:[#allocation4 + $0xa4] sm:$0x7] }
 0x62b   :  { %11153 = vmatmul.msk.bf16.vlgmr.msra.gmra.mxu1 %vm2798_vm6, %v5951_v62  ;;  %v6246_v62 = vrot.slane %v6244_v2, 3 }
 0x62c   :  { %v15095_v35 = vpop.f32.mrf.mxu3  ;;  %6464 = vmatpush.bf16.msra.mxu1 %v12126_v48 }
 0x630   :  { %v15097_v58 = vpop.f32.mrf.mxu1 }
 0x631   :  { %v15099_v5 = vpop.f32.mrf.mxu2 }
 0x634   :  { %v15101_v37 = vpop.f32.mrf.mxu3 }
 0x636   :  { %11163 = vmatmul.msk.bf16.gmra.mxu2 %vm2798_vm6, %v12111_v6  ;;  %v6251_v6 = vrot.slane %v6249_v1, 2  ;;  %v6263_v1 = vrot.slane %v6261_v32, 3 }
 0x638   :  { %v15104_v26 = vpop.f32.mrf.mxu1  ;;  %v6255_v14 = vor.u32 %v6254_v56, %v6251_v6  ;;  %v5256_v6 = vadd.f32 %v14953_v42, %v14956_v57  ;;  %v6267_v57 = vshrl.u32 %v15178_v59, 16 }
 0x639   :  { %v15107_v7 = vpop.f32.mrf.mxu2  ;;  %11172 = vmatmul.msk.bf16.gmra.mxu3 %vm2798_vm6, %v6076_v0  ;;  %v6247_v0 = vor.u32 %v6246_v62, %v6243_v9  ;;  %v6264_v62 = vor.u32 %v6263_v1, %v6260_v55 }
 0x63b   :  { %11154 = vmatmul.msk.bf16.gmra.mxu1 %vm2798_vm6, %v5959_v63  ;;  %v6079_v63 = vrot.slane %v5939_v39, 1  ;;  %v6256_v3 = vsel %vm3062_vm11, %v6247_v0, %v6255_v14  ;;  %v6344_v39 = vpack.c.b16 %v6157_v47, %v6343_v33 }
 0x63c   :  { %v15112_v40 = vpop.f32.mrf.mxu3 }
 0x63d   :  { %v6345_v0 = vrot.slane %v6344_v39, 3 }
 0x640   :  { %v15116_v24 = vpop.f32.mrf.mxu1 }
 0x641   :  { %v15118_v34 = vpop.f32.mrf.mxu2 }
 0x644   :  { %v15121_v18 = vpop.f32.mrf.mxu3 }
 0x646   :  { %11164 = vmatmul.msk.bf16.gmra.mxu2 %vm2798_vm6, %v12112_v38  ;;  %v5975_v38 = vsel %vm2755_vm7, %v5970_v61, %v5974_v25  ;;  %v6265_v61 = vsel %vm3062_vm11, %v6255_v14, %v6264_v62 }
 0x648   :  { %v15132_v28 = vpop.f32.mrf.mxu1 }
 0x649   :  { %v15135_v17 = vpop.f32.mrf.mxu2  ;;  %11173 = vmatmul.msk.bf16.gmra.mxu3 %vm2798_vm6, %v6078_v53  ;;  %v6080_v53 = vsel %vm2890_vm10, %v6077_v8, %v6079_v63  ;;  %v5433_v8 = vadd.f32 %v15087_v13, %v14950_v23  ;;  %v5336_v63 = vadd.f32 %v14960_v10, %v5256_v6  ;;  %v6346_v23 = vrot.slane %v15130_v12, 3 }
 0x64a   :  { %v6170_v13 = vrot.slane %v15123_v45, 2  ;;  %v6171_v10 = vrot.slane %v15130_v12, 2  ;;  %v5435_v12 = vadd.f32 %v15104_v26, %v14984_v41 }
 0x64b   :  { %11155 = vmatmul.msk.bf16.gmra.mxu1 %vm2798_vm6, %v5967_v60  ;;  %v5538_v56 = vadd.f32 %v15076_v52, %v5433_v8  ;;  %v5434_v42 = vadd.f32 %v15097_v58, %v5336_v63  ;;  %v6270_v52 = vshll.u32 %v15178_v59, 16  ;;  %v6269_v58 = vrot.slane %v6267_v57, 2 }
 0x64c   :  { %v15149_v4 = vpop.f32.mrf.mxu3  ;;  %v6238_v8 = vunpack.c.l.b16 %v6234_v20 }
 0x64d   :  { %v5608_v47 = vadd.f32 %v15095_v35, %v5538_v56  ;;  %v5539_v45 = vadd.f32 %v15082_v15, %v5434_v42  ;;  %v6272_v51 = vrot.slane %v6270_v52, 3  ;;  %v6859_v56 = vld [vmem:[#allocation5 + $0xb1] sm:$0xff] }
 0x64e   :  { %v6891_v42 = vmax.f32 %v14905_v36, %v6859_v56  ;;  %v6350_v56 = vrot.slane %v15178_v59, 3 }
 0x64f   :  { %v5609_v1 = vadd.f32 %v15101_v37, %v5539_v45  ;;  %v6273_v33 = vor.u32 %v6272_v51, %v6269_v58  ;;  %v15207_v37 = vpack.c.b16 %v6238_v8, %v6238_v8 }
 0x650   :  { %v15151_v46 = vpop.f32.mrf.mxu1 }
 0x651   :  { %v15153_v31 = vpop.f32.mrf.mxu2  ;;  %v6279_v52 = vshll.u32 %v15207_v37, 16 }
 0x653   :  { %v6281_v58 = vrot.slane %v6279_v52, 3 }
 0x654   :  { %v15155_v11 = vpop.f32.mrf.mxu3 }
 0x656   :  { %11203 = vmatmul.msk.bf16.vlgmr.msrb.gmra.mxu2 %vm2798_vm6, %v6256_v3  ;;  %v6347_v3 = vsel %vm3169_vm9, %v6345_v0, %v6346_v23  ;;  %v5540_v0 = vadd.f32 %v15090_v22, %v5435_v12  ;;  %v6173_v22 = vrot.slane %v15158_v43, 2 }
 0x658   :  { %v15162_v49 = vpop.f32.mrf.mxu1 }
 0x659   :  { %v5798_v60 = vpop.f32.mrf.mxu2  ;;  %11174 = vmatmul.msk.bf16.gmra.mxu3 %vm2798_vm6, %v6080_v53 }
 0x65b   :  { %11156 = vmatmul.msk.bf16.gmra.mxu1 %vm2798_vm6, %v5975_v38  ;;  %v6172_v38 = vsel %vm2990_vm8, %v6170_v13, %v6171_v10  ;;  %v6348_v13 = vrot.slane %v15158_v43, 3  ;;  %v6174_v43 = vsel %vm2990_vm8, %v6171_v10, %v6173_v22  ;;  %v5437_v10 = vadd.f32 %v15132_v28, %v15070_v50 }
 0x65c   :  { %v15169_v2 = vpop.f32.mrf.mxu3  ;;  %v6175_v50 = vrot.slane %v15178_v59, 2 }
 0x65d   :  { %v6349_v36 = vsel %vm3169_vm9, %v6346_v23, %v6348_v13 }
 0x660   :  { %v15173_v48 = vpop.f32.mrf.mxu1 }
 0x661   :  { %v5800_v9 = vpop.f32.mrf.mxu2 }
 0x664   :  { %v15180_v44 = vpop.f32.mrf.mxu3 }
 0x666   :  { %11204 = vmatmul.msk.bf16.gmra.mxu2 %vm2798_vm6, %v6265_v61  ;;  %v6274_v61 = vsel %vm3062_vm11, %v6264_v62, %v6273_v33 }
 0x668   :  { %v5673_v25 = vpop.f32.mrf.mxu1 }
 0x669   :  { %v5693_v14 = vadd.f32 %v5673_v25, %v5608_v47  ;;  %v5803_v53 = vpop.f32.mrf.mxu2  ;;  %11213 = vmatmul.msk.bf16.vlgmr.msra.gmra.mxu3 %vm2798_vm6, %v6347_v3 }
 0x66b   :  { %11193 = vmatmul.msk.bf16.vlgmr.msrb.gmra.mxu1 %vm2798_vm6, %v6172_v38  ;;  %v5818_v35 = vadd.f32 %v5798_v60, %v5693_v14  ;;  %v5261_v60 = vadd.f32 %v15045_v30, %v15052_v27 }
 0x66c   :  { %v5868_v32 = vpop.f32.mrf.mxu3 }
 0x66d   :  { %v15197_v55 = vadd.f32 %v5868_v32, %v5818_v35  ;;  %v5338_v41 = vadd.f32 %v15054_v16, %v5261_v60  ;;  %v6276_v16 = vshrl.u32 %v15207_v37, 16 }
 0x66f   :  { %5896 = vst [vmem:[#allocation5 + $0xc0] sm:$0xff] %v15197_v55  ;;  %v5436_v57 = vadd.f32 %v15116_v24, %v5338_v41  ;;  %v6278_v23 = vrot.slane %v6276_v16, 2 }
 0x670   :  { %v5675_v39 = vpop.f32.mrf.mxu1 }
 0x671   :  { %v5694_v15 = vadd.f32 %v5675_v39, %v5609_v1  ;;  %v5805_v6 = vpop.f32.mrf.mxu2  ;;  %v5541_v38 = vadd.f32 %v15099_v5, %v5436_v57  ;;  %v15233_v5 = vld [vmem:[#allocation4 + $0x90] sm:$0xf]  ;;  %v6282_v12 = vor.u32 %v6281_v58, %v6278_v23 }
 0x672   :  { %v6515_v60 = vunpack.c.l.b16 %v15233_v5 }
 0x673   :  { %v5819_v63 = vadd.f32 %v5800_v9, %v5694_v15  ;;  %v5610_v9 = vadd.f32 %v15112_v40, %v5540_v0  ;;  %v15228_v40 = vld [vmem:[%s15713_s4] ss:$0 sm:$0xff]  ;;  %v5611_v1 = vadd.f32 %v15121_v18, %v5541_v38  ;;  %v5542_v0 = vadd.f32 %v15107_v7, %v5437_v10 }
 0x674   :  { %v5870_v26 = vpop.f32.mrf.mxu3 }
 0x675   :  { %v15211_v47 = vadd.f32 %v5870_v26, %v5819_v63  ;;  %v6283_v63 = vsel %vm3062_vm11, %v6273_v33, %v6282_v12  ;;  %v5612_v7 = vadd.f32 %v15149_v4, %v5542_v0  ;;  %v5438_v33 = vadd.f32 %v15151_v46, %v15072_v19 }
 0x676   :  { %v6923_v30 = vld [vmem:[#allocation5 + $0xbc] sm:$0xff]  ;;  %11205 = vmatmul.msk.bf16.gmra.mxu2 %vm2798_vm6, %v6274_v61 }
 0x677   :  { %v6955_v27 = vld [vmem:[#allocation5 + $0xbd] sm:$0xff]  ;;  %5897 = vst [vmem:[#allocation5 + $0xc8] sm:$0xff] %v15211_v47  ;;  %v5543_v19 = vadd.f32 %v15118_v34, %v5438_v33  ;;  %v5439_v34 = vadd.f32 %v15162_v49, %v15080_v54 }
 0x678   :  { %v6987_v62 = vmax.f32 %v6923_v30, %v6955_v27  ;;  %v5678_v25 = vpop.f32.mrf.mxu1 }
 0x679   :  { %v5695_v24 = vadd.f32 %v5678_v25, %v5610_v9  ;;  %v5808_v14 = vpop.f32.mrf.mxu2  ;;  %11214 = vmatmul.msk.bf16.gmra.mxu3 %vm2798_vm6, %v6349_v36  ;;  %v6176_v9 = vsel %vm2990_vm8, %v6173_v22, %v6175_v50  ;;  %v5544_v54 = vadd.f32 %v15135_v17, %v5439_v34 }
 0x67a   :  { %v7019_v3 = vmax.f32 %v6891_v42, %v6987_v62 }
 0x67b   :  { %11194 = vmatmul.msk.bf16.gmra.mxu1 %vm2798_vm6, %v6174_v43  ;;  %v5820_v35 = vadd.f32 %v5803_v53, %v5695_v24  ;;  %v6514_v53 = vunpack.c.h.b16 %v15114_v21  ;;  %v6351_v21 = vsel %vm3169_vm9, %v6348_v13, %v6350_v56  ;;  %v6144_v13 = vld [vmem:[#allocation4 + $0xa4] sm:$0x3]  ;;  %v5614_v17 = vadd.f32 %v15169_v2, %v5544_v54 }
 0x67c   :  { %v7055_v45 = vadd.f32 %v15228_v40, %v7019_v3  ;;  %v5873_v51 = vpop.f32.mrf.mxu3  ;;  %v6164_v3 = vunpack.c.l.b16 %v6144_v13 }
 0x67d   :  { %v5890_v20 = vadd.f32 %v5873_v51, %v5820_v35  ;;  %v6523_v26 = vpack.c.b16 %v6515_v60, %v6514_v53  ;;  %v5613_v35 = vadd.f32 %v15155_v11, %v5543_v19  ;;  %v6352_v11 = vrot.slane %v15207_v37, 3 }
 0x67e   :  { %v7087_v32 = vmax.f32 %v7055_v45, 0.0  ;;  %v6861_v28 = vld [vmem:[#allocation5 + $0xc1] sm:$0xff] }
 0x67f   :  { %5898 = vst [vmem:[#allocation5 + $0xd0] sm:$0xff] %v5890_v20  ;;  %v6893_v57 = vmax.f32 %v15197_v55, %v6861_v28  ;;  %v6531_v4 = vshll.u32 %v6523_v26, 16  ;;  %v15262_v55 = vld [vmem:[#allocation4 + $0x94] sm:$0xff]  ;;  %v6529_v58 = vshrl.u32 %v6523_v26, 16  ;;  %v5440_v28 = vadd.f32 %v15173_v48, %v15084_v29  ;;  %v6619_v48 = vld [vmem:[#allocation4 + $0x8c] sm:$0xe] }
 0x680   :  { %7119 = vst [vmem:[#allocation6 + $0xb0] sm:$0xff] %v7087_v32  ;;  %v5680_v8 = vpop.f32.mrf.mxu1  ;;  %v6536_v43 = vshll.u32 %v15262_v55, 16  ;;  %v6353_v37 = vsel %vm3169_vm9, %v6350_v56, %v6352_v11  ;;  %v6540_v2 = vshrl.u32 %v15262_v55, 16 }
 0x681   :  { %v5696_v39 = vadd.f32 %v5680_v8, %v5611_v1  ;;  %v5810_v15 = vpop.f32.mrf.mxu2  ;;  %v6533_v38 = vrot.slane %v6531_v4, 1  ;;  %v6169_v1 = vpack.c.b16 %v6164_v3, %v6164_v3 }
 0x683   :  { %v5821_v18 = vadd.f32 %v5805_v6, %v5696_v39  ;;  %v6534_v8 = vor.u32 %v6533_v38, %v6529_v58  ;;  %v6538_v39 = vrot.slane %v6536_v43, 1 }
 0x684   :  { %v5875_v61 = vpop.f32.mrf.mxu3 }
 0x685   :  { %v15243_v41 = vadd.f32 %v5875_v61, %v5821_v18 }
 0x686   :  { %11206 = vmatmul.msk.bf16.gmra.mxu2 %vm2798_vm6, %v6283_v63  ;;  %v6925_v6 = vld [vmem:[#allocation5 + $0xcc] sm:$0xff]  ;;  %v6177_v63 = vrot.slane %v6169_v1, 2  ;;  %v12122_v1 = vld [vmem:[#allocation4 + $0x8c] sm:$0xff] }
 0x687   :  { %v6957_v42 = vld [vmem:[#allocation5 + $0xcd] sm:$0xff]  ;;  %5899 = vst [vmem:[#allocation5 + $0xd8] sm:$0xff] %v15243_v41 }
 0x688   :  { %v6989_v30 = vmax.f32 %v6925_v6, %v6957_v42  ;;  %v5683_v27 = vpop.f32.mrf.mxu1  ;;  %v6862_v24 = vld [vmem:[#allocation5 + $0xc9] sm:$0xff]  ;;  %v5545_v6 = vadd.f32 %v15153_v31, %v5440_v28  ;;  %v6542_v31 = vor.u32 %v6540_v2, %v6538_v39 }
 0x689   :  { %v5697_v62 = vadd.f32 %v5683_v27, %v5612_v7  ;;  %v5813_v16 = vpop.f32.mrf.mxu2  ;;  %11215 = vmatmul.msk.bf16.gmra.mxu3 %vm2798_vm6, %v6351_v21  ;;  %v6894_v51 = vmax.f32 %v15211_v47, %v6862_v24  ;;  %v6539_v47 = vsel %vm2755_vm7, %v6534_v8, %v6538_v39  ;;  %v6178_v7 = vsel %vm2990_vm8, %v6175_v50, %v6177_v63 }
 0x68a   :  { %v7021_v52 = vmax.f32 %v6893_v57, %v6989_v30  ;;  %v6623_v27 = vunpack.c.l.b16 %v6619_v48  ;;  %v5615_v50 = vadd.f32 %v15180_v44, %v5545_v6 }
 0x68b   :  { %11195 = vmatmul.msk.bf16.gmra.mxu1 %vm2798_vm6, %v6176_v9  ;;  %v5822_v46 = vadd.f32 %v5808_v14, %v5697_v62 }
 0x68c   :  { %v7057_v25 = vadd.f32 %v15228_v40, %v7021_v52  ;;  %v5878_v36 = vpop.f32.mrf.mxu3  ;;  %v6624_v19 = vpack.c.b16 %v6515_v60, %v6623_v27 }
 0x68d   :  { %v15265_v22 = vadd.f32 %v5878_v36, %v5822_v46 }
 0x68e   :  { %v7089_v45 = vmax.f32 %v7057_v25, 0.0  ;;  %v6926_v23 = vld [vmem:[#allocation5 + $0xd4] sm:$0xff]  ;;  %v6625_v43 = vrot.slane %v6624_v19, 1 }
 0x68f   :  { %v6958_v14 = vld [vmem:[#allocation5 + $0xd5] sm:$0xff]  ;;  %5900 = vst [vmem:[#allocation5 + $0xe0] sm:$0xff] %v15265_v22 }
 0x690   :  { %7121 = vst [vmem:[#allocation6 + $0xc0] sm:$0xff] %v7089_v45  ;;  %v6990_v32 = vmax.f32 %v6926_v23, %v6958_v14  ;;  %v5685_v20 = vpop.f32.mrf.mxu1  ;;  %v12129_v23 = vld [vmem:[#allocation4 + $0xa4] sm:$0xff] }
 0x691   :  { %v5698_v10 = vadd.f32 %v5685_v20, %v5613_v35  ;;  %v5815_v12 = vpop.f32.mrf.mxu2  ;;  %v6552_v8 = vshll.u32 %v12129_v23, 16  ;;  %v6556_v6 = vshrl.u32 %v12129_v23, 16  ;;  %v6630_v27 = vrot.slane %v12129_v23, 1 }
 0x692   :  { %v7022_v53 = vmax.f32 %v6894_v51, %v6990_v32 }
 0x693   :  { %v5823_v49 = vadd.f32 %v5810_v15, %v5698_v10  ;;  %v15284_v15 = vld [vmem:[#allocation4 + $0x9c] sm:$0xff] }
 0x694   :  { %v7058_v0 = vadd.f32 %v15228_v40, %v7022_v53  ;;  %v5880_v18 = vpop.f32.mrf.mxu3  ;;  %v6544_v42 = vshll.u32 %v15284_v15, 16 }
 0x695   :  { %v5893_v61 = vadd.f32 %v5880_v18, %v5823_v49  ;;  %v6554_v49 = vrot.slane %v6552_v8, 1  ;;  %v6502_v18 = vld [vmem:[#allocation4 + $0xac] sm:$0x1] }
 0x696   :  { %v7090_v26 = vmax.f32 %v7058_v0, 0.0  ;;  %11261 = vmatmul.msk.bf16.vlgmr.msra.gmra.mxu2 %vm2798_vm6, %v6539_v47  ;;  %v6864_v57 = vld [vmem:[#allocation5 + $0xd9] sm:$0xff]  ;;  %v6546_v52 = vrot.slane %v6544_v42, 1  ;;  %v6628_v47 = vrot.slane %v15284_v15, 1 }
 0x697   :  { %5901 = vst [vmem:[#allocation5 + $0xe8] sm:$0xff] %v5893_v61  ;;  %v6896_v4 = vmax.f32 %v15243_v41, %v6864_v57  ;;  %v6626_v41 = vrot.slane %v15262_v55, 1  ;;  %v6558_v2 = vor.u32 %v6556_v6, %v6554_v49 }
 0x698   :  { %7122 = vst [vmem:[#allocation6 + $0xc8] sm:$0xff] %v7090_v26  ;;  %v5688_v21 = vpop.f32.mrf.mxu1  ;;  %v6547_v44 = vsel %vm2755_vm7, %v6542_v31, %v6546_v52  ;;  %v6522_v26 = vunpack.c.l.b16 %v6502_v18 }
 0x699   :  { %v5699_v33 = vadd.f32 %v5688_v21, %v5614_v17  ;;  %v6046_v29 = vpop.f32.mrf.mxu2  ;;  %11216 = vmatmul.msk.bf16.gmra.mxu3 %vm2798_vm6, %v6353_v37  ;;  %v6627_v32 = vsel %vm2890_vm10, %v6625_v43, %v6626_v41  ;;  %v6629_v21 = vsel %vm2890_vm10, %v6626_v41, %v6628_v47 }
 0x69b   :  { %11196 = vmatmul.msk.bf16.gmra.mxu1 %vm2798_vm6, %v6178_v7  ;;  %v5824_v56 = vadd.f32 %v5813_v16, %v5699_v33  ;;  %v12123_v7 = vld [vmem:[#allocation4 + $0x94] sm:$0xff]  ;;  %v6527_v33 = vpack.c.b16 %v6522_v26, %v6522_v26 }
 0x69c   :  { %v5883_v30 = vpop.f32.mrf.mxu3 }
 0x69d   :  { %v15294_v59 = vadd.f32 %v5883_v30, %v5824_v56 }
 0x69e   :  { %v6928_v9 = vld [vmem:[#allocation5 + $0xe4] sm:$0xff] }
 0x69f   :  { %v6960_v62 = vld [vmem:[#allocation5 + $0xe5] sm:$0xff]  ;;  %5902 = vst [vmem:[#allocation5 + $0xf0] sm:$0xff] %v15294_v59 }
 0x6a0   :  { %v6992_v13 = vmax.f32 %v6928_v9, %v6960_v62  ;;  %v5690_v16 = vpop.f32.mrf.mxu1  ;;  %v6865_v45 = vld [vmem:[#allocation5 + $0xe1] sm:$0xff]  ;;  %v6631_v62 = vsel %vm2890_vm10, %v6628_v47, %v6630_v27 }
 0x6a1   :  { %v5700_v25 = vadd.f32 %v5690_v16, %v5615_v50  ;;  %v6048_v36 = vpop.f32.mrf.mxu2  ;;  %v6897_v14 = vmax.f32 %v15265_v22, %v6865_v45 }
 0x6a2   :  { %v7024_v46 = vmax.f32 %v6896_v4, %v6992_v13  ;;  %v12124_v4 = vld [vmem:[#allocation4 + $0x9c] sm:$0xff] }
 0x6a3   :  { %v5825_v24 = vadd.f32 %v5815_v12, %v5700_v25  ;;  %v6548_v12 = vshrl.u32 %v15284_v15, 16  ;;  %v6560_v15 = vshll.u32 %v6527_v33, 16 }
 0x6a4   :  { %v7060_v3 = vadd.f32 %v15228_v40, %v7024_v46  ;;  %v5885_v38 = vpop.f32.mrf.mxu3  ;;  %v6632_v46 = vrot.slane %v6527_v33, 1 }
 0x6a5   :  { %v15304_v34 = vadd.f32 %v5885_v38, %v5825_v24  ;;  %v6550_v54 = vor.u32 %v6548_v12, %v6546_v52  ;;  %v6562_v42 = vrot.slane %v6560_v15, 1 }
 0x6a6   :  { %v7092_v35 = vmax.f32 %v7060_v3, 0.0  ;;  %11262 = vmatmul.msk.bf16.gmra.mxu2 %vm2798_vm6, %v6547_v44  ;;  %v6929_v5 = vld [vmem:[#allocation5 + $0xec] sm:$0xff]  ;;  %v12125_v3 = vld [vmem:[#allocation4 + $0xa4] sm:$0xff] }
 0x6a7   :  { %v6961_v60 = vld [vmem:[#allocation5 + $0xed] sm:$0xff]  ;;  %5903 = vst [vmem:[#allocation5 + $0xf8] sm:$0xff] %v15304_v34  ;;  %v6555_v28 = vsel %vm2755_vm7, %v6550_v54, %v6554_v49  ;;  %v6563_v50 = vsel %vm2755_vm7, %v6558_v2, %v6562_v42 }
 0x6a8   :  { %7124 = vst [vmem:[#allocation6 + $0xd8] sm:$0xff] %v7092_v35  ;;  %v6993_v58 = vmax.f32 %v6929_v5, %v6961_v60  ;;  %v6003_v51 = vpop.f32.mrf.mxu1 }
 0x6a9   :  { %v6047_v20 = vadd.f32 %v6046_v29, %v6003_v51  ;;  %v6051_v55 = vpop.f32.mrf.mxu2  ;;  %11271 = vmatmul.msk.bf16.vlgmr.msrb.gmra.mxu3 %vm2798_vm6, %v6627_v32 }
 0x6aa   :  { %v7025_v10 = vmax.f32 %v6897_v14, %v6993_v58 }
 0x6ab   :  { %11239 = vmatmul.msk.bf16.vlgmr.msra.gmra.mxu1 %vm2798_vm6, %v12122_v1 }
 0x6ac   :  { %v7061_v39 = vadd.f32 %v15228_v40, %v7025_v10  ;;  %v6108_v22 = vpop.f32.mrf.mxu3 }
 0x6ad   :  { %v15314_v53 = vadd.f32 %v6108_v22, %v6047_v20 }
 0x6ae   :  { %v7093_v11 = vmax.f32 %v7061_v39, 0.0 }
 0x6b0   :  { %7125 = vst [vmem:[#allocation6 + $0xe0] sm:$0xff] %v7093_v11  ;;  %v6005_v0 = vpop.f32.mrf.mxu1 }
 0x6b1   :  { %v6049_v63 = vadd.f32 %v6048_v36, %v6005_v0  ;;  %v6053_v61 = vpop.f32.mrf.mxu2  ;;  %v6633_v36 = vsel %vm2890_vm10, %v6630_v27, %v6632_v46 }
 0x6b4   :  { %v6110_v37 = vpop.f32.mrf.mxu3 }
 0x6b5   :  { %v15318_v17 = vadd.f32 %v6110_v37, %v6049_v63 }
 0x6b6   :  { %11263 = vmatmul.msk.bf16.gmra.mxu2 %vm2798_vm6, %v6555_v28 }
 0x6b8   :  { %v6008_v29 = vpop.f32.mrf.mxu1 }
 0x6b9   :  { %v6056_v48 = vpop.f32.mrf.mxu2  ;;  %11272 = vmatmul.msk.bf16.gmra.mxu3 %vm2798_vm6, %v6629_v21 }
 0x6bb   :  { %11240 = vmatmul.msk.bf16.gmra.mxu1 %vm2798_vm6, %v12123_v7 }
 0x6bc   :  { %v6113_v56 = vpop.f32.mrf.mxu3 }
 0x6c0   :  { %v6010_v57 = vpop.f32.mrf.mxu1 }
 0x6c1   :  { %v6058_v30 = vpop.f32.mrf.mxu2 }
 0x6c4   :  { %v6115_v9 = vpop.f32.mrf.mxu3 }
 0x6c6   :  { %11264 = vmatmul.msk.bf16.gmra.mxu2 %vm2798_vm6, %v6563_v50 }
 0x6c8   :  { %v6013_v13 = vpop.f32.mrf.mxu1 }
 0x6c9   :  { %v6061_v31 = vpop.f32.mrf.mxu2  ;;  %11273 = vmatmul.msk.bf16.gmra.mxu3 %vm2798_vm6, %v6631_v62 }
 0x6cb   :  { %11241 = vmatmul.msk.bf16.gmra.mxu1 %vm2798_vm6, %v12124_v4 }
 0x6cc   :  { %v6118_v52 = vpop.f32.mrf.mxu3 }
 0x6d0   :  { %v6015_v16 = vpop.f32.mrf.mxu1 }
 0x6d1   :  { %v6063_v19 = vpop.f32.mrf.mxu2 }
 0x6d4   :  { %v6120_v25 = vpop.f32.mrf.mxu3 }
 0x6d8   :  { %v6018_v24 = vpop.f32.mrf.mxu1 }
 0x6d9   :  { %v6311_v44 = vpop.f32.mrf.mxu2  ;;  %11274 = vmatmul.msk.bf16.gmra.mxu3 %vm2798_vm6, %v6633_v36 }
 0x6db   :  { %11242 = vmatmul.msk.bf16.gmra.mxu1 %vm2798_vm6, %v12125_v3 }
 0x6dc   :  { %v6123_v38 = vpop.f32.mrf.mxu3 }
 0x6e0   :  { %v6020_v43 = vpop.f32.mrf.mxu1 }
 0x6e1   :  { %v6313_v41 = vpop.f32.mrf.mxu2 }
 0x6e4   :  { %v6125_v45 = vpop.f32.mrf.mxu3 }
 0x6e8   :  { %v6206_v35 = vpop.f32.mrf.mxu1 }
 0x6e9   :  { %v6316_v5 = vpop.f32.mrf.mxu2  ;;  %v6226_v63 = vadd.f32 %v6206_v35, %v15314_v53  ;;  %v6867_v53 = vld [vmem:[#allocation5 + $0xf1] sm:$0xff] }
 0x6eb   :  { %v6331_v47 = vadd.f32 %v6311_v44, %v6226_v63 }
 0x6ec   :  { %v6381_v60 = vpop.f32.mrf.mxu3 }
 0x6ed   :  { %v6401_v26 = vadd.f32 %v6381_v60, %v6331_v47 }
 0x6f0   :  { %v6208_v23 = vpop.f32.mrf.mxu1 }
 0x6f1   :  { %v6318_v14 = vpop.f32.mrf.mxu2  ;;  %v6227_v37 = vadd.f32 %v6208_v23, %v15318_v17  ;;  %v6899_v17 = vmax.f32 %v15294_v59, %v6867_v53  ;;  %v12352_v23 = vmov 0.0  }
 0x6f2   :  { %6701 = vst [vmem:[#allocation6 + $0x120] sm:$0xff] %v12352_v23 }
 0x6f3   :  { %v6332_v29 = vadd.f32 %v6313_v41, %v6227_v37  ;;  %6702 = vst [vmem:[#allocation6 + $0x128] sm:$0xff] %v12352_v23 }
 0x6f4   :  { %v6383_v58 = vpop.f32.mrf.mxu3  ;;  %6704 = vst [vmem:[#allocation6 + $0x138] sm:$0xff] %v12352_v23 }
 0x6f5   :  { %v6402_v56 = vadd.f32 %v6383_v58, %v6332_v29  ;;  %6705 = vst [vmem:[#allocation6 + $0x140] sm:$0xff] %v12352_v23 }
 0x6f6   :  { %6707 = vst [vmem:[#allocation6 + $0x150] sm:$0xff] %v12352_v23 }
 0x6f7   :  { %6708 = vst [vmem:[#allocation6 + $0x158] sm:$0xff] %v12352_v23 }
 0x6f8   :  { %v6211_v51 = vpop.f32.mrf.mxu1  ;;  %6710 = vst [vmem:[#allocation6 + $0x168] sm:$0xff] %v12352_v23 }
 0x6f9   :  { %v6321_v32 = vpop.f32.mrf.mxu2  ;;  %6711 = vst [vmem:[#allocation6 + $0x170] sm:$0xff] %v12352_v23 }
 0x6fa   :  { %6713 = vst [vmem:[#allocation6 + $0x180] sm:$0xff] %v12352_v23 }
 0x6fb   :  { %6714 = vst [vmem:[#allocation6 + $0x188] sm:$0xff] %v12352_v23 }
 0x6fc   :  { %v6386_v20 = vpop.f32.mrf.mxu3  ;;  %6719 = vst [vmem:[#allocation6 + $0x1b0] sm:$0xff] %v12352_v23 }
 0x6fd   :  { %6720 = vst [vmem:[#allocation6 + $0x1b8] sm:$0xff] %v12352_v23 }
 0x6fe   :  { %6722 = vst [vmem:[#allocation6 + $0x1c8] sm:$0xff] %v12352_v23 }
 0x6ff   :  { %6723 = vst [vmem:[#allocation6 + $0x1d0] sm:$0xff] %v12352_v23 }
 0x700   :  { %v6213_v55 = vpop.f32.mrf.mxu1  ;;  %6725 = vst [vmem:[#allocation6 + $0x1e0] sm:$0xff] %v12352_v23 }
 0x701   :  { %v6323_v1 = vpop.f32.mrf.mxu2  ;;  %6726 = vst [vmem:[#allocation6 + $0x1e8] sm:$0xff] %v12352_v23 }
 0x702   :  { %6728 = vst [vmem:[#allocation6 + $0x1f8] sm:$0xff] %v12352_v23 }
 0x703   :  { %6729 = vst [vmem:[#allocation6 + $0x200] sm:$0xff] %v12352_v23 }
 0x704   :  { %v6388_v10 = vpop.f32.mrf.mxu3  ;;  %6731 = vst [vmem:[#allocation6 + $0x210] sm:$0xff] %v12352_v23 }
 0x705   :  { %6732 = vst [vmem:[#allocation6 + $0x218] sm:$0xff] %v12352_v23 }
 0x706   :  { %6737 = vst [vmem:[#allocation6 + $0x240] sm:$0xff] %v12352_v23 }
 0x707   :  { %6738 = vst [vmem:[#allocation6 + $0x248] sm:$0xff] %v12352_v23 }
 0x708   :  { %v6216_v12 = vpop.f32.mrf.mxu1  ;;  %6740 = vst [vmem:[#allocation6 + $0x258] sm:$0xff] %v12352_v23 }
 0x709   :  { %v6326_v8 = vpop.f32.mrf.mxu2  ;;  %6741 = vst [vmem:[#allocation6 + $0x260] sm:$0xff] %v12352_v23 }
 0x70a   :  { %6743 = vst [vmem:[#allocation6 + $0x270] sm:$0xff] %v12352_v23 }
 0x70b   :  { %6744 = vst [vmem:[#allocation6 + $0x278] sm:$0xff] %v12352_v23 }
 0x70c   :  { %v6391_v39 = vpop.f32.mrf.mxu3  ;;  %6746 = vst [vmem:[#allocation6 + $0x288] sm:$0xff] %v12352_v23 }
 0x70d   :  { %6747 = vst [vmem:[#allocation6 + $0x290] sm:$0xff] %v12352_v23 }
 0x70e   :  { %6749 = vst [vmem:[#allocation6 + $0x2a0] sm:$0xff] %v12352_v23 }
 0x70f   :  { %6750 = vst [vmem:[#allocation6 + $0x2a8] sm:$0xff] %v12352_v23 }
 0x710   :  { %v6218_v22 = vpop.f32.mrf.mxu1  ;;  %6755 = vst [vmem:[#allocation6 + $0x2d0] sm:$0xff] %v12352_v23 }
 0x711   :  { %v6328_v11 = vpop.f32.mrf.mxu2  ;;  %6756 = vst [vmem:[#allocation6 + $0x2d8] sm:$0xff] %v12352_v23 }
 0x712   :  { %6758 = vst [vmem:[#allocation6 + $0x2e8] sm:$0xff] %v12352_v23 }
 0x713   :  { %6759 = vst [vmem:[#allocation6 + $0x2f0] sm:$0xff] %v12352_v23 }
 0x714   :  { %v6393_v54 = vpop.f32.mrf.mxu3  ;;  %6761 = vst [vmem:[#allocation6 + $0x300] sm:$0xff] %v12352_v23 }
 0x715   :  { %6762 = vst [vmem:[#allocation6 + $0x308] sm:$0xff] %v12352_v23 }
 0x716   :  { %6764 = vst [vmem:[#allocation6 + $0x318] sm:$0xff] %v12352_v23 }
 0x717   :  { %6765 = vst [vmem:[#allocation6 + $0x320] sm:$0xff] %v12352_v23 }
 0x718   :  { %v6221_v49 = vpop.f32.mrf.mxu1  ;;  %6767 = vst [vmem:[#allocation6 + $0x330] sm:$0xff] %v12352_v23 }
 0x719   :  { %v6591_v18 = vpop.f32.mrf.mxu2  ;;  %6768 = vst [vmem:[#allocation6 + $0x338] sm:$0xff] %v12352_v23 }
 0x71a   :  { %6773 = vst [vmem:[#allocation6 + $0x360] sm:$0xff] %v12352_v23 }
 0x71b   :  { %6774 = vst [vmem:[#allocation6 + $0x368] sm:$0xff] %v12352_v23 }
 0x71c   :  { %v6396_v0 = vpop.f32.mrf.mxu3  ;;  %6776 = vst [vmem:[#allocation6 + $0x378] sm:$0xff] %v12352_v23 }
 0x71d   :  { %6777 = vst [vmem:[#allocation6 + $0x380] sm:$0xff] %v12352_v23 }
 0x71e   :  { %6779 = vst [vmem:[#allocation6 + $0x390] sm:$0xff] %v12352_v23 }
 0x71f   :  { %6780 = vst [vmem:[#allocation6 + $0x398] sm:$0xff] %v12352_v23 }
 0x720   :  { %v6223_v61 = vpop.f32.mrf.mxu1  ;;  %6782 = vst [vmem:[#allocation6 + $0x3a8] sm:$0xff] %v12352_v23 }
 0x721   :  { %v6593_v21 = vpop.f32.mrf.mxu2  ;;  %6783 = vst [vmem:[#allocation6 + $0x3b0] sm:$0xff] %v12352_v23 }
 0x722   :  { %6785 = vst [vmem:[#allocation6 + $0x3c0] sm:$0xff] %v12352_v23 }
 0x723   :  { %6786 = vst [vmem:[#allocation6 + $0x3c8] sm:$0xff] %v12352_v23 }
 0x724   :  { %v6398_v28 = vpop.f32.mrf.mxu3  ;;  %6791 = vst [vmem:[#allocation6 + $0x3f0] sm:$0xff] %v12352_v23 }
 0x725   :  { %6792 = vst [vmem:[#allocation6 + $0x3f8] sm:$0xff] %v12352_v23 }
 0x726   :  { %6794 = vst [vmem:[#allocation6 + $0x408] sm:$0xff] %v12352_v23 }
 0x727   :  { %6795 = vst [vmem:[#allocation6 + $0x410] sm:$0xff] %v12352_v23 }
 0x728   :  { %v6466_v7 = vpop.f32.mrf.mxu1  ;;  %6797 = vst [vmem:[#allocation6 + $0x420] sm:$0xff] %v12352_v23 }
 0x729   :  { %v6486_v33 = vadd.f32 %v6466_v7, %v6401_v26  ;;  %v6596_v42 = vpop.f32.mrf.mxu2  ;;  %6798 = vst [vmem:[#allocation6 + $0x428] sm:$0xff] %v12352_v23 }
 0x72a   :  { %6800 = vst [vmem:[#allocation6 + $0x438] sm:$0xff] %v12352_v23 }
 0x72b   :  { %v6611_v48 = vadd.f32 %v6591_v18, %v6486_v33  ;;  %6801 = vst [vmem:[#allocation6 + $0x440] sm:$0xff] %v12352_v23 }
 0x72c   :  { %v6661_v6 = vpop.f32.mrf.mxu3  ;;  %6803 = vst [vmem:[#allocation6 + $0x450] sm:$0xff] %v12352_v23 }
 0x72d   :  { %v6681_v15 = vadd.f32 %v6661_v6, %v6611_v48  ;;  %6804 = vst [vmem:[#allocation6 + $0x458] sm:$0xff] %v12352_v23 }
 0x72f   :  { %6689 = vst [vmem:[#allocation5 + $0x100] sm:$0xff] %v6681_v15 }
 0x730   :  { %v6468_v2 = vpop.f32.mrf.mxu1 }
 0x731   :  { %v6487_v57 = vadd.f32 %v6468_v2, %v6402_v56  ;;  %v6598_v52 = vpop.f32.mrf.mxu2 }
 0x733   :  { %v6612_v30 = vadd.f32 %v6593_v21, %v6487_v57 }
 0x734   :  { %v6663_v27 = vpop.f32.mrf.mxu3 }
 0x735   :  { %v6682_v50 = vadd.f32 %v6663_v27, %v6612_v30 }
 0x736   :  { %v6931_v9 = vld [vmem:[#allocation5 + $0xfc] sm:$0xff] }
 0x737   :  { %v6963_v62 = vld [vmem:[#allocation5 + $0xfd] sm:$0xff]  ;;  %6690 = vst [vmem:[#allocation5 + $0x108] sm:$0xff] %v6682_v50 }
 0x738   :  { %v6995_v4 = vmax.f32 %v6931_v9, %v6963_v62  ;;  %v6471_v13 = vpop.f32.mrf.mxu1  ;;  %v6868_v19 = vld [vmem:[#allocation5 + $0xf9] sm:$0xff] }
 0x739   :  { %v6900_v24 = vmax.f32 %v15304_v34, %v6868_v19  ;;  %v6601_v41 = vpop.f32.mrf.mxu2 }
 0x73a   :  { %v7027_v31 = vmax.f32 %v6899_v17, %v6995_v4 }
 0x73c   :  { %v7063_v16 = vadd.f32 %v15228_v40, %v7027_v31  ;;  %v6666_v46 = vpop.f32.mrf.mxu3 }
 0x73e   :  { %v7095_v25 = vmax.f32 %v7063_v16, 0.0  ;;  %v6932_v36 = vld [vmem:[#allocation5 + $0x104] sm:$0xff] }
 0x73f   :  { %v6964_v3 = vld [vmem:[#allocation5 + $0x105] sm:$0xff] }
 0x740   :  { %7127 = vst [vmem:[#allocation6 + $0xf0] sm:$0xff] %v7095_v25  ;;  %v6996_v44 = vmax.f32 %v6932_v36, %v6964_v3  ;;  %v6473_v38 = vpop.f32.mrf.mxu1 }
 0x741   :  { %v6603_v14 = vpop.f32.mrf.mxu2 }
 0x742   :  { %v7028_v43 = vmax.f32 %v6900_v24, %v6996_v44 }
 0x744   :  { %v7064_v59 = vadd.f32 %v15228_v40, %v7028_v43  ;;  %v6668_v45 = vpop.f32.mrf.mxu3 }
 0x746   :  { %v7096_v35 = vmax.f32 %v7064_v59, 0.0 }
 0x748   :  { %7128 = vst [vmem:[#allocation6 + $0xf8] sm:$0xff] %v7096_v35  ;;  %v6476_v5 = vpop.f32.mrf.mxu1 }
 0x749   :  { %v6606_v40 = vpop.f32.mrf.mxu2 }
 0x74c   :  { %v6671_v60 = vpop.f32.mrf.mxu3 }
 0x750   :  { %v6478_v58 = vpop.f32.mrf.mxu1 }
 0x751   :  { %v6608_v55 = vpop.f32.mrf.mxu2 }
 0x754   :  { %v6673_v34 = vpop.f32.mrf.mxu3 }
 0x758   :  { %v6481_v51 = vpop.f32.mrf.mxu1 }
 0x75c   :  { %v6676_v32 = vpop.f32.mrf.mxu3 }
 0x760   :  { %v6483_v20 = vpop.f32.mrf.mxu1 }
 0x764   :  { %v6678_v1 = vpop.f32.mrf.mxu3 }
 0x765   :  { %12340 = dma.done.wait [#allocation11], 12288 }
 0x766   :  { %12341 = vsyncadd [#allocation11], 4294955008  ;;  %v7160_v10 = vld [vmem:[#allocation7 + $0x30] sm:$0xff]  ;;  %v7161_v12 = vld [vmem:[#allocation7 + $0x38] sm:$0xf]  ;;  %vm7195_vm12 = vcmask 162816  }
 0x767   :  { %v11277_v8 = vld [vmem:[#allocation7 + $0x18] sm:$0xc]  ;;  %v7174_v39 = vunpack.c.l.b16 %v7160_v10  ;;  %v7175_v22 = vunpack.c.h.b16 %v7160_v10  ;;  %v7176_v11 = vunpack.c.l.b16 %v7161_v12  ;;  %v12136_v54 = vld [vmem:[#allocation7 + $0x20] sm:$0xf0]  ;;  %v12135_v49 = vld [vmem:[#allocation7 + $0x1c] sm:$0xc] }
 0x768   :  { %v11279_v0 = vld [vmem:[#allocation7 + $0x24] sm:$0xf0]  ;;  %v11278_v18 = vor.u32 %v12136_v54, %v11277_v8  ;;  %v11285_v61 = vld [vmem:[#allocation7 + $0x20] sm:$0xc]  ;;  %v12137_v47 = vld [vmem:[#allocation7 + $0x28] sm:$0xf0] }
 0x769   :  { %v11282_v63 = vor.u32 %v12135_v49, %v11279_v0  ;;  %v7145_v28 = vld [vmem:[#allocation7 + $0x18] sm:$0x33]  ;;  %v7180_v26 = vpack.c.b16 %v7174_v39, %v7174_v39  ;;  %v7181_v37 = vpack.c.b16 %v7175_v22, %v7175_v22  ;;  %v7182_v21 = vpack.c.b16 %v7176_v11, %v7176_v11  ;;  %v7148_v33 = vld [vmem:[#allocation6 + $0x2] ss:$144 sm:$0x3] }
 0x76a   :  { %v11286_v7 = vor.u32 %v12137_v47, %v11285_v61  ;;  %v7149_v29 = vld [vmem:[#allocation6 + $0x2] ss:$144 sm:$0xc]  ;;  %v7183_v48 = vrot.slane %v11278_v18, 2  ;;  %v7260_v56 = vunpack.c.l.b16 %v7145_v28  ;;  %v7261_v62 = vunpack.c.h.b16 %v7145_v28  ;;  %v7146_v31 = vld [vmem:[#allocation7 + $0x20] sm:$0x3] }
 0x76b   :  { %v7150_v6 = vor.u32 %v7149_v29, %v7148_v33  ;;  %v7151_v15 = vld [vmem:[#allocation6 + $0x2] ss:$144 sm:$0x30]  ;;  %v7184_v2 = vrot.slane %v7180_v26, 2  ;;  %v7187_v42 = vrot.slane %v7181_v37, 2  ;;  %v7190_v57 = vrot.slane %v7182_v21, 2 }
 0x76c   :  { %v7186_v30 = vrot.slane %v11282_v63, 2  ;;  %v7189_v53 = vrot.slane %v11286_v7, 2  ;;  %v7153_v50 = vld [vmem:[#allocation6 + $0x2] ss:$144 sm:$0xc0]  ;;  %v7266_v9 = vpack.c.b16 %v7260_v56, %v7260_v56  ;;  %v7267_v36 = vpack.c.b16 %v7261_v62, %v7261_v62 }
 0x76d   :  { %v7152_v27 = vor.u32 %v7151_v15, %v7150_v6  ;;  %v7201_v17 = vsel %vm2346_vm3, %v7184_v2, 0  ;;  %v7204_v4 = vsel %vm2346_vm3, %v7187_v42, 0  ;;  %v7207_v13 = vsel %vm2346_vm3, %v7190_v57, 0  ;;  %v11292_v46 = vld [vmem:[#allocation7] sm:$0xf]  ;;  %v7429_v28 = vld [vmem:[#allocation7 + $0x6c] sm:$0xff] }
 0x76e   :  { %7215 = vmatpush.bf16.msrb.mxu1 %v7201_v17  ;;  %7228 = vmatpush.bf16.msrb.mxu2 %v7204_v4  ;;  %v7185_v16 = vsel %vm2990_vm8, %v7183_v48, %v7184_v2  ;;  %v7188_v19 = vsel %vm2990_vm8, %v7186_v30, %v7187_v42  ;;  %v12133_v25 = vld [vmem:[#allocation7 + $0x8] sm:$0xf0]  ;;  %v7262_v3 = vunpack.c.l.b16 %v7146_v31  ;;  %v7336_v24 = vld [vmem:[#allocation7 + $0x54] sm:$0x33]  ;;  %v7191_v44 = vsel %vm2990_vm8, %v7189_v53, %v7190_v57  ;;  %v12132_v43 = vld [vmem:[#allocation7 + $0x4] sm:$0xf] }
 0x76f   :  { %v7154_v52 = vor.u32 %v7153_v50, %v7152_v27  ;;  %7241 = vmatpush.bf16.msra.mxu3 %v7207_v13  ;;  %v7276_v38 = vsel %vm2346_vm3, %v7266_v9, 0  ;;  %v11294_v59 = vld [vmem:[#allocation7 + $0xc] sm:$0xf0]  ;;  %v7350_v41 = vunpack.c.l.b16 %v7336_v24  ;;  %v7351_v45 = vunpack.c.h.b16 %v7336_v24  ;;  %v11300_v23 = vld [vmem:[#allocation7 + $0x8] sm:$0xf] }
 0x770   :  { %v7279_v5 = vsel %vm2346_vm3, %v7267_v36, 0  ;;  %v7268_v60 = vpack.c.b16 %v7262_v3, %v7262_v3  ;;  %v12134_v14 = vld [vmem:[#allocation7 + $0x10] sm:$0xf0]  ;;  %v7133_v58 = vld [vmem:[#allocation6] ss:$144 sm:$0x3]  ;;  %v11293_v32 = vor.u32 %v12133_v25, %v11292_v46  ;;  %v11297_v1 = vor.u32 %v12132_v43, %v11294_v59 }
 0x771   :  { %v7155_v35 = vpack.c.bf16 %v7154_v52, %v7154_v52  ;;  %v7134_v34 = vld [vmem:[#allocation6] ss:$144 sm:$0xc]  ;;  %v7356_v40 = vpack.c.b16 %v7350_v41, %v7350_v41  ;;  %v7357_v51 = vpack.c.b16 %v7351_v45, %v7351_v45  ;;  %v7337_v55 = vld [vmem:[#allocation7 + $0x5c] sm:$0x3]  ;;  %v11301_v10 = vor.u32 %v12134_v14, %v11300_v23 }
 0x772   :  { %7216 = vmatpush.bf16.msrb.mxu1 %v7185_v16  ;;  %7229 = vmatpush.bf16.msrb.mxu2 %v7188_v19  ;;  %v7282_v20 = vsel %vm2346_vm3, %v7268_v60, 0  ;;  %v7136_v12 = vld [vmem:[#allocation6] ss:$144 sm:$0x30]  ;;  %v7352_v8 = vunpack.c.l.b16 %v7337_v55  ;;  %v7135_v39 = vor.u32 %v7134_v34, %v7133_v58  ;;  %v11307_v22 = vld [vmem:[#allocation7 + $0x3c] sm:$0xf]  ;;  %v7443_v37 = vunpack.c.l.b16 %v7429_v28 }
 0x773   :  { %7242 = vmatpush.bf16.msra.mxu3 %v7191_v44  ;;  %v12139_v11 = vld [vmem:[#allocation7 + $0x44] sm:$0xf0]  ;;  %v7366_v54 = vsel %vm2346_vm3, %v7356_v40, 0  ;;  %v7369_v49 = vsel %vm2346_vm3, %v7357_v51, 0  ;;  %v12138_v18 = vld [vmem:[#allocation7 + $0x40] sm:$0xf]  ;;  %v7444_v21 = vunpack.c.h.b16 %v7429_v28 }
 0x774   :  { %v7358_v0 = vpack.c.b16 %v7352_v8, %v7352_v8  ;;  %v11309_v63 = vld [vmem:[#allocation7 + $0x48] sm:$0xf0]  ;;  %v11315_v61 = vld [vmem:[#allocation7 + $0x44] sm:$0xf]  ;;  %v12140_v47 = vld [vmem:[#allocation7 + $0x4c] sm:$0xf0]  ;;  %v7137_v33 = vor.u32 %v7136_v12, %v7135_v39  ;;  %v11308_v29 = vor.u32 %v12139_v11, %v11307_v22  ;;  %v7449_v2 = vpack.c.b16 %v7443_v37, %v7443_v37 }
 0x775   :  { %11287 = vmatmul.msk.bf16.vlgmr.msrb.gmra.mxu1 %vm7195_vm12, %v7155_v35  ;;  %11288 = vmatmul.msk.bf16.vlgmr.msrb.gmra.mxu2 %vm7195_vm12, %v7155_v35  ;;  %v7430_v7 = vld [vmem:[#allocation7 + $0x74] sm:$0xf]  ;;  %v11312_v48 = vor.u32 %v12138_v18, %v11309_v63  ;;  %v7138_v15 = vld [vmem:[#allocation6] ss:$144 sm:$0xc0]  ;;  %v11316_v56 = vor.u32 %v12140_v47, %v11315_v61  ;;  %v7450_v30 = vpack.c.b16 %v7444_v21, %v7444_v21  ;;  %v7624_v21 = vld [vmem:[#allocation7 + $0xa8] sm:$0xff] }
 0x776   :  { %7290 = vmatpush.bf16.msra.mxu1 %v7276_v38  ;;  %7303 = vmatpush.bf16.msra.mxu2 %v7279_v5  ;;  %v7372_v26 = vsel %vm2346_vm3, %v7358_v0, 0  ;;  %v7445_v6 = vunpack.c.l.b16 %v7430_v7  ;;  %v11322_v42 = vld [vmem:[#allocation7 + $0x54] sm:$0xc]  ;;  %v12142_v57 = vld [vmem:[#allocation7 + $0x5c] sm:$0xf0]  ;;  %v7139_v50 = vor.u32 %v7138_v15, %v7137_v33  ;;  %v7453_v4 = vrot.slane %v7449_v2, 2 }
 0x777   :  { %7316 = vmatpush.bf16.msrb.mxu3 %v7282_v20  ;;  %v12141_v27 = vld [vmem:[#allocation7 + $0x58] sm:$0xc]  ;;  %v11324_v9 = vld [vmem:[#allocation7 + $0x60] sm:$0xf0]  ;;  %v11330_v62 = vld [vmem:[#allocation7 + $0x5c] sm:$0xc]  ;;  %v11323_v13 = vor.u32 %v12142_v57, %v11322_v42 }
 0x778   :  { %11289 = vmatmul.msk.bf16.vlgmr.msra.gmra.mxu3 %vm7195_vm12, %v7155_v35  ;;  %v7451_v53 = vpack.c.b16 %v7445_v6, %v7445_v6  ;;  %v12143_v17 = vld [vmem:[#allocation7 + $0x64] sm:$0xf0]  ;;  %v7456_v31 = vrot.slane %v7450_v30, 2  ;;  %v11327_v16 = vor.u32 %v12141_v27, %v11324_v9  ;;  %v7140_v46 = vpack.c.bf16 %v7139_v50, %v7139_v50  ;;  %v7324_v25 = vld [vmem:[#allocation6 + $0x4] ss:$144 sm:$0x3] }
 0x779   :  { %v11331_v19 = vor.u32 %v12143_v17, %v11330_v62  ;;  %v7325_v36 = vld [vmem:[#allocation6 + $0x4] ss:$144 sm:$0xc]  ;;  %v7468_v3 = vsel %vm2346_vm3, %v7453_v4, 0  ;;  %v7452_v24 = vrot.slane %v11323_v13, 2  ;;  %v7639_v6 = vunpack.c.h.b16 %v7624_v21 }
 0x77a   :  { %7291 = vmatpush.bf16.msra.mxu1 %v11293_v32  ;;  %7304 = vmatpush.bf16.msra.mxu2 %v11297_v1  ;;  %v7459_v52 = vrot.slane %v7451_v53, 2  ;;  %v7471_v44 = vsel %vm2346_vm3, %v7456_v31, 0  ;;  %v7455_v43 = vrot.slane %v11327_v16, 2  ;;  %v7326_v41 = vor.u32 %v7325_v36, %v7324_v25  ;;  %v7327_v45 = vld [vmem:[#allocation6 + $0x4] ss:$144 sm:$0x30] }
 0x77b   :  { %7317 = vmatpush.bf16.msrb.mxu3 %v11301_v10  ;;  %v7458_v59 = vrot.slane %v11331_v19, 2  ;;  %v7454_v35 = vsel %vm2990_vm8, %v7452_v24, %v7453_v4  ;;  %v7531_v23 = vld [vmem:[#allocation7 + $0x90] sm:$0x33]  ;;  %v7532_v58 = vld [vmem:[#allocation7 + $0x98] sm:$0x3]  ;;  %v7645_v53 = vpack.c.b16 %v7639_v6, %v7639_v6 }
 0x77c   :  { %v7474_v38 = vsel %vm2346_vm3, %v7459_v52, 0  ;;  %v7457_v5 = vsel %vm2990_vm8, %v7455_v43, %v7456_v31  ;;  %v7328_v14 = vor.u32 %v7327_v45, %v7326_v41  ;;  %v7329_v34 = vld [vmem:[#allocation6 + $0x4] ss:$144 sm:$0xc0]  ;;  %v7545_v40 = vunpack.c.l.b16 %v7531_v23  ;;  %v11337_v22 = vld [vmem:[#allocation7 + $0x78] sm:$0xf] }
 0x77d   :  { %v7460_v60 = vsel %vm2990_vm8, %v7458_v59, %v7459_v52  ;;  %v7546_v51 = vunpack.c.h.b16 %v7531_v23  ;;  %v7547_v32 = vunpack.c.l.b16 %v7532_v58  ;;  %v7417_v8 = vld [vmem:[#allocation6 + $0x6] ss:$144 sm:$0x3]  ;;  %v11339_v0 = vld [vmem:[#allocation7 + $0x84] sm:$0xf0]  ;;  %v7651_v52 = vrot.slane %v7645_v53, 2 }
 0x77e   :  { %7380 = vmatpush.bf16.msrb.mxu1 %v7366_v54  ;;  %7393 = vmatpush.bf16.msrb.mxu2 %v7369_v49  ;;  %v7330_v20 = vor.u32 %v7329_v34, %v7328_v14  ;;  %v7551_v55 = vpack.c.b16 %v7545_v40, %v7545_v40  ;;  %v7418_v39 = vld [vmem:[#allocation6 + $0x6] ss:$144 sm:$0xc]  ;;  %v12144_v49 = vld [vmem:[#allocation7 + $0x7c] sm:$0xf] }
 0x77f   :  { %7406 = vmatpush.bf16.msra.mxu3 %v7372_v26  ;;  %v7552_v1 = vpack.c.b16 %v7546_v51, %v7546_v51  ;;  %v7553_v10 = vpack.c.b16 %v7547_v32, %v7547_v32  ;;  %v12145_v11 = vld [vmem:[#allocation7 + $0x80] sm:$0xf0]  ;;  %v11345_v61 = vld [vmem:[#allocation7 + $0x80] sm:$0xf]  ;;  %v12146_v47 = vld [vmem:[#allocation7 + $0x88] sm:$0xf0]  ;;  %v7419_v28 = vor.u32 %v7418_v39, %v7417_v8  ;;  %v11342_v7 = vor.u32 %v12144_v49, %v11339_v0 }
 0x780   :  { %v7331_v12 = vpack.c.bf16 %v7330_v20, %v7330_v20  ;;  %v7561_v54 = vsel %vm2346_vm3, %v7551_v55, 0  ;;  %v7420_v26 = vld [vmem:[#allocation6 + $0x6] ss:$144 sm:$0x30]  ;;  %v11338_v37 = vor.u32 %v12145_v11, %v11337_v22  ;;  %v11346_v33 = vor.u32 %v12146_v47, %v11345_v61  ;;  %v11352_v57 = vld [vmem:[#allocation7 + $0x90] sm:$0xc] }
 0x781   :  { %v7564_v18 = vsel %vm2346_vm3, %v7552_v1, 0  ;;  %v7567_v63 = vsel %vm2346_vm3, %v7553_v10, 0  ;;  %v7422_v2 = vld [vmem:[#allocation6 + $0x6] ss:$144 sm:$0xc0] }
 0x782   :  { %7381 = vmatpush.bf16.msrb.mxu1 %v11308_v29  ;;  %7394 = vmatpush.bf16.msrb.mxu2 %v11312_v48  ;;  %v7638_v29 = vunpack.c.l.b16 %v7624_v21  ;;  %v7625_v48 = vld [vmem:[#allocation7 + $0xb0] sm:$0xf]  ;;  %v12148_v30 = vld [vmem:[#allocation7 + $0x98] sm:$0xf0]  ;;  %v12147_v50 = vld [vmem:[#allocation7 + $0x94] sm:$0xc] }
 0x783   :  { %7407 = vmatpush.bf16.msra.mxu3 %v11316_v56  ;;  %v7640_v15 = vunpack.c.l.b16 %v7625_v48  ;;  %v7421_v56 = vor.u32 %v7420_v26, %v7419_v28  ;;  %v11354_v62 = vld [vmem:[#allocation7 + $0x9c] sm:$0xf0]  ;;  %v11360_v17 = vld [vmem:[#allocation7 + $0x98] sm:$0xc]  ;;  %v12149_v4 = vld [vmem:[#allocation7 + $0xa0] sm:$0xf0]  ;;  %v11353_v31 = vor.u32 %v12148_v30, %v11352_v57 }
 0x784   :  { %v7644_v42 = vpack.c.b16 %v7638_v29, %v7638_v29  ;;  %v11357_v19 = vor.u32 %v12147_v50, %v11354_v62  ;;  %v7519_v36 = vld [vmem:[#allocation6 + $0x8] ss:$144 sm:$0x3]  ;;  %v7726_v14 = vld [vmem:[#allocation7 + $0xcc] sm:$0x33] }
 0x785   :  { %11302 = vmatmul.msk.bf16.vlgmr.msra.gmra.mxu1 %vm7195_vm12, %v7140_v46  ;;  %11303 = vmatmul.msk.bf16.vlgmr.msra.gmra.mxu2 %vm7195_vm12, %v7140_v46  ;;  %v7646_v27 = vpack.c.b16 %v7640_v15, %v7640_v15  ;;  %v7423_v9 = vor.u32 %v7422_v2, %v7421_v56  ;;  %v7727_v34 = vld [vmem:[#allocation7 + $0xd4] sm:$0x3]  ;;  %v7524_v40 = vld [vmem:[#allocation6 + $0x8] ss:$144 sm:$0xc0]  ;;  %v7740_v51 = vunpack.c.l.b16 %v7726_v14  ;;  %v7741_v32 = vunpack.c.h.b16 %v7726_v14 }
 0x786   :  { %7482 = vmatpush.bf16.msra.mxu1 %v7468_v3  ;;  %7495 = vmatpush.bf16.msra.mxu2 %v7471_v44  ;;  %v7648_v13 = vrot.slane %v7644_v42, 2  ;;  %v7520_v3 = vld [vmem:[#allocation6 + $0x8] ss:$144 sm:$0xc]  ;;  %v7647_v44 = vrot.slane %v11353_v31, 2  ;;  %v7650_v59 = vrot.slane %v11357_v19, 2  ;;  %v7742_v20 = vunpack.c.l.b16 %v7727_v34 }
 0x787   :  { %v7654_v16 = vrot.slane %v7646_v27, 2  ;;  %v7424_v25 = vpack.c.bf16 %v7423_v9, %v7423_v9  ;;  %v7521_v45 = vor.u32 %v7520_v3, %v7519_v36  ;;  %v7746_v1 = vpack.c.b16 %v7740_v51, %v7740_v51  ;;  %v7612_v39 = vld [vmem:[#allocation6 + $0x18] ss:$144 sm:$0x3]  ;;  %v11367_v11 = vld [vmem:[#allocation7 + $0xb4] sm:$0xf] }
 0x788   :  { %11304 = vmatmul.msk.bf16.vlgmr.msrb.gmra.mxu3 %vm7195_vm12, %v7140_v46  ;;  %v11361_v46 = vor.u32 %v12149_v4, %v11360_v17  ;;  %v7663_v24 = vsel %vm2346_vm3, %v7648_v13, 0  ;;  %v7747_v10 = vpack.c.b16 %v7741_v32, %v7741_v32  ;;  %v7613_v22 = vld [vmem:[#allocation6 + $0x18] ss:$144 sm:$0xc]  ;;  %v11375_v47 = vld [vmem:[#allocation7 + $0xbc] sm:$0xf] }
 0x789   :  { %7508 = vmatpush.bf16.msrb.mxu3 %v7474_v38  ;;  %v7666_v38 = vsel %vm2346_vm3, %v7651_v52, 0  ;;  %v7669_v43 = vsel %vm2346_vm3, %v7654_v16, 0  ;;  %v7756_v49 = vsel %vm2346_vm3, %v7746_v1, 0  ;;  %v12150_v0 = vld [vmem:[#allocation7 + $0xb8] sm:$0xf]  ;;  %v7614_v26 = vor.u32 %v7613_v22, %v7612_v39 }
 0x78a   :  { %7483 = vmatpush.bf16.msra.mxu1 %v7454_v35  ;;  %7496 = vmatpush.bf16.msra.mxu2 %v7457_v5  ;;  %v7653_v41 = vrot.slane %v11361_v46, 2  ;;  %v7522_v35 = vld [vmem:[#allocation6 + $0x8] ss:$144 sm:$0x30]  ;;  %v7649_v5 = vsel %vm2990_vm8, %v7647_v44, %v7648_v13  ;;  %v7820_v6 = vld [vmem:[#allocation7 + $0xec] sm:$0xf] }
 0x78b   :  { %v7523_v58 = vor.u32 %v7522_v35, %v7521_v45  ;;  %v12152_v28 = vld [vmem:[#allocation7 + $0xc4] sm:$0xf0]  ;;  %v7835_v56 = vunpack.c.l.b16 %v7820_v6  ;;  %v11382_v30 = vld [vmem:[#allocation7 + $0xcc] sm:$0xc]  ;;  %v12154_v53 = vld [vmem:[#allocation7 + $0xd4] sm:$0xf0] }
 0x78c   :  { %v7655_v23 = vsel %vm2990_vm8, %v7653_v41, %v7654_v16  ;;  %v11376_v29 = vor.u32 %v12152_v28, %v11375_v47  ;;  %v7617_v42 = vld [vmem:[#allocation6 + $0x18] ss:$144 sm:$0xc0]  ;;  %v12153_v9 = vld [vmem:[#allocation7 + $0xd0] sm:$0xc] }
 0x78d   :  { %7509 = vmatpush.bf16.msrb.mxu3 %v7460_v60  ;;  %v7652_v60 = vsel %vm2990_vm8, %v7650_v59, %v7651_v52  ;;  %v7525_v55 = vor.u32 %v7524_v40, %v7523_v58  ;;  %v7841_v50 = vpack.c.b16 %v7835_v56, %v7835_v56  ;;  %v11384_v17 = vld [vmem:[#allocation7 + $0xd8] sm:$0xf0]  ;;  %v11390_v4 = vld [vmem:[#allocation7 + $0xd4] sm:$0xc]  ;;  %v12155_v13 = vld [vmem:[#allocation7 + $0xdc] sm:$0xf0]  ;;  %v11383_v52 = vor.u32 %v12154_v53, %v11382_v30 }
 0x78e   :  { %v11387_v46 = vor.u32 %v12153_v9, %v11384_v17  ;;  %v7714_v3 = vld [vmem:[#allocation6 + $0x1a] ss:$144 sm:$0x3]  ;;  %v7921_v58 = vld [vmem:[#allocation7 + $0x108] sm:$0x33] }
 0x78f   :  { %v7526_v8 = vpack.c.bf16 %v7525_v55, %v7525_v55  ;;  %v7849_v19 = vrot.slane %v7841_v50, 2  ;;  %v7922_v34 = vld [vmem:[#allocation7 + $0x110] sm:$0x3]  ;;  %v7719_v51 = vld [vmem:[#allocation6 + $0x1a] ss:$144 sm:$0xc0]  ;;  %v7935_v32 = vunpack.c.l.b16 %v7921_v58 }
 0x790   :  { %v7845_v41 = vrot.slane %v11387_v46, 2  ;;  %v7937_v55 = vunpack.c.l.b16 %v7922_v34  ;;  %v7807_v22 = vld [vmem:[#allocation6 + $0x1c] ss:$144 sm:$0x3]  ;;  %v11399_v47 = vld [vmem:[#allocation7 + $0xfc] sm:$0xf0] }
 0x791   :  { %v7864_v59 = vsel %vm2346_vm3, %v7849_v19, 0  ;;  %v11405_v28 = vld [vmem:[#allocation7 + $0xf8] sm:$0xf]  ;;  %v11412_v53 = vld [vmem:[#allocation7 + $0x108] sm:$0xc] }
 0x792   :  { %v12159_v17 = vld [vmem:[#allocation7 + $0x10c] sm:$0xc]  ;;  %v8116_v34 = vld [vmem:[#allocation7 + $0x144] sm:$0x33] }
 0x795   :  { %11317 = vmatmul.msk.bf16.vlgmr.msrb.gmra.mxu1 %vm7195_vm12, %v7331_v12  ;;  %11318 = vmatmul.msk.bf16.vlgmr.msrb.gmra.mxu2 %vm7195_vm12, %v7331_v12 }
 0x796   :  { %7575 = vmatpush.bf16.msrb.mxu1 %v7561_v54  ;;  %7588 = vmatpush.bf16.msrb.mxu2 %v7564_v18  ;;  %v12151_v54 = vld [vmem:[#allocation7 + $0xbc] sm:$0xf0]  ;;  %v11369_v18 = vld [vmem:[#allocation7 + $0xc0] sm:$0xf0] }
 0x797   :  { %v11368_v21 = vor.u32 %v12151_v54, %v11367_v11  ;;  %v7808_v11 = vld [vmem:[#allocation6 + $0x1c] ss:$144 sm:$0xc]  ;;  %v11397_v54 = vld [vmem:[#allocation7 + $0xf0] sm:$0xf] }
 0x798   :  { %11319 = vmatmul.msk.bf16.vlgmr.msra.gmra.mxu3 %vm7195_vm12, %v7331_v12  ;;  %v7748_v12 = vpack.c.b16 %v7742_v20, %v7742_v20  ;;  %v7936_v20 = vunpack.c.h.b16 %v7921_v58 }
 0x799   :  { %7601 = vmatpush.bf16.msra.mxu3 %v7567_v63  ;;  %v7759_v63 = vsel %vm2346_vm3, %v7747_v10, 0  ;;  %v7941_v10 = vpack.c.b16 %v7935_v32, %v7935_v32  ;;  %v7914_v32 = vld [vmem:[#allocation6 + $0x1e] ss:$144 sm:$0xc0] }
 0x79a   :  { %7576 = vmatpush.bf16.msrb.mxu1 %v11338_v37  ;;  %7589 = vmatpush.bf16.msrb.mxu2 %v11342_v7  ;;  %v7762_v61 = vsel %vm2346_vm3, %v7748_v12, 0  ;;  %v7615_v37 = vld [vmem:[#allocation6 + $0x18] ss:$144 sm:$0x30]  ;;  %v7942_v12 = vpack.c.b16 %v7936_v20, %v7936_v20  ;;  %v8130_v20 = vunpack.c.l.b16 %v8116_v34 }
 0x79b   :  { %v7819_v7 = vld [vmem:[#allocation7 + $0xe4] sm:$0xff]  ;;  %v7616_v2 = vor.u32 %v7615_v37, %v7614_v26  ;;  %v7809_v37 = vor.u32 %v7808_v11, %v7807_v22  ;;  %v8002_v11 = vld [vmem:[#allocation6 + $0x20] ss:$144 sm:$0x3] }
 0x79c   :  { %v7833_v48 = vunpack.c.l.b16 %v7819_v7  ;;  %v7834_v15 = vunpack.c.h.b16 %v7819_v7  ;;  %v12158_v26 = vld [vmem:[#allocation7 + $0x100] sm:$0xf0] }
 0x79d   :  { %7602 = vmatpush.bf16.msra.mxu3 %v11346_v33  ;;  %v11372_v33 = vor.u32 %v12150_v0, %v11369_v18  ;;  %v7618_v62 = vor.u32 %v7617_v42, %v7616_v2  ;;  %v7951_v0 = vsel %vm2346_vm3, %v7941_v10, 0  ;;  %v7954_v18 = vsel %vm2346_vm3, %v7942_v12, 0 }
 0x79e   :  { %v7839_v57 = vpack.c.b16 %v7833_v48, %v7833_v48  ;;  %v7840_v27 = vpack.c.b16 %v7834_v15, %v7834_v15  ;;  %v11406_v48 = vor.u32 %v12158_v26, %v11405_v28  ;;  %v8015_v15 = vld [vmem:[#allocation7 + $0x128] sm:$0xf]  ;;  %v8136_v12 = vpack.c.b16 %v8130_v20, %v8130_v20  ;;  %v12162_v28 = vld [vmem:[#allocation7 + $0x130] sm:$0xf]  ;;  %v11429_v26 = vld [vmem:[#allocation7 + $0x138] sm:$0xf0] }
 0x79f   :  { %v7619_v36 = vpack.c.bf16 %v7618_v62, %v7618_v62  ;;  %v8030_v2 = vunpack.c.l.b16 %v8015_v15 }
 0x7a0   :  { %v7843_v31 = vrot.slane %v7839_v57, 2  ;;  %v7846_v16 = vrot.slane %v7840_v27, 2  ;;  %v7812_v57 = vld [vmem:[#allocation6 + $0x1c] ss:$144 sm:$0xc0] }
 0x7a1   :  { %v12160_v27 = vld [vmem:[#allocation7 + $0x110] sm:$0xf0]  ;;  %v8036_v9 = vpack.c.b16 %v8030_v2, %v8030_v2  ;;  %v8210_v2 = vld [vmem:[#allocation7 + $0x164] sm:$0xf] }
 0x7a2   :  { %v7858_v44 = vsel %vm2346_vm3, %v7843_v31, 0 }
 0x7a3   :  { %v8044_v46 = vrot.slane %v8036_v9, 2  ;;  %v8007_v9 = vld [vmem:[#allocation6 + $0x20] ss:$144 sm:$0xc0] }
 0x7a5   :  { %11332 = vmatmul.msk.bf16.vlgmr.msra.gmra.mxu1 %vm7195_vm12, %v7424_v25  ;;  %11333 = vmatmul.msk.bf16.vlgmr.msra.gmra.mxu2 %vm7195_vm12, %v7424_v25 }
 0x7a6   :  { %7677 = vmatpush.bf16.msra.mxu1 %v7663_v24  ;;  %7690 = vmatpush.bf16.msra.mxu2 %v7666_v38  ;;  %v7715_v24 = vld [vmem:[#allocation6 + $0x1a] ss:$144 sm:$0xc]  ;;  %v7842_v38 = vrot.slane %v11383_v52, 2 }
 0x7a7   :  { %v7716_v35 = vor.u32 %v7715_v24, %v7714_v3  ;;  %v7909_v24 = vld [vmem:[#allocation6 + $0x1e] ss:$144 sm:$0x3] }
 0x7a8   :  { %11334 = vmatmul.msk.bf16.vlgmr.msrb.gmra.mxu3 %vm7195_vm12, %v7424_v25  ;;  %v11391_v25 = vor.u32 %v12155_v13, %v11390_v4  ;;  %v11414_v4 = vld [vmem:[#allocation7 + $0x114] sm:$0xf0]  ;;  %v11420_v13 = vld [vmem:[#allocation7 + $0x110] sm:$0xc] }
 0x7a9   :  { %7703 = vmatpush.bf16.msrb.mxu3 %v7669_v43  ;;  %v7861_v43 = vsel %vm2346_vm3, %v7846_v16, 0 }
 0x7aa   :  { %7678 = vmatpush.bf16.msra.mxu1 %v7649_v5  ;;  %7691 = vmatpush.bf16.msra.mxu2 %v7652_v60  ;;  %v7848_v45 = vrot.slane %v11391_v25, 2  ;;  %v7717_v5 = vld [vmem:[#allocation6 + $0x1a] ss:$144 sm:$0x30]  ;;  %v7844_v60 = vsel %vm2990_vm8, %v7842_v38, %v7843_v31  ;;  %v12161_v31 = vld [vmem:[#allocation7 + $0x118] sm:$0xf0]  ;;  %v11417_v25 = vor.u32 %v12159_v17, %v11414_v4 }
 0x7ab   :  { %v7718_v40 = vor.u32 %v7717_v5, %v7716_v35  ;;  %v11442_v17 = vld [vmem:[#allocation7 + $0x144] sm:$0xc]  ;;  %v12166_v4 = vld [vmem:[#allocation7 + $0x14c] sm:$0xf0] }
 0x7ac   :  { %v7850_v14 = vsel %vm2990_vm8, %v7848_v45, %v7849_v19  ;;  %v8040_v45 = vrot.slane %v11417_v25, 2  ;;  %v12167_v25 = vld [vmem:[#allocation7 + $0x154] sm:$0xf0] }
 0x7ad   :  { %7704 = vmatpush.bf16.msrb.mxu3 %v7655_v23  ;;  %v7847_v23 = vsel %vm2990_vm8, %v7845_v41, %v7846_v16  ;;  %v7720_v1 = vor.u32 %v7719_v51, %v7718_v40  ;;  %v11413_v16 = vor.u32 %v12160_v27, %v11412_v53  ;;  %v8059_v41 = vsel %vm2346_vm3, %v8044_v46, 0  ;;  %v8117_v51 = vld [vmem:[#allocation7 + $0x14c] sm:$0x3] }
 0x7af   :  { %v7721_v39 = vpack.c.bf16 %v7720_v1, %v7720_v1  ;;  %v8132_v1 = vunpack.c.l.b16 %v8117_v51 }
 0x7b5   :  { %11347 = vmatmul.msk.bf16.vlgmr.msrb.gmra.mxu1 %vm7195_vm12, %v7526_v8  ;;  %11348 = vmatmul.msk.bf16.vlgmr.msrb.gmra.mxu2 %vm7195_vm12, %v7526_v8 }
 0x7b6   :  { %7770 = vmatpush.bf16.msrb.mxu1 %v7756_v49  ;;  %7783 = vmatpush.bf16.msrb.mxu2 %v7759_v63  ;;  %v12157_v49 = vld [vmem:[#allocation7 + $0xf8] sm:$0xf0] }
 0x7b7   :  { %v11398_v7 = vor.u32 %v12157_v49, %v11397_v54  ;;  %v8003_v54 = vld [vmem:[#allocation6 + $0x20] ss:$144 sm:$0xc] }
 0x7b8   :  { %11349 = vmatmul.msk.bf16.vlgmr.msra.gmra.mxu3 %vm7195_vm12, %v7526_v8  ;;  %v7943_v8 = vpack.c.b16 %v7937_v55, %v7937_v55  ;;  %v8131_v55 = vunpack.c.h.b16 %v8116_v34 }
 0x7b9   :  { %7796 = vmatpush.bf16.msra.mxu3 %v7762_v61  ;;  %v12156_v61 = vld [vmem:[#allocation7 + $0xf4] sm:$0xf] }
 0x7ba   :  { %7771 = vmatpush.bf16.msrb.mxu1 %v11368_v21  ;;  %7784 = vmatpush.bf16.msrb.mxu2 %v11372_v33  ;;  %v7957_v63 = vsel %vm2346_vm3, %v7943_v8, 0  ;;  %v7810_v21 = vld [vmem:[#allocation6 + $0x1c] ss:$144 sm:$0x30]  ;;  %v8014_v33 = vld [vmem:[#allocation7 + $0x120] sm:$0xff]  ;;  %v8137_v8 = vpack.c.b16 %v8131_v55, %v8131_v55 }
 0x7bb   :  { %v8028_v6 = vunpack.c.l.b16 %v8014_v33  ;;  %v8029_v56 = vunpack.c.h.b16 %v8014_v33  ;;  %v7811_v42 = vor.u32 %v7810_v21, %v7809_v37  ;;  %v11435_v37 = vld [vmem:[#allocation7 + $0x134] sm:$0xf]  ;;  %v12164_v21 = vld [vmem:[#allocation7 + $0x13c] sm:$0xf0] }
 0x7bc   :  { %v8005_v33 = vld [vmem:[#allocation6 + $0x20] ss:$144 sm:$0x30]  ;;  %v11436_v15 = vor.u32 %v12164_v21, %v11435_v37 }
 0x7bd   :  { %7797 = vmatpush.bf16.msra.mxu3 %v11376_v29  ;;  %v11402_v29 = vor.u32 %v12156_v61, %v11399_v47  ;;  %v8034_v30 = vpack.c.b16 %v8028_v6, %v8028_v6  ;;  %v8035_v50 = vpack.c.b16 %v8029_v56, %v8029_v56  ;;  %v7813_v62 = vor.u32 %v7812_v57, %v7811_v42  ;;  %v8107_v55 = vld [vmem:[#allocation6 + $0x30] ss:$144 sm:$0x30] }
 0x7be   :  { %v8149_v61 = vsel %vm2346_vm3, %v8137_v8, 0  ;;  %v11432_v6 = vor.u32 %v12162_v28, %v11429_v26 }
 0x7bf   :  { %v8038_v52 = vrot.slane %v8034_v30, 2  ;;  %v8041_v19 = vrot.slane %v8035_v50, 2  ;;  %v7814_v3 = vpack.c.bf16 %v7813_v62, %v7813_v62  ;;  %v8225_v30 = vunpack.c.l.b16 %v8210_v2  ;;  %v11457_v2 = vld [vmem:[#allocation7 + $0x168] sm:$0xf] }
 0x7c1   :  { %v8053_v38 = vsel %vm2346_vm3, %v8038_v52, 0 }
 0x7c5   :  { %11362 = vmatmul.msk.bf16.vlgmr.msra.gmra.mxu1 %vm7195_vm12, %v7619_v36  ;;  %11363 = vmatmul.msk.bf16.vlgmr.msra.gmra.mxu2 %vm7195_vm12, %v7619_v36 }
 0x7c6   :  { %7872 = vmatpush.bf16.msra.mxu1 %v7858_v44  ;;  %7885 = vmatpush.bf16.msra.mxu2 %v7861_v43  ;;  %v7910_v44 = vld [vmem:[#allocation6 + $0x1e] ss:$144 sm:$0xc]  ;;  %v8037_v43 = vrot.slane %v11413_v16, 2  ;;  %v12165_v16 = vld [vmem:[#allocation7 + $0x148] sm:$0xc] }
 0x7c7   :  { %v7911_v5 = vor.u32 %v7910_v44, %v7909_v24 }
 0x7c8   :  { %11364 = vmatmul.msk.bf16.vlgmr.msrb.gmra.mxu3 %vm7195_vm12, %v7619_v36  ;;  %v11421_v36 = vor.u32 %v12161_v31, %v11420_v13  ;;  %v8231_v31 = vpack.c.b16 %v8225_v30, %v8225_v30 }
 0x7c9   :  { %7898 = vmatpush.bf16.msrb.mxu3 %v7864_v59  ;;  %v8056_v59 = vsel %vm2346_vm3, %v8041_v19, 0 }
 0x7ca   :  { %7873 = vmatpush.bf16.msra.mxu1 %v7844_v60  ;;  %7886 = vmatpush.bf16.msra.mxu2 %v7847_v23  ;;  %v8043_v35 = vrot.slane %v11421_v36, 2  ;;  %v7912_v60 = vld [vmem:[#allocation6 + $0x1e] ss:$144 sm:$0x30]  ;;  %v8039_v23 = vsel %vm2990_vm8, %v8037_v43, %v8038_v52 }
 0x7cb   :  { %v7913_v40 = vor.u32 %v7912_v60, %v7911_v5  ;;  %v8104_v5 = vld [vmem:[#allocation6 + $0x30] ss:$144 sm:$0x3] }
 0x7cc   :  { %v8045_v58 = vsel %vm2990_vm8, %v8043_v35, %v8044_v46  ;;  %v11450_v46 = vld [vmem:[#allocation7 + $0x14c] sm:$0xc]  ;;  %v8105_v60 = vld [vmem:[#allocation6 + $0x30] ss:$144 sm:$0xc] }
 0x7cd   :  { %7899 = vmatpush.bf16.msrb.mxu3 %v7850_v14  ;;  %v8042_v14 = vsel %vm2990_vm8, %v8040_v45, %v8041_v19  ;;  %v7915_v10 = vor.u32 %v7914_v32, %v7913_v40  ;;  %v11444_v19 = vld [vmem:[#allocation7 + $0x150] sm:$0xf0]  ;;  %v8106_v20 = vor.u32 %v8105_v60, %v8104_v5  ;;  %v11472_v5 = vld [vmem:[#allocation7 + $0x180] sm:$0xc]  ;;  %v12172_v60 = vld [vmem:[#allocation7 + $0x188] sm:$0xf0] }
 0x7ce   :  { %v11447_v43 = vor.u32 %v12165_v16, %v11444_v19 }
 0x7cf   :  { %v7916_v22 = vpack.c.bf16 %v7915_v10, %v7915_v10 }
 0x7d0   :  { %v8235_v51 = vrot.slane %v11447_v43, 2 }
 0x7d5   :  { %11377 = vmatmul.msk.bf16.vlgmr.msrb.gmra.mxu1 %vm7195_vm12, %v7721_v39  ;;  %11378 = vmatmul.msk.bf16.vlgmr.msrb.gmra.mxu2 %vm7195_vm12, %v7721_v39 }
 0x7d6   :  { %7965 = vmatpush.bf16.msrb.mxu1 %v7951_v0  ;;  %7978 = vmatpush.bf16.msrb.mxu2 %v7954_v18  ;;  %v11427_v0 = vld [vmem:[#allocation7 + $0x12c] sm:$0xf]  ;;  %v12163_v18 = vld [vmem:[#allocation7 + $0x134] sm:$0xf0] }
 0x7d8   :  { %11379 = vmatmul.msk.bf16.vlgmr.msra.gmra.mxu3 %vm7195_vm12, %v7721_v39  ;;  %v8138_v39 = vpack.c.b16 %v8132_v1, %v8132_v1 }
 0x7d9   :  { %7991 = vmatpush.bf16.msra.mxu3 %v7957_v63  ;;  %v8146_v63 = vsel %vm2346_vm3, %v8136_v12, 0 }
 0x7da   :  { %7966 = vmatpush.bf16.msrb.mxu1 %v11398_v7  ;;  %7979 = vmatpush.bf16.msrb.mxu2 %v11402_v29  ;;  %v8152_v47 = vsel %vm2346_vm3, %v8138_v39, 0  ;;  %v8004_v7 = vor.u32 %v8003_v54, %v8002_v11  ;;  %v11428_v29 = vor.u32 %v12163_v18, %v11427_v0  ;;  %v8311_v39 = vld [vmem:[#allocation7 + $0x180] sm:$0x33]  ;;  %v8108_v54 = vor.u32 %v8107_v55, %v8106_v20 }
 0x7db   :  { %v11473_v55 = vor.u32 %v12172_v60, %v11472_v5  ;;  %v12175_v5 = vld [vmem:[#allocation7 + $0x1ac] sm:$0xf0] }
 0x7dc   :  { %v8006_v27 = vor.u32 %v8005_v33, %v8004_v7 }
 0x7dd   :  { %7992 = vmatpush.bf16.msra.mxu3 %v11406_v48  ;;  %v8209_v48 = vld [vmem:[#allocation7 + $0x15c] sm:$0xff] }
 0x7de   :  { %v8223_v56 = vunpack.c.l.b16 %v8209_v48  ;;  %v8224_v57 = vunpack.c.h.b16 %v8209_v48  ;;  %v8008_v52 = vor.u32 %v8007_v9, %v8006_v27  ;;  %v11459_v9 = vld [vmem:[#allocation7 + $0x174] sm:$0xf0] }
 0x7e0   :  { %v8229_v62 = vpack.c.b16 %v8223_v56, %v8223_v56  ;;  %v8230_v13 = vpack.c.b16 %v8224_v57, %v8224_v57  ;;  %v8009_v45 = vpack.c.bf16 %v8008_v52, %v8008_v52  ;;  %v8404_v52 = vld [vmem:[#allocation7 + $0x198] sm:$0xff] }
 0x7e2   :  { %v8233_v36 = vrot.slane %v8229_v62, 2  ;;  %v8236_v44 = vrot.slane %v8230_v13, 2  ;;  %v11465_v62 = vld [vmem:[#allocation7 + $0x170] sm:$0xf] }
 0x7e3   :  { %v8200_v13 = vld [vmem:[#allocation6 + $0x32] ss:$144 sm:$0x30] }
 0x7e4   :  { %v8251_v34 = vsel %vm2346_vm3, %v8236_v44, 0  ;;  %v8237_v12 = vsel %vm2990_vm8, %v8235_v51, %v8236_v44  ;;  %v11480_v51 = vld [vmem:[#allocation7 + $0x188] sm:$0xc] }
 0x7e5   :  { %11392 = vmatmul.msk.bf16.vlgmr.msra.gmra.mxu1 %vm7195_vm12, %v7814_v3  ;;  %11393 = vmatmul.msk.bf16.vlgmr.msra.gmra.mxu2 %vm7195_vm12, %v7814_v3 }
 0x7e6   :  { %8067 = vmatpush.bf16.msra.mxu1 %v8053_v38  ;;  %8080 = vmatpush.bf16.msra.mxu2 %v8056_v59  ;;  %v8239_v38 = vrot.slane %v8231_v31, 2  ;;  %v11451_v59 = vor.u32 %v12167_v25, %v11450_v46  ;;  %v8418_v46 = vunpack.c.l.b16 %v8404_v52  ;;  %v8405_v25 = vld [vmem:[#allocation7 + $0x1a0] sm:$0xf] }
 0x7e8   :  { %11394 = vmatmul.msk.bf16.vlgmr.msrb.gmra.mxu3 %vm7195_vm12, %v7814_v3  ;;  %v11443_v3 = vor.u32 %v12166_v4, %v11442_v17  ;;  %v8254_v40 = vsel %vm2346_vm3, %v8239_v38, 0  ;;  %v8238_v32 = vrot.slane %v11451_v59, 2  ;;  %v12170_v17 = vld [vmem:[#allocation7 + $0x178] sm:$0xf0] }
 0x7e9   :  { %8093 = vmatpush.bf16.msrb.mxu3 %v8059_v41  ;;  %v11466_v19 = vor.u32 %v12170_v17, %v11465_v62 }
 0x7ea   :  { %8068 = vmatpush.bf16.msra.mxu1 %v8039_v23  ;;  %8081 = vmatpush.bf16.msra.mxu2 %v8042_v14  ;;  %v8248_v14 = vsel %vm2346_vm3, %v8233_v36, 0  ;;  %v8240_v8 = vsel %vm2990_vm8, %v8238_v32, %v8239_v38  ;;  %v12173_v32 = vld [vmem:[#allocation7 + $0x190] sm:$0xf0] }
 0x7ed   :  { %8094 = vmatpush.bf16.msrb.mxu3 %v8045_v58  ;;  %v8232_v58 = vrot.slane %v11443_v3, 2  ;;  %v8419_v3 = vunpack.c.h.b16 %v8404_v52 }
 0x7ef   :  { %v8234_v1 = vsel %vm2990_vm8, %v8232_v58, %v8233_v36 }
 0x7f2   :  { %v7218_v49 = vpop.f32.mrf.mxu1 }
 0x7f5   :  { %11407 = vmatmul.msk.bf16.vlgmr.msrb.gmra.mxu1 %vm7195_vm12, %v7916_v22  ;;  %11408 = vmatmul.msk.bf16.vlgmr.msrb.gmra.mxu2 %vm7195_vm12, %v7916_v22 }
 0x7f6   :  { %8160 = vmatpush.bf16.msrb.mxu1 %v8146_v63  ;;  %8173 = vmatpush.bf16.msrb.mxu2 %v8149_v61  ;;  %v8109_v63 = vld [vmem:[#allocation6 + $0x30] ss:$144 sm:$0xc0]  ;;  %v8325_v61 = vunpack.c.l.b16 %v8311_v39 }
 0x7f7   :  { %v8110_v26 = vor.u32 %v8109_v63, %v8108_v54 }
 0x7f8   :  { %11409 = vmatmul.msk.bf16.vlgmr.msra.gmra.mxu3 %vm7195_vm12, %v7916_v22  ;;  %v7231_v42 = vpop.f32.mrf.mxu2  ;;  %v8331_v37 = vpack.c.b16 %v8325_v61, %v8325_v61  ;;  %v8427_v61 = vrot.slane %v11473_v55, 2  ;;  %v8587_v55 = vld [vmem:[#allocation6 + $0x48] ss:$144 sm:$0x3] }
 0x7f9   :  { %8186 = vmatpush.bf16.msra.mxu3 %v8152_v47  ;;  %v8326_v47 = vunpack.c.h.b16 %v8311_v39  ;;  %v8111_v48 = vpack.c.bf16 %v8110_v26, %v8110_v26  ;;  %v11481_v39 = vor.u32 %v12173_v32, %v11480_v51 }
 0x7fa   :  { %v7220_v50 = vpop.f32.mrf.mxu1  ;;  %8161 = vmatpush.bf16.msrb.mxu1 %v11428_v29  ;;  %8174 = vmatpush.bf16.msrb.mxu2 %v11432_v6  ;;  %v8197_v6 = vld [vmem:[#allocation6 + $0x32] ss:$144 sm:$0x3]  ;;  %v8341_v30 = vsel %vm2346_vm3, %v8331_v37, 0 }
 0x7fb   :  { %v7244_v53 = vpop.f32.mrf.mxu3  ;;  %v8332_v21 = vpack.c.b16 %v8326_v47, %v8326_v47  ;;  %v12168_v50 = vld [vmem:[#allocation7 + $0x16c] sm:$0xf]  ;;  %v8433_v37 = vrot.slane %v11481_v39, 2 }
 0x7fc   :  { %v11462_v16 = vor.u32 %v12168_v50, %v11459_v9  ;;  %v8304_v9 = vld [vmem:[#allocation6 + $0x34] ss:$144 sm:$0xc0] }
 0x7fd   :  { %8187 = vmatpush.bf16.msra.mxu3 %v11436_v15  ;;  %v8198_v15 = vld [vmem:[#allocation6 + $0x32] ss:$144 sm:$0xc] }
 0x7fe   :  { %v8199_v4 = vor.u32 %v8198_v15, %v8197_v6 }
 0x800   :  { %v7233_v24 = vpop.f32.mrf.mxu2  ;;  %v8201_v43 = vor.u32 %v8200_v13, %v8199_v4 }
 0x801   :  { %v8420_v24 = vunpack.c.l.b16 %v8405_v25  ;;  %v11502_v25 = vld [vmem:[#allocation7 + $0x1bc] sm:$0xc] }
 0x802   :  { %v7293_v35 = vpop.f32.mrf.mxu1 }
 0x803   :  { %v7246_v41 = vpop.f32.mrf.mxu3  ;;  %v7294_v23 = vadd.f32 %v7293_v35, %v7218_v49  ;;  %v8312_v49 = vld [vmem:[#allocation7 + $0x188] sm:$0x3]  ;;  %v8424_v35 = vpack.c.b16 %v8418_v46, %v8418_v46 }
 0x804   :  { %v8327_v28 = vunpack.c.l.b16 %v8312_v49  ;;  %v8299_v49 = vld [vmem:[#allocation6 + $0x34] ss:$144 sm:$0x3] }
 0x805   :  { %11422 = vmatmul.msk.bf16.vlgmr.msra.gmra.mxu1 %vm7195_vm12, %v8009_v45  ;;  %11423 = vmatmul.msk.bf16.vlgmr.msra.gmra.mxu2 %vm7195_vm12, %v8009_v45  ;;  %v8428_v20 = vrot.slane %v8424_v35, 2  ;;  %v11487_v35 = vld [vmem:[#allocation7 + $0x1a4] sm:$0xf] }
 0x806   :  { %8262 = vmatpush.bf16.msra.mxu1 %v8248_v14  ;;  %8275 = vmatpush.bf16.msra.mxu2 %v8251_v34  ;;  %v8333_v7 = vpack.c.b16 %v8327_v28, %v8327_v28  ;;  %v8426_v14 = vpack.c.b16 %v8420_v24, %v8420_v24  ;;  %v12171_v34 = vld [vmem:[#allocation7 + $0x184] sm:$0xc] }
 0x807   :  { %v8443_v63 = vsel %vm2346_vm3, %v8428_v20, 0  ;;  %v8392_v24 = vld [vmem:[#allocation6 + $0x36] ss:$144 sm:$0x3] }
 0x808   :  { %11424 = vmatmul.msk.bf16.vlgmr.msrb.gmra.mxu3 %vm7195_vm12, %v8009_v45  ;;  %v7306_v10 = vpop.f32.mrf.mxu2  ;;  %v8347_v27 = vsel %vm2346_vm3, %v8333_v7, 0  ;;  %v8202_v45 = vld [vmem:[#allocation6 + $0x32] ss:$144 sm:$0xc0] }
 0x809   :  { %8288 = vmatpush.bf16.msrb.mxu3 %v8254_v40  ;;  %v7307_v22 = vadd.f32 %v7306_v10, %v7231_v42  ;;  %v12169_v42 = vld [vmem:[#allocation7 + $0x170] sm:$0xf0]  ;;  %v8203_v58 = vor.u32 %v8202_v45, %v8201_v43  ;;  %v11474_v40 = vld [vmem:[#allocation7 + $0x18c] sm:$0xf0] }
 0x80a   :  { %v7295_v18 = vpop.f32.mrf.mxu1  ;;  %8263 = vmatpush.bf16.msra.mxu1 %v8234_v1  ;;  %8276 = vmatpush.bf16.msra.mxu2 %v8237_v12  ;;  %v11458_v31 = vor.u32 %v12169_v42, %v11457_v2  ;;  %v8434_v12 = vrot.slane %v8426_v14, 2  ;;  %v8302_v7 = vld [vmem:[#allocation6 + $0x34] ss:$144 sm:$0x30]  ;;  %v12174_v14 = vld [vmem:[#allocation7 + $0x1a8] sm:$0xf] }
 0x80b   :  { %v7319_v11 = vpop.f32.mrf.mxu3 }
 0x80c   :  { %v7320_v0 = vadd.f32 %v7319_v11, %v7244_v53  ;;  %v8344_v53 = vsel %vm2346_vm3, %v8332_v21, 0  ;;  %v8204_v11 = vpack.c.bf16 %v8203_v58, %v8203_v58  ;;  %v8449_v28 = vsel %vm2346_vm3, %v8434_v12, 0  ;;  %v11489_v58 = vld [vmem:[#allocation7 + $0x1b0] sm:$0xf0] }
 0x80d   :  { %8289 = vmatpush.bf16.msrb.mxu3 %v8240_v8  ;;  %v11477_v8 = vor.u32 %v12171_v34, %v11474_v40  ;;  %v8435_v15 = vsel %vm2990_vm8, %v8433_v37, %v8434_v12  ;;  %v11495_v34 = vld [vmem:[#allocation7 + $0x1ac] sm:$0xf] }
 0x80f   :  { %v8430_v26 = vrot.slane %v11477_v8, 2 }
 0x810   :  { %v7308_v33 = vpop.f32.mrf.mxu2 }
 0x811   :  { %v8506_v33 = vld [vmem:[#allocation7 + $0x1bc] sm:$0x33] }
 0x812   :  { %v7383_v56 = vpop.f32.mrf.mxu1  ;;  %v8521_v62 = vunpack.c.h.b16 %v8506_v33 }
 0x813   :  { %v7321_v29 = vpop.f32.mrf.mxu3  ;;  %v7413_v57 = vadd.f32 %v7383_v56, %v7294_v23  ;;  %v8425_v23 = vpack.c.b16 %v8419_v3, %v8419_v3 }
 0x814   :  { %v8429_v29 = vsel %vm2990_vm8, %v8427_v61, %v8428_v20  ;;  %v12176_v20 = vld [vmem:[#allocation7 + $0x1b4] sm:$0xf0]  ;;  %v8600_v61 = vld [vmem:[#allocation7 + $0x1dc] sm:$0xf] }
 0x815   :  { %11437 = vmatmul.msk.bf16.vlgmr.msrb.gmra.mxu1 %vm7195_vm12, %v8111_v48  ;;  %11438 = vmatmul.msk.bf16.vlgmr.msrb.gmra.mxu2 %vm7195_vm12, %v8111_v48  ;;  %v8431_v10 = vrot.slane %v8425_v23, 2 }
 0x816   :  { %8355 = vmatpush.bf16.msrb.mxu1 %v8341_v30  ;;  %8368 = vmatpush.bf16.msrb.mxu2 %v8344_v53  ;;  %v8507_v30 = vld [vmem:[#allocation7 + $0x1c4] sm:$0x3]  ;;  %v15499_v53 = vld [vmem:[#allocation7 + $0x1d4] sm:$0xff] }
 0x817   :  { %v8446_v47 = vsel %vm2346_vm3, %v8431_v10, 0  ;;  %v8432_v6 = vsel %vm2990_vm8, %v8430_v26, %v8431_v10  ;;  %v8613_v17 = vunpack.c.l.b16 %v15499_v53  ;;  %v8522_v4 = vunpack.c.l.b16 %v8507_v30  ;;  %v8590_v10 = vld [vmem:[#allocation6 + $0x48] ss:$144 sm:$0x30] }
 0x818   :  { %11439 = vmatmul.msk.bf16.vlgmr.msra.gmra.mxu3 %vm7195_vm12, %v8111_v48  ;;  %v7396_v36 = vpop.f32.mrf.mxu2 }
 0x819   :  { %8381 = vmatpush.bf16.msra.mxu3 %v8347_v27  ;;  %v7414_v44 = vadd.f32 %v7396_v36, %v7307_v22  ;;  %v8619_v13 = vpack.c.b16 %v8613_v17, %v8613_v17  ;;  %v8528_v46 = vpack.c.b16 %v8522_v4, %v8522_v4  ;;  %v12178_v36 = vld [vmem:[#allocation7 + $0x1c4] sm:$0xf0] }
 0x81a   :  { %v7385_v41 = vpop.f32.mrf.mxu1  ;;  %8356 = vmatpush.bf16.msrb.mxu1 %v11458_v31  ;;  %8369 = vmatpush.bf16.msrb.mxu2 %v11462_v16  ;;  %v8527_v16 = vpack.c.b16 %v8521_v62, %v8521_v62  ;;  %v11503_v43 = vor.u32 %v12178_v36, %v11502_v25 }
 0x81b   :  { %v7409_v38 = vpop.f32.mrf.mxu3  ;;  %v8542_v32 = vsel %vm2346_vm3, %v8528_v46, 0 }
 0x81c   :  { %v7415_v59 = vadd.f32 %v7409_v38, %v7320_v0  ;;  %v8300_v0 = vld [vmem:[#allocation6 + $0x34] ss:$144 sm:$0xc]  ;;  %v8539_v23 = vsel %vm2346_vm3, %v8527_v16, 0  ;;  %v8622_v40 = vrot.slane %v11503_v43, 2 }
 0x81d   :  { %8382 = vmatpush.bf16.msra.mxu3 %v11466_v19  ;;  %v8301_v21 = vor.u32 %v8300_v0, %v8299_v49  ;;  %v8623_v19 = vrot.slane %v8619_v13, 2  ;;  %v8592_v49 = vld [vmem:[#allocation6 + $0x48] ss:$144 sm:$0xc0]  ;;  %v11492_v0 = vor.u32 %v12174_v14, %v11489_v58  ;;  %v11517_v58 = vld [vmem:[#allocation7 + $0x1e0] sm:$0xf] }
 0x81e   :  { %v8689_v13 = vld [vmem:[#allocation6 + $0x4a] ss:$144 sm:$0x3]  ;;  %v8495_v43 = vld [vmem:[#allocation6 + $0x38] ss:$144 sm:$0xc] }
 0x81f   :  { %v8303_v42 = vor.u32 %v8302_v7, %v8301_v21  ;;  %v8638_v38 = vsel %vm2346_vm3, %v8623_v19, 0  ;;  %v8624_v8 = vsel %vm2990_vm8, %v8622_v40, %v8623_v19  ;;  %v8690_v16 = vld [vmem:[#allocation6 + $0x4a] ss:$144 sm:$0xc] }
 0x820   :  { %v7398_v1 = vpop.f32.mrf.mxu2  ;;  %8652 = vmatpush.bf16.msrb.mxu0 %v8638_v38  ;;  %v8691_v36 = vor.u32 %v8690_v16, %v8689_v13  ;;  %v8494_v38 = vld [vmem:[#allocation6 + $0x38] ss:$144 sm:$0x3] }
 0x821   :  { %v8305_v31 = vor.u32 %v8304_v9, %v8303_v42  ;;  %v8588_v1 = vld [vmem:[#allocation6 + $0x48] ss:$144 sm:$0xc]  ;;  %v12177_v42 = vld [vmem:[#allocation7 + $0x1c0] sm:$0xc] }
 0x822   :  { %v7485_v54 = vpop.f32.mrf.mxu1  ;;  %v8589_v39 = vor.u32 %v8588_v1, %v8587_v55  ;;  %v11510_v9 = vld [vmem:[#allocation7 + $0x1c4] sm:$0xc]  ;;  %v8694_v55 = vld [vmem:[#allocation6 + $0x4a] ss:$144 sm:$0xc0]  ;;  %v8496_v1 = vor.u32 %v8495_v43, %v8494_v38 }
 0x823   :  { %v7411_v22 = vpop.f32.mrf.mxu3  ;;  %v7515_v18 = vadd.f32 %v7485_v54, %v7413_v57  ;;  %v8520_v57 = vunpack.c.l.b16 %v8506_v33  ;;  %v8306_v41 = vpack.c.bf16 %v8305_v31, %v8305_v31  ;;  %v8614_v54 = vunpack.c.h.b16 %v15499_v53  ;;  %v8701_v33 = vld [vmem:[#allocation7 + $0x1f8] sm:$0x33] }
 0x824   :  { %v8395_v22 = vld [vmem:[#allocation6 + $0x36] ss:$144 sm:$0x30]  ;;  %8653 = vmatpush.bf16.msrb.mxu0 %v8624_v8  ;;  %v8716_v53 = vunpack.c.h.b16 %v8701_v33  ;;  %v8785_v38 = vld [vmem:[#allocation6 + $0x4c] ss:$144 sm:$0x30] }
 0x825   :  { %11452 = vmatmul.msk.bf16.vlgmr.msra.gmra.mxu1 %vm7195_vm12, %v8204_v11  ;;  %11453 = vmatmul.msk.bf16.vlgmr.msra.gmra.mxu2 %vm7195_vm12, %v8204_v11  ;;  %v8526_v52 = vpack.c.b16 %v8520_v57, %v8520_v57  ;;  %v11504_v57 = vld [vmem:[#allocation7 + $0x1c8] sm:$0xf0] }
 0x826   :  { %8457 = vmatpush.bf16.msra.mxu1 %v8443_v63  ;;  %8470 = vmatpush.bf16.msra.mxu2 %v8446_v47  ;;  %v8591_v63 = vor.u32 %v8590_v10, %v8589_v39  ;;  %v11507_v17 = vor.u32 %v12177_v42, %v11504_v57  ;;  %v8722_v4 = vpack.c.b16 %v8716_v53, %v8716_v53  ;;  %v8497_v10 = vld [vmem:[#allocation6 + $0x38] ss:$144 sm:$0x30]  ;;  %v8794_v39 = vld [vmem:[#allocation7 + $0x210] sm:$0xff]  ;;  %v11532_v57 = vld [vmem:[#allocation7 + $0x1f8] sm:$0xc] }
 0x827   :  { %v8536_v45 = vsel %vm2346_vm3, %v8526_v52, 0  ;;  %v11534_v53 = vld [vmem:[#allocation7 + $0x204] sm:$0xf0] }
 0x828   :  { %11454 = vmatmul.msk.bf16.vlgmr.msrb.gmra.mxu3 %vm7195_vm12, %v8204_v11  ;;  %v7498_v48 = vpop.f32.mrf.mxu2  ;;  %v11488_v11 = vor.u32 %v12175_v5, %v11487_v35  ;;  %v8593_v7 = vor.u32 %v8592_v49, %v8591_v63  ;;  %v8734_v46 = vsel %vm2346_vm3, %v8722_v4, 0  ;;  %v12180_v35 = vld [vmem:[#allocation7 + $0x1e4] sm:$0xf]  ;;  %v11519_v5 = vld [vmem:[#allocation7 + $0x1ec] sm:$0xf0]  ;;  %v8808_v49 = vunpack.c.l.b16 %v8794_v39 }
 0x829   :  { %8483 = vmatpush.bf16.msrb.mxu3 %v8449_v28  ;;  %v15497_v56 = vadd.f32 %v7498_v48, %v7414_v44  ;;  %v8393_v44 = vld [vmem:[#allocation6 + $0x36] ss:$144 sm:$0xc]  ;;  %v8615_v28 = vunpack.c.l.b16 %v8600_v61  ;;  %8758 = vmatpush.bf16.msra.mxu0 %v8734_v46  ;;  %v8498_v61 = vor.u32 %v8497_v10, %v8496_v1 }
 0x82a   :  { %v7487_v50 = vpop.f32.mrf.mxu1  ;;  %8458 = vmatpush.bf16.msra.mxu1 %v8429_v29  ;;  %8471 = vmatpush.bf16.msra.mxu2 %v8432_v6  ;;  %v8394_v12 = vor.u32 %v8393_v44, %v8392_v24  ;;  %v8397_v6 = vld [vmem:[#allocation6 + $0x36] ss:$144 sm:$0xc0] }
 0x82b   :  { %v7511_v2 = vpop.f32.mrf.mxu3  ;;  %v8621_v30 = vpack.c.b16 %v8615_v28, %v8615_v28 }
 0x82c   :  { %v15501_v27 = vadd.f32 %v7511_v2, %v7415_v59  ;;  %v8396_v21 = vor.u32 %v8395_v22, %v8394_v12  ;;  %v15521_v2 = vpack.c.bf16 %v8593_v7, %v8593_v7 }
 0x82d   :  { %8484 = vmatpush.bf16.msrb.mxu3 %v8435_v15  ;;  %v8620_v15 = vpack.c.b16 %v8614_v54, %v8614_v54  ;;  %v8629_v31 = vrot.slane %v8621_v30, 2  ;;  %v8702_v54 = vld [vmem:[#allocation7 + $0x200] sm:$0x3]  ;;  %v12184_v30 = vld [vmem:[#allocation7 + $0x200] sm:$0xf0] }
 0x82e   :  { %v8398_v50 = vor.u32 %v8397_v6, %v8396_v21  ;;  %11512 = vmatmul.msk.bf16.vlgmr.msrb.gmra.mxu0 %vm7195_vm12, %v15521_v2  ;;  %v8499_v21 = vld [vmem:[#allocation6 + $0x38] ss:$144 sm:$0xc0]  ;;  %v8814_v6 = vpack.c.b16 %v8808_v49, %v8808_v49 }
 0x82f   :  { %v8626_v62 = vrot.slane %v8620_v15, 2 }
 0x830   :  { %v7500_v3 = vpop.f32.mrf.mxu2  ;;  %v8399_v44 = vpack.c.bf16 %v8398_v50, %v8398_v50 }
 0x831   :  { %v8692_v3 = vld [vmem:[#allocation6 + $0x4a] ss:$144 sm:$0x30] }
 0x832   :  { %v7578_v60 = vpop.f32.mrf.mxu1 }
 0x833   :  { %v7513_v59 = vpop.f32.mrf.mxu3  ;;  %v15507_v51 = vadd.f32 %v7578_v60, %v7515_v18  ;;  %v11496_v18 = vor.u32 %v12176_v20, %v11495_v34  ;;  %v8693_v34 = vor.u32 %v8692_v3, %v8691_v36  ;;  %v11522_v20 = vor.u32 %v12180_v35, %v11519_v5  ;;  %v8783_v36 = vld [vmem:[#allocation6 + $0x4c] ss:$144 sm:$0xc] }
 0x835   :  { %11467 = vmatmul.msk.bf16.vlgmr.msrb.gmra.mxu1 %vm7195_vm12, %v8306_v41  ;;  %11468 = vmatmul.msk.bf16.vlgmr.msrb.gmra.mxu2 %vm7195_vm12, %v8306_v41  ;;  %v8695_v8 = vor.u32 %v8694_v55, %v8693_v34  ;;  %v8787_v34 = vld [vmem:[#allocation6 + $0x4c] ss:$144 sm:$0xc0] }
 0x836   :  { %8550 = vmatpush.bf16.msrb.mxu1 %v8536_v45  ;;  %8563 = vmatpush.bf16.msrb.mxu2 %v8539_v23  ;;  %v8625_v45 = vrot.slane %v11507_v17, 2  ;;  %v8644_v23 = vsel %vm2346_vm3, %v8629_v31, 0  ;;  %v12185_v17 = vld [vmem:[#allocation7 + $0x208] sm:$0xf0] }
 0x837   :  { %8759 = vmatpush.bf16.msra.mxu0 %v11522_v20 }
 0x838   :  { %11469 = vmatmul.msk.bf16.vlgmr.msra.gmra.mxu3 %vm7195_vm12, %v8306_v41  ;;  %v7591_v47 = vpop.f32.mrf.mxu2  ;;  %v8641_v41 = vsel %vm2346_vm3, %v8626_v62, 0 }
 0x839   :  { %8576 = vmatpush.bf16.msra.mxu3 %v8542_v32  ;;  %v15516_v26 = vadd.f32 %v7591_v47, %v15497_v56  ;;  %v8715_v56 = vunpack.c.l.b16 %v8701_v33  ;;  %v12181_v32 = vld [vmem:[#allocation7 + $0x1e8] sm:$0xf0]  ;;  %v8795_v47 = vld [vmem:[#allocation7 + $0x218] sm:$0xf]  ;;  %v15543_v33 = vpack.c.bf16 %v8695_v8, %v8695_v8 }
 0x83a   :  { %v7580_v48 = vpop.f32.mrf.mxu1  ;;  %8551 = vmatpush.bf16.msrb.mxu1 %v11488_v11  ;;  %8564 = vmatpush.bf16.msrb.mxu2 %v11492_v0  ;;  %v11518_v12 = vor.u32 %v12181_v32, %v11517_v58  ;;  %v8809_v0 = vunpack.c.h.b16 %v8794_v39  ;;  %v8810_v7 = vunpack.c.l.b16 %v8795_v47  ;;  %v8896_v32 = vld [vmem:[#allocation7 + $0x234] sm:$0x33]  ;;  %v8897_v39 = vld [vmem:[#allocation7 + $0x23c] sm:$0x3] }
 0x83b   :  { %v7604_v37 = vpop.f32.mrf.mxu3  ;;  %v8721_v52 = vpack.c.b16 %v8715_v56, %v8715_v56  ;;  %v8717_v48 = vunpack.c.l.b16 %v8702_v54  ;;  %v8910_v8 = vunpack.c.l.b16 %v8896_v32  ;;  %v8911_v49 = vunpack.c.h.b16 %v8896_v32 }
 0x83c   :  { %v15519_v29 = vadd.f32 %v7604_v37, %v15501_v27  ;;  %v12179_v27 = vld [vmem:[#allocation7 + $0x1cc] sm:$0xf0]  ;;  %v8815_v15 = vpack.c.b16 %v8809_v0, %v8809_v0  ;;  %v8816_v42 = vpack.c.b16 %v8810_v7, %v8810_v7 }
 0x83d   :  { %8577 = vmatpush.bf16.msra.mxu3 %v11496_v18  ;;  %v11511_v25 = vor.u32 %v12179_v27, %v11510_v9  ;;  %v8731_v14 = vsel %vm2346_vm3, %v8721_v52, 0  ;;  %v8723_v50 = vpack.c.b16 %v8717_v48, %v8717_v48  ;;  %v8818_v9 = vrot.slane %v8814_v6, 2  ;;  %v11562_v48 = vld [vmem:[#allocation7 + $0x234] sm:$0xc] }
 0x83e   :  { %11528 = vmatmul.msk.bf16.vlgmr.msra.gmra.mxu0 %vm7195_vm12, %v15543_v33  ;;  %v8824_v56 = vrot.slane %v8816_v42, 2  ;;  %v8821_v27 = vrot.slane %v8815_v15, 2 }
 0x83f   :  { %v8628_v40 = vrot.slane %v11511_v25, 2  ;;  %v8833_v35 = vsel %vm2346_vm3, %v8818_v9, 0 }
 0x840   :  { %v7593_v19 = vpop.f32.mrf.mxu2  ;;  %v8839_v13 = vsel %vm2346_vm3, %v8824_v56, 0  ;;  %v8836_v5 = vsel %vm2346_vm3, %v8821_v27, 0 }
 0x841   :  { %v8630_v11 = vsel %vm2990_vm8, %v8628_v40, %v8629_v31  ;;  %v11533_v31 = vor.u32 %v12184_v30, %v11532_v57  ;;  %v8782_v19 = vld [vmem:[#allocation6 + $0x4c] ss:$144 sm:$0x3]  ;;  %8873 = vmatpush.bf16.msrb.mxu0 %v8839_v13  ;;  %v12188_v13 = vld [vmem:[#allocation7 + $0x22c] sm:$0xf0] }
 0x842   :  { %v7680_v59 = vpop.f32.mrf.mxu1  ;;  %v11547_v30 = vld [vmem:[#allocation7 + $0x21c] sm:$0xf] }
 0x843   :  { %v7606_v24 = vpop.f32.mrf.mxu3  ;;  %v15528_v60 = vadd.f32 %v7680_v59, %v15507_v51  ;;  %v8627_v51 = vsel %vm2990_vm8, %v8625_v45, %v8626_v62  ;;  %v11540_v62 = vld [vmem:[#allocation7 + $0x200] sm:$0xc]  ;;  %v8737_v59 = vsel %vm2346_vm3, %v8723_v50, 0  ;;  %v12182_v45 = vld [vmem:[#allocation7 + $0x1f0] sm:$0xf0] }
 0x844   :  { %v11541_v16 = vor.u32 %v12185_v17, %v11540_v62  ;;  %v12186_v50 = vld [vmem:[#allocation7 + $0x220] sm:$0xf] }
 0x845   :  { %11482 = vmatmul.msk.bf16.vlgmr.msra.gmra.mxu1 %vm7195_vm12, %v8399_v44  ;;  %11483 = vmatmul.msk.bf16.vlgmr.msra.gmra.mxu2 %vm7195_vm12, %v8399_v44 }
 0x846   :  { %8665 = vmatpush.bf16.msra.mxu1 %v8641_v41  ;;  %8678 = vmatpush.bf16.msra.mxu2 %v8644_v23  ;;  %v8823_v24 = vrot.slane %v11541_v16, 2  ;;  %v11525_v41 = vld [vmem:[#allocation7 + $0x1e8] sm:$0xf]  ;;  %v8817_v23 = vrot.slane %v11533_v31, 2 }
 0x847   :  { %v8977_v31 = vld [vmem:[#allocation6 + $0x50] ss:$144 sm:$0x3] }
 0x848   :  { %11484 = vmatmul.msk.bf16.vlgmr.msrb.gmra.mxu3 %vm7195_vm12, %v8399_v44  ;;  %v7693_v22 = vpop.f32.mrf.mxu2  ;;  %v8784_v44 = vor.u32 %v8783_v36, %v8782_v19  ;;  %v8825_v40 = vsel %vm2990_vm8, %v8823_v24, %v8824_v56  ;;  %v8819_v1 = vsel %vm2990_vm8, %v8817_v23, %v8818_v9  ;;  %v11549_v9 = vld [vmem:[#allocation7 + $0x228] sm:$0xf0]  ;;  %v8980_v16 = vld [vmem:[#allocation6 + $0x50] ss:$144 sm:$0x30] }
 0x849   :  { %8745 = vmatpush.bf16.msrb.mxu3 %v8731_v14  ;;  %v15538_v18 = vadd.f32 %v7693_v22, %v15516_v26  ;;  %v8500_v26 = vor.u32 %v8499_v21, %v8498_v61  ;;  %8874 = vmatpush.bf16.msrb.mxu0 %v8825_v40  ;;  %v15559_v22 = vld [vmem:[#allocation7 + $0x24c] sm:$0xff]  ;;  %v8912_v61 = vunpack.c.l.b16 %v8897_v39  ;;  %v11552_v24 = vor.u32 %v12186_v50, %v11549_v9  ;;  %v12189_v40 = vld [vmem:[#allocation7 + $0x238] sm:$0xc]  ;;  %v12193_v50 = vld [vmem:[#allocation7 + $0x260] sm:$0xf0] }
 0x84a   :  { %v7682_v37 = vpop.f32.mrf.mxu1  ;;  %8666 = vmatpush.bf16.msra.mxu1 %v8627_v51  ;;  %8679 = vmatpush.bf16.msra.mxu2 %v8630_v11  ;;  %v8786_v58 = vor.u32 %v8785_v38, %v8784_v44  ;;  %v9003_v0 = vunpack.c.l.b16 %v15559_v22  ;;  %v9004_v36 = vunpack.c.h.b16 %v15559_v22  ;;  %v9079_v39 = vld [vmem:[#allocation6 + $0x60] ss:$144 sm:$0x3] }
 0x84b   :  { %v7706_v63 = vpop.f32.mrf.mxu3  ;;  %v8501_v25 = vpack.c.bf16 %v8500_v26, %v8500_v26  ;;  %v8916_v37 = vpack.c.b16 %v8910_v8, %v8910_v8  ;;  %v8918_v7 = vpack.c.b16 %v8912_v61, %v8912_v61 }
 0x84c   :  { %v15541_v28 = vadd.f32 %v7706_v63, %v15519_v29  ;;  %v12183_v29 = vld [vmem:[#allocation7 + $0x1fc] sm:$0xc]  ;;  %v8788_v20 = vor.u32 %v8787_v34, %v8786_v58  ;;  %v9009_v47 = vpack.c.b16 %v9003_v0, %v9003_v0  ;;  %v9010_v58 = vpack.c.b16 %v9004_v36, %v9004_v36 }
 0x84d   :  { %8746 = vmatpush.bf16.msrb.mxu3 %v11518_v12  ;;  %v11537_v52 = vor.u32 %v12183_v29, %v11534_v53  ;;  %v8926_v57 = vsel %vm2346_vm3, %v8916_v37, 0  ;;  %v12187_v29 = vld [vmem:[#allocation7 + $0x224] sm:$0xf0]  ;;  %v9082_v37 = vld [vmem:[#allocation6 + $0x60] ss:$144 sm:$0x30] }
 0x84e   :  { %v15563_v63 = vpack.c.bf16 %v8788_v20, %v8788_v20  ;;  %v9013_v21 = vrot.slane %v9009_v47, 2 }
 0x84f   :  { %v8820_v14 = vrot.slane %v11537_v52, 2  ;;  %v8978_v52 = vld [vmem:[#allocation6 + $0x50] ss:$144 sm:$0xc] }
 0x850   :  { %v7695_v4 = vpop.f32.mrf.mxu2  ;;  %11544 = vmatmul.msk.bf16.vlgmr.msrb.gmra.mxu0 %vm7195_vm12, %v15563_v63  ;;  %v9028_v15 = vsel %vm2346_vm3, %v9013_v21, 0 }
 0x851   :  { %v8822_v10 = vsel %vm2990_vm8, %v8820_v14, %v8821_v27  ;;  %9042 = vmatpush.bf16.msra.mxu0 %v9028_v15  ;;  %v11555_v27 = vld [vmem:[#allocation7 + $0x224] sm:$0xf]  ;;  %v8932_v4 = vsel %vm2346_vm3, %v8918_v7, 0  ;;  %v8885_v7 = vld [vmem:[#allocation6 + $0x4e] ss:$144 sm:$0xc] }
 0x852   :  { %v7773_v3 = vpop.f32.mrf.mxu1  ;;  %v11556_v44 = vor.u32 %v12188_v13, %v11555_v27  ;;  %v12192_v15 = vld [vmem:[#allocation7 + $0x25c] sm:$0xf]  ;;  %v9084_v27 = vld [vmem:[#allocation6 + $0x60] ss:$144 sm:$0xc0] }
 0x853   :  { %v7708_v46 = vpop.f32.mrf.mxu3  ;;  %v7803_v43 = vadd.f32 %v7773_v3, %v15528_v60  ;;  %v11526_v60 = vor.u32 %v12182_v45, %v11525_v41  ;;  %v8982_v3 = vld [vmem:[#allocation6 + $0x50] ss:$144 sm:$0xc0] }
 0x854   :  { %v8979_v46 = vor.u32 %v8978_v52, %v8977_v31  ;;  %v9184_v52 = vld [vmem:[#allocation7 + $0x288] sm:$0xff] }
 0x855   :  { %11497 = vmatmul.msk.bf16.vlgmr.msrb.gmra.mxu1 %vm7195_vm12, %v8501_v25  ;;  %11498 = vmatmul.msk.bf16.vlgmr.msrb.gmra.mxu2 %vm7195_vm12, %v8501_v25 }
 0x856   :  { %8771 = vmatpush.bf16.msrb.mxu1 %v8737_v59  ;;  %8847 = vmatpush.bf16.msrb.mxu2 %v8833_v35  ;;  %v8981_v38 = vor.u32 %v8980_v16, %v8979_v46  ;;  %v9198_v46 = vunpack.c.l.b16 %v9184_v52 }
 0x858   :  { %11499 = vmatmul.msk.bf16.vlgmr.msra.gmra.mxu3 %vm7195_vm12, %v8501_v25  ;;  %v7786_v55 = vpop.f32.mrf.mxu2  ;;  %v11548_v25 = vor.u32 %v12187_v29, %v11547_v30  ;;  %v8983_v35 = vor.u32 %v8982_v3, %v8981_v38  ;;  %v11577_v29 = vld [vmem:[#allocation7 + $0x258] sm:$0xf] }
 0x859   :  { %8860 = vmatpush.bf16.msra.mxu3 %v8836_v5  ;;  %v7804_v51 = vadd.f32 %v7786_v55, %v15538_v18  ;;  %v8917_v18 = vpack.c.b16 %v8911_v49, %v8911_v49  ;;  %v9091_v5 = vld [vmem:[#allocation7 + $0x270] sm:$0x33]  ;;  %v11578_v13 = vor.u32 %v12193_v50, %v11577_v29 }
 0x85a   :  { %v7775_v54 = vpop.f32.mrf.mxu1  ;;  %8772 = vmatpush.bf16.msrb.mxu1 %v11526_v60  ;;  %8848 = vmatpush.bf16.msrb.mxu2 %v8819_v1  ;;  %v15585_v34 = vpack.c.bf16 %v8983_v35, %v8983_v35  ;;  %v11564_v60 = vld [vmem:[#allocation7 + $0x240] sm:$0xf0]  ;;  %v9105_v20 = vunpack.c.l.b16 %v9091_v5  ;;  %v9106_v55 = vunpack.c.h.b16 %v9091_v5  ;;  %v11570_v1 = vld [vmem:[#allocation7 + $0x23c] sm:$0xc]  ;;  %v9204_v35 = vpack.c.b16 %v9198_v46, %v9198_v46  ;;  %v9286_v50 = vld [vmem:[#allocation7 + $0x2ac] sm:$0x33] }
 0x85b   :  { %v7799_v12 = vpop.f32.mrf.mxu3  ;;  %v8929_v53 = vsel %vm2346_vm3, %v8917_v18, 0  ;;  %v9080_v54 = vld [vmem:[#allocation6 + $0x60] ss:$144 sm:$0xc]  ;;  %v9301_v46 = vunpack.c.h.b16 %v9286_v50 }
 0x85c   :  { %v7805_v11 = vadd.f32 %v7799_v12, %v15541_v28  ;;  %v12190_v28 = vld [vmem:[#allocation7 + $0x23c] sm:$0xf0]  ;;  %v11567_v12 = vor.u32 %v12189_v40, %v11564_v60  ;;  %v9112_v8 = vpack.c.b16 %v9106_v55, %v9106_v55  ;;  %v9081_v47 = vor.u32 %v9080_v54, %v9079_v39  ;;  %v12196_v40 = vld [vmem:[#allocation7 + $0x278] sm:$0xf0] }
 0x85d   :  { %8861 = vmatpush.bf16.msra.mxu3 %v8822_v10  ;;  %v11563_v42 = vor.u32 %v12190_v28, %v11562_v48  ;;  %v12191_v10 = vld [vmem:[#allocation7 + $0x244] sm:$0xf0]  ;;  %v9208_v55 = vrot.slane %v9204_v35, 2  ;;  %v9172_v54 = vld [vmem:[#allocation6 + $0x62] ss:$144 sm:$0x3] }
 0x85e   :  { %v9124_v0 = vsel %vm2346_vm3, %v9112_v8, 0  ;;  %v11571_v61 = vor.u32 %v12191_v10, %v11570_v1  ;;  %v11600_v10 = vld [vmem:[#allocation7 + $0x278] sm:$0xc] }
 0x85f   :  { %v9012_v62 = vrot.slane %v11563_v42, 2  ;;  %v11579_v42 = vld [vmem:[#allocation7 + $0x264] sm:$0xf0] }
 0x860   :  { %v7788_v6 = vpop.f32.mrf.mxu2  ;;  %v11582_v9 = vor.u32 %v12192_v15, %v11579_v42  ;;  %v9223_v15 = vsel %vm2346_vm3, %v9208_v55, 0 }
 0x861   :  { %v9014_v19 = vsel %vm2990_vm8, %v9012_v62, %v9013_v21  ;;  %v8884_v21 = vld [vmem:[#allocation6 + $0x4e] ss:$144 sm:$0x3]  ;;  %v9015_v6 = vrot.slane %v11567_v12, 2 }
 0x862   :  { %v7875_v56 = vpop.f32.mrf.mxu1  ;;  %9043 = vmatpush.bf16.msra.mxu0 %v9014_v19  ;;  %v8886_v62 = vor.u32 %v8885_v7, %v8884_v21  ;;  %v9175_v21 = vld [vmem:[#allocation6 + $0x62] ss:$144 sm:$0x30] }
 0x863   :  { %v7801_v26 = vpop.f32.mrf.mxu3  ;;  %v15570_v17 = vadd.f32 %v7875_v56, %v7803_v43  ;;  %v8990_v43 = vld [vmem:[#allocation7 + $0x254] sm:$0xf]  ;;  %v9083_v56 = vor.u32 %v9082_v37, %v9081_v47 }
 0x865   :  { %11513 = vmatmul.msk.bf16.vlgmr.msra.gmra.mxu1 %vm7195_vm12, %v15521_v2  ;;  %11514 = vmatmul.msk.bf16.vlgmr.msra.gmra.mxu2 %vm7195_vm12, %v15521_v2  ;;  %v9005_v2 = vunpack.c.l.b16 %v8990_v43  ;;  %v9085_v31 = vor.u32 %v9084_v27, %v9083_v56  ;;  %v8889_v43 = vld [vmem:[#allocation6 + $0x4e] ss:$144 sm:$0xc0]  ;;  %v9177_v56 = vld [vmem:[#allocation6 + $0x62] ss:$144 sm:$0xc0] }
 0x866   :  { %8940 = vmatpush.bf16.msra.mxu1 %v8926_v57  ;;  %8953 = vmatpush.bf16.msra.mxu2 %v8929_v53  ;;  %v9018_v53 = vrot.slane %v11571_v61, 2  ;;  %v9173_v61 = vld [vmem:[#allocation6 + $0x62] ss:$144 sm:$0xc] }
 0x867   :  { %v9011_v32 = vpack.c.b16 %v9005_v2, %v9005_v2  ;;  %11572 = vmatmul.msk.bf16.vlgmr.msra.gmra.mxu0 %vm7195_vm12, %v15585_v34  ;;  %v15610_v2 = vpack.c.bf16 %v9085_v31, %v9085_v31  ;;  %v9300_v31 = vunpack.c.l.b16 %v9286_v50 }
 0x868   :  { %11527 = vmatmul.msk.bf16.vlgmr.msrb.gmra.mxu3 %vm7195_vm12, %v15543_v33  ;;  %v7888_v59 = vpop.f32.mrf.mxu2  ;;  %9148 = vmatpush.bf16.msrb.mxu0 %v9124_v0 }
 0x869   :  { %8966 = vmatpush.bf16.msrb.mxu3 %v8932_v4  ;;  %v15581_v41 = vadd.f32 %v7888_v59, %v7804_v51  ;;  %v9016_v51 = vrot.slane %v9010_v58, 2  ;;  %v9019_v22 = vrot.slane %v9011_v32, 2  ;;  %v11592_v58 = vld [vmem:[#allocation7 + $0x270] sm:$0xc]  ;;  %v11594_v32 = vld [vmem:[#allocation7 + $0x27c] sm:$0xf0] }
 0x86a   :  { %v7877_v14 = vpop.f32.mrf.mxu1  ;;  %8941 = vmatpush.bf16.msra.mxu1 %v11548_v25  ;;  %8954 = vmatpush.bf16.msra.mxu2 %v11552_v24  ;;  %v9199_v25 = vunpack.c.h.b16 %v9184_v52  ;;  %v9185_v24 = vld [vmem:[#allocation7 + $0x290] sm:$0xf]  ;;  %v11593_v39 = vor.u32 %v12196_v40, %v11592_v58  ;;  %v9287_v52 = vld [vmem:[#allocation7 + $0x2b4] sm:$0x3] }
 0x86b   :  { %v7901_v45 = vpop.f32.mrf.mxu3  ;;  %v9031_v28 = vsel %vm2346_vm3, %v9016_v51, 0  ;;  %v9034_v57 = vsel %vm2346_vm3, %v9019_v22, 0  ;;  %v9017_v4 = vsel %vm2990_vm8, %v9015_v6, %v9016_v51  ;;  %v9020_v19 = vsel %vm2990_vm8, %v9018_v53, %v9019_v22  ;;  %v12197_v51 = vld [vmem:[#allocation7 + $0x280] sm:$0xf0]  ;;  %v12194_v6 = vld [vmem:[#allocation7 + $0x268] sm:$0xf0] }
 0x86c   :  { %v15583_v23 = vadd.f32 %v7901_v45, %v7805_v11  ;;  %v9111_v11 = vpack.c.b16 %v9105_v20, %v9105_v20  ;;  %9149 = vmatpush.bf16.msrb.mxu0 %v11582_v9  ;;  %v9200_v59 = vunpack.c.l.b16 %v9185_v24  ;;  %v9205_v5 = vpack.c.b16 %v9199_v25, %v9199_v25  ;;  %v11607_v40 = vld [vmem:[#allocation7 + $0x294] sm:$0xf] }
 0x86d   :  { %8967 = vmatpush.bf16.msrb.mxu3 %v11556_v44 }
 0x86e   :  { %v9121_v30 = vsel %vm2346_vm3, %v9111_v11, 0  ;;  %v9206_v14 = vpack.c.b16 %v9200_v59, %v9200_v59  ;;  %v9211_v1 = vrot.slane %v9205_v5, 2  ;;  %v11601_v11 = vor.u32 %v12197_v51, %v11600_v10 }
 0x870   :  { %v7890_v49 = vpop.f32.mrf.mxu2  ;;  %v9214_v60 = vrot.slane %v9206_v14, 2  ;;  %v9213_v37 = vrot.slane %v11601_v11, 2  ;;  %v9226_v42 = vsel %vm2346_vm3, %v9211_v1, 0  ;;  %v9370_v11 = vld [vmem:[#allocation6 + $0x66] ss:$144 sm:$0x30] }
 0x872   :  { %v7968_v48 = vpop.f32.mrf.mxu1  ;;  %v9229_v8 = vsel %vm2346_vm3, %v9214_v60, 0  ;;  %v9215_v53 = vsel %vm2990_vm8, %v9213_v37, %v9214_v60 }
 0x873   :  { %v7903_v18 = vpop.f32.mrf.mxu3  ;;  %v15592_v26 = vadd.f32 %v7968_v48, %v15570_v17  ;;  %v8887_v17 = vld [vmem:[#allocation6 + $0x4e] ss:$144 sm:$0x30]  ;;  %9263 = vmatpush.bf16.msra.mxu0 %v9229_v8  ;;  %v12200_v8 = vld [vmem:[#allocation7 + $0x2a4] sm:$0xf0] }
 0x874   :  { %v8888_v3 = vor.u32 %v8887_v17, %v8886_v62  ;;  %v9174_v18 = vor.u32 %v9173_v61, %v9172_v54 }
 0x875   :  { %11529 = vmatmul.msk.bf16.vlgmr.msrb.gmra.mxu1 %vm7195_vm12, %v15543_v33  ;;  %11542 = vmatmul.msk.bf16.vlgmr.msrb.gmra.mxu2 %vm7195_vm12, %v15563_v63  ;;  %v9092_v33 = vld [vmem:[#allocation7 + $0x278] sm:$0x3] }
 0x876   :  { %9055 = vmatpush.bf16.msrb.mxu1 %v9031_v28  ;;  %9068 = vmatpush.bf16.msrb.mxu2 %v9034_v57  ;;  %v9107_v45 = vunpack.c.l.b16 %v9092_v33  ;;  %v11585_v28 = vld [vmem:[#allocation7 + $0x260] sm:$0xf]  ;;  %v9207_v57 = vrot.slane %v11593_v39, 2  ;;  %v9176_v29 = vor.u32 %v9175_v21, %v9174_v18  ;;  %v9367_v39 = vld [vmem:[#allocation6 + $0x66] ss:$144 sm:$0x3] }
 0x877   :  { %11588 = vmatmul.msk.bf16.vlgmr.msrb.gmra.mxu0 %vm7195_vm12, %v15610_v2 }
 0x878   :  { %11543 = vmatmul.msk.bf16.vlgmr.msra.gmra.mxu3 %vm7195_vm12, %v15563_v63  ;;  %v7981_v16 = vpop.f32.mrf.mxu2  ;;  %v9113_v20 = vpack.c.b16 %v9107_v45, %v9107_v45  ;;  %v9178_v9 = vor.u32 %v9177_v56, %v9176_v29  ;;  %v9209_v62 = vsel %vm2990_vm8, %v9207_v57, %v9208_v55  ;;  %9264 = vmatpush.bf16.msra.mxu0 %v9215_v53  ;;  %v11622_v45 = vld [vmem:[#allocation7 + $0x2ac] sm:$0xc]  ;;  %v11609_v55 = vld [vmem:[#allocation7 + $0x2a0] sm:$0xf0]  ;;  %v12201_v53 = vld [vmem:[#allocation7 + $0x2b0] sm:$0xc] }
 0x879   :  { %9135 = vmatpush.bf16.msra.mxu3 %v9121_v30  ;;  %v15605_v36 = vadd.f32 %v7981_v16, %v15581_v41  ;;  %v8890_v41 = vor.u32 %v8889_v43, %v8888_v3  ;;  %v15626_v16 = vld [vmem:[#allocation7 + $0x2c4] sm:$0xff]  ;;  %v9302_v3 = vunpack.c.l.b16 %v9287_v52 }
 0x87a   :  { %v7970_v38 = vpop.f32.mrf.mxu1  ;;  %9056 = vmatpush.bf16.msrb.mxu1 %v9017_v4  ;;  %9069 = vmatpush.bf16.msrb.mxu2 %v9020_v19  ;;  %v9127_v48 = vsel %vm2346_vm3, %v9113_v20, 0  ;;  %v9393_v25 = vunpack.c.l.b16 %v15626_v16  ;;  %v12198_v20 = vld [vmem:[#allocation7 + $0x298] sm:$0xf]  ;;  %v9394_v61 = vunpack.c.h.b16 %v15626_v16 }
 0x87b   :  { %v7994_v63 = vpop.f32.mrf.mxu3  ;;  %v8891_v0 = vpack.c.bf16 %v8890_v41, %v8890_v41  ;;  %v9306_v38 = vpack.c.b16 %v9300_v31, %v9300_v31  ;;  %v9308_v59 = vpack.c.b16 %v9302_v3, %v9302_v3  ;;  %v11612_v37 = vor.u32 %v12198_v20, %v11609_v55  ;;  %v9469_v52 = vld [vmem:[#allocation6 + $0x68] ss:$144 sm:$0x3]  ;;  %v12205_v20 = vld [vmem:[#allocation7 + $0x2d8] sm:$0xf0] }
 0x87c   :  { %v15608_v44 = vadd.f32 %v7994_v63, %v15583_v23  ;;  %v12195_v23 = vld [vmem:[#allocation7 + $0x274] sm:$0xc]  ;;  %v15630_v63 = vpack.c.bf16 %v9178_v9, %v9178_v9  ;;  %v9399_v24 = vpack.c.b16 %v9393_v25, %v9393_v25  ;;  %v9400_v29 = vpack.c.b16 %v9394_v61, %v9394_v61 }
 0x87d   :  { %9136 = vmatpush.bf16.msra.mxu3 %v11578_v13  ;;  %v11597_v22 = vor.u32 %v12195_v23, %v11594_v32  ;;  %v9316_v58 = vsel %vm2346_vm3, %v9306_v38, 0  ;;  %v12199_v23 = vld [vmem:[#allocation7 + $0x29c] sm:$0xf0]  ;;  %v9472_v38 = vld [vmem:[#allocation6 + $0x68] ss:$144 sm:$0x30] }
 0x87e   :  { %v9403_v43 = vrot.slane %v9399_v24, 2 }
 0x87f   :  { %v9210_v30 = vrot.slane %v11597_v22, 2  ;;  %v9368_v22 = vld [vmem:[#allocation6 + $0x66] ss:$144 sm:$0xc] }
 0x880   :  { %v7983_v12 = vpop.f32.mrf.mxu2  ;;  %v9418_v5 = vsel %vm2346_vm3, %v9403_v43, 0 }
 0x881   :  { %v9212_v17 = vsel %vm2990_vm8, %v9210_v30, %v9211_v1  ;;  %9432 = vmatpush.bf16.msrb.mxu0 %v9418_v5  ;;  %v11615_v1 = vld [vmem:[#allocation7 + $0x29c] sm:$0xf]  ;;  %v9322_v12 = vsel %vm2346_vm3, %v9308_v59, 0  ;;  %v9275_v59 = vld [vmem:[#allocation6 + $0x64] ss:$144 sm:$0xc] }
 0x882   :  { %v8070_v47 = vpop.f32.mrf.mxu1  ;;  %v11616_v18 = vor.u32 %v12200_v8, %v11615_v1  ;;  %v12204_v5 = vld [vmem:[#allocation7 + $0x2d4] sm:$0xf]  ;;  %v9474_v1 = vld [vmem:[#allocation6 + $0x68] ss:$144 sm:$0xc0] }
 0x883   :  { %v7996_v49 = vpop.f32.mrf.mxu3  ;;  %v8100_v7 = vadd.f32 %v8070_v47, %v15592_v26  ;;  %v11586_v26 = vor.u32 %v12194_v6, %v11585_v28  ;;  %v9372_v47 = vld [vmem:[#allocation6 + $0x66] ss:$144 sm:$0xc0] }
 0x884   :  { %v9369_v49 = vor.u32 %v9368_v22, %v9367_v39 }
 0x885   :  { %11557 = vmatmul.msk.bf16.vlgmr.msra.gmra.mxu1 %vm7195_vm12, %v8891_v0  ;;  %11558 = vmatmul.msk.bf16.vlgmr.msra.gmra.mxu2 %vm7195_vm12, %v8891_v0 }
 0x886   :  { %9161 = vmatpush.bf16.msra.mxu1 %v9127_v48  ;;  %9237 = vmatpush.bf16.msra.mxu2 %v9223_v15  ;;  %v9371_v21 = vor.u32 %v9370_v11, %v9369_v49 }
 0x887   :  { %11604 = vmatmul.msk.bf16.vlgmr.msra.gmra.mxu0 %vm7195_vm12, %v15630_v63 }
 0x888   :  { %11559 = vmatmul.msk.bf16.vlgmr.msrb.gmra.mxu3 %vm7195_vm12, %v8891_v0  ;;  %v8083_v27 = vpop.f32.mrf.mxu2  ;;  %v11608_v0 = vor.u32 %v12199_v23, %v11607_v40  ;;  %v9373_v15 = vor.u32 %v9372_v47, %v9371_v21  ;;  %v11637_v23 = vld [vmem:[#allocation7 + $0x2d0] sm:$0xf]  ;;  %v9279_v47 = vld [vmem:[#allocation6 + $0x64] ss:$144 sm:$0xc0] }
 0x889   :  { %9250 = vmatpush.bf16.msrb.mxu3 %v9226_v42  ;;  %v8101_v4 = vadd.f32 %v8083_v27, %v15605_v36  ;;  %v9307_v36 = vpack.c.b16 %v9301_v46, %v9301_v46  ;;  %v9481_v42 = vld [vmem:[#allocation7 + $0x2e8] sm:$0x33]  ;;  %v11638_v8 = vor.u32 %v12205_v20, %v11637_v23 }
 0x88a   :  { %v8072_v33 = vpop.f32.mrf.mxu1  ;;  %9162 = vmatpush.bf16.msra.mxu1 %v11586_v26  ;;  %9238 = vmatpush.bf16.msra.mxu2 %v9209_v62  ;;  %v15652_v56 = vpack.c.bf16 %v9373_v15, %v9373_v15  ;;  %v11624_v26 = vld [vmem:[#allocation7 + $0x2b8] sm:$0xf0]  ;;  %v9495_v9 = vunpack.c.l.b16 %v9481_v42  ;;  %v9496_v27 = vunpack.c.h.b16 %v9481_v42  ;;  %v11630_v62 = vld [vmem:[#allocation7 + $0x2b4] sm:$0xc] }
 0x88b   :  { %v8096_v13 = vpop.f32.mrf.mxu3  ;;  %v9319_v32 = vsel %vm2346_vm3, %v9307_v36, 0  ;;  %v9470_v33 = vld [vmem:[#allocation6 + $0x68] ss:$144 sm:$0xc] }
 0x88c   :  { %v8102_v19 = vadd.f32 %v8096_v13, %v15608_v44  ;;  %v12202_v44 = vld [vmem:[#allocation7 + $0x2b4] sm:$0xf0]  ;;  %v11627_v13 = vor.u32 %v12201_v53, %v11624_v26  ;;  %v9502_v31 = vpack.c.b16 %v9496_v27, %v9496_v27  ;;  %v9471_v24 = vor.u32 %v9470_v33, %v9469_v52 }
 0x88d   :  { %9251 = vmatpush.bf16.msrb.mxu3 %v9212_v17  ;;  %v11623_v14 = vor.u32 %v12202_v44, %v11622_v45  ;;  %v12203_v17 = vld [vmem:[#allocation7 + $0x2bc] sm:$0xf0] }
 0x88e   :  { %v9514_v25 = vsel %vm2346_vm3, %v9502_v31, 0  ;;  %v11631_v3 = vor.u32 %v12203_v17, %v11630_v62 }
 0x88f   :  { %v9402_v10 = vrot.slane %v11623_v14, 2  ;;  %v11639_v14 = vld [vmem:[#allocation7 + $0x2dc] sm:$0xf0] }
 0x890   :  { %v8085_v35 = vpop.f32.mrf.mxu2  ;;  %v11642_v55 = vor.u32 %v12204_v5, %v11639_v14 }
 0x891   :  { %v9404_v54 = vsel %vm2990_vm8, %v9402_v10, %v9403_v43  ;;  %v9274_v43 = vld [vmem:[#allocation6 + $0x64] ss:$144 sm:$0x3]  ;;  %v9405_v35 = vrot.slane %v11627_v13, 2 }
 0x892   :  { %v8163_v60 = vpop.f32.mrf.mxu1  ;;  %9433 = vmatpush.bf16.msrb.mxu0 %v9404_v54  ;;  %v9276_v10 = vor.u32 %v9275_v59, %v9274_v43 }
 0x893   :  { %v8098_v41 = vpop.f32.mrf.mxu3  ;;  %v15637_v51 = vadd.f32 %v8163_v60, %v8100_v7  ;;  %v9380_v7 = vld [vmem:[#allocation7 + $0x2cc] sm:$0xf]  ;;  %v9473_v60 = vor.u32 %v9472_v38, %v9471_v24 }
 0x895   :  { %11573 = vmatmul.msk.bf16.vlgmr.msrb.gmra.mxu1 %vm7195_vm12, %v15585_v34  ;;  %11574 = vmatmul.msk.bf16.vlgmr.msrb.gmra.mxu2 %vm7195_vm12, %v15585_v34  ;;  %v9395_v34 = vunpack.c.l.b16 %v9380_v7  ;;  %v9475_v39 = vor.u32 %v9474_v1, %v9473_v60 }
 0x896   :  { %9330 = vmatpush.bf16.msrb.mxu1 %v9316_v58  ;;  %9343 = vmatpush.bf16.msrb.mxu2 %v9319_v32  ;;  %v9408_v32 = vrot.slane %v11631_v3, 2 }
 0x897   :  { %v9401_v50 = vpack.c.b16 %v9395_v34, %v9395_v34  ;;  %11632 = vmatmul.msk.bf16.vlgmr.msrb.gmra.mxu0 %vm7195_vm12, %v15652_v56 }
 0x898   :  { %11587 = vmatmul.msk.bf16.vlgmr.msra.gmra.mxu3 %vm7195_vm12, %v15610_v2  ;;  %v8176_v48 = vpop.f32.mrf.mxu2  ;;  %9538 = vmatpush.bf16.msra.mxu0 %v9514_v25 }
 0x899   :  { %9356 = vmatpush.bf16.msra.mxu3 %v9322_v12  ;;  %v15648_v28 = vadd.f32 %v8176_v48, %v8101_v4  ;;  %v9406_v4 = vrot.slane %v9400_v29, 2  ;;  %v9409_v16 = vrot.slane %v9401_v50, 2 }
 0x89a   :  { %v8165_v30 = vpop.f32.mrf.mxu1  ;;  %9331 = vmatpush.bf16.msrb.mxu1 %v11608_v0  ;;  %9344 = vmatpush.bf16.msrb.mxu2 %v11612_v37  ;;  %v9476_v37 = vpack.c.bf16 %v9475_v39, %v9475_v39 }
 0x89b   :  { %v8189_v6 = vpop.f32.mrf.mxu3  ;;  %v9421_v44 = vsel %vm2346_vm3, %v9406_v4, 0  ;;  %v9424_v58 = vsel %vm2346_vm3, %v9409_v16, 0  ;;  %v9407_v12 = vsel %vm2990_vm8, %v9405_v35, %v9406_v4  ;;  %v9410_v11 = vsel %vm2990_vm8, %v9408_v32, %v9409_v16  ;;  %v11645_v30 = vld [vmem:[#allocation7 + $0x2d8] sm:$0xf] }
 0x89c   :  { %v15650_v57 = vadd.f32 %v8189_v6, %v8102_v19  ;;  %v9501_v19 = vpack.c.b16 %v9495_v9, %v9495_v9  ;;  %9539 = vmatpush.bf16.msra.mxu0 %v11642_v55 }
 0x89d   :  { %9357 = vmatpush.bf16.msra.mxu3 %v11616_v18 }
 0x89e   :  { %v9511_v40 = vsel %vm2346_vm3, %v9501_v19, 0 }
 0x8a0   :  { %v8178_v46 = vpop.f32.mrf.mxu2 }
 0x8a2   :  { %v8265_v45 = vpop.f32.mrf.mxu1 }
 0x8a3   :  { %v8191_v36 = vpop.f32.mrf.mxu3  ;;  %v8295_v41 = vadd.f32 %v8265_v45, %v15637_v51  ;;  %v9277_v51 = vld [vmem:[#allocation6 + $0x64] ss:$144 sm:$0x30] }
 0x8a4   :  { %v9278_v0 = vor.u32 %v9277_v51, %v9276_v10 }
 0x8a5   :  { %11589 = vmatmul.msk.bf16.vlgmr.msra.gmra.mxu1 %vm7195_vm12, %v15610_v2  ;;  %11602 = vmatmul.msk.bf16.vlgmr.msra.gmra.mxu2 %vm7195_vm12, %v15630_v63  ;;  %v9482_v2 = vld [vmem:[#allocation7 + $0x2f0] sm:$0x3] }
 0x8a6   :  { %9445 = vmatpush.bf16.msra.mxu1 %v9421_v44  ;;  %9458 = vmatpush.bf16.msra.mxu2 %v9424_v58  ;;  %v9497_v18 = vunpack.c.l.b16 %v9482_v2  ;;  %v9280_v21 = vor.u32 %v9279_v47, %v9278_v0 }
 0x8a7   :  { %11648 = vmatmul.msk.bf16.vlgmr.msra.gmra.mxu0 %vm7195_vm12, %v9476_v37 }
 0x8a8   :  { %11603 = vmatmul.msk.bf16.vlgmr.msrb.gmra.mxu3 %vm7195_vm12, %v15630_v63  ;;  %v8278_v22 = vpop.f32.mrf.mxu2  ;;  %v9503_v7 = vpack.c.b16 %v9497_v18, %v9497_v18  ;;  %v9281_v6 = vpack.c.bf16 %v9280_v21, %v9280_v21 }
 0x8a9   :  { %9525 = vmatpush.bf16.msrb.mxu3 %v9511_v40  ;;  %v8296_v54 = vadd.f32 %v8278_v22, %v15648_v28 }
 0x8aa   :  { %v8267_v63 = vpop.f32.mrf.mxu1  ;;  %9446 = vmatpush.bf16.msra.mxu1 %v9407_v12  ;;  %9459 = vmatpush.bf16.msra.mxu2 %v9410_v11  ;;  %v9517_v42 = vsel %vm2346_vm3, %v9503_v7, 0 }
 0x8ab   :  { %v8291_v49 = vpop.f32.mrf.mxu3  ;;  %v8655_v62 = vpop.f32.mrf.mxu0 }
 0x8ac   :  { %v8297_v61 = vadd.f32 %v8291_v49, %v15650_v57  ;;  %v12206_v57 = vld [vmem:[#allocation7 + $0x2e0] sm:$0xf0] }
 0x8ad   :  { %9526 = vmatpush.bf16.msrb.mxu3 %v11638_v8  ;;  %v11646_v29 = vor.u32 %v12206_v57, %v11645_v30 }
 0x8b0   :  { %v8280_v48 = vpop.f32.mrf.mxu2 }
 0x8b2   :  { %v8358_v15 = vpop.f32.mrf.mxu1 }
 0x8b3   :  { %v8293_v34 = vpop.f32.mrf.mxu3  ;;  %v8388_v28 = vadd.f32 %v8358_v15, %v8295_v41  ;;  %v8657_v31 = vpop.f32.mrf.mxu0 }
 0x8b5   :  { %11617 = vmatmul.msk.bf16.vlgmr.msrb.gmra.mxu1 %vm7195_vm12, %v9281_v6  ;;  %11618 = vmatmul.msk.bf16.vlgmr.msrb.gmra.mxu2 %vm7195_vm12, %v9281_v6 }
 0x8b6   :  { %9551 = vmatpush.bf16.msrb.mxu1 %v9517_v42 }
 0x8b8   :  { %11619 = vmatmul.msk.bf16.vlgmr.msra.gmra.mxu3 %vm7195_vm12, %v9281_v6  ;;  %v8371_v53 = vpop.f32.mrf.mxu2 }
 0x8b9   :  { %v8389_v26 = vadd.f32 %v8371_v53, %v8296_v54 }
 0x8ba   :  { %v8360_v27 = vpop.f32.mrf.mxu1  ;;  %9552 = vmatpush.bf16.msrb.mxu1 %v11646_v29 }
 0x8bb   :  { %v8384_v50 = vpop.f32.mrf.mxu3  ;;  %v8761_v3 = vpop.f32.mrf.mxu0 }
 0x8bc   :  { %v8390_v9 = vadd.f32 %v8384_v50, %v8297_v61 }
 0x8c0   :  { %v8373_v17 = vpop.f32.mrf.mxu2 }
 0x8c2   :  { %v8460_v13 = vpop.f32.mrf.mxu1 }
 0x8c3   :  { %v8386_v4 = vpop.f32.mrf.mxu3  ;;  %v8490_v52 = vadd.f32 %v8460_v13, %v8388_v28  ;;  %v8763_v43 = vpop.f32.mrf.mxu0 }
 0x8c5   :  { %11633 = vmatmul.msk.bf16.vlgmr.msra.gmra.mxu1 %vm7195_vm12, %v15652_v56  ;;  %11634 = vmatmul.msk.bf16.vlgmr.msra.gmra.mxu2 %vm7195_vm12, %v15652_v56 }
 0x8c8   :  { %11647 = vmatmul.msk.bf16.vlgmr.msrb.gmra.mxu3 %vm7195_vm12, %v9476_v37  ;;  %v8473_v16 = vpop.f32.mrf.mxu2 }
 0x8c9   :  { %v8491_v19 = vadd.f32 %v8473_v16, %v8389_v26 }
 0x8ca   :  { %v8462_v25 = vpop.f32.mrf.mxu1 }
 0x8cb   :  { %v8486_v33 = vpop.f32.mrf.mxu3 }
 0x8cc   :  { %v8492_v46 = vadd.f32 %v8486_v33, %v8390_v9 }
 0x8cd   :  { %v8876_v41 = vpop.f32.mrf.mxu0 }
 0x8d0   :  { %v8475_v24 = vpop.f32.mrf.mxu2 }
 0x8d2   :  { %v8553_v36 = vpop.f32.mrf.mxu1 }
 0x8d3   :  { %v8488_v38 = vpop.f32.mrf.mxu3  ;;  %v8583_v59 = vadd.f32 %v8553_v36, %v8490_v52 }
 0x8d5   :  { %v8685_v45 = vadd.f32 %v8655_v62, %v8583_v59  ;;  %11649 = vmatmul.msk.bf16.vlgmr.msrb.gmra.mxu1 %vm7195_vm12, %v9476_v37  ;;  %v8878_v60 = vpop.f32.mrf.mxu0 }
 0x8d6   :  { %v9561_v60 = vld [vmem:[%s15715_s6] sm:$0x7] }
 0x8d8   :  { %v8566_v44 = vpop.f32.mrf.mxu2 }
 0x8d9   :  { %v8584_v35 = vadd.f32 %v8566_v44, %v8491_v19 }
 0x8da   :  { %v8555_v14 = vpop.f32.mrf.mxu1 }
 0x8db   :  { %v8579_v5 = vpop.f32.mrf.mxu3 }
 0x8dc   :  { %v8585_v56 = vadd.f32 %v8579_v5, %v8492_v46 }
 0x8e0   :  { %v8568_v58 = vpop.f32.mrf.mxu2 }
 0x8e2   :  { %v8668_v23 = vpop.f32.mrf.mxu1 }
 0x8e3   :  { %v8581_v40 = vpop.f32.mrf.mxu3  ;;  %v8686_v32 = vadd.f32 %v8668_v23, %v8584_v35 }
 0x8e4   :  { %v9045_v8 = vpop.f32.mrf.mxu0 }
 0x8e5   :  { %v8779_v20 = vadd.f32 %v8761_v3, %v8686_v32 }
 0x8e8   :  { %v8681_v55 = vpop.f32.mrf.mxu2 }
 0x8e9   :  { %v8687_v1 = vadd.f32 %v8681_v55, %v8585_v56 }
 0x8ea   :  { %v8670_v12 = vpop.f32.mrf.mxu1 }
 0x8eb   :  { %v8748_v10 = vpop.f32.mrf.mxu3 }
 0x8ec   :  { %v8778_v51 = vadd.f32 %v8748_v10, %v8685_v45  ;;  %v9047_v2 = vpop.f32.mrf.mxu0 }
 0x8ed   :  { %v9563_v2 = vperm.slane %v9561_v60, 0 }
 0x8f0   :  { %v8683_v39 = vpop.f32.mrf.mxu2 }
 0x8f2   :  { %v8774_v11 = vpop.f32.mrf.mxu1 }
 0x8f3   :  { %v8750_v22 = vpop.f32.mrf.mxu3  ;;  %v8780_v54 = vadd.f32 %v8774_v11, %v8687_v1 }
 0x8f4   :  { %v9151_v18 = vpop.f32.mrf.mxu0 }
 0x8f5   :  { %v8882_v49 = vadd.f32 %v8876_v41, %v8780_v54 }
 0x8f8   :  { %v8850_v0 = vpop.f32.mrf.mxu2 }
 0x8f9   :  { %v8880_v61 = vadd.f32 %v8850_v0, %v8778_v51  ;;  %v9564_v51 = vperm.slane %v9561_v60, 1 }
 0x8fa   :  { %v8776_v37 = vpop.f32.mrf.mxu1 }
 0x8fb   :  { %v8863_v63 = vpop.f32.mrf.mxu3 }
 0x8fc   :  { %v8881_v47 = vadd.f32 %v8863_v63, %v8779_v20  ;;  %v9153_v34 = vpop.f32.mrf.mxu0 }
 0x900   :  { %v8852_v21 = vpop.f32.mrf.mxu2 }
 0x902   :  { %v8943_v48 = vpop.f32.mrf.mxu1 }
 0x903   :  { %v8865_v7 = vpop.f32.mrf.mxu3  ;;  %v8973_v6 = vadd.f32 %v8943_v48, %v8880_v61 }
 0x904   :  { %v9266_v57 = vpop.f32.mrf.mxu0 }
 0x905   :  { %v9075_v15 = vadd.f32 %v9045_v8, %v8973_v6  ;;  %v9565_v6 = vperm.slane %v9561_v60, 2 }
 0x908   :  { %v8956_v28 = vpop.f32.mrf.mxu2 }
 0x909   :  { %v8974_v53 = vadd.f32 %v8956_v28, %v8881_v47 }
 0x90a   :  { %v8945_v30 = vpop.f32.mrf.mxu1 }
 0x90b   :  { %v8969_v42 = vpop.f32.mrf.mxu3 }
 0x90c   :  { %v9268_v9 = vpop.f32.mrf.mxu0  ;;  %v8975_v52 = vadd.f32 %v8969_v42, %v8882_v49 }
 0x910   :  { %v8958_v29 = vpop.f32.mrf.mxu2 }
 0x912   :  { %v9058_v50 = vpop.f32.mrf.mxu1 }
 0x913   :  { %v8971_v26 = vpop.f32.mrf.mxu3  ;;  %v9076_v27 = vadd.f32 %v9058_v50, %v8974_v53 }
 0x914   :  { %v9435_v31 = vpop.f32.mrf.mxu0 }
 0x915   :  { %v9169_v62 = vadd.f32 %v9151_v18, %v9076_v27 }
 0x918   :  { %v9071_v17 = vpop.f32.mrf.mxu2 }
 0x919   :  { %v9077_v19 = vadd.f32 %v9071_v17, %v8975_v52 }
 0x91a   :  { %v9060_v13 = vpop.f32.mrf.mxu1 }
 0x91b   :  { %v9138_v4 = vpop.f32.mrf.mxu3 }
 0x91c   :  { %v9437_v25 = vpop.f32.mrf.mxu0  ;;  %v9168_v40 = vadd.f32 %v9138_v4, %v9075_v15 }
 0x920   :  { %v9073_v16 = vpop.f32.mrf.mxu2 }
 0x922   :  { %v9164_v46 = vpop.f32.mrf.mxu1 }
 0x923   :  { %v9140_v33 = vpop.f32.mrf.mxu3  ;;  %v9170_v3 = vadd.f32 %v9164_v46, %v9077_v19 }
 0x924   :  { %v9541_v59 = vpop.f32.mrf.mxu0 }
 0x925   :  { %v9272_v24 = vadd.f32 %v9266_v57, %v9170_v3 }
 0x928   :  { %v9240_v38 = vpop.f32.mrf.mxu2 }
 0x929   :  { %v9270_v55 = vadd.f32 %v9240_v38, %v9168_v40 }
 0x92a   :  { %v9166_v43 = vpop.f32.mrf.mxu1 }
 0x92b   :  { %v9253_v36 = vpop.f32.mrf.mxu3 }
 0x92c   :  { %v9543_v5 = vpop.f32.mrf.mxu0  ;;  %v9271_v58 = vadd.f32 %v9253_v36, %v9169_v62 }
 0x930   :  { %v9242_v45 = vpop.f32.mrf.mxu2 }
 0x932   :  { %v9333_v35 = vpop.f32.mrf.mxu1 }
 0x933   :  { %v9255_v44 = vpop.f32.mrf.mxu3  ;;  %v9363_v12 = vadd.f32 %v9333_v35, %v9270_v55 }
 0x935   :  { %v9465_v22 = vadd.f32 %v9435_v31, %v9363_v12 }
 0x938   :  { %v9346_v56 = vpop.f32.mrf.mxu2 }
 0x939   :  { %v9364_v32 = vadd.f32 %v9346_v56, %v9271_v58 }
 0x93a   :  { %v9335_v41 = vpop.f32.mrf.mxu1 }
 0x93b   :  { %v9359_v14 = vpop.f32.mrf.mxu3 }
 0x93c   :  { %v9365_v18 = vadd.f32 %v9359_v14, %v9272_v24 }
 0x940   :  { %v9348_v23 = vpop.f32.mrf.mxu2 }
 0x942   :  { %v9448_v1 = vpop.f32.mrf.mxu1 }
 0x943   :  { %v9361_v20 = vpop.f32.mrf.mxu3  ;;  %v9466_v10 = vadd.f32 %v9448_v1, %v9364_v32 }
 0x945   :  { %v9559_v8 = vadd.f32 %v9541_v59, %v9466_v10 }
 0x947   :  { %v9570_v39 = vadd.f32 %v9564_v51, %v9559_v8 }
 0x948   :  { %v9461_v11 = vpop.f32.mrf.mxu2 }
 0x949   :  { %v9573_v54 = vmax.f32 %v9570_v39, 0.0  ;;  %v9467_v48 = vadd.f32 %v9461_v11, %v9365_v18 }
 0x94a   :  { %v9450_v61 = vpop.f32.mrf.mxu1 }
 0x94b   :  { %v9528_v49 = vpop.f32.mrf.mxu3  ;;  %v15685_v63 = vpack.c.bf16 %v9573_v54, %v9573_v54 }
 0x94c   :  { %v9558_v0 = vadd.f32 %v9528_v49, %v9465_v22 }
 0x94e   :  { %v9569_v47 = vadd.f32 %v9563_v2, %v9558_v0 }
 0x950   :  { %v9572_v37 = vmax.f32 %v9569_v47, 0.0  ;;  %v9463_v7 = vpop.f32.mrf.mxu2 }
 0x952   :  { %v15687_v21 = vpack.c.bf16 %v9572_v37, %v9572_v37  ;;  %v9554_v15 = vpop.f32.mrf.mxu1 }
 0x953   :  { %v9530_v34 = vpop.f32.mrf.mxu3  ;;  %v9560_v28 = vadd.f32 %v9554_v15, %v9467_v48 }
 0x955   :  { %v9571_v42 = vadd.f32 %v9565_v6, %v9560_v28 }
 0x957   :  { %v9574_v30 = vmax.f32 %v9571_v42, 0.0 }
 0x959   :  { %v15689_v57 = vpack.c.bf16 %v9574_v30, %v9574_v30 }
 0x95a   :  { %v9556_v29 = vpop.f32.mrf.mxu1 }
 0x95b   :  { %12342 = dma.done.wait [#allocation11 + $0x1], 6144 }
 0x95c   :  { %12343 = vsyncadd [#allocation11 + $0x1], 4294961152  ;;  %v11708_v53 = vld [vmem:[#allocation8 + $0x70] sm:$0xf]  ;;  %v12222_v26 = vld [vmem:[#allocation8 + $0x74] sm:$0xf0] }
 0x95d   :  { %v11772_v50 = vld [vmem:[#allocation8 + $0xf0] sm:$0xf]  ;;  %v11709_v9 = vor.u32 %v12222_v26, %v11708_v53  ;;  %v12238_v27 = vld [vmem:[#allocation8 + $0xf4] sm:$0xf0]  ;;  %v11700_v62 = vld [vmem:[#allocation8 + $0x60] sm:$0xf] }
 0x95e   :  { %v12220_v17 = vld [vmem:[#allocation8 + $0x64] sm:$0xf0]  ;;  %v11773_v4 = vor.u32 %v12238_v27, %v11772_v50  ;;  %v11764_v13 = vld [vmem:[#allocation8 + $0xe0] sm:$0xf]  ;;  %v11692_v19 = vld [vmem:[#allocation8 + $0x50] sm:$0xf] }
 0x95f   :  { %v12236_v31 = vld [vmem:[#allocation8 + $0xe4] sm:$0xf0]  ;;  %9876 = vmatpush.bf16.msrb.mxu2 %v11709_v9  ;;  %v11701_v52 = vor.u32 %v12220_v17, %v11700_v62  ;;  %v12218_v33 = vld [vmem:[#allocation8 + $0x54] sm:$0xf0]  ;;  %v11756_v46 = vld [vmem:[#allocation8 + $0xd0] sm:$0xf] }
 0x960   :  { %9889 = vmatpush.bf16.msra.mxu3 %v11773_v4  ;;  %v11765_v16 = vor.u32 %v12236_v31, %v11764_v13  ;;  %v12234_v25 = vld [vmem:[#allocation8 + $0xd4] sm:$0xf0]  ;;  %v11693_v3 = vor.u32 %v12218_v33, %v11692_v19  ;;  %v11684_v24 = vld [vmem:[#allocation8 + $0x40] sm:$0xf]  ;;  %v12216_v36 = vld [vmem:[#allocation8 + $0x44] sm:$0xf0] }
 0x961   :  { %v11757_v38 = vor.u32 %v12234_v25, %v11756_v46  ;;  %v11836_v43 = vld [vmem:[#allocation8 + $0x170] sm:$0xf]  ;;  %v12254_v59 = vld [vmem:[#allocation8 + $0x174] sm:$0xf0]  ;;  %v11748_v45 = vld [vmem:[#allocation8 + $0xc0] sm:$0xf]  ;;  %v11685_v41 = vor.u32 %v12216_v36, %v11684_v24 }
 0x962   :  { %v12232_v44 = vld [vmem:[#allocation8 + $0xc4] sm:$0xf0]  ;;  %v11837_v35 = vor.u32 %v12254_v59, %v11836_v43  ;;  %v11828_v5 = vld [vmem:[#allocation8 + $0x160] sm:$0xf]  ;;  %v12221_v14 = vld [vmem:[#allocation8 + $0x74] sm:$0xf] }
 0x963   :  { %9877 = vmatpush.bf16.msrb.mxu2 %v11701_v52  ;;  %v12252_v56 = vld [vmem:[#allocation8 + $0x164] sm:$0xf0]  ;;  %v11710_v40 = vld [vmem:[#allocation8 + $0x78] sm:$0xf0]  ;;  %v11749_v23 = vor.u32 %v12232_v44, %v11748_v45  ;;  %v11676_v60 = vld [vmem:[#allocation8 + $0x30] sm:$0xf] }
 0x964   :  { %9890 = vmatpush.bf16.msra.mxu3 %v11765_v16  ;;  %9902 = vmatpush.bf16.msrb.mxu0 %v11837_v35  ;;  %v11829_v58 = vor.u32 %v12252_v56, %v11828_v5  ;;  %v12214_v32 = vld [vmem:[#allocation8 + $0x34] sm:$0xf0]  ;;  %v11713_v20 = vor.u32 %v12221_v14, %v11710_v40  ;;  %v11820_v55 = vld [vmem:[#allocation8 + $0x150] sm:$0xf]  ;;  %v12219_v12 = vld [vmem:[#allocation8 + $0x64] sm:$0xf] }
 0x965   :  { %v11740_v1 = vld [vmem:[#allocation8 + $0xb0] sm:$0xf]  ;;  %v12230_v10 = vld [vmem:[#allocation8 + $0xb4] sm:$0xf0]  ;;  %v11677_v8 = vor.u32 %v12214_v32, %v11676_v60  ;;  %v11668_v39 = vld [vmem:[#allocation8 + $0x20] sm:$0xf] }
 0x966   :  { %v12250_v51 = vld [vmem:[#allocation8 + $0x154] sm:$0xf0]  ;;  %9915 = vmatpush.bf16.msra.mxu1 %v11713_v20  ;;  %v12212_v22 = vld [vmem:[#allocation8 + $0x24] sm:$0xf0]  ;;  %v11702_v2 = vld [vmem:[#allocation8 + $0x68] sm:$0xf0]  ;;  %v11741_v54 = vor.u32 %v12230_v10, %v11740_v1 }
 0x967   :  { %9878 = vmatpush.bf16.msrb.mxu2 %v11693_v3  ;;  %v11821_v11 = vor.u32 %v12250_v51, %v11820_v55  ;;  %v11732_v49 = vld [vmem:[#allocation8 + $0xa0] sm:$0xf]  ;;  %v11705_v0 = vor.u32 %v12219_v12, %v11702_v2  ;;  %v12248_v47 = vld [vmem:[#allocation8 + $0x144] sm:$0xf0]  ;;  %v12217_v18 = vld [vmem:[#allocation8 + $0x54] sm:$0xf]  ;;  %v11669_v34 = vor.u32 %v12212_v22, %v11668_v39 }
 0x968   :  { %9891 = vmatpush.bf16.msra.mxu3 %v11757_v38  ;;  %9903 = vmatpush.bf16.msrb.mxu0 %v11829_v58  ;;  %v11812_v61 = vld [vmem:[#allocation8 + $0x140] sm:$0xf]  ;;  %v12228_v37 = vld [vmem:[#allocation8 + $0xa4] sm:$0xf0]  ;;  %v11694_v7 = vld [vmem:[#allocation8 + $0x58] sm:$0xf0] }
 0x969   :  { %v11697_v48 = vor.u32 %v12217_v18, %v11694_v7  ;;  %v11660_v6 = vld [vmem:[#allocation8 + $0x10] sm:$0xf]  ;;  %v12210_v15 = vld [vmem:[#allocation8 + $0x14] sm:$0xf0]  ;;  %v11813_v28 = vor.u32 %v12248_v47, %v11812_v61  ;;  %v11733_v30 = vor.u32 %v12228_v37, %v11732_v49  ;;  %v12215_v53 = vld [vmem:[#allocation8 + $0x44] sm:$0xf] }
 0x96a   :  { %9916 = vmatpush.bf16.msra.mxu1 %v11705_v0  ;;  %v11804_v42 = vld [vmem:[#allocation8 + $0x130] sm:$0xf]  ;;  %v12246_v29 = vld [vmem:[#allocation8 + $0x134] sm:$0xf0]  ;;  %v11686_v26 = vld [vmem:[#allocation8 + $0x48] sm:$0xf0]  ;;  %v11661_v17 = vor.u32 %v12210_v15, %v11660_v6 }
 0x96b   :  { %9879 = vmatpush.bf16.msrb.mxu2 %v11685_v41  ;;  %v11724_v50 = vld [vmem:[#allocation8 + $0x90] sm:$0xf]  ;;  %v12226_v9 = vld [vmem:[#allocation8 + $0x94] sm:$0xf0]  ;;  %v11652_v27 = vld [vmem:[#allocation8] sm:$0xf]  ;;  %v11689_v62 = vor.u32 %v12215_v53, %v11686_v26  ;;  %v11805_v13 = vor.u32 %v12246_v29, %v11804_v42 }
 0x96c   :  { %9892 = vmatpush.bf16.msra.mxu3 %v11749_v23  ;;  %9904 = vmatpush.bf16.msrb.mxu0 %v11821_v11  ;;  %v12208_v4 = vld [vmem:[#allocation8 + $0x4] sm:$0xf0]  ;;  %v12213_v31 = vld [vmem:[#allocation8 + $0x34] sm:$0xf]  ;;  %v11678_v52 = vld [vmem:[#allocation8 + $0x38] sm:$0xf0]  ;;  %v11725_v16 = vor.u32 %v12226_v9, %v11724_v50 }
 0x96d   :  { %v11716_v19 = vld [vmem:[#allocation8 + $0x80] sm:$0xf]  ;;  %v12244_v46 = vld [vmem:[#allocation8 + $0x124] sm:$0xf0]  ;;  %v12237_v3 = vld [vmem:[#allocation8 + $0xf4] sm:$0xf]  ;;  %v11681_v43 = vor.u32 %v12213_v31, %v11678_v52  ;;  %v11653_v59 = vor.u32 %v12208_v4, %v11652_v27 }
 0x96e   :  { %9917 = vmatpush.bf16.msra.mxu1 %v11697_v48  ;;  %v11796_v33 = vld [vmem:[#allocation8 + $0x120] sm:$0xf]  ;;  %v12224_v25 = vld [vmem:[#allocation8 + $0x84] sm:$0xf0]  ;;  %v11774_v24 = vld [vmem:[#allocation8 + $0xf8] sm:$0xf0] }
 0x96f   :  { %9880 = vmatpush.bf16.msrb.mxu2 %v11677_v8  ;;  %v12253_v38 = vld [vmem:[#allocation8 + $0x174] sm:$0xf]  ;;  %v11838_v36 = vld [vmem:[#allocation8 + $0x178] sm:$0xf0]  ;;  %v11797_v45 = vor.u32 %v12244_v46, %v11796_v33  ;;  %v12211_v44 = vld [vmem:[#allocation8 + $0x24] sm:$0xf]  ;;  %v11717_v5 = vor.u32 %v12224_v25, %v11716_v19  ;;  %v11777_v56 = vor.u32 %v12237_v3, %v11774_v24 }
 0x970   :  { %9893 = vmatpush.bf16.msra.mxu3 %v11741_v54  ;;  %9905 = vmatpush.bf16.msrb.mxu0 %v11813_v28  ;;  %v11670_v35 = vld [vmem:[#allocation8 + $0x28] sm:$0xf0]  ;;  %v11788_v14 = vld [vmem:[#allocation8 + $0x110] sm:$0xf]  ;;  %v12242_v41 = vld [vmem:[#allocation8 + $0x114] sm:$0xf0]  ;;  %v11841_v58 = vor.u32 %v12253_v38, %v11838_v36 }
 0x971   :  { %v12235_v40 = vld [vmem:[#allocation8 + $0xe4] sm:$0xf]  ;;  %v11766_v23 = vld [vmem:[#allocation8 + $0xe8] sm:$0xf0]  ;;  %v11673_v20 = vor.u32 %v12211_v44, %v11670_v35  ;;  %v11789_v55 = vor.u32 %v12242_v41, %v11788_v14  ;;  %v12209_v1 = vld [vmem:[#allocation8 + $0x14] sm:$0xf] }
 0x972   :  { %9918 = vmatpush.bf16.msra.mxu1 %v11689_v62  ;;  %v12251_v60 = vld [vmem:[#allocation8 + $0x164] sm:$0xf]  ;;  %v11830_v32 = vld [vmem:[#allocation8 + $0x168] sm:$0xf0]  ;;  %v11662_v10 = vld [vmem:[#allocation8 + $0x18] sm:$0xf0]  ;;  %v11769_v51 = vor.u32 %v12235_v40, %v11766_v23 }
 0x973   :  { %9881 = vmatpush.bf16.msrb.mxu2 %v11669_v34  ;;  %v11780_v12 = vld [vmem:[#allocation8 + $0x100] sm:$0xf]  ;;  %v12240_v8 = vld [vmem:[#allocation8 + $0x104] sm:$0xf0]  ;;  %v11833_v39 = vor.u32 %v12251_v60, %v11830_v32  ;;  %v12233_v22 = vld [vmem:[#allocation8 + $0xd4] sm:$0xf]  ;;  %v11665_v49 = vor.u32 %v12209_v1, %v11662_v10 }
 0x974   :  { %9894 = vmatpush.bf16.msra.mxu3 %v11733_v30  ;;  %9906 = vmatpush.bf16.msrb.mxu0 %v11805_v13  ;;  %v11758_v11 = vld [vmem:[#allocation8 + $0xd8] sm:$0xf0]  ;;  %v12249_v2 = vld [vmem:[#allocation8 + $0x154] sm:$0xf]  ;;  %v11781_v0 = vor.u32 %v12240_v8, %v11780_v12  ;;  %v12207_v61 = vld [vmem:[#allocation8 + $0x4] sm:$0xf] }
 0x975   :  { %v11822_v54 = vld [vmem:[#allocation8 + $0x158] sm:$0xf0]  ;;  %v11654_v47 = vld [vmem:[#allocation8 + $0x8] sm:$0xf0]  ;;  %v11761_v37 = vor.u32 %v12233_v22, %v11758_v11  ;;  %v12231_v7 = vld [vmem:[#allocation8 + $0xc4] sm:$0xf] }
 0x976   :  { %9919 = vmatpush.bf16.msra.mxu1 %v11681_v43  ;;  %v11825_v18 = vor.u32 %v12249_v2, %v11822_v54  ;;  %v11750_v48 = vld [vmem:[#allocation8 + $0xc8] sm:$0xf0]  ;;  %v12247_v34 = vld [vmem:[#allocation8 + $0x144] sm:$0xf]  ;;  %v11657_v15 = vor.u32 %v12207_v61, %v11654_v47  ;;  %v12229_v30 = vld [vmem:[#allocation8 + $0xb4] sm:$0xf] }
 0x977   :  { %9882 = vmatpush.bf16.msrb.mxu2 %v11661_v17  ;;  %v11814_v6 = vld [vmem:[#allocation8 + $0x148] sm:$0xf0]  ;;  %v11753_v28 = vor.u32 %v12231_v7, %v11750_v48  ;;  %v11742_v29 = vld [vmem:[#allocation8 + $0xb8] sm:$0xf0]  ;;  %v12245_v53 = vld [vmem:[#allocation8 + $0x134] sm:$0xf] }
 0x978   :  { %9895 = vmatpush.bf16.msra.mxu3 %v11725_v16  ;;  %9907 = vmatpush.bf16.msrb.mxu0 %v11797_v45  ;;  %v11817_v42 = vor.u32 %v12247_v34, %v11814_v6  ;;  %v11806_v26 = vld [vmem:[#allocation8 + $0x138] sm:$0xf0]  ;;  %v11745_v50 = vor.u32 %v12229_v30, %v11742_v29  ;;  %v12227_v27 = vld [vmem:[#allocation8 + $0xa4] sm:$0xf]  ;;  %v11734_v62 = vld [vmem:[#allocation8 + $0xa8] sm:$0xf0] }
 0x979   :  { %v11809_v9 = vor.u32 %v12245_v53, %v11806_v26  ;;  %v12243_v17 = vld [vmem:[#allocation8 + $0x124] sm:$0xf]  ;;  %v11798_v4 = vld [vmem:[#allocation8 + $0x128] sm:$0xf0]  ;;  %v11737_v13 = vor.u32 %v12227_v27, %v11734_v62  ;;  %v12225_v52 = vld [vmem:[#allocation8 + $0x94] sm:$0xf] }
 0x97a   :  { %9920 = vmatpush.bf16.msra.mxu1 %v11673_v20  ;;  %v11801_v31 = vor.u32 %v12243_v17, %v11798_v4  ;;  %v11726_v16 = vld [vmem:[#allocation8 + $0x98] sm:$0xf0]  ;;  %v12241_v19 = vld [vmem:[#allocation8 + $0x114] sm:$0xf]  ;;  %v12223_v3 = vld [vmem:[#allocation8 + $0x84] sm:$0xf] }
 0x97b   :  { %9883 = vmatpush.bf16.msrb.mxu2 %v11653_v59  ;;  %v11790_v33 = vld [vmem:[#allocation8 + $0x118] sm:$0xf0]  ;;  %v11729_v46 = vor.u32 %v12225_v52, %v11726_v16  ;;  %v11718_v24 = vld [vmem:[#allocation8 + $0x88] sm:$0xf0]  ;;  %v12239_v38 = vld [vmem:[#allocation8 + $0x104] sm:$0xf] }
 0x97c   :  { %9896 = vmatpush.bf16.msra.mxu3 %v11717_v5  ;;  %9908 = vmatpush.bf16.msrb.mxu0 %v11789_v55  ;;  %v11793_v25 = vor.u32 %v12241_v19, %v11790_v33  ;;  %v11782_v36 = vld [vmem:[#allocation8 + $0x108] sm:$0xf0]  ;;  %v9630_v59 = vld [vmem:[%s15717_s8] sm:$0x3] }
 0x97d   :  { %v11785_v43 = vor.u32 %v12239_v38, %v11782_v36  ;;  %v9632_v45 = vperm.slane %v9630_v59, 0  ;;  %v9633_v55 = vperm.slane %v9630_v59, 1 }
 0x97e   :  { %9884 = vmatmul.bf16.vlgmr.msrb.gmra.mxu2 %v15687_v21  ;;  %9921 = vmatpush.bf16.msra.mxu1 %v11665_v49 }
 0x97f   :  { %9928 = vmatpush.bf16.msra.mxu2 %v11777_v56  ;;  %9897 = vmatmul.bf16.vlgmr.msra.gmra.mxu3 %v15685_v63 }
 0x980   :  { %9941 = vmatpush.bf16.msrb.mxu3 %v11841_v58  ;;  %9909 = vmatpush.bf16.msrb.mxu0 %v11781_v0 }
 0x982   :  { %9922 = vmatpush.bf16.msra.mxu1 %v11657_v15 }
 0x983   :  { %9929 = vmatpush.bf16.msra.mxu2 %v11769_v51  ;;  %9910 = vmatmul.bf16.vlgmr.msrb.gmra.mxu0 %v15689_v57 }
 0x984   :  { %9942 = vmatpush.bf16.msrb.mxu3 %v11833_v39 }
 0x985   :  { %9923 = vmatmul.bf16.vlgmr.msra.gmra.mxu1 %v15687_v21  ;;  %v11721_v21 = vor.u32 %v12223_v3, %v11718_v24 }
 0x987   :  { %9930 = vmatpush.bf16.msra.mxu2 %v11761_v37 }
 0x988   :  { %9943 = vmatpush.bf16.msrb.mxu3 %v11825_v18 }
 0x98b   :  { %9931 = vmatpush.bf16.msra.mxu2 %v11753_v28 }
 0x98c   :  { %9944 = vmatpush.bf16.msrb.mxu3 %v11817_v42 }
 0x98f   :  { %9932 = vmatpush.bf16.msra.mxu2 %v11745_v50 }
 0x990   :  { %9945 = vmatpush.bf16.msrb.mxu3 %v11809_v9 }
 0x993   :  { %9933 = vmatpush.bf16.msra.mxu2 %v11737_v13 }
 0x994   :  { %9946 = vmatpush.bf16.msrb.mxu3 %v11801_v31 }
 0x997   :  { %9934 = vmatpush.bf16.msra.mxu2 %v11729_v46 }
 0x998   :  { %9947 = vmatpush.bf16.msrb.mxu3 %v11793_v25 }
 0x99b   :  { %9935 = vmatpush.bf16.msra.mxu2 %v11721_v21 }
 0x99c   :  { %9948 = vmatpush.bf16.msrb.mxu3 %v11785_v43 }
 0x99e   :  { %9936 = vmatmul.bf16.vlgmr.msra.gmra.mxu2 %v15685_v63 }
 0x99f   :  { %9949 = vmatmul.bf16.vlgmr.msrb.gmra.mxu3 %v15689_v57 }
 0xa00   :  { %v9911_v56 = vpop.f32.mrf.mxu0 }
 0xa01   :  { %v9885_v44 = vpop.f32.mrf.mxu2 }
 0xa02   :  { %v9886_v35 = vadd.f32 %v9885_v44, %v9632_v45  ;;  %v9898_v5 = vpop.f32.mrf.mxu3  ;;  %v9924_v58 = vpop.f32.mrf.mxu1 }
 0xa03   :  { %v9925_v57 = vadd.f32 %v9924_v58, %v9633_v55 }
 0xa04   :  { %v9899_v14 = vadd.f32 %v9898_v5, %v9886_v35 }
 0xa06   :  { %v9912_v41 = vadd.f32 %v9911_v56, %v9899_v14 }
 0xa08   :  { %v9954_v40 = vmax.f32 %v9912_v41, 0.0  ;;  %v9913_v20 = vpop.f32.mrf.mxu0 }
 0xa09   :  { %v9887_v23 = vpop.f32.mrf.mxu2 }
 0xa0a   :  { %v9900_v60 = vpop.f32.mrf.mxu3  ;;  %v9956_v32 = vpack.c.bf16 %v9954_v40, %v9954_v40  ;;  %v9926_v63 = vpop.f32.mrf.mxu1 }
 0xa21   :  { %v9937_v1 = vpop.f32.mrf.mxu2 }
 0xa22   :  { %v9938_v10 = vadd.f32 %v9937_v1, %v9925_v57  ;;  %v9950_v51 = vpop.f32.mrf.mxu3 }
 0xa24   :  { %v9951_v12 = vadd.f32 %v9950_v51, %v9938_v10 }
 0xa26   :  { %v9955_v8 = vmax.f32 %v9951_v12, 0.0 }
 0xa28   :  { %v9957_v39 = vpack.c.bf16 %v9955_v8, %v9955_v8 }
 0xa29   :  { %v9939_v22 = vpop.f32.mrf.mxu2 }
 0xa2a   :  { %v9952_v11 = vpop.f32.mrf.mxu3 }
 0xa2b   :  { %12344 = dma.done.wait [#allocation11 + $0x2], 2048 }
 0xa2c   :  { %12345 = vsyncadd [#allocation11 + $0x2], 4294965248  ;;  %v12262_v2 = vld [vmem:[#allocation9 + $0x48] sm:$0xff]  ;;  %v12269_v0 = vld [vmem:[#allocation9 + $0x78] sm:$0xff] }
 0xa2d   :  { %v12270_v54 = vld [vmem:[#allocation9 + $0x28] sm:$0xff]  ;;  %10094 = vmatpush.bf16.msra.mxu0 %v12262_v2  ;;  %v12268_v47 = vld [vmem:[#allocation9 + $0x70] sm:$0xff]  ;;  %v12267_v18 = vld [vmem:[#allocation9 + $0x60] sm:$0xff] }
 0xa2e   :  { %10107 = vmatpush.bf16.msrb.mxu1 %v12270_v54  ;;  %v12261_v49 = vld [vmem:[#allocation9 + $0x8] sm:$0xff]  ;;  %v12259_v37 = vld [vmem:[#allocation9 + $0x50] sm:$0xff]  ;;  %v12258_v7 = vld [vmem:[#allocation9 + $0x18] sm:$0xff] }
 0xa2f   :  { %v12260_v61 = vld [vmem:[#allocation9 + $0x68] sm:$0xff]  ;;  %v12266_v48 = vld [vmem:[#allocation9 + $0x38] sm:$0xff]  ;;  %v12265_v6 = vld [vmem:[#allocation9 + $0x10] sm:$0xff] }
 0xa30   :  { %v12257_v34 = vld [vmem:[#allocation9 + $0x58] sm:$0xff]  ;;  %v12256_v15 = vld [vmem:[#allocation9] sm:$0xff]  ;;  %v12255_v42 = vld [vmem:[#allocation9 + $0x30] sm:$0xff] }
 0xa31   :  { %10095 = vmatpush.bf16.msra.mxu0 %v12261_v49  ;;  %v12264_v28 = vld [vmem:[#allocation9 + $0x20] sm:$0xff] }
 0xa32   :  { %10108 = vmatpush.bf16.msrb.mxu1 %v12269_v0  ;;  %v12263_v30 = vld [vmem:[#allocation9 + $0x40] sm:$0xff] }
 0xa33   :  { %v12332_v29 = vld [vmem:[%s15719_s10] ss:$0 sm:$0xff] }
 0xa35   :  { %10096 = vmatpush.bf16.msra.mxu0 %v12260_v61 }
 0xa36   :  { %10109 = vmatpush.bf16.msrb.mxu1 %v12268_v47 }
 0xa39   :  { %10097 = vmatpush.bf16.msra.mxu0 %v12259_v37 }
 0xa3a   :  { %10110 = vmatpush.bf16.msrb.mxu1 %v12267_v18 }
 0xa3d   :  { %10098 = vmatpush.bf16.msra.mxu0 %v12258_v7 }
 0xa3e   :  { %10111 = vmatpush.bf16.msrb.mxu1 %v12266_v48 }
 0xa41   :  { %10099 = vmatpush.bf16.msra.mxu0 %v12257_v34 }
 0xa42   :  { %10112 = vmatpush.bf16.msrb.mxu1 %v12265_v6 }
 0xa45   :  { %10100 = vmatpush.bf16.msra.mxu0 %v12256_v15 }
 0xa46   :  { %10113 = vmatpush.bf16.msrb.mxu1 %v12264_v28 }
 0xa49   :  { %10101 = vmatpush.bf16.msra.mxu0 %v12255_v42 }
 0xa4a   :  { %10114 = vmatpush.bf16.msrb.mxu1 %v12263_v30 }
 0xa4c   :  { %10102 = vmatmul.bf16.vlgmr.msra.gmra.mxu0 %v9956_v32 }
 0xa4d   :  { %10115 = vmatmul.bf16.vlgmr.msrb.gmra.mxu1 %v9957_v39 }
 0xac9   :  { %v10103_v53 = vpop.f32.mrf.mxu0 }
 0xaca   :  { %v10116_v26 = vpop.f32.mrf.mxu1  ;;  %v10104_v50 = vadd.f32 %v12332_v29, %v10103_v53 }
 0xacc   :  { %v10117_v9 = vadd.f32 %v10116_v26, %v10104_v50 }
 0xace   :  { %v10120_v27 = vmax.f32 %v10117_v9, 0.0 }
 0xad0   :  { %v10121_v62 = vpack.c.bf16 %v10120_v27, %v10120_v27 }
 0xad1   :  { %v10105_v17 = vpop.f32.mrf.mxu0 }
 0xad2   :  { %v10118_v4 = vpop.f32.mrf.mxu1 }
 0xad3   :  { %12346 = dma.done.wait [#allocation11 + $0x3], 1024 }
 0xad4   :  { %12347 = vsyncadd [#allocation11 + $0x3], 4294966272  ;;  %v12278_v13 = vld [vmem:[#allocation10 + $0x30] sm:$0xff]  ;;  %v12277_v31 = vld [vmem:[#allocation10 + $0x38] sm:$0xff] }
 0xad5   :  { %10194 = vmatpush.bf16.msrb.mxu2 %v12278_v13  ;;  %v12276_v52 = vld [vmem:[#allocation10 + $0x8] sm:$0xff]  ;;  %v12275_v16 = vld [vmem:[#allocation10 + $0x18] sm:$0xff]  ;;  %v12274_v19 = vld [vmem:[#allocation10 + $0x20] sm:$0xff] }
 0xad6   :  { %v12273_v33 = vld [vmem:[#allocation10 + $0x10] sm:$0xff]  ;;  %v12272_v46 = vld [vmem:[#allocation10] sm:$0xff]  ;;  %v12271_v25 = vld [vmem:[#allocation10 + $0x28] sm:$0xff] }
 0xad7   :  { %v12333_v3 = vld [vmem:[%s15721_s12] ss:$0 sm:$0xff] }
 0xad9   :  { %10195 = vmatpush.bf16.msrb.mxu2 %v12277_v31 }
 0xadd   :  { %10196 = vmatpush.bf16.msrb.mxu2 %v12276_v52 }
 0xae1   :  { %10197 = vmatpush.bf16.msrb.mxu2 %v12275_v16 }
 0xae5   :  { %10198 = vmatpush.bf16.msrb.mxu2 %v12274_v19 }
 0xae9   :  { %10199 = vmatpush.bf16.msrb.mxu2 %v12273_v33 }
 0xaed   :  { %10200 = vmatpush.bf16.msrb.mxu2 %v12272_v46 }
 0xaf1   :  { %10201 = vmatpush.bf16.msrb.mxu2 %v12271_v25 }
 0xaf4   :  { %10202 = vmatmul.bf16.vlgmr.msrb.gmra.mxu2 %v10121_v62 }
 0xb77   :  { %v10203_v24 = vpop.f32.mrf.mxu2 }
 0xb78   :  { %v10204_v38 = vadd.f32 %v12333_v3, %v10203_v24 }
 0xb7a   :  { %10207 = vst [vmem:[%s15722_s13] sm:$0xff] %v10204_v38 }
 0xb7f   :  { %v10205_v36 = vpop.f32.mrf.mxu2 }
 0xb80   :  { %10212 = vsyncmov [#allocation11] }
 0xb83   :  { %s10213_s30 = vpop.sfrf %10212 }
 0xb84   :  { %p11938_p0 = scmp.ne.s32.totalorder %s10213_s30, 0 }
 0xb86   :  { %10217 = shalt.err (%p11938_p0)  }
 0xb87   :  { %10219 = vsyncmov [#allocation11 + $0x1] }
 0xb8a   :  { %s10220_s14 = vpop.sfrf %10219 }
 0xb8b   :  { %p11939_p1 = scmp.ne.s32.totalorder %s10220_s14, 0 }
 0xb8d   :  { %10224 = shalt.err (%p11939_p1)  }
 0xb8e   :  { %10226 = vsyncmov [#allocation11 + $0x2] }
 0xb91   :  { %s10227_s15 = vpop.sfrf %10226 }
 0xb92   :  { %p11940_p2 = scmp.ne.s32.totalorder %s10227_s15, 0 }
 0xb94   :  { %10231 = shalt.err (%p11940_p2)  }
 0xb95   :  { %10233 = vsyncmov [#allocation11 + $0x3] }
 0xb98   :  { %s10234_s12 = vpop.sfrf %10233 }
 0xb99   :  { %p11941_p3 = scmp.ne.s32.totalorder %s10234_s12, 0 }
 0xb9b   :  { %10238 = shalt.err (%p11941_p3)  }

</bundles_post_ra>
